<compile_context>
chip_gen: v5e
topology: v5e:2x2
jax: 0.10.0
libtpu: 0.0.40
codegen_flags: <defaults>
</compile_context>

<pallas_src>
import jax
import jax.numpy as jnp
from jax import lax
from jax.experimental import pallas as pl
from jax.experimental.pallas import tpu as pltpu


_GN_EPS = 1e-5


# ----------------------------------------------------------------------------------
# GroupNorm helper: per-group reduce + broadcast using only lane slices/concats
# (groups are contiguous runs of Cg channels inside each repeated c_base block).
# ----------------------------------------------------------------------------------
def _group_stats_broadcast(s, c_base, num_groups, reps):
    cg = c_base // num_groups
    base = s[:, 0:c_base]
    for r in range(1, reps):                       # fold the repeated phase blocks
        base = base + s[:, r * c_base:(r + 1) * c_base]
    pieces = []
    for g in range(num_groups):
        tot = jnp.sum(base[:, g * cg:(g + 1) * cg], axis=1, keepdims=True)   # (1, 1)
        pieces.append(jnp.broadcast_to(tot, (1, cg)))
    per_c = jnp.concatenate(pieces, axis=1)                                   # (1, c_base)
    if reps > 1:
        per_c = jnp.concatenate([per_c] * reps, axis=1)                       # (1, reps*c_base)
    return per_c


# ----------------------------------------------------------------------------------
# Fused Pallas layer: in-kernel SAME pad -> single im2col matmul (9*Cin contraction)
# -> bias [-> GroupNorm -> ReLU] [-> fused 1x1 skip matmul] -> (sub-pixel) store.
# One sample per grid step, batch axis "parallel".
# ----------------------------------------------------------------------------------
def _fused_conv_layer(x, wcol, bias, *, gn=None, relu=False, skip_w=None,
                      subpixel=False, out_dtype=jnp.float32):
    """x:    (N, H, W, Cin)  activation in compute dtype (bf16).
    wcol: (9*Cin, Cout_t) flipped conv kernel with (kh, kw, cin) collapsed.
    bias: (Cout_t,) f32.
    gn:   None or (gamma, beta, c_base, num_groups, reps)   (channel layout = reps
          repeated c_base blocks, groups contiguous inside each block).
    skip_w: None or (Cin, Cs) -> extra bf16 output (unpadded input @ skip_w).
    subpixel: Cout_t == 4*Cb, channels ordered (p, q, c); output written as
          (N, H, 2, W, 2*Cb) so .reshape(N, 2H, 2W, Cb) is free (fused depth-to-space)."""
    N, H, W, Cin = x.shape
    KC, Cout_t = wcol.shape
    assert KC == 9 * Cin
    cd = x.dtype

    has_gn = gn is not None
    has_skip = skip_w is not None
    if subpixel:
        assert Cout_t % 4 == 0
        Cb = Cout_t // 4

    inputs = [x, wcol, jnp.asarray(bias, jnp.float32).reshape(1, Cout_t)]
    in_specs = [
        pl.BlockSpec((None, H, W, Cin), lambda n: (n, 0, 0, 0)),
        pl.BlockSpec((KC, Cout_t), lambda n: (0, 0)),
        pl.BlockSpec((1, Cout_t), lambda n: (0, 0)),
    ]
    if has_gn:
        gamma, beta, c_base, num_groups, reps = gn
        inputs += [jnp.asarray(gamma, jnp.float32).reshape(1, Cout_t),
                   jnp.asarray(beta, jnp.float32).reshape(1, Cout_t)]
        in_specs += [pl.BlockSpec((1, Cout_t), lambda n: (0, 0)),
                     pl.BlockSpec((1, Cout_t), lambda n: (0, 0))]
        inv_count = 1.0 / float(H * W * reps * (c_base // num_groups))
    if has_skip:
        Cs = skip_w.shape[1]
        inputs += [skip_w.astype(cd)]
        in_specs += [pl.BlockSpec((Cin, Cs), lambda n: (0, 0))]

    if subpixel:
        out_shape = [jax.ShapeDtypeStruct((N, H, 2, W, 2 * Cb), out_dtype)]
        out_specs = [pl.BlockSpec((None, H, 2, W, 2 * Cb), lambda n: (n, 0, 0, 0, 0))]
    else:
        out_shape = [jax.ShapeDtypeStruct((N, H, W, Cout_t), out_dtype)]
        out_specs = [pl.BlockSpec((None, H, W, Cout_t), lambda n: (n, 0, 0, 0))]
    if has_skip:
        out_shape += [jax.ShapeDtypeStruct((N, H, W, Cs), cd)]           # bf16 skip store
        out_specs += [pl.BlockSpec((None, H, W, Cs), lambda n: (n, 0, 0, 0))]

    def kernel(*refs):
        x_ref, w_ref, b_ref = refs[0], refs[1], refs[2]
        i = 3
        if has_gn:
            g_ref, be_ref = refs[i], refs[i + 1]
            i += 2
        if has_skip:
            ws_ref = refs[i]
            i += 1
        o_ref = refs[i]
        i += 1
        if has_skip:
            s_ref = refs[i]
            i += 1
        pad_ref = refs[i]

        xin = x_ref[...]                                    # (H, W, Cin), VMEM resident

        # ---- in-kernel SAME padding into VMEM scratch (no HBM jnp.pad pass) ----
        pad_ref[...] = jnp.zeros(pad_ref.shape, pad_ref.dtype)
        pad_ref[1:H + 1, 1:W + 1, :] = xin

        # ---- ONE im2col matmul: (H*W, 9*Cin) @ (9*Cin, Cout_t), f32 accumulation ----
        win = jnp.concatenate(
            [pad_ref[kh:kh + H, kw:kw + W, :] for kh in range(3) for kw in range(3)],
            axis=2).reshape(H * W, KC)
        acc = jnp.dot(win, w_ref[...], preferred_element_type=jnp.float32)
        acc = acc + b_ref[...]                              # bias once

        if has_gn:
            # Two-pass (centered) GroupNorm; no mask matmuls, groups sliced contiguously.
            s1 = jnp.sum(acc, axis=0, keepdims=True)
            mean_c = _group_stats_broadcast(s1, c_base, num_groups, reps) * inv_count
            xc = acc - mean_c
            s2 = jnp.sum(xc * xc, axis=0, keepdims=True)
            var_c = _group_stats_broadcast(s2, c_base, num_groups, reps) * inv_count
            acc = xc * (lax.rsqrt(var_c + _GN_EPS) * g_ref[...]) + be_ref[...]
        if relu:
            acc = jnp.maximum(acc, 0.0)

        if subpixel:
            # Fused depth-to-space: store each row-phase p; (q, c) stay merged in lanes so
            # the post-shuffle (2H, 2W, Cb) view is a free reshape outside the kernel.
            for p in range(2):
                blk = acc[:, p * 2 * Cb:(p + 1) * 2 * Cb]
                o_ref[:, p, :, :] = blk.reshape(H, W, 2 * Cb).astype(out_dtype)
        else:
            o_ref[...] = acc.reshape(H, W, Cout_t).astype(out_dtype)

        if has_skip:
            # 1x1 skip matmul on the same VMEM-resident input; stored bf16 (small).
            sk = jnp.dot(xin.reshape(H * W, Cin), ws_ref[...],
                         preferred_element_type=jnp.float32)
            s_ref[...] = sk.reshape(H, W, Cs).astype(s_ref.dtype)

    # ---- VMEM budget: per-sample block footprint + temps, with headroom (<=64 MiB). ----
    def nbytes(shape, dtype):
        sz = 1
        for d in shape:
            sz *= int(d)
        return sz * jnp.dtype(dtype).itemsize

    est = (2 * (nbytes((H, W, Cin), cd)
                + sum(nbytes(s.shape[1:], s.dtype) for s in out_shape))
           + nbytes((H + 2, W + 2, Cin), cd)                 # pad scratch
           + nbytes((H * W, KC), cd)                         # im2col window
           + 3 * nbytes((H * W, Cout_t), jnp.float32)        # acc + GN temps
           + nbytes(wcol.shape, cd))
    vmem_limit = int(min(64 * 1024 * 1024, max(32 * 1024 * 1024, 2 * est)))

    res = pl.pallas_call(
        kernel,
        out_shape=tuple(out_shape),
        grid=(N,),
        in_specs=in_specs,
        out_specs=tuple(out_specs),
        scratch_shapes=[pltpu.VMEM((H + 2, W + 2, Cin), cd)],
        compiler_params=pltpu.CompilerParams(
            dimension_semantics=("parallel",),
            vmem_limit_bytes=vmem_limit),
    )(*inputs)
    return res if has_skip else res[0]


# ----------------------------------------------------------------------------------
# Weight conversions (trace-time glue).
# ----------------------------------------------------------------------------------
def _convert_deconv_weight(wt):
    # PyTorch ConvTranspose2d weight (Cin, Cout, kH, kW) -> flipped (kH, kW, Cin, Cout)
    return jnp.transpose(wt, (2, 3, 0, 1))[::-1, ::-1, :, :]


def _subpixel_conv_weight(wf):
    """wf: (5,5,Cin,Co) flipped kernel of a k=5, s=2, p=2, op=1 ConvTranspose2d.
    Returns (3,3,Cin,4*Co) s.t. with 1-pixel SAME padding:
      y[2i+p, 2j+q, :] = 3x3 conv(pad1(x), W[..., (2p+q)*Co:(2p+q+1)*Co]) at (i, j)."""
    zrow = jnp.zeros_like(wf[0:1])
    row_taps = [wf[0::2],                                         # p=0: [wf0, wf2, wf4]
                jnp.concatenate([zrow, wf[1::2]], axis=0)]        # p=1: [0, wf1, wf3]
    blocks = []
    for p in range(2):
        a = row_taps[p]                                           # (3, 5, Cin, Co)
        zcol = jnp.zeros_like(a[:, 0:1])
        col_taps = [a[:, 0::2],                                   # q=0
                    jnp.concatenate([zcol, a[:, 1::2]], axis=1)]  # q=1
        for q in range(2):
            blocks.append(col_taps[q])                            # (3, 3, Cin, Co)
    return jnp.concatenate(blocks, axis=-1)                       # channel order (p, q, c)


# ----------------------------------------------------------------------------------
# Full module forward (NCHW in, NCHW out, f32).
# ----------------------------------------------------------------------------------
def improved_synthesis_forward(x_nchw, params, *, compute_dtype=jnp.bfloat16):
    p = params
    N, C, H, W = x_nchw.shape
    G = 8
    Co = p["w3"].shape[1]
    cd = compute_dtype

    x = jnp.transpose(x_nchw, (0, 2, 3, 1)).astype(cd)                    # NHWC bf16

    # ---- layer 1: 3x3 stride-1 deconv == SAME conv (flipped kernel) + GN + ReLU,
    #      fused with the 1x1 skip matmul on the same resident input. ----
    w1col = _convert_deconv_weight(p["w1"]).reshape(9 * C, C).astype(cd)
    ws = p["ws"][:, :, 0, 0]                                              # (C, Co)
    y1, skip_core = _fused_conv_layer(
        x, w1col, p["b1"],
        gn=(p["g1"], p["be1"], C, G, 1), relu=True,
        skip_w=ws, out_dtype=cd)

    # ---- layer 2: k=5 stride-2 deconv as sub-pixel 3x3 conv (4C out) + GN + ReLU
    #      (pre-shuffle GN is valid: group ids tile across the 4 phase blocks and the
    #      per-group count matches the post-shuffle one). Depth-to-space is fused:
    #      the reshape below is free (row-major). ----
    w2col = _subpixel_conv_weight(
        _convert_deconv_weight(p["w2"])).reshape(9 * C, 4 * C).astype(cd)
    y2 = _fused_conv_layer(
        y1, w2col, jnp.tile(p["b2"], 4),
        gn=(jnp.tile(p["g2"], 4), jnp.tile(p["be2"], 4), C, G, 4), relu=True,
        subpixel=True, out_dtype=cd)
    a2 = y2.reshape(N, 2 * H, 2 * W, C)                                   # free reshape

    # ---- layer 3: k=5 stride-2 deconv as sub-pixel 3x3 conv (4*Co out); the skip's
    #      bias (added everywhere by the stride-4 ConvTranspose2d) is folded in. ----
    w3col = _subpixel_conv_weight(
        _convert_deconv_weight(p["w3"])).reshape(9 * C, 4 * Co).astype(cd)
    y3 = _fused_conv_layer(
        a2, w3col, jnp.tile(p["b3"] + p["bs"], 4),
        subpixel=True, out_dtype=jnp.float32)                             # (N, 2H, 2, 2W, 2Co)

    # ---- skip placement: out[:, ::4, ::4, :] is a STATIC slice of the free factored
    #      view (a, r, p, b, s, q, c); no interior-padded zero tensor, no full-res add. ----
    y3f = y3.reshape(N, H, 2, 2, W, 2, 2, Co)
    sl = y3f[:, :, 0, 0, :, 0, 0, :]
    y3f = y3f.at[:, :, 0, 0, :, 0, 0, :].set(sl + skip_core.astype(jnp.float32))
    out = y3f.reshape(N, 4 * H, 4 * W, Co)                                # free reshape
    return jnp.transpose(out, (0, 3, 1, 2))                               # NCHW


# ----------------------------------------------------------------------------------
# Pure-JAX reference (independent of the Pallas path) for the correctness check.
# ----------------------------------------------------------------------------------
def _ref_deconv(x_nhwc, wt, b, stride, k, padding, output_padding):
    w_hwio = _convert_deconv_weight(wt)
    lo = k - 1 - padding
    hi = k - 1 - padding + output_padding
    y = lax.conv_general_dilated(
        x_nhwc, w_hwio, window_strides=(1, 1),
        padding=[(lo, hi), (lo, hi)], lhs_dilation=(stride, stride),
        dimension_numbers=("NHWC", "HWIO", "NHWC"),
        precision=lax.Precision.HIGHEST)
    return y + b[None, None, None, :]


def _ref_gn(x, gamma, beta, G, eps=1e-5):
    N, H, W, C = x.shape
    Cg = C // G
    xr = x.reshape(N, H, W, G, Cg)
    mean = xr.mean(axis=(1, 2, 4), keepdims=True)
    var = ((xr - mean) ** 2).mean(axis=(1, 2, 4), keepdims=True)
    xn = ((xr - mean) / jnp.sqrt(var + eps)).reshape(N, H, W, C)
    return xn * gamma[None, None, None, :] + beta[None, None, None, :]


def ref_forward(x_nchw, p):
    x = jnp.transpose(x_nchw, (0, 2, 3, 1)).astype(jnp.float32)
    out = _ref_deconv(x, p["w1"], p["b1"], 1, 3, 1, 0)
    out = jax.nn.relu(_ref_gn(out, p["g1"], p["be1"], 8))
    out = _ref_deconv(out, p["w2"], p["b2"], 2, 5, 2, 1)
    out = jax.nn.relu(_ref_gn(out, p["g2"], p["be2"], 8))
    out = _ref_deconv(out, p["w3"], p["b3"], 2, 5, 2, 1)
    skip = _ref_deconv(x, p["ws"], p["bs"], 4, 1, 0, 3)
    return jnp.transpose(out + skip, (0, 3, 1, 2))


# ----------------------------------------------------------------------------------
if __name__ == "__main__":
    latent, outc = 16, 8          # channels divisible by 8 for GroupNorm(8, .)
    N, H, W = 2, 8, 8

    key = jax.random.PRNGKey(0)
    keys = jax.random.split(key, 13)

    def winit(k, shape, fan):
        return jax.random.normal(k, shape, jnp.float32) / jnp.sqrt(float(fan))

    params = {
        # ConvTranspose2d weights are (Cin, Cout, kH, kW)
        "w1": winit(keys[0], (latent, latent, 3, 3), latent * 9),
        "b1": 0.01 * jax.random.normal(keys[1], (latent,), jnp.float32),
        "g1": 1.0 + 0.1 * jax.random.normal(keys[2], (latent,), jnp.float32),
        "be1": 0.1 * jax.random.normal(keys[3], (latent,), jnp.float32),
        "w2": winit(keys[4], (latent, latent, 5, 5), latent * 25),
        "b2": 0.01 * jax.random.normal(keys[5], (latent,), jnp.float32),
        "g2": 1.0 + 0.1 * jax.random.normal(keys[6], (latent,), jnp.float32),
        "be2": 0.1 * jax.random.normal(keys[7], (latent,), jnp.float32),
        "w3": winit(keys[8], (latent, outc, 5, 5), latent * 25),
        "b3": 0.01 * jax.random.normal(keys[9], (outc,), jnp.float32),
        "ws": winit(keys[10], (latent, outc, 1, 1), latent),
        "bs": 0.01 * jax.random.normal(keys[11], (outc,), jnp.float32),
    }
    x = jax.random.normal(keys[12], (N, latent, H, W), jnp.float32)       # NCHW input

    fwd = jax.jit(improved_synthesis_forward)
    y = jax.block_until_ready(fwd(x, params))

    assert y.shape == (N, outc, 4 * H, 4 * W), y.shape

    y_ref = ref_forward(x, params)
    rel_err = float(jnp.linalg.norm(y.astype(jnp.float32) - y_ref)
                    / (jnp.linalg.norm(y_ref) + 1e-12))
    # bf16 MXU operands + bf16 inter-layer activations (f32 accumulation / GN math):
    # expected rel err ~1e-3..1e-2 vs the all-f32 XLA reference.
    assert rel_err < 3e-2, f"relative error too large: {rel_err}"

    print("KERNEL_OK")
</pallas_src>

<mosaic_0001>
module attributes {stable_mosaic.version = 11 : i64} {
  func.func @kernel(%arg0: i32, %arg1: memref<1x8x8x16xbf16, #tpu.memory_space<vmem>>, %arg2: memref<144x16xbf16, #tpu.memory_space<vmem>>, %arg3: memref<1x16xf32, #tpu.memory_space<vmem>>, %arg4: memref<1x16xf32, #tpu.memory_space<vmem>>, %arg5: memref<1x16xf32, #tpu.memory_space<vmem>>, %arg6: memref<16x8xbf16, #tpu.memory_space<vmem>>, %arg7: memref<1x8x8x16xbf16, #tpu.memory_space<vmem>>, %arg8: memref<1x8x8x8xbf16, #tpu.memory_space<vmem>>, %arg9: memref<10x10x16xbf16, #tpu.memory_space<vmem>>) attributes {dimension_semantics = [#tpu.dimension_semantics<parallel>], iteration_bounds = array<i64: 2>, scalar_prefetch = 0 : i64, scratch_operands = 1 : i64, tpu.core_type = #tpu.core_type<tc>, window_params = [{transform_indices = @transform_0, window_bounds = array<i64: 1, 8, 8, 16>}, {pipeline_mode = #tpu.pipeline_mode<synchronous>, transform_indices = @transform_1, window_bounds = array<i64: 144, 16>}, {pipeline_mode = #tpu.pipeline_mode<synchronous>, transform_indices = @transform_2, window_bounds = array<i64: 1, 16>}, {pipeline_mode = #tpu.pipeline_mode<synchronous>, transform_indices = @transform_3, window_bounds = array<i64: 1, 16>}, {pipeline_mode = #tpu.pipeline_mode<synchronous>, transform_indices = @transform_4, window_bounds = array<i64: 1, 16>}, {pipeline_mode = #tpu.pipeline_mode<synchronous>, transform_indices = @transform_5, window_bounds = array<i64: 16, 8>}, {transform_indices = @transform_6, window_bounds = array<i64: 1, 8, 8, 16>}, {transform_indices = @transform_7, window_bounds = array<i64: 1, 8, 8, 8>}]} {
    %c0 = arith.constant 0 : index
    %c0_0 = arith.constant 0 : index
    %c0_1 = arith.constant 0 : index
    %c0_2 = arith.constant 0 : index
    %0 = vector.load %arg1[%c0, %c0_0, %c0_1, %c0_2] : memref<1x8x8x16xbf16, #tpu.memory_space<vmem>>, vector<1x8x8x16xbf16>
    %1 = vector.shape_cast %0 : vector<1x8x8x16xbf16> to vector<8x8x16xbf16>
    %cst = arith.constant 0.000000e+00 : bf16
    %2 = vector.broadcast %cst : bf16 to vector<10x10x16xbf16>
    %c0_3 = arith.constant 0 : index
    %c0_4 = arith.constant 0 : index
    %c0_5 = arith.constant 0 : index
    %3 = vector.load %arg9[%c0_3, %c0_4, %c0_5] : memref<10x10x16xbf16, #tpu.memory_space<vmem>>, vector<10x10x16xbf16>
    tpu.vector_store %arg9[%c0_3, %c0_4, %c0_5], %2 {strides = array<i32>} : memref<10x10x16xbf16, #tpu.memory_space<vmem>>, vector<10x10x16xbf16>,
    %c1 = arith.constant 1 : index
    %c1_6 = arith.constant 1 : index
    %c0_7 = arith.constant 0 : index
    %4 = vector.load %arg9[%c1, %c1_6, %c0_7] : memref<10x10x16xbf16, #tpu.memory_space<vmem>>, vector<8x8x16xbf16>
    tpu.vector_store %arg9[%c1, %c1_6, %c0_7], %1 {strides = array<i32>} : memref<10x10x16xbf16, #tpu.memory_space<vmem>>, vector<8x8x16xbf16>,
    %c0_8 = arith.constant 0 : index
    %c0_9 = arith.constant 0 : index
    %c0_10 = arith.constant 0 : index
    %5 = vector.load %arg9[%c0_8, %c0_9, %c0_10] : memref<10x10x16xbf16, #tpu.memory_space<vmem>>, vector<8x8x16xbf16>
    %c0_11 = arith.constant 0 : index
    %c1_12 = arith.constant 1 : index
    %c0_13 = arith.constant 0 : index
    %6 = vector.load %arg9[%c0_11, %c1_12, %c0_13] : memref<10x10x16xbf16, #tpu.memory_space<vmem>>, vector<8x8x16xbf16>
    %c0_14 = arith.constant 0 : index
    %c2 = arith.constant 2 : index
    %c0_15 = arith.constant 0 : index
    %7 = vector.load %arg9[%c0_14, %c2, %c0_15] : memref<10x10x16xbf16, #tpu.memory_space<vmem>>, vector<8x8x16xbf16>
    %c1_16 = arith.constant 1 : index
    %c0_17 = arith.constant 0 : index
    %c0_18 = arith.constant 0 : index
    %8 = vector.load %arg9[%c1_16, %c0_17, %c0_18] : memref<10x10x16xbf16, #tpu.memory_space<vmem>>, vector<8x8x16xbf16>
    %c1_19 = arith.constant 1 : index
    %c1_20 = arith.constant 1 : index
    %c0_21 = arith.constant 0 : index
    %9 = vector.load %arg9[%c1_19, %c1_20, %c0_21] : memref<10x10x16xbf16, #tpu.memory_space<vmem>>, vector<8x8x16xbf16>
    %c1_22 = arith.constant 1 : index
    %c2_23 = arith.constant 2 : index
    %c0_24 = arith.constant 0 : index
    %10 = vector.load %arg9[%c1_22, %c2_23, %c0_24] : memref<10x10x16xbf16, #tpu.memory_space<vmem>>, vector<8x8x16xbf16>
    %c2_25 = arith.constant 2 : index
    %c0_26 = arith.constant 0 : index
    %c0_27 = arith.constant 0 : index
    %11 = vector.load %arg9[%c2_25, %c0_26, %c0_27] : memref<10x10x16xbf16, #tpu.memory_space<vmem>>, vector<8x8x16xbf16>
    %c2_28 = arith.constant 2 : index
    %c1_29 = arith.constant 1 : index
    %c0_30 = arith.constant 0 : index
    %12 = vector.load %arg9[%c2_28, %c1_29, %c0_30] : memref<10x10x16xbf16, #tpu.memory_space<vmem>>, vector<8x8x16xbf16>
    %c2_31 = arith.constant 2 : index
    %c2_32 = arith.constant 2 : index
    %c0_33 = arith.constant 0 : index
    %13 = vector.load %arg9[%c2_31, %c2_32, %c0_33] : memref<10x10x16xbf16, #tpu.memory_space<vmem>>, vector<8x8x16xbf16>
    %14 = tpu.concatenate %5, %6, %7, %8, %9, %10, %11, %12, %13 in 2 : vector<8x8x16xbf16>, vector<8x8x16xbf16>, vector<8x8x16xbf16>, vector<8x8x16xbf16>, vector<8x8x16xbf16>, vector<8x8x16xbf16>, vector<8x8x16xbf16>, vector<8x8x16xbf16>, vector<8x8x16xbf16> -> vector<8x8x144xbf16>
    %15 = vector.shape_cast %14 : vector<8x8x144xbf16> to vector<64x144xbf16>
    %c0_34 = arith.constant 0 : index
    %c0_35 = arith.constant 0 : index
    %16 = vector.load %arg2[%c0_34, %c0_35] : memref<144x16xbf16, #tpu.memory_space<vmem>>, vector<144x16xbf16>
    %cst_36 = arith.constant dense<0.000000e+00> : vector<64x16xf32>
    %17 = tpu.matmul %15, %16, %cst_36 {dimension_numbers = #tpu.dot_dimension_numbers<[1], [0], [0], [1], [0, 0, 1, 1], [], []>} : vector<64x144xbf16>, vector<144x16xbf16>, vector<64x16xf32> -> vector<64x16xf32>
    %c0_37 = arith.constant 0 : index
    %c0_38 = arith.constant 0 : index
    %18 = vector.load %arg3[%c0_37, %c0_38] : memref<1x16xf32, #tpu.memory_space<vmem>>, vector<1x16xf32>
    %19 = vector.broadcast %18 : vector<1x16xf32> to vector<64x16xf32>
    %20 = arith.addf %17, %19 : vector<64x16xf32>
    %cst_39 = arith.constant dense<0.000000e+00> : vector<16xf32>
    %21 = vector.multi_reduction <add>, %20, %cst_39 [0] : vector<64x16xf32> to vector<16xf32>
    %22 = vector.shape_cast %21 : vector<16xf32> to vector<1x16xf32>
    %23 = vector.extract_strided_slice %22 {offsets = [0, 0], sizes = [1, 2], strides = [1, 1]} : vector<1x16xf32> to vector<1x2xf32>
    %cst_40 = arith.constant dense<0.000000e+00> : vector<1xf32>
    %24 = vector.multi_reduction <add>, %23, %cst_40 [1] : vector<1x2xf32> to vector<1xf32>
    %25 = vector.shape_cast %24 : vector<1xf32> to vector<1x1xf32>
    %26 = vector.shape_cast %25 : vector<1x1xf32> to vector<1x1xf32>
    %27 = vector.broadcast %26 : vector<1x1xf32> to vector<1x2xf32>
    %28 = vector.extract_strided_slice %22 {offsets = [0, 2], sizes = [1, 2], strides = [1, 1]} : vector<1x16xf32> to vector<1x2xf32>
    %cst_41 = arith.constant dense<0.000000e+00> : vector<1xf32>
    %29 = vector.multi_reduction <add>, %28, %cst_41 [1] : vector<1x2xf32> to vector<1xf32>
    %30 = vector.shape_cast %29 : vector<1xf32> to vector<1x1xf32>
    %31 = vector.shape_cast %30 : vector<1x1xf32> to vector<1x1xf32>
    %32 = vector.broadcast %31 : vector<1x1xf32> to vector<1x2xf32>
    %33 = vector.extract_strided_slice %22 {offsets = [0, 4], sizes = [1, 2], strides = [1, 1]} : vector<1x16xf32> to vector<1x2xf32>
    %cst_42 = arith.constant dense<0.000000e+00> : vector<1xf32>
    %34 = vector.multi_reduction <add>, %33, %cst_42 [1] : vector<1x2xf32> to vector<1xf32>
    %35 = vector.shape_cast %34 : vector<1xf32> to vector<1x1xf32>
    %36 = vector.shape_cast %35 : vector<1x1xf32> to vector<1x1xf32>
    %37 = vector.broadcast %36 : vector<1x1xf32> to vector<1x2xf32>
    %38 = vector.extract_strided_slice %22 {offsets = [0, 6], sizes = [1, 2], strides = [1, 1]} : vector<1x16xf32> to vector<1x2xf32>
    %cst_43 = arith.constant dense<0.000000e+00> : vector<1xf32>
    %39 = vector.multi_reduction <add>, %38, %cst_43 [1] : vector<1x2xf32> to vector<1xf32>
    %40 = vector.shape_cast %39 : vector<1xf32> to vector<1x1xf32>
    %41 = vector.shape_cast %40 : vector<1x1xf32> to vector<1x1xf32>
    %42 = vector.broadcast %41 : vector<1x1xf32> to vector<1x2xf32>
    %43 = vector.extract_strided_slice %22 {offsets = [0, 8], sizes = [1, 2], strides = [1, 1]} : vector<1x16xf32> to vector<1x2xf32>
    %cst_44 = arith.constant dense<0.000000e+00> : vector<1xf32>
    %44 = vector.multi_reduction <add>, %43, %cst_44 [1] : vector<1x2xf32> to vector<1xf32>
    %45 = vector.shape_cast %44 : vector<1xf32> to vector<1x1xf32>
    %46 = vector.shape_cast %45 : vector<1x1xf32> to vector<1x1xf32>
    %47 = vector.broadcast %46 : vector<1x1xf32> to vector<1x2xf32>
    %48 = vector.extract_strided_slice %22 {offsets = [0, 10], sizes = [1, 2], strides = [1, 1]} : vector<1x16xf32> to vector<1x2xf32>
    %cst_45 = arith.constant dense<0.000000e+00> : vector<1xf32>
    %49 = vector.multi_reduction <add>, %48, %cst_45 [1] : vector<1x2xf32> to vector<1xf32>
    %50 = vector.shape_cast %49 : vector<1xf32> to vector<1x1xf32>
    %51 = vector.shape_cast %50 : vector<1x1xf32> to vector<1x1xf32>
    %52 = vector.broadcast %51 : vector<1x1xf32> to vector<1x2xf32>
    %53 = vector.extract_strided_slice %22 {offsets = [0, 12], sizes = [1, 2], strides = [1, 1]} : vector<1x16xf32> to vector<1x2xf32>
    %cst_46 = arith.constant dense<0.000000e+00> : vector<1xf32>
    %54 = vector.multi_reduction <add>, %53, %cst_46 [1] : vector<1x2xf32> to vector<1xf32>
    %55 = vector.shape_cast %54 : vector<1xf32> to vector<1x1xf32>
    %56 = vector.shape_cast %55 : vector<1x1xf32> to vector<1x1xf32>
    %57 = vector.broadcast %56 : vector<1x1xf32> to vector<1x2xf32>
    %58 = vector.extract_strided_slice %22 {offsets = [0, 14], sizes = [1, 2], strides = [1, 1]} : vector<1x16xf32> to vector<1x2xf32>
    %cst_47 = arith.constant dense<0.000000e+00> : vector<1xf32>
    %59 = vector.multi_reduction <add>, %58, %cst_47 [1] : vector<1x2xf32> to vector<1xf32>
    %60 = vector.shape_cast %59 : vector<1xf32> to vector<1x1xf32>
    %61 = vector.shape_cast %60 : vector<1x1xf32> to vector<1x1xf32>
    %62 = vector.broadcast %61 : vector<1x1xf32> to vector<1x2xf32>
    %63 = tpu.concatenate %27, %32, %37, %42, %47, %52, %57, %62 in 1 : vector<1x2xf32>, vector<1x2xf32>, vector<1x2xf32>, vector<1x2xf32>, vector<1x2xf32>, vector<1x2xf32>, vector<1x2xf32>, vector<1x2xf32> -> vector<1x16xf32>
    %cst_48 = arith.constant 7.812500e-03 : f32
    %64 = vector.broadcast %cst_48 : f32 to vector<1x16xf32>
    %65 = arith.mulf %63, %64 : vector<1x16xf32>
    %66 = vector.broadcast %65 : vector<1x16xf32> to vector<64x16xf32>
    %67 = arith.subf %20, %66 : vector<64x16xf32>
    %68 = arith.mulf %67, %67 : vector<64x16xf32>
    %cst_49 = arith.constant dense<0.000000e+00> : vector<16xf32>
    %69 = vector.multi_reduction <add>, %68, %cst_49 [0] : vector<64x16xf32> to vector<16xf32>
    %70 = vector.shape_cast %69 : vector<16xf32> to vector<1x16xf32>
    %71 = vector.extract_strided_slice %70 {offsets = [0, 0], sizes = [1, 2], strides = [1, 1]} : vector<1x16xf32> to vector<1x2xf32>
    %cst_50 = arith.constant dense<0.000000e+00> : vector<1xf32>
    %72 = vector.multi_reduction <add>, %71, %cst_50 [1] : vector<1x2xf32> to vector<1xf32>
    %73 = vector.shape_cast %72 : vector<1xf32> to vector<1x1xf32>
    %74 = vector.shape_cast %73 : vector<1x1xf32> to vector<1x1xf32>
    %75 = vector.broadcast %74 : vector<1x1xf32> to vector<1x2xf32>
    %76 = vector.extract_strided_slice %70 {offsets = [0, 2], sizes = [1, 2], strides = [1, 1]} : vector<1x16xf32> to vector<1x2xf32>
    %cst_51 = arith.constant dense<0.000000e+00> : vector<1xf32>
    %77 = vector.multi_reduction <add>, %76, %cst_51 [1] : vector<1x2xf32> to vector<1xf32>
    %78 = vector.shape_cast %77 : vector<1xf32> to vector<1x1xf32>
    %79 = vector.shape_cast %78 : vector<1x1xf32> to vector<1x1xf32>
    %80 = vector.broadcast %79 : vector<1x1xf32> to vector<1x2xf32>
    %81 = vector.extract_strided_slice %70 {offsets = [0, 4], sizes = [1, 2], strides = [1, 1]} : vector<1x16xf32> to vector<1x2xf32>
    %cst_52 = arith.constant dense<0.000000e+00> : vector<1xf32>
    %82 = vector.multi_reduction <add>, %81, %cst_52 [1] : vector<1x2xf32> to vector<1xf32>
    %83 = vector.shape_cast %82 : vector<1xf32> to vector<1x1xf32>
    %84 = vector.shape_cast %83 : vector<1x1xf32> to vector<1x1xf32>
    %85 = vector.broadcast %84 : vector<1x1xf32> to vector<1x2xf32>
    %86 = vector.extract_strided_slice %70 {offsets = [0, 6], sizes = [1, 2], strides = [1, 1]} : vector<1x16xf32> to vector<1x2xf32>
    %cst_53 = arith.constant dense<0.000000e+00> : vector<1xf32>
    %87 = vector.multi_reduction <add>, %86, %cst_53 [1] : vector<1x2xf32> to vector<1xf32>
    %88 = vector.shape_cast %87 : vector<1xf32> to vector<1x1xf32>
    %89 = vector.shape_cast %88 : vector<1x1xf32> to vector<1x1xf32>
    %90 = vector.broadcast %89 : vector<1x1xf32> to vector<1x2xf32>
    %91 = vector.extract_strided_slice %70 {offsets = [0, 8], sizes = [1, 2], strides = [1, 1]} : vector<1x16xf32> to vector<1x2xf32>
    %cst_54 = arith.constant dense<0.000000e+00> : vector<1xf32>
    %92 = vector.multi_reduction <add>, %91, %cst_54 [1] : vector<1x2xf32> to vector<1xf32>
    %93 = vector.shape_cast %92 : vector<1xf32> to vector<1x1xf32>
    %94 = vector.shape_cast %93 : vector<1x1xf32> to vector<1x1xf32>
    %95 = vector.broadcast %94 : vector<1x1xf32> to vector<1x2xf32>
    %96 = vector.extract_strided_slice %70 {offsets = [0, 10], sizes = [1, 2], strides = [1, 1]} : vector<1x16xf32> to vector<1x2xf32>
    %cst_55 = arith.constant dense<0.000000e+00> : vector<1xf32>
    %97 = vector.multi_reduction <add>, %96, %cst_55 [1] : vector<1x2xf32> to vector<1xf32>
    %98 = vector.shape_cast %97 : vector<1xf32> to vector<1x1xf32>
    %99 = vector.shape_cast %98 : vector<1x1xf32> to vector<1x1xf32>
    %100 = vector.broadcast %99 : vector<1x1xf32> to vector<1x2xf32>
    %101 = vector.extract_strided_slice %70 {offsets = [0, 12], sizes = [1, 2], strides = [1, 1]} : vector<1x16xf32> to vector<1x2xf32>
    %cst_56 = arith.constant dense<0.000000e+00> : vector<1xf32>
    %102 = vector.multi_reduction <add>, %101, %cst_56 [1] : vector<1x2xf32> to vector<1xf32>
    %103 = vector.shape_cast %102 : vector<1xf32> to vector<1x1xf32>
    %104 = vector.shape_cast %103 : vector<1x1xf32> to vector<1x1xf32>
    %105 = vector.broadcast %104 : vector<1x1xf32> to vector<1x2xf32>
    %106 = vector.extract_strided_slice %70 {offsets = [0, 14], sizes = [1, 2], strides = [1, 1]} : vector<1x16xf32> to vector<1x2xf32>
    %cst_57 = arith.constant dense<0.000000e+00> : vector<1xf32>
    %107 = vector.multi_reduction <add>, %106, %cst_57 [1] : vector<1x2xf32> to vector<1xf32>
    %108 = vector.shape_cast %107 : vector<1xf32> to vector<1x1xf32>
    %109 = vector.shape_cast %108 : vector<1x1xf32> to vector<1x1xf32>
    %110 = vector.broadcast %109 : vector<1x1xf32> to vector<1x2xf32>
    %111 = tpu.concatenate %75, %80, %85, %90, %95, %100, %105, %110 in 1 : vector<1x2xf32>, vector<1x2xf32>, vector<1x2xf32>, vector<1x2xf32>, vector<1x2xf32>, vector<1x2xf32>, vector<1x2xf32>, vector<1x2xf32> -> vector<1x16xf32>
    %cst_58 = arith.constant 7.812500e-03 : f32
    %112 = vector.broadcast %cst_58 : f32 to vector<1x16xf32>
    %113 = arith.mulf %111, %112 : vector<1x16xf32>
    %cst_59 = arith.constant 9.99999974E-6 : f32
    %114 = vector.broadcast %cst_59 : f32 to vector<1x16xf32>
    %115 = arith.addf %113, %114 : vector<1x16xf32>
    %116 = math.rsqrt %115 : vector<1x16xf32>
    %c0_60 = arith.constant 0 : index
    %c0_61 = arith.constant 0 : index
    %117 = vector.load %arg4[%c0_60, %c0_61] : memref<1x16xf32, #tpu.memory_space<vmem>>, vector<1x16xf32>
    %118 = arith.mulf %116, %117 : vector<1x16xf32>
    %119 = vector.broadcast %118 : vector<1x16xf32> to vector<64x16xf32>
    %120 = arith.mulf %67, %119 : vector<64x16xf32>
    %c0_62 = arith.constant 0 : index
    %c0_63 = arith.constant 0 : index
    %121 = vector.load %arg5[%c0_62, %c0_63] : memref<1x16xf32, #tpu.memory_space<vmem>>, vector<1x16xf32>
    %122 = vector.broadcast %121 : vector<1x16xf32> to vector<64x16xf32>
    %123 = arith.addf %120, %122 : vector<64x16xf32>
    %cst_64 = arith.constant 0.000000e+00 : f32
    %124 = vector.broadcast %cst_64 : f32 to vector<64x16xf32>
    %125 = arith.maximumf %123, %124 : vector<64x16xf32>
    %126 = vector.shape_cast %125 : vector<64x16xf32> to vector<8x8x16xf32>
    %127 = arith.truncf %126 : vector<8x8x16xf32> to vector<8x8x16xbf16>
    %c0_65 = arith.constant 0 : index
    %c0_66 = arith.constant 0 : index
    %c0_67 = arith.constant 0 : index
    %c0_68 = arith.constant 0 : index
    %128 = vector.load %arg7[%c0_65, %c0_66, %c0_67, %c0_68] : memref<1x8x8x16xbf16, #tpu.memory_space<vmem>>, vector<1x8x8x16xbf16>
    %129 = vector.shape_cast %128 : vector<1x8x8x16xbf16> to vector<8x8x16xbf16>
    %130 = vector.shape_cast %127 : vector<8x8x16xbf16> to vector<1x8x8x16xbf16>
    tpu.vector_store %arg7[%c0_65, %c0_66, %c0_67, %c0_68], %130 {strides = array<i32>} : memref<1x8x8x16xbf16, #tpu.memory_space<vmem>>, vector<1x8x8x16xbf16>,
    %131 = vector.shape_cast %1 : vector<8x8x16xbf16> to vector<64x16xbf16>
    %c0_69 = arith.constant 0 : index
    %c0_70 = arith.constant 0 : index
    %132 = vector.load %arg6[%c0_69, %c0_70] : memref<16x8xbf16, #tpu.memory_space<vmem>>, vector<16x8xbf16>
    %cst_71 = arith.constant dense<0.000000e+00> : vector<64x8xf32>
    %133 = tpu.matmul %131, %132, %cst_71 {dimension_numbers = #tpu.dot_dimension_numbers<[1], [0], [0], [1], [0, 0, 1, 1], [], []>} : vector<64x16xbf16>, vector<16x8xbf16>, vector<64x8xf32> -> vector<64x8xf32>
    %134 = vector.shape_cast %133 : vector<64x8xf32> to vector<8x8x8xf32>
    %135 = arith.truncf %134 : vector<8x8x8xf32> to vector<8x8x8xbf16>
    %c0_72 = arith.constant 0 : index
    %c0_73 = arith.constant 0 : index
    %c0_74 = arith.constant 0 : index
    %c0_75 = arith.constant 0 : index
    %136 = vector.load %arg8[%c0_72, %c0_73, %c0_74, %c0_75] : memref<1x8x8x8xbf16, #tpu.memory_space<vmem>>, vector<1x8x8x8xbf16>
    %137 = vector.shape_cast %136 : vector<1x8x8x8xbf16> to vector<8x8x8xbf16>
    %138 = vector.shape_cast %135 : vector<8x8x8xbf16> to vector<1x8x8x8xbf16>
    tpu.vector_store %arg8[%c0_72, %c0_73, %c0_74, %c0_75], %138 {strides = array<i32>} : memref<1x8x8x8xbf16, #tpu.memory_space<vmem>>, vector<1x8x8x8xbf16>,
    return
  }
  func.func @transform_0(%arg0: i32) -> (i32, i32, i32, i32) {
    %c0_i32 = arith.constant 0 : i32
    %c0_i32_0 = arith.constant 0 : i32
    %c0_i32_1 = arith.constant 0 : i32
    %c0_i32_2 = arith.constant 0 : i32
    return %arg0, %c0_i32, %c0_i32_0, %c0_i32_1 : i32, i32, i32, i32
  }
  func.func @transform_1(%arg0: i32) -> (i32, i32) {
    %c0_i32 = arith.constant 0 : i32
    %c0_i32_0 = arith.constant 0 : i32
    %c0_i32_1 = arith.constant 0 : i32
    return %c0_i32, %c0_i32_0 : i32, i32
  }
  func.func @transform_2(%arg0: i32) -> (i32, i32) {
    %c0_i32 = arith.constant 0 : i32
    %c0_i32_0 = arith.constant 0 : i32
    %c0_i32_1 = arith.constant 0 : i32
    return %c0_i32, %c0_i32_0 : i32, i32
  }
  func.func @transform_3(%arg0: i32) -> (i32, i32) {
    %c0_i32 = arith.constant 0 : i32
    %c0_i32_0 = arith.constant 0 : i32
    %c0_i32_1 = arith.constant 0 : i32
    return %c0_i32, %c0_i32_0 : i32, i32
  }
  func.func @transform_4(%arg0: i32) -> (i32, i32) {
    %c0_i32 = arith.constant 0 : i32
    %c0_i32_0 = arith.constant 0 : i32
    %c0_i32_1 = arith.constant 0 : i32
    return %c0_i32, %c0_i32_0 : i32, i32
  }
  func.func @transform_5(%arg0: i32) -> (i32, i32) {
    %c0_i32 = arith.constant 0 : i32
    %c0_i32_0 = arith.constant 0 : i32
    %c0_i32_1 = arith.constant 0 : i32
    return %c0_i32, %c0_i32_0 : i32, i32
  }
  func.func @transform_6(%arg0: i32) -> (i32, i32, i32, i32) {
    %c0_i32 = arith.constant 0 : i32
    %c0_i32_0 = arith.constant 0 : i32
    %c0_i32_1 = arith.constant 0 : i32
    %c0_i32_2 = arith.constant 0 : i32
    return %arg0, %c0_i32, %c0_i32_0, %c0_i32_1 : i32, i32, i32, i32
  }
  func.func @transform_7(%arg0: i32) -> (i32, i32, i32, i32) {
    %c0_i32 = arith.constant 0 : i32
    %c0_i32_0 = arith.constant 0 : i32
    %c0_i32_1 = arith.constant 0 : i32
    %c0_i32_2 = arith.constant 0 : i32
    return %arg0, %c0_i32, %c0_i32_0, %c0_i32_1 : i32, i32, i32, i32
  }
}

module attributes {stable_mosaic.version = 11 : i64} {
  func.func @kernel(%arg0: i32, %arg1: memref<1x8x8x16xbf16, #tpu.memory_space<vmem>>, %arg2: memref<144x64xbf16, #tpu.memory_space<vmem>>, %arg3: memref<1x64xf32, #tpu.memory_space<vmem>>, %arg4: memref<1x64xf32, #tpu.memory_space<vmem>>, %arg5: memref<1x64xf32, #tpu.memory_space<vmem>>, %arg6: memref<1x8x2x8x32xbf16, #tpu.memory_space<vmem>>, %arg7: memref<10x10x16xbf16, #tpu.memory_space<vmem>>) attributes {dimension_semantics = [#tpu.dimension_semantics<parallel>], iteration_bounds = array<i64: 2>, scalar_prefetch = 0 : i64, scratch_operands = 1 : i64, tpu.core_type = #tpu.core_type<tc>, window_params = [{transform_indices = @transform_0, window_bounds = array<i64: 1, 8, 8, 16>}, {pipeline_mode = #tpu.pipeline_mode<synchronous>, transform_indices = @transform_1, window_bounds = array<i64: 144, 64>}, {pipeline_mode = #tpu.pipeline_mode<synchronous>, transform_indices = @transform_2, window_bounds = array<i64: 1, 64>}, {pipeline_mode = #tpu.pipeline_mode<synchronous>, transform_indices = @transform_3, window_bounds = array<i64: 1, 64>}, {pipeline_mode = #tpu.pipeline_mode<synchronous>, transform_indices = @transform_4, window_bounds = array<i64: 1, 64>}, {transform_indices = @transform_5, window_bounds = array<i64: 1, 8, 2, 8, 32>}]} {
    %c0 = arith.constant 0 : index
    %c0_0 = arith.constant 0 : index
    %c0_1 = arith.constant 0 : index
    %c0_2 = arith.constant 0 : index
    %0 = vector.load %arg1[%c0, %c0_0, %c0_1, %c0_2] : memref<1x8x8x16xbf16, #tpu.memory_space<vmem>>, vector<1x8x8x16xbf16>
    %1 = vector.shape_cast %0 : vector<1x8x8x16xbf16> to vector<8x8x16xbf16>
    %cst = arith.constant 0.000000e+00 : bf16
    %2 = vector.broadcast %cst : bf16 to vector<10x10x16xbf16>
    %c0_3 = arith.constant 0 : index
    %c0_4 = arith.constant 0 : index
    %c0_5 = arith.constant 0 : index
    %3 = vector.load %arg7[%c0_3, %c0_4, %c0_5] : memref<10x10x16xbf16, #tpu.memory_space<vmem>>, vector<10x10x16xbf16>
    tpu.vector_store %arg7[%c0_3, %c0_4, %c0_5], %2 {strides = array<i32>} : memref<10x10x16xbf16, #tpu.memory_space<vmem>>, vector<10x10x16xbf16>,
    %c1 = arith.constant 1 : index
    %c1_6 = arith.constant 1 : index
    %c0_7 = arith.constant 0 : index
    %4 = vector.load %arg7[%c1, %c1_6, %c0_7] : memref<10x10x16xbf16, #tpu.memory_space<vmem>>, vector<8x8x16xbf16>
    tpu.vector_store %arg7[%c1, %c1_6, %c0_7], %1 {strides = array<i32>} : memref<10x10x16xbf16, #tpu.memory_space<vmem>>, vector<8x8x16xbf16>,
    %c0_8 = arith.constant 0 : index
    %c0_9 = arith.constant 0 : index
    %c0_10 = arith.constant 0 : index
    %5 = vector.load %arg7[%c0_8, %c0_9, %c0_10] : memref<10x10x16xbf16, #tpu.memory_space<vmem>>, vector<8x8x16xbf16>
    %c0_11 = arith.constant 0 : index
    %c1_12 = arith.constant 1 : index
    %c0_13 = arith.constant 0 : index
    %6 = vector.load %arg7[%c0_11, %c1_12, %c0_13] : memref<10x10x16xbf16, #tpu.memory_space<vmem>>, vector<8x8x16xbf16>
    %c0_14 = arith.constant 0 : index
    %c2 = arith.constant 2 : index
    %c0_15 = arith.constant 0 : index
    %7 = vector.load %arg7[%c0_14, %c2, %c0_15] : memref<10x10x16xbf16, #tpu.memory_space<vmem>>, vector<8x8x16xbf16>
    %c1_16 = arith.constant 1 : index
    %c0_17 = arith.constant 0 : index
    %c0_18 = arith.constant 0 : index
    %8 = vector.load %arg7[%c1_16, %c0_17, %c0_18] : memref<10x10x16xbf16, #tpu.memory_space<vmem>>, vector<8x8x16xbf16>
    %c1_19 = arith.constant 1 : index
    %c1_20 = arith.constant 1 : index
    %c0_21 = arith.constant 0 : index
    %9 = vector.load %arg7[%c1_19, %c1_20, %c0_21] : memref<10x10x16xbf16, #tpu.memory_space<vmem>>, vector<8x8x16xbf16>
    %c1_22 = arith.constant 1 : index
    %c2_23 = arith.constant 2 : index
    %c0_24 = arith.constant 0 : index
    %10 = vector.load %arg7[%c1_22, %c2_23, %c0_24] : memref<10x10x16xbf16, #tpu.memory_space<vmem>>, vector<8x8x16xbf16>
    %c2_25 = arith.constant 2 : index
    %c0_26 = arith.constant 0 : index
    %c0_27 = arith.constant 0 : index
    %11 = vector.load %arg7[%c2_25, %c0_26, %c0_27] : memref<10x10x16xbf16, #tpu.memory_space<vmem>>, vector<8x8x16xbf16>
    %c2_28 = arith.constant 2 : index
    %c1_29 = arith.constant 1 : index
    %c0_30 = arith.constant 0 : index
    %12 = vector.load %arg7[%c2_28, %c1_29, %c0_30] : memref<10x10x16xbf16, #tpu.memory_space<vmem>>, vector<8x8x16xbf16>
    %c2_31 = arith.constant 2 : index
    %c2_32 = arith.constant 2 : index
    %c0_33 = arith.constant 0 : index
    %13 = vector.load %arg7[%c2_31, %c2_32, %c0_33] : memref<10x10x16xbf16, #tpu.memory_space<vmem>>, vector<8x8x16xbf16>
    %14 = tpu.concatenate %5, %6, %7, %8, %9, %10, %11, %12, %13 in 2 : vector<8x8x16xbf16>, vector<8x8x16xbf16>, vector<8x8x16xbf16>, vector<8x8x16xbf16>, vector<8x8x16xbf16>, vector<8x8x16xbf16>, vector<8x8x16xbf16>, vector<8x8x16xbf16>, vector<8x8x16xbf16> -> vector<8x8x144xbf16>
    %15 = vector.shape_cast %14 : vector<8x8x144xbf16> to vector<64x144xbf16>
    %c0_34 = arith.constant 0 : index
    %c0_35 = arith.constant 0 : index
    %16 = vector.load %arg2[%c0_34, %c0_35] : memref<144x64xbf16, #tpu.memory_space<vmem>>, vector<144x64xbf16>
    %cst_36 = arith.constant dense<0.000000e+00> : vector<64x64xf32>
    %17 = tpu.matmul %15, %16, %cst_36 {dimension_numbers = #tpu.dot_dimension_numbers<[1], [0], [0], [1], [0, 0, 1, 1], [], []>} : vector<64x144xbf16>, vector<144x64xbf16>, vector<64x64xf32> -> vector<64x64xf32>
    %c0_37 = arith.constant 0 : index
    %c0_38 = arith.constant 0 : index
    %18 = vector.load %arg3[%c0_37, %c0_38] : memref<1x64xf32, #tpu.memory_space<vmem>>, vector<1x64xf32>
    %19 = vector.broadcast %18 : vector<1x64xf32> to vector<64x64xf32>
    %20 = arith.addf %17, %19 : vector<64x64xf32>
    %cst_39 = arith.constant dense<0.000000e+00> : vector<64xf32>
    %21 = vector.multi_reduction <add>, %20, %cst_39 [0] : vector<64x64xf32> to vector<64xf32>
    %22 = vector.shape_cast %21 : vector<64xf32> to vector<1x64xf32>
    %23 = vector.extract_strided_slice %22 {offsets = [0, 0], sizes = [1, 16], strides = [1, 1]} : vector<1x64xf32> to vector<1x16xf32>
    %24 = vector.extract_strided_slice %22 {offsets = [0, 16], sizes = [1, 16], strides = [1, 1]} : vector<1x64xf32> to vector<1x16xf32>
    %25 = arith.addf %23, %24 : vector<1x16xf32>
    %26 = vector.extract_strided_slice %22 {offsets = [0, 32], sizes = [1, 16], strides = [1, 1]} : vector<1x64xf32> to vector<1x16xf32>
    %27 = arith.addf %25, %26 : vector<1x16xf32>
    %28 = vector.extract_strided_slice %22 {offsets = [0, 48], sizes = [1, 16], strides = [1, 1]} : vector<1x64xf32> to vector<1x16xf32>
    %29 = arith.addf %27, %28 : vector<1x16xf32>
    %30 = vector.extract_strided_slice %29 {offsets = [0, 0], sizes = [1, 2], strides = [1, 1]} : vector<1x16xf32> to vector<1x2xf32>
    %cst_40 = arith.constant dense<0.000000e+00> : vector<1xf32>
    %31 = vector.multi_reduction <add>, %30, %cst_40 [1] : vector<1x2xf32> to vector<1xf32>
    %32 = vector.shape_cast %31 : vector<1xf32> to vector<1x1xf32>
    %33 = vector.shape_cast %32 : vector<1x1xf32> to vector<1x1xf32>
    %34 = vector.broadcast %33 : vector<1x1xf32> to vector<1x2xf32>
    %35 = vector.extract_strided_slice %29 {offsets = [0, 2], sizes = [1, 2], strides = [1, 1]} : vector<1x16xf32> to vector<1x2xf32>
    %cst_41 = arith.constant dense<0.000000e+00> : vector<1xf32>
    %36 = vector.multi_reduction <add>, %35, %cst_41 [1] : vector<1x2xf32> to vector<1xf32>
    %37 = vector.shape_cast %36 : vector<1xf32> to vector<1x1xf32>
    %38 = vector.shape_cast %37 : vector<1x1xf32> to vector<1x1xf32>
    %39 = vector.broadcast %38 : vector<1x1xf32> to vector<1x2xf32>
    %40 = vector.extract_strided_slice %29 {offsets = [0, 4], sizes = [1, 2], strides = [1, 1]} : vector<1x16xf32> to vector<1x2xf32>
    %cst_42 = arith.constant dense<0.000000e+00> : vector<1xf32>
    %41 = vector.multi_reduction <add>, %40, %cst_42 [1] : vector<1x2xf32> to vector<1xf32>
    %42 = vector.shape_cast %41 : vector<1xf32> to vector<1x1xf32>
    %43 = vector.shape_cast %42 : vector<1x1xf32> to vector<1x1xf32>
    %44 = vector.broadcast %43 : vector<1x1xf32> to vector<1x2xf32>
    %45 = vector.extract_strided_slice %29 {offsets = [0, 6], sizes = [1, 2], strides = [1, 1]} : vector<1x16xf32> to vector<1x2xf32>
    %cst_43 = arith.constant dense<0.000000e+00> : vector<1xf32>
    %46 = vector.multi_reduction <add>, %45, %cst_43 [1] : vector<1x2xf32> to vector<1xf32>
    %47 = vector.shape_cast %46 : vector<1xf32> to vector<1x1xf32>
    %48 = vector.shape_cast %47 : vector<1x1xf32> to vector<1x1xf32>
    %49 = vector.broadcast %48 : vector<1x1xf32> to vector<1x2xf32>
    %50 = vector.extract_strided_slice %29 {offsets = [0, 8], sizes = [1, 2], strides = [1, 1]} : vector<1x16xf32> to vector<1x2xf32>
    %cst_44 = arith.constant dense<0.000000e+00> : vector<1xf32>
    %51 = vector.multi_reduction <add>, %50, %cst_44 [1] : vector<1x2xf32> to vector<1xf32>
    %52 = vector.shape_cast %51 : vector<1xf32> to vector<1x1xf32>
    %53 = vector.shape_cast %52 : vector<1x1xf32> to vector<1x1xf32>
    %54 = vector.broadcast %53 : vector<1x1xf32> to vector<1x2xf32>
    %55 = vector.extract_strided_slice %29 {offsets = [0, 10], sizes = [1, 2], strides = [1, 1]} : vector<1x16xf32> to vector<1x2xf32>
    %cst_45 = arith.constant dense<0.000000e+00> : vector<1xf32>
    %56 = vector.multi_reduction <add>, %55, %cst_45 [1] : vector<1x2xf32> to vector<1xf32>
    %57 = vector.shape_cast %56 : vector<1xf32> to vector<1x1xf32>
    %58 = vector.shape_cast %57 : vector<1x1xf32> to vector<1x1xf32>
    %59 = vector.broadcast %58 : vector<1x1xf32> to vector<1x2xf32>
    %60 = vector.extract_strided_slice %29 {offsets = [0, 12], sizes = [1, 2], strides = [1, 1]} : vector<1x16xf32> to vector<1x2xf32>
    %cst_46 = arith.constant dense<0.000000e+00> : vector<1xf32>
    %61 = vector.multi_reduction <add>, %60, %cst_46 [1] : vector<1x2xf32> to vector<1xf32>
    %62 = vector.shape_cast %61 : vector<1xf32> to vector<1x1xf32>
    %63 = vector.shape_cast %62 : vector<1x1xf32> to vector<1x1xf32>
    %64 = vector.broadcast %63 : vector<1x1xf32> to vector<1x2xf32>
    %65 = vector.extract_strided_slice %29 {offsets = [0, 14], sizes = [1, 2], strides = [1, 1]} : vector<1x16xf32> to vector<1x2xf32>
    %cst_47 = arith.constant dense<0.000000e+00> : vector<1xf32>
    %66 = vector.multi_reduction <add>, %65, %cst_47 [1] : vector<1x2xf32> to vector<1xf32>
    %67 = vector.shape_cast %66 : vector<1xf32> to vector<1x1xf32>
    %68 = vector.shape_cast %67 : vector<1x1xf32> to vector<1x1xf32>
    %69 = vector.broadcast %68 : vector<1x1xf32> to vector<1x2xf32>
    %70 = tpu.concatenate %34, %39, %44, %49, %54, %59, %64, %69 in 1 : vector<1x2xf32>, vector<1x2xf32>, vector<1x2xf32>, vector<1x2xf32>, vector<1x2xf32>, vector<1x2xf32>, vector<1x2xf32>, vector<1x2xf32> -> vector<1x16xf32>
    %71 = tpu.concatenate %70, %70, %70, %70 in 1 : vector<1x16xf32>, vector<1x16xf32>, vector<1x16xf32>, vector<1x16xf32> -> vector<1x64xf32>
    %cst_48 = arith.constant 0.001953125 : f32
    %72 = vector.broadcast %cst_48 : f32 to vector<1x64xf32>
    %73 = arith.mulf %71, %72 : vector<1x64xf32>
    %74 = vector.broadcast %73 : vector<1x64xf32> to vector<64x64xf32>
    %75 = arith.subf %20, %74 : vector<64x64xf32>
    %76 = arith.mulf %75, %75 : vector<64x64xf32>
    %cst_49 = arith.constant dense<0.000000e+00> : vector<64xf32>
    %77 = vector.multi_reduction <add>, %76, %cst_49 [0] : vector<64x64xf32> to vector<64xf32>
    %78 = vector.shape_cast %77 : vector<64xf32> to vector<1x64xf32>
    %79 = vector.extract_strided_slice %78 {offsets = [0, 0], sizes = [1, 16], strides = [1, 1]} : vector<1x64xf32> to vector<1x16xf32>
    %80 = vector.extract_strided_slice %78 {offsets = [0, 16], sizes = [1, 16], strides = [1, 1]} : vector<1x64xf32> to vector<1x16xf32>
    %81 = arith.addf %79, %80 : vector<1x16xf32>
    %82 = vector.extract_strided_slice %78 {offsets = [0, 32], sizes = [1, 16], strides = [1, 1]} : vector<1x64xf32> to vector<1x16xf32>
    %83 = arith.addf %81, %82 : vector<1x16xf32>
    %84 = vector.extract_strided_slice %78 {offsets = [0, 48], sizes = [1, 16], strides = [1, 1]} : vector<1x64xf32> to vector<1x16xf32>
    %85 = arith.addf %83, %84 : vector<1x16xf32>
    %86 = vector.extract_strided_slice %85 {offsets = [0, 0], sizes = [1, 2], strides = [1, 1]} : vector<1x16xf32> to vector<1x2xf32>
    %cst_50 = arith.constant dense<0.000000e+00> : vector<1xf32>
    %87 = vector.multi_reduction <add>, %86, %cst_50 [1] : vector<1x2xf32> to vector<1xf32>
    %88 = vector.shape_cast %87 : vector<1xf32> to vector<1x1xf32>
    %89 = vector.shape_cast %88 : vector<1x1xf32> to vector<1x1xf32>
    %90 = vector.broadcast %89 : vector<1x1xf32> to vector<1x2xf32>
    %91 = vector.extract_strided_slice %85 {offsets = [0, 2], sizes = [1, 2], strides = [1, 1]} : vector<1x16xf32> to vector<1x2xf32>
    %cst_51 = arith.constant dense<0.000000e+00> : vector<1xf32>
    %92 = vector.multi_reduction <add>, %91, %cst_51 [1] : vector<1x2xf32> to vector<1xf32>
    %93 = vector.shape_cast %92 : vector<1xf32> to vector<1x1xf32>
    %94 = vector.shape_cast %93 : vector<1x1xf32> to vector<1x1xf32>
    %95 = vector.broadcast %94 : vector<1x1xf32> to vector<1x2xf32>
    %96 = vector.extract_strided_slice %85 {offsets = [0, 4], sizes = [1, 2], strides = [1, 1]} : vector<1x16xf32> to vector<1x2xf32>
    %cst_52 = arith.constant dense<0.000000e+00> : vector<1xf32>
    %97 = vector.multi_reduction <add>, %96, %cst_52 [1] : vector<1x2xf32> to vector<1xf32>
    %98 = vector.shape_cast %97 : vector<1xf32> to vector<1x1xf32>
    %99 = vector.shape_cast %98 : vector<1x1xf32> to vector<1x1xf32>
    %100 = vector.broadcast %99 : vector<1x1xf32> to vector<1x2xf32>
    %101 = vector.extract_strided_slice %85 {offsets = [0, 6], sizes = [1, 2], strides = [1, 1]} : vector<1x16xf32> to vector<1x2xf32>
    %cst_53 = arith.constant dense<0.000000e+00> : vector<1xf32>
    %102 = vector.multi_reduction <add>, %101, %cst_53 [1] : vector<1x2xf32> to vector<1xf32>
    %103 = vector.shape_cast %102 : vector<1xf32> to vector<1x1xf32>
    %104 = vector.shape_cast %103 : vector<1x1xf32> to vector<1x1xf32>
    %105 = vector.broadcast %104 : vector<1x1xf32> to vector<1x2xf32>
    %106 = vector.extract_strided_slice %85 {offsets = [0, 8], sizes = [1, 2], strides = [1, 1]} : vector<1x16xf32> to vector<1x2xf32>
    %cst_54 = arith.constant dense<0.000000e+00> : vector<1xf32>
    %107 = vector.multi_reduction <add>, %106, %cst_54 [1] : vector<1x2xf32> to vector<1xf32>
    %108 = vector.shape_cast %107 : vector<1xf32> to vector<1x1xf32>
    %109 = vector.shape_cast %108 : vector<1x1xf32> to vector<1x1xf32>
    %110 = vector.broadcast %109 : vector<1x1xf32> to vector<1x2xf32>
    %111 = vector.extract_strided_slice %85 {offsets = [0, 10], sizes = [1, 2], strides = [1, 1]} : vector<1x16xf32> to vector<1x2xf32>
    %cst_55 = arith.constant dense<0.000000e+00> : vector<1xf32>
    %112 = vector.multi_reduction <add>, %111, %cst_55 [1] : vector<1x2xf32> to vector<1xf32>
    %113 = vector.shape_cast %112 : vector<1xf32> to vector<1x1xf32>
    %114 = vector.shape_cast %113 : vector<1x1xf32> to vector<1x1xf32>
    %115 = vector.broadcast %114 : vector<1x1xf32> to vector<1x2xf32>
    %116 = vector.extract_strided_slice %85 {offsets = [0, 12], sizes = [1, 2], strides = [1, 1]} : vector<1x16xf32> to vector<1x2xf32>
    %cst_56 = arith.constant dense<0.000000e+00> : vector<1xf32>
    %117 = vector.multi_reduction <add>, %116, %cst_56 [1] : vector<1x2xf32> to vector<1xf32>
    %118 = vector.shape_cast %117 : vector<1xf32> to vector<1x1xf32>
    %119 = vector.shape_cast %118 : vector<1x1xf32> to vector<1x1xf32>
    %120 = vector.broadcast %119 : vector<1x1xf32> to vector<1x2xf32>
    %121 = vector.extract_strided_slice %85 {offsets = [0, 14], sizes = [1, 2], strides = [1, 1]} : vector<1x16xf32> to vector<1x2xf32>
    %cst_57 = arith.constant dense<0.000000e+00> : vector<1xf32>
    %122 = vector.multi_reduction <add>, %121, %cst_57 [1] : vector<1x2xf32> to vector<1xf32>
    %123 = vector.shape_cast %122 : vector<1xf32> to vector<1x1xf32>
    %124 = vector.shape_cast %123 : vector<1x1xf32> to vector<1x1xf32>
    %125 = vector.broadcast %124 : vector<1x1xf32> to vector<1x2xf32>
    %126 = tpu.concatenate %90, %95, %100, %105, %110, %115, %120, %125 in 1 : vector<1x2xf32>, vector<1x2xf32>, vector<1x2xf32>, vector<1x2xf32>, vector<1x2xf32>, vector<1x2xf32>, vector<1x2xf32>, vector<1x2xf32> -> vector<1x16xf32>
    %127 = tpu.concatenate %126, %126, %126, %126 in 1 : vector<1x16xf32>, vector<1x16xf32>, vector<1x16xf32>, vector<1x16xf32> -> vector<1x64xf32>
    %cst_58 = arith.constant 0.001953125 : f32
    %128 = vector.broadcast %cst_58 : f32 to vector<1x64xf32>
    %129 = arith.mulf %127, %128 : vector<1x64xf32>
    %cst_59 = arith.constant 9.99999974E-6 : f32
    %130 = vector.broadcast %cst_59 : f32 to vector<1x64xf32>
    %131 = arith.addf %129, %130 : vector<1x64xf32>
    %132 = math.rsqrt %131 : vector<1x64xf32>
    %c0_60 = arith.constant 0 : index
    %c0_61 = arith.constant 0 : index
    %133 = vector.load %arg4[%c0_60, %c0_61] : memref<1x64xf32, #tpu.memory_space<vmem>>, vector<1x64xf32>
    %134 = arith.mulf %132, %133 : vector<1x64xf32>
    %135 = vector.broadcast %134 : vector<1x64xf32> to vector<64x64xf32>
    %136 = arith.mulf %75, %135 : vector<64x64xf32>
    %c0_62 = arith.constant 0 : index
    %c0_63 = arith.constant 0 : index
    %137 = vector.load %arg5[%c0_62, %c0_63] : memref<1x64xf32, #tpu.memory_space<vmem>>, vector<1x64xf32>
    %138 = vector.broadcast %137 : vector<1x64xf32> to vector<64x64xf32>
    %139 = arith.addf %136, %138 : vector<64x64xf32>
    %cst_64 = arith.constant 0.000000e+00 : f32
    %140 = vector.broadcast %cst_64 : f32 to vector<64x64xf32>
    %141 = arith.maximumf %139, %140 : vector<64x64xf32>
    %142 = vector.extract_strided_slice %141 {offsets = [0, 0], sizes = [64, 32], strides = [1, 1]} : vector<64x64xf32> to vector<64x32xf32>
    %143 = vector.shape_cast %142 : vector<64x32xf32> to vector<8x8x32xf32>
    %144 = arith.truncf %143 : vector<8x8x32xf32> to vector<8x8x32xbf16>
    %c0_65 = arith.constant 0 : index
    %c0_66 = arith.constant 0 : index
    %c0_67 = arith.constant 0 : index
    %c0_68 = arith.constant 0 : index
    %c0_69 = arith.constant 0 : index
    %145 = vector.load %arg6[%c0_65, %c0_66, %c0_67, %c0_68, %c0_69] : memref<1x8x2x8x32xbf16, #tpu.memory_space<vmem>>, vector<1x8x1x8x32xbf16>
    %146 = vector.shape_cast %145 : vector<1x8x1x8x32xbf16> to vector<8x8x32xbf16>
    %147 = vector.shape_cast %144 : vector<8x8x32xbf16> to vector<1x8x1x8x32xbf16>
    tpu.vector_store %arg6[%c0_65, %c0_66, %c0_67, %c0_68, %c0_69], %147 {strides = array<i32>} : memref<1x8x2x8x32xbf16, #tpu.memory_space<vmem>>, vector<1x8x1x8x32xbf16>,
    %148 = vector.extract_strided_slice %141 {offsets = [0, 32], sizes = [64, 32], strides = [1, 1]} : vector<64x64xf32> to vector<64x32xf32>
    %149 = vector.shape_cast %148 : vector<64x32xf32> to vector<8x8x32xf32>
    %150 = arith.truncf %149 : vector<8x8x32xf32> to vector<8x8x32xbf16>
    %c0_70 = arith.constant 0 : index
    %c0_71 = arith.constant 0 : index
    %c1_72 = arith.constant 1 : index
    %c0_73 = arith.constant 0 : index
    %c0_74 = arith.constant 0 : index
    %151 = vector.load %arg6[%c0_70, %c0_71, %c1_72, %c0_73, %c0_74] : memref<1x8x2x8x32xbf16, #tpu.memory_space<vmem>>, vector<1x8x1x8x32xbf16>
    %152 = vector.shape_cast %151 : vector<1x8x1x8x32xbf16> to vector<8x8x32xbf16>
    %153 = vector.shape_cast %150 : vector<8x8x32xbf16> to vector<1x8x1x8x32xbf16>
    tpu.vector_store %arg6[%c0_70, %c0_71, %c1_72, %c0_73, %c0_74], %153 {strides = array<i32>} : memref<1x8x2x8x32xbf16, #tpu.memory_space<vmem>>, vector<1x8x1x8x32xbf16>,
    return
  }
  func.func @transform_0(%arg0: i32) -> (i32, i32, i32, i32) {
    %c0_i32 = arith.constant 0 : i32
    %c0_i32_0 = arith.constant 0 : i32
    %c0_i32_1 = arith.constant 0 : i32
    %c0_i32_2 = arith.constant 0 : i32
    return %arg0, %c0_i32, %c0_i32_0, %c0_i32_1 : i32, i32, i32, i32
  }
  func.func @transform_1(%arg0: i32) -> (i32, i32) {
    %c0_i32 = arith.constant 0 : i32
    %c0_i32_0 = arith.constant 0 : i32
    %c0_i32_1 = arith.constant 0 : i32
    return %c0_i32, %c0_i32_0 : i32, i32
  }
  func.func @transform_2(%arg0: i32) -> (i32, i32) {
    %c0_i32 = arith.constant 0 : i32
    %c0_i32_0 = arith.constant 0 : i32
    %c0_i32_1 = arith.constant 0 : i32
    return %c0_i32, %c0_i32_0 : i32, i32
  }
  func.func @transform_3(%arg0: i32) -> (i32, i32) {
    %c0_i32 = arith.constant 0 : i32
    %c0_i32_0 = arith.constant 0 : i32
    %c0_i32_1 = arith.constant 0 : i32
    return %c0_i32, %c0_i32_0 : i32, i32
  }
  func.func @transform_4(%arg0: i32) -> (i32, i32) {
    %c0_i32 = arith.constant 0 : i32
    %c0_i32_0 = arith.constant 0 : i32
    %c0_i32_1 = arith.constant 0 : i32
    return %c0_i32, %c0_i32_0 : i32, i32
  }
  func.func @transform_5(%arg0: i32) -> (i32, i32, i32, i32, i32) {
    %c0_i32 = arith.constant 0 : i32
    %c0_i32_0 = arith.constant 0 : i32
    %c0_i32_1 = arith.constant 0 : i32
    %c0_i32_2 = arith.constant 0 : i32
    %c0_i32_3 = arith.constant 0 : i32
    return %arg0, %c0_i32, %c0_i32_0, %c0_i32_1, %c0_i32_2 : i32, i32, i32, i32, i32
  }
}

module attributes {stable_mosaic.version = 11 : i64} {
  func.func @kernel(%arg0: i32, %arg1: memref<1x16x16x16xbf16, #tpu.memory_space<vmem>>, %arg2: memref<144x32xbf16, #tpu.memory_space<vmem>>, %arg3: memref<1x32xf32, #tpu.memory_space<vmem>>, %arg4: memref<1x16x2x16x16xf32, #tpu.memory_space<vmem>>, %arg5: memref<18x18x16xbf16, #tpu.memory_space<vmem>>) attributes {dimension_semantics = [#tpu.dimension_semantics<parallel>], iteration_bounds = array<i64: 2>, scalar_prefetch = 0 : i64, scratch_operands = 1 : i64, tpu.core_type = #tpu.core_type<tc>, window_params = [{transform_indices = @transform_0, window_bounds = array<i64: 1, 16, 16, 16>}, {pipeline_mode = #tpu.pipeline_mode<synchronous>, transform_indices = @transform_1, window_bounds = array<i64: 144, 32>}, {pipeline_mode = #tpu.pipeline_mode<synchronous>, transform_indices = @transform_2, window_bounds = array<i64: 1, 32>}, {transform_indices = @transform_3, window_bounds = array<i64: 1, 16, 2, 16, 16>}]} {
    %c0 = arith.constant 0 : index
    %c0_0 = arith.constant 0 : index
    %c0_1 = arith.constant 0 : index
    %c0_2 = arith.constant 0 : index
    %0 = vector.load %arg1[%c0, %c0_0, %c0_1, %c0_2] : memref<1x16x16x16xbf16, #tpu.memory_space<vmem>>, vector<1x16x16x16xbf16>
    %1 = vector.shape_cast %0 : vector<1x16x16x16xbf16> to vector<16x16x16xbf16>
    %cst = arith.constant 0.000000e+00 : bf16
    %2 = vector.broadcast %cst : bf16 to vector<18x18x16xbf16>
    %c0_3 = arith.constant 0 : index
    %c0_4 = arith.constant 0 : index
    %c0_5 = arith.constant 0 : index
    %3 = vector.load %arg5[%c0_3, %c0_4, %c0_5] : memref<18x18x16xbf16, #tpu.memory_space<vmem>>, vector<18x18x16xbf16>
    tpu.vector_store %arg5[%c0_3, %c0_4, %c0_5], %2 {strides = array<i32>} : memref<18x18x16xbf16, #tpu.memory_space<vmem>>, vector<18x18x16xbf16>,
    %c1 = arith.constant 1 : index
    %c1_6 = arith.constant 1 : index
    %c0_7 = arith.constant 0 : index
    %4 = vector.load %arg5[%c1, %c1_6, %c0_7] : memref<18x18x16xbf16, #tpu.memory_space<vmem>>, vector<16x16x16xbf16>
    tpu.vector_store %arg5[%c1, %c1_6, %c0_7], %1 {strides = array<i32>} : memref<18x18x16xbf16, #tpu.memory_space<vmem>>, vector<16x16x16xbf16>,
    %c0_8 = arith.constant 0 : index
    %c0_9 = arith.constant 0 : index
    %c0_10 = arith.constant 0 : index
    %5 = vector.load %arg5[%c0_8, %c0_9, %c0_10] : memref<18x18x16xbf16, #tpu.memory_space<vmem>>, vector<16x16x16xbf16>
    %c0_11 = arith.constant 0 : index
    %c1_12 = arith.constant 1 : index
    %c0_13 = arith.constant 0 : index
    %6 = vector.load %arg5[%c0_11, %c1_12, %c0_13] : memref<18x18x16xbf16, #tpu.memory_space<vmem>>, vector<16x16x16xbf16>
    %c0_14 = arith.constant 0 : index
    %c2 = arith.constant 2 : index
    %c0_15 = arith.constant 0 : index
    %7 = vector.load %arg5[%c0_14, %c2, %c0_15] : memref<18x18x16xbf16, #tpu.memory_space<vmem>>, vector<16x16x16xbf16>
    %c1_16 = arith.constant 1 : index
    %c0_17 = arith.constant 0 : index
    %c0_18 = arith.constant 0 : index
    %8 = vector.load %arg5[%c1_16, %c0_17, %c0_18] : memref<18x18x16xbf16, #tpu.memory_space<vmem>>, vector<16x16x16xbf16>
    %c1_19 = arith.constant 1 : index
    %c1_20 = arith.constant 1 : index
    %c0_21 = arith.constant 0 : index
    %9 = vector.load %arg5[%c1_19, %c1_20, %c0_21] : memref<18x18x16xbf16, #tpu.memory_space<vmem>>, vector<16x16x16xbf16>
    %c1_22 = arith.constant 1 : index
    %c2_23 = arith.constant 2 : index
    %c0_24 = arith.constant 0 : index
    %10 = vector.load %arg5[%c1_22, %c2_23, %c0_24] : memref<18x18x16xbf16, #tpu.memory_space<vmem>>, vector<16x16x16xbf16>
    %c2_25 = arith.constant 2 : index
    %c0_26 = arith.constant 0 : index
    %c0_27 = arith.constant 0 : index
    %11 = vector.load %arg5[%c2_25, %c0_26, %c0_27] : memref<18x18x16xbf16, #tpu.memory_space<vmem>>, vector<16x16x16xbf16>
    %c2_28 = arith.constant 2 : index
    %c1_29 = arith.constant 1 : index
    %c0_30 = arith.constant 0 : index
    %12 = vector.load %arg5[%c2_28, %c1_29, %c0_30] : memref<18x18x16xbf16, #tpu.memory_space<vmem>>, vector<16x16x16xbf16>
    %c2_31 = arith.constant 2 : index
    %c2_32 = arith.constant 2 : index
    %c0_33 = arith.constant 0 : index
    %13 = vector.load %arg5[%c2_31, %c2_32, %c0_33] : memref<18x18x16xbf16, #tpu.memory_space<vmem>>, vector<16x16x16xbf16>
    %14 = tpu.concatenate %5, %6, %7, %8, %9, %10, %11, %12, %13 in 2 : vector<16x16x16xbf16>, vector<16x16x16xbf16>, vector<16x16x16xbf16>, vector<16x16x16xbf16>, vector<16x16x16xbf16>, vector<16x16x16xbf16>, vector<16x16x16xbf16>, vector<16x16x16xbf16>, vector<16x16x16xbf16> -> vector<16x16x144xbf16>
    %15 = vector.shape_cast %14 : vector<16x16x144xbf16> to vector<256x144xbf16>
    %c0_34 = arith.constant 0 : index
    %c0_35 = arith.constant 0 : index
    %16 = vector.load %arg2[%c0_34, %c0_35] : memref<144x32xbf16, #tpu.memory_space<vmem>>, vector<144x32xbf16>
    %cst_36 = arith.constant dense<0.000000e+00> : vector<256x32xf32>
    %17 = tpu.matmul %15, %16, %cst_36 {dimension_numbers = #tpu.dot_dimension_numbers<[1], [0], [0], [1], [0, 0, 1, 1], [], []>} : vector<256x144xbf16>, vector<144x32xbf16>, vector<256x32xf32> -> vector<256x32xf32>
    %c0_37 = arith.constant 0 : index
    %c0_38 = arith.constant 0 : index
    %18 = vector.load %arg3[%c0_37, %c0_38] : memref<1x32xf32, #tpu.memory_space<vmem>>, vector<1x32xf32>
    %19 = vector.broadcast %18 : vector<1x32xf32> to vector<256x32xf32>
    %20 = arith.addf %17, %19 : vector<256x32xf32>
    %21 = vector.extract_strided_slice %20 {offsets = [0, 0], sizes = [256, 16], strides = [1, 1]} : vector<256x32xf32> to vector<256x16xf32>
    %22 = vector.shape_cast %21 : vector<256x16xf32> to vector<16x16x16xf32>
    %c0_39 = arith.constant 0 : index
    %c0_40 = arith.constant 0 : index
    %c0_41 = arith.constant 0 : index
    %c0_42 = arith.constant 0 : index
    %c0_43 = arith.constant 0 : index
    %23 = vector.load %arg4[%c0_39, %c0_40, %c0_41, %c0_42, %c0_43] : memref<1x16x2x16x16xf32, #tpu.memory_space<vmem>>, vector<1x16x1x16x16xf32>
    %24 = vector.shape_cast %23 : vector<1x16x1x16x16xf32> to vector<16x16x16xf32>
    %25 = vector.shape_cast %22 : vector<16x16x16xf32> to vector<1x16x1x16x16xf32>
    tpu.vector_store %arg4[%c0_39, %c0_40, %c0_41, %c0_42, %c0_43], %25 {strides = array<i32>} : memref<1x16x2x16x16xf32, #tpu.memory_space<vmem>>, vector<1x16x1x16x16xf32>,
    %26 = vector.extract_strided_slice %20 {offsets = [0, 16], sizes = [256, 16], strides = [1, 1]} : vector<256x32xf32> to vector<256x16xf32>
    %27 = vector.shape_cast %26 : vector<256x16xf32> to vector<16x16x16xf32>
    %c0_44 = arith.constant 0 : index
    %c0_45 = arith.constant 0 : index
    %c1_46 = arith.constant 1 : index
    %c0_47 = arith.constant 0 : index
    %c0_48 = arith.constant 0 : index
    %28 = vector.load %arg4[%c0_44, %c0_45, %c1_46, %c0_47, %c0_48] : memref<1x16x2x16x16xf32, #tpu.memory_space<vmem>>, vector<1x16x1x16x16xf32>
    %29 = vector.shape_cast %28 : vector<1x16x1x16x16xf32> to vector<16x16x16xf32>
    %30 = vector.shape_cast %27 : vector<16x16x16xf32> to vector<1x16x1x16x16xf32>
    tpu.vector_store %arg4[%c0_44, %c0_45, %c1_46, %c0_47, %c0_48], %30 {strides = array<i32>} : memref<1x16x2x16x16xf32, #tpu.memory_space<vmem>>, vector<1x16x1x16x16xf32>,
    return
  }
  func.func @transform_0(%arg0: i32) -> (i32, i32, i32, i32) {
    %c0_i32 = arith.constant 0 : i32
    %c0_i32_0 = arith.constant 0 : i32
    %c0_i32_1 = arith.constant 0 : i32
    %c0_i32_2 = arith.constant 0 : i32
    return %arg0, %c0_i32, %c0_i32_0, %c0_i32_1 : i32, i32, i32, i32
  }
  func.func @transform_1(%arg0: i32) -> (i32, i32) {
    %c0_i32 = arith.constant 0 : i32
    %c0_i32_0 = arith.constant 0 : i32
    %c0_i32_1 = arith.constant 0 : i32
    return %c0_i32, %c0_i32_0 : i32, i32
  }
  func.func @transform_2(%arg0: i32) -> (i32, i32) {
    %c0_i32 = arith.constant 0 : i32
    %c0_i32_0 = arith.constant 0 : i32
    %c0_i32_1 = arith.constant 0 : i32
    return %c0_i32, %c0_i32_0 : i32, i32
  }
  func.func @transform_3(%arg0: i32) -> (i32, i32, i32, i32, i32) {
    %c0_i32 = arith.constant 0 : i32
    %c0_i32_0 = arith.constant 0 : i32
    %c0_i32_1 = arith.constant 0 : i32
    %c0_i32_2 = arith.constant 0 : i32
    %c0_i32_3 = arith.constant 0 : i32
    return %arg0, %c0_i32, %c0_i32_0, %c0_i32_1, %c0_i32_2 : i32, i32, i32, i32, i32
  }
}

</mosaic_0001>

<bundles_post_ra>
// kernel: tile.23
= control target key start
LH: loop header
LB: loop body
LE: loop exit
PB: predicated region body
PF: predicated region fallthrough
CT: control target
= control target key end

     0   :  { %s22_s0 = inlined_call_operand.vmem [shape: f32[16], index: 0, kind: input, shape index: {}]   ;;  %s23_s1 = inlined_call_operand.vmem [shape: f32[4,16], index: 1, kind: output, shape index: {}]  }
   0x1   :  { %v4_v0 = vld [vmem:[%s22_s0] ss:$0 sm:$0xff] }
   0x2   :  { %5 = vst [vmem:[%s23_s1] sm:$0xf] %v4_v0 }

// kernel: tile.38
= control target key start
LH: loop header
LB: loop body
LE: loop exit
PB: predicated region body
PF: predicated region fallthrough
CT: control target
= control target key end

     0   :  { %s22_s0 = inlined_call_operand.vmem [shape: f32[8], index: 0, kind: input, shape index: {}]   ;;  %s23_s1 = inlined_call_operand.vmem [shape: f32[4,8], index: 1, kind: output, shape index: {}]  }
   0x1   :  { %v4_v0 = vld [vmem:[%s22_s0] ss:$0 sm:$0xff] }
   0x2   :  { %5 = vst [vmem:[%s23_s1] sm:$0xf] %v4_v0 }

// kernel: tile.39
= control target key start
LH: loop header
LB: loop body
LE: loop exit
PB: predicated region body
PF: predicated region fallthrough
CT: control target
= control target key end

     0   :  { %s37_s8 = smov 8   ;;  %s38_s9 = smov 16   ;;  %vm7_vm0 = vcmask 64512   ;;  %vm13_vm1 = vcmask 261312   ;;  %vm19_vm2 = vcmask 195712   ;;  %vm25_vm3 = vcmask 130112   ;;  %s55_s0 = inlined_call_operand.vmem [shape: f32[4,8], index: 0, kind: input, shape index: {}]   ;;  %s56_s1 = inlined_call_operand.vmem [shape: f32[1,32], index: 1, kind: output, shape index: {}]  }
   0x1   :  { %v4_v0 = vld [vmem:[%s55_s0] sm:$0xf]  ;;  %s36_s0 = smov 24  }
   0x2   :  { %5 = vst [vmem:[#allocation1] sm:$0xf] %v4_v0 }
   0x9   :  { %v10_v1 = vld [vmem:[#allocation1 + $0x3] sm:$0x1]   ;;  %v22_v2 = vld [vmem:[#allocation1 + $0x1] sm:$0x1]   ;;  %v16_v3 = vld [vmem:[#allocation1 + $0x2] sm:$0x1]  }
   0xa   :  { %11 = vrot.lane.b32.xlu0 %v10_v1, %s36_s0  ;;  %23 = vrot.lane.b32.xlu1 %v22_v2, %s37_s8  ;;  %v6_v4 = vld [vmem:[#allocation1] sm:$0x1]  }
   0xb   :  { %8 = vst.msk [vmem:[#allocation0] sm:$0x1] %vm7_vm0, %v6_v4  }
  0x12   :  { %17 = vrot.lane.b32.xlu0 %v16_v3, %s38_s9 }
  0x7c   :  { %v12_v5 = vpop.permute.xlu0 %11   ;;  %v24_v6 = vpop.permute.xlu1 %23  }
  0x7d   :  { %14 = vst.msk [vmem:[#allocation0] sm:$0x1] %vm13_vm1, %v12_v5  }
  0x84   :  { %v18_v7 = vpop.permute.xlu0 %17  }
  0x85   :  { %20 = vst.msk [vmem:[#allocation0] sm:$0x1] %vm19_vm2, %v18_v7  }
  0x86   :  { %26 = vst.msk [vmem:[#allocation0] sm:$0x1] %vm25_vm3, %v24_v6  }
  0x8d   :  { %v29_v8 = vld [vmem:[#allocation0] sm:$0x1] }
  0x8e   :  { %32 = vst [vmem:[%s56_s1] sm:$0x1] %v29_v8 }

// kernel: tile.32
= control target key start
LH: loop header
LB: loop body
LE: loop exit
PB: predicated region body
PF: predicated region fallthrough
CT: control target
= control target key end

     0   :  { %s37_s8 = smov 16   ;;  %s38_s9 = smov 32   ;;  %vm7_vm0 = vcmask 130048   ;;  %vm13_vm1 = vcmask 523648   ;;  %vm19_vm2 = vcmask 392448   ;;  %vm25_vm3 = vcmask 261248   ;;  %s55_s0 = inlined_call_operand.vmem [shape: f32[4,16], index: 0, kind: input, shape index: {}]   ;;  %s56_s1 = inlined_call_operand.vmem [shape: f32[1,64], index: 1, kind: output, shape index: {}]  }
   0x1   :  { %v4_v0 = vld [vmem:[%s55_s0] sm:$0xf]  ;;  %s36_s0 = smov 48  }
   0x2   :  { %5 = vst [vmem:[#allocation1] sm:$0xf] %v4_v0 }
   0x9   :  { %v10_v1 = vld [vmem:[#allocation1 + $0x3] sm:$0x1]   ;;  %v22_v2 = vld [vmem:[#allocation1 + $0x1] sm:$0x1]   ;;  %v16_v3 = vld [vmem:[#allocation1 + $0x2] sm:$0x1]  }
   0xa   :  { %11 = vrot.lane.b32.xlu0 %v10_v1, %s36_s0  ;;  %23 = vrot.lane.b32.xlu1 %v22_v2, %s37_s8  ;;  %v6_v4 = vld [vmem:[#allocation1] sm:$0x1]  }
   0xb   :  { %8 = vst.msk [vmem:[#allocation0] sm:$0x1] %vm7_vm0, %v6_v4  }
  0x12   :  { %17 = vrot.lane.b32.xlu0 %v16_v3, %s38_s9 }
  0x7c   :  { %v12_v5 = vpop.permute.xlu0 %11   ;;  %v24_v6 = vpop.permute.xlu1 %23  }
  0x7d   :  { %14 = vst.msk [vmem:[#allocation0] sm:$0x1] %vm13_vm1, %v12_v5  }
  0x84   :  { %v18_v7 = vpop.permute.xlu0 %17  }
  0x85   :  { %20 = vst.msk [vmem:[#allocation0] sm:$0x1] %vm19_vm2, %v18_v7  }
  0x86   :  { %26 = vst.msk [vmem:[#allocation0] sm:$0x1] %vm25_vm3, %v24_v6  }
  0x8d   :  { %v29_v8 = vld [vmem:[#allocation0] sm:$0x1] }
  0x8e   :  { %32 = vst [vmem:[%s56_s1] sm:$0x1] %v29_v8 }

// kernel: reverse.7
= control target key start
LH: loop header
LB: loop body
LE: loop exit
PB: predicated region body
PF: predicated region fallthrough
CT: control target
= control target key end

     0   :  { %s181_s0 = inlined_call_operand.vmem [shape: bf16[2,5,16,8], index: 0, kind: input, shape index: {}]   ;;  %s182_s1 = inlined_call_operand.vmem [shape: bf16[2,5,16,8], index: 1, kind: output, shape index: {}]  }
   0x1   :  { %v105_v0 = vld [vmem:[%s181_s0 + $0x24] sm:$0xf]  ;;  %v71_v1 = vld [vmem:[%s181_s0 + $0x10] sm:$0xf]  ;;  %v117_v2 = vld [vmem:[%s181_s0 + $0x1c] sm:$0xf0] }
   0x2   :  { %72 = vst [vmem:[%s182_s1 + $0x14] sm:$0xf] %v71_v1  ;;  %v106_v3 = vor.u32 %v117_v2, %v105_v0  ;;  %v109_v4 = vld [vmem:[%s181_s0 + $0xc] sm:$0xf]  ;;  %v114_v5 = vld [vmem:[%s181_s0 + $0x1c] sm:$0xf] }
   0x3   :  { %v118_v6 = vld [vmem:[%s181_s0 + $0x4] sm:$0xf0]  ;;  %v119_v7 = vld [vmem:[%s181_s0 + $0x14] sm:$0xf0]  ;;  %v83_v8 = vld [vmem:[%s181_s0 + $0x4] sm:$0xf] }
   0x4   :  { %92 = vst [vmem:[%s182_s1] sm:$0xff] %v106_v3   ;;  %v110_v9 = vor.u32 %v118_v6, %v109_v4  ;;  %v115_v10 = vor.u32 %v119_v7, %v114_v5  ;;  %v85_v11 = vld [vmem:[%s181_s0 + $0x14] sm:$0xf]  ;;  %v64_v12 = vld [vmem:[%s181_s0] sm:$0xf] }
   0x5   :  { %84 = vst [vmem:[%s182_s1 + $0x20] sm:$0xf] %v83_v8 }
   0x6   :  { %111 = vst [vmem:[%s182_s1 + $0x18] sm:$0xff] %v110_v9  }
   0x7   :  { %116 = vst [vmem:[%s182_s1 + $0x8] sm:$0xff] %v115_v10  }
   0x8   :  { %86 = vst [vmem:[%s182_s1 + $0x10] sm:$0xf] %v85_v11 }
   0x9   :  { %87 = vst [vmem:[%s182_s1 + $0x24] sm:$0xf] %v64_v12 }

// kernel: reverse.14
= control target key start
LH: loop header
LB: loop body
LE: loop exit
PB: predicated region body
PF: predicated region fallthrough
CT: control target
= control target key end

     0   :  { %s143_s0 = inlined_call_operand.vmem [shape: bf16[3,3,16,8], index: 0, kind: input, shape index: {}]   ;;  %s144_s1 = inlined_call_operand.vmem [shape: bf16[3,3,16,8], index: 1, kind: output, shape index: {}]  }
   0x1   :  { %v63_v0 = vld [vmem:[%s143_s0 + $0x20] sm:$0xf]  ;;  %v64_v1 = vld [vmem:[%s143_s0 + $0x14] sm:$0xf]  ;;  %v66_v2 = vld [vmem:[%s143_s0 + $0x8] sm:$0xf] }
   0x2   :  { %7 = vst [vmem:[%s144_s1] sm:$0xf] %v63_v0  ;;  %v68_v3 = vld [vmem:[%s143_s0 + $0x1c] sm:$0xf]  ;;  %v70_v4 = vld [vmem:[%s143_s0 + $0x10] sm:$0xf] }
   0x3   :  { %65 = vst [vmem:[%s144_s1 + $0xc] sm:$0xf] %v64_v1  ;;  %v72_v5 = vld [vmem:[%s143_s0 + $0x4] sm:$0xf]  ;;  %v74_v6 = vld [vmem:[%s143_s0 + $0x18] sm:$0xf] }
   0x4   :  { %67 = vst [vmem:[%s144_s1 + $0x18] sm:$0xf] %v66_v2  ;;  %v76_v7 = vld [vmem:[%s143_s0 + $0xc] sm:$0xf]  ;;  %v57_v8 = vld [vmem:[%s143_s0] sm:$0xf] }
   0x5   :  { %69 = vst [vmem:[%s144_s1 + $0x4] sm:$0xf] %v68_v3 }
   0x6   :  { %71 = vst [vmem:[%s144_s1 + $0x10] sm:$0xf] %v70_v4 }
   0x7   :  { %73 = vst [vmem:[%s144_s1 + $0x1c] sm:$0xf] %v72_v5 }
   0x8   :  { %75 = vst [vmem:[%s144_s1 + $0x8] sm:$0xf] %v74_v6 }
   0x9   :  { %77 = vst [vmem:[%s144_s1 + $0x14] sm:$0xf] %v76_v7 }
   0xa   :  { %78 = vst [vmem:[%s144_s1 + $0x20] sm:$0xf] %v57_v8 }

// kernel: reverse.15
= control target key start
LH: loop header
LB: loop body
LE: loop exit
PB: predicated region body
PF: predicated region fallthrough
CT: control target
= control target key end

     0   :  { %s98_s0 = inlined_call_operand.vmem [shape: bf16[3,2,16,8], index: 0, kind: input, shape index: {}]   ;;  %s99_s1 = inlined_call_operand.vmem [shape: bf16[3,2,16,8], index: 1, kind: output, shape index: {}]  }
   0x1   :  { %v42_v0 = vld [vmem:[%s98_s0 + $0x14] sm:$0xf]  ;;  %v43_v1 = vld [vmem:[%s98_s0 + $0xc] sm:$0xf]  ;;  %v45_v2 = vld [vmem:[%s98_s0 + $0x4] sm:$0xf] }
   0x2   :  { %7 = vst [vmem:[%s99_s1] sm:$0xf] %v42_v0  ;;  %v47_v3 = vld [vmem:[%s98_s0 + $0x10] sm:$0xf]  ;;  %v49_v4 = vld [vmem:[%s98_s0 + $0x8] sm:$0xf] }
   0x3   :  { %44 = vst [vmem:[%s99_s1 + $0x8] sm:$0xf] %v43_v1  ;;  %v36_v5 = vld [vmem:[%s98_s0] sm:$0xf] }
   0x4   :  { %46 = vst [vmem:[%s99_s1 + $0x10] sm:$0xf] %v45_v2 }
   0x5   :  { %48 = vst [vmem:[%s99_s1 + $0x4] sm:$0xf] %v47_v3 }
   0x6   :  { %50 = vst [vmem:[%s99_s1 + $0xc] sm:$0xf] %v49_v4 }
   0x7   :  { %51 = vst [vmem:[%s99_s1 + $0x14] sm:$0xf] %v36_v5 }

// kernel: reverse.3
= control target key start
LH: loop header
LB: loop body
LE: loop exit
PB: predicated region body
PF: predicated region fallthrough
CT: control target
= control target key end

     0   :  { %s248_s0 = inlined_call_operand.vmem [shape: bf16[2,5,16,16], index: 0, kind: input, shape index: {}]   ;;  %s249_s1 = inlined_call_operand.vmem [shape: bf16[2,5,16,16], index: 1, kind: output, shape index: {}]  }
   0x1   :  { %v140_v0 = vld [vmem:[%s248_s0 + $0x48] sm:$0xff]   ;;  %v141_v1 = vld [vmem:[%s248_s0 + $0x20] sm:$0xff]   ;;  %v145_v3 = vld [vmem:[%s248_s0 + $0x18] sm:$0xff]  }
   0x2   :  { %v143_v2 = vld [vmem:[%s248_s0 + $0x40] sm:$0xff]   ;;  %7 = vst [vmem:[%s249_s1] sm:$0xff] %v140_v0   ;;  %v147_v4 = vld [vmem:[%s248_s0 + $0x38] sm:$0xff]   ;;  %v149_v5 = vld [vmem:[%s248_s0 + $0x10] sm:$0xff]  }
   0x3   :  { %142 = vst [vmem:[%s249_s1 + $0x28] sm:$0xff] %v141_v1   ;;  %v151_v6 = vld [vmem:[%s248_s0 + $0x30] sm:$0xff]   ;;  %v153_v7 = vld [vmem:[%s248_s0 + $0x8] sm:$0xff]   ;;  %v64_v9 = vld [vmem:[%s248_s0] sm:$0xff]  }
   0x4   :  { %144 = vst [vmem:[%s249_s1 + $0x8] sm:$0xff] %v143_v2   ;;  %v155_v8 = vld [vmem:[%s248_s0 + $0x28] sm:$0xff]  }
   0x5   :  { %146 = vst [vmem:[%s249_s1 + $0x30] sm:$0xff] %v145_v3  }
   0x6   :  { %148 = vst [vmem:[%s249_s1 + $0x10] sm:$0xff] %v147_v4  }
   0x7   :  { %150 = vst [vmem:[%s249_s1 + $0x38] sm:$0xff] %v149_v5  }
   0x8   :  { %152 = vst [vmem:[%s249_s1 + $0x18] sm:$0xff] %v151_v6  }
   0x9   :  { %154 = vst [vmem:[%s249_s1 + $0x40] sm:$0xff] %v153_v7  }
   0xa   :  { %156 = vst [vmem:[%s249_s1 + $0x20] sm:$0xff] %v155_v8  }
   0xb   :  { %157 = vst [vmem:[%s249_s1 + $0x48] sm:$0xff] %v64_v9  }

// kernel: reverse.12
= control target key start
LH: loop header
LB: loop body
LE: loop exit
PB: predicated region body
PF: predicated region fallthrough
CT: control target
= control target key end

     0   :  { %s224_s0 = inlined_call_operand.vmem [shape: bf16[3,3,16,16], index: 0, kind: input, shape index: {}]   ;;  %s225_s1 = inlined_call_operand.vmem [shape: bf16[3,3,16,16], index: 1, kind: output, shape index: {}]  }
   0x1   :  { %v126_v0 = vld [vmem:[%s224_s0 + $0x40] sm:$0xff]   ;;  %v127_v1 = vld [vmem:[%s224_s0 + $0x28] sm:$0xff]   ;;  %v129_v2 = vld [vmem:[%s224_s0 + $0x10] sm:$0xff]  }
   0x2   :  { %7 = vst [vmem:[%s225_s1] sm:$0xff] %v126_v0   ;;  %v131_v3 = vld [vmem:[%s224_s0 + $0x38] sm:$0xff]   ;;  %v133_v4 = vld [vmem:[%s224_s0 + $0x20] sm:$0xff]   ;;  %v135_v5 = vld [vmem:[%s224_s0 + $0x8] sm:$0xff]  }
   0x3   :  { %128 = vst [vmem:[%s225_s1 + $0x18] sm:$0xff] %v127_v1   ;;  %v137_v6 = vld [vmem:[%s224_s0 + $0x30] sm:$0xff]   ;;  %v139_v7 = vld [vmem:[%s224_s0 + $0x18] sm:$0xff]   ;;  %v57_v8 = vld [vmem:[%s224_s0] sm:$0xff]  }
   0x4   :  { %130 = vst [vmem:[%s225_s1 + $0x30] sm:$0xff] %v129_v2  }
   0x5   :  { %132 = vst [vmem:[%s225_s1 + $0x8] sm:$0xff] %v131_v3  }
   0x6   :  { %134 = vst [vmem:[%s225_s1 + $0x20] sm:$0xff] %v133_v4  }
   0x7   :  { %136 = vst [vmem:[%s225_s1 + $0x38] sm:$0xff] %v135_v5  }
   0x8   :  { %138 = vst [vmem:[%s225_s1 + $0x10] sm:$0xff] %v137_v6  }
   0x9   :  { %140 = vst [vmem:[%s225_s1 + $0x28] sm:$0xff] %v139_v7  }
   0xa   :  { %141 = vst [vmem:[%s225_s1 + $0x40] sm:$0xff] %v57_v8  }

// kernel: reverse.13
= control target key start
LH: loop header
LB: loop body
LE: loop exit
PB: predicated region body
PF: predicated region fallthrough
CT: control target
= control target key end

     0   :  { %s152_s0 = inlined_call_operand.vmem [shape: bf16[3,2,16,16], index: 0, kind: input, shape index: {}]   ;;  %s153_s1 = inlined_call_operand.vmem [shape: bf16[3,2,16,16], index: 1, kind: output, shape index: {}]  }
   0x1   :  { %v84_v0 = vld [vmem:[%s152_s0 + $0x28] sm:$0xff]   ;;  %v85_v1 = vld [vmem:[%s152_s0 + $0x18] sm:$0xff]   ;;  %v89_v3 = vld [vmem:[%s152_s0 + $0x20] sm:$0xff]  }
   0x2   :  { %v87_v2 = vld [vmem:[%s152_s0 + $0x8] sm:$0xff]   ;;  %7 = vst [vmem:[%s153_s1] sm:$0xff] %v84_v0   ;;  %v91_v4 = vld [vmem:[%s152_s0 + $0x10] sm:$0xff]   ;;  %v36_v5 = vld [vmem:[%s152_s0] sm:$0xff]  }
   0x3   :  { %86 = vst [vmem:[%s153_s1 + $0x10] sm:$0xff] %v85_v1  }
   0x4   :  { %88 = vst [vmem:[%s153_s1 + $0x20] sm:$0xff] %v87_v2  }
   0x5   :  { %90 = vst [vmem:[%s153_s1 + $0x8] sm:$0xff] %v89_v3  }
   0x6   :  { %92 = vst [vmem:[%s153_s1 + $0x18] sm:$0xff] %v91_v4  }
   0x7   :  { %93 = vst [vmem:[%s153_s1 + $0x28] sm:$0xff] %v36_v5  }

// kernel: improved_synthesis_forward.3
= control target key start
LH: loop header
LB: loop body
LE: loop exit
PB: predicated region body
PF: predicated region fallthrough
CT: control target
= control target key end

     0   :  { %s1950_s24 = smov 0   ;;  %s2546_s0 = inlined_call_operand.vmem [shape: bf16[2,8,8,16], index: 0, kind: input, shape index: {}]   ;;  %s2547_s1 = inlined_call_operand.vmem [shape: bf16[144,16], index: 1, kind: input, shape index: {}]   ;;  %s2548_s2 = inlined_call_operand.vmem [shape: f32[1,16], index: 2, kind: input, shape index: {}]   ;;  %s2549_s3 = inlined_call_operand.vmem [shape: f32[1,16], index: 3, kind: input, shape index: {}]   ;;  %s2550_s4 = inlined_call_operand.vmem [shape: f32[1,16], index: 4, kind: input, shape index: {}]   ;;  %s2551_s5 = inlined_call_operand.vmem [shape: bf16[16,8], index: 5, kind: input, shape index: {}]   ;;  %s2552_s6 = inlined_call_operand.vmem [shape: bf16[2,8,8,16], index: 6, kind: output, shape index: {0}]   ;;  %s2553_s7 = inlined_call_operand.vmem [shape: bf16[2,8,8,8], index: 7, kind: output, shape index: {1}]  }
   0x1 LB: > { %s1758_s25 = sadd.s32 4294967295, %s1893_s24   ;;  %p1762_p0 = scmp.ge.s32.totalorder %s1893_s24, 1  ;;  %s1893_s24 = sphi %s1950_s24, %s18_s24  }
   0x2   : > { %p240_p1 = scmp.lt.s32.totalorder %s1893_s24, 3 }
   0x4   : > { %p241_p2 = pnand %p1762_p0, %p240_p1 }
   0x5   : > { %p277_p3 = scmp.lt.s32.totalorder (!%p241_p2), %s1758_s25, 1  ;;  %s1896_s30 = smov (!%p241_p2), 96  }
   0x6   : > { %244 = sbr.rel (%p241_p2) target bundleno = 1180 (0x49c), region = 44  ;;  %s1897_s8 = smov (!%p241_p2), 80  }
   0x7   : > { %s1898_s9 = smov (!%p241_p2), 48   ;;  %s1899_s10 = smov (!%p241_p2), 32  }
   0x8   : > { %s1900_s11 = smov (!%p241_p2), 16   ;;  %s1901_s12 = smov (!%p241_p2), 64  }
   0x9   : > { %s1902_s13 = smov (!%p241_p2), 112   ;;  %s1907_s18 = smov (!%p241_p2), 124  }
   0xa   : > { %s1908_s19 = smov (!%p241_p2), 114   ;;  %s1909_s20 = smov (!%p241_p2), 116  }
   0xb   : > { %vm301_vm0 = vcmask 125952   ;;  %vm303_vm1 = vcmask 122880   ;;  %v1895_v0 = vmov 0   ;;  %s2559_s25 = smov (!%p277_p3, %s1758_s25), 1  ;;  %vm405_vm2 = vsmask.f32 7938 }
   0xc   : > { %311 = vst.msk [vmem:[#allocation2 + $0x20] sm:$0xf] %vm301_vm0, %v1895_v0  ;;  %s1964_s26 = sshll.u32 %s2559_s25, 5  ;;  %vm411_vm3 = vsmask.f32 256  ;;  %vm1986_vm4 = vmand %vm301_vm0, %vm405_vm2  ;;  %vm1043_vm6 = vcmask 130048  }
   0xd   : > { %312 = vst.msk [vmem:[#allocation2 + $0x24] sm:$0x1] %vm303_vm1, %v1895_v0  ;;  %s1972_s29 = scalar_lea.vmem %s2546_s0, %s1964_s26  ;;  %vm1994_vm5 = vmand %vm303_vm1, %vm411_vm3  ;;  %vm1068_vm7 = vcmask 261120   ;;  %vm1085_vm8 = vcmask 392192   ;;  %vm1102_vm9 = vcmask 523264   ;;  %vm1119_vm10 = vcmask 654336   ;;  %s2494_s25 = scalar_lea.vmem %s2553_s7, %s1964_s26 }
   0xe   : > { %302 = vst.msk [vmem:[#allocation2] sm:$0xf] %vm301_vm0, %v1895_v0  ;;  %v296_v1 = vld [vmem:[%s1972_s29 + $0xc] sm:$0xf]  ;;  %v294_v2 = vld [vmem:[%s1972_s29 + $0x4] sm:$0xf]  ;;  %s286_s17 = scalar_lea.vmem %s2552_s6, %s1964_s26 }
   0xf   : > { %304 = vst.msk [vmem:[#allocation2 + $0x4] sm:$0x1] %vm303_vm1, %v1895_v0  ;;  %v348_v3 = vshrl.u32 %v296_v1, 16  ;;  %v351_v4 = vshll.u32 %v296_v1, 16  ;;  %v332_v5 = vshrl.u32 %v294_v2, 16  ;;  %v335_v17 = vshll.u32 %v294_v2, 16 }
  0x10   : > { %305 = vst.msk [vmem:[#allocation2 + $0x8] sm:$0xf] %vm301_vm0, %v1895_v0  ;;  %v295_v7 = vld [vmem:[%s1972_s29 + $0x8] sm:$0xf]  ;;  %v297_v13 = vld [vmem:[%s1972_s29 + $0x10] sm:$0xf] }
  0x11   : > { %306 = vst.msk [vmem:[#allocation2 + $0xc] sm:$0x1] %vm303_vm1, %v1895_v0  ;;  %v350_v8 = vrot.slane %v348_v3, 7  ;;  %v340_v12 = vshrl.u32 %v295_v7, 16  ;;  %v334_v16 = vrot.slane %v332_v5, 7  ;;  %v356_v18 = vshrl.u32 %v297_v13, 16 }
  0x12   : > { %307 = vst.msk [vmem:[#allocation2 + $0x10] sm:$0xf] %vm301_vm0, %v1895_v0  ;;  %v343_v22 = vshll.u32 %v295_v7, 16  ;;  %v359_v25 = vshll.u32 %v297_v13, 16  ;;  %v298_v7 = vld [vmem:[%s1972_s29 + $0x14] sm:$0xf] }
  0x13   : > { %v428_v6 = vld [vmem:[#allocation2 + $0x20] sm:$0xf]  ;;  %308 = vst.msk [vmem:[#allocation2 + $0x14] sm:$0x1] %vm303_vm1, %v1895_v0  ;;  %v353_v14 = vor.u32 %v351_v4, %v350_v8  ;;  %v354_v15 = vrot.slane %v350_v8, 4  ;;  %v342_v21 = vrot.slane %v340_v12, 7  ;;  %v337_v24 = vor.u32 %v335_v17, %v334_v16 }
  0x14   : > { %v431_v10 = vld [vmem:[#allocation2 + $0x24] sm:$0x1]  ;;  %309 = vst.msk [vmem:[#allocation2 + $0x18] sm:$0xf] %vm301_vm0, %v1895_v0  ;;  %v358_v23 = vrot.slane %v356_v18, 7  ;;  %v338_v26 = vrot.slane %v334_v16, 4 }
  0x15   : > { %310 = vst.msk [vmem:[#allocation2 + $0x1c] sm:$0x1] %vm303_vm1, %v1895_v0  ;;  %v429_v19 = vsel %vm1986_vm4, %v353_v14, %v428_v6  ;;  %v432_v20 = vsel %vm1994_vm5, %v354_v15, %v431_v10  ;;  %v345_v29 = vor.u32 %v343_v22, %v342_v21  ;;  %v346_v30 = vrot.slane %v342_v21, 4 }
  0x16   : > { %313 = vst.msk [vmem:[#allocation2 + $0x28] sm:$0xf] %vm301_vm0, %v1895_v0  ;;  %v362_v32 = vrot.slane %v358_v23, 4  ;;  %v361_v35 = vor.u32 %v359_v25, %v358_v23  ;;  %v364_v17 = vshrl.u32 %v298_v7, 16  ;;  %vm1136_vm11 = vcmask 785408  }
  0x17   : > { %314 = vst.msk [vmem:[#allocation2 + $0x2c] sm:$0x1] %vm303_vm1, %v1895_v0  ;;  %vm1153_vm12 = vcmask 916480   ;;  %vm1373_vm13 = vcmask 15360   ;;  %vm1421_vm14 = vcmask 31744   ;;  %vm1423_vm15 = vcmask 48128  }
  0x18   : > { %315 = vst.msk [vmem:[#allocation2 + $0x30] sm:$0xf] %vm301_vm0, %v1895_v0  ;;  %vm1427_vm2 = vcmask 80896   ;;  %vm1429_vm3 = vcmask 97280  }
  0x19   : > { %430 = vst [vmem:[#allocation2 + $0x20] sm:$0xf] %v429_v19  ;;  %v416_v27 = vld [vmem:[#allocation2 + $0x10] sm:$0xf] }
  0x1a   : > { %433 = vst [vmem:[#allocation2 + $0x24] sm:$0x1] %v432_v20  ;;  %v419_v28 = vld [vmem:[#allocation2 + $0x14] sm:$0x1]  ;;  %v417_v33 = vsel %vm1986_vm4, %v337_v24, %v416_v27 }
  0x1b   : > { %316 = vst.msk [vmem:[#allocation2 + $0x34] sm:$0x1] %vm303_vm1, %v1895_v0  ;;  %v422_v31 = vld [vmem:[#allocation2 + $0x18] sm:$0xf]  ;;  %v420_v39 = vsel %vm1994_vm5, %v338_v26, %v419_v28 }
  0x1c   : > { %317 = vst.msk [vmem:[#allocation2 + $0x38] sm:$0xf] %vm301_vm0, %v1895_v0  ;;  %v425_v34 = vld [vmem:[#allocation2 + $0x1c] sm:$0x1]  ;;  %v423_v43 = vsel %vm1986_vm4, %v345_v29, %v422_v31 }
  0x1d   : > { %318 = vst.msk [vmem:[#allocation2 + $0x3c] sm:$0x1] %vm303_vm1, %v1895_v0  ;;  %v434_v36 = vld [vmem:[#allocation2 + $0x28] sm:$0xf]  ;;  %v426_v46 = vsel %vm1994_vm5, %v346_v30, %v425_v34  ;;  %v366_v30 = vrot.slane %v364_v17, 7  ;;  %v367_v34 = vshll.u32 %v298_v7, 16 }
  0x1e   : > { %319 = vst.msk [vmem:[#allocation2 + $0x40] sm:$0xf] %vm301_vm0, %v1895_v0  ;;  %v437_v44 = vld [vmem:[#allocation2 + $0x2c] sm:$0x1]  ;;  %v435_v48 = vsel %vm1986_vm4, %v361_v35, %v434_v36 }
  0x1f   : > { %320 = vst.msk [vmem:[#allocation2 + $0x44] sm:$0x1] %vm303_vm1, %v1895_v0  ;;  %v438_v50 = vsel %vm1994_vm5, %v362_v32, %v437_v44  ;;  %v440_v35 = vld [vmem:[#allocation2 + $0x30] sm:$0xf] }
  0x20   : > { %v509_v37 = vld [vmem:[#allocation2 + $0x20] sm:$0xf]  ;;  %321 = vst.msk [vmem:[#allocation2 + $0x48] sm:$0xf] %vm301_vm0, %v1895_v0 }
  0x21   : > { %v501_v38 = vld [vmem:[#allocation2 + $0x20] sm:$0xe]  ;;  %v2027_v40 = vunpack.c.l.b16 %v509_v37  ;;  %322 = vst.msk [vmem:[#allocation2 + $0x4c] sm:$0x1] %vm303_vm1, %v1895_v0  ;;  %v493_v41 = vld [vmem:[#allocation2 + $0x24] sm:$0x1]  ;;  %v369_v37 = vor.u32 %v367_v34, %v366_v30 }
  0x22   : > { %v838_v42 = vunpack.c.l.b16 %v501_v38  ;;  %v742_v45 = vunpack.c.l.b16 %v493_v41  ;;  %418 = vst [vmem:[#allocation2 + $0x10] sm:$0xf] %v417_v33  ;;  %v485_v52 = vld [vmem:[#allocation2 + $0x20] sm:$0xf]  ;;  %v2057_v26 = vld [vmem:[#allocation2 + $0x24] sm:$0x1] }
  0x23   : > { %v893_v47 = vpack.c.b16 %v2027_v40, %v2027_v40  ;;  %421 = vst [vmem:[#allocation2 + $0x14] sm:$0x1] %v420_v39  ;;  %v702_v58 = vunpack.c.l.b16 %v485_v52  ;;  %v925_v36 = vunpack.c.l.b16 %v2057_v26  ;;  %v443_v38 = vld [vmem:[#allocation2 + $0x34] sm:$0x1]  ;;  %v299_v39 = vld [vmem:[%s1972_s29 + $0x18] sm:$0xf] }
  0x24   : > { %v846_v49 = vpack.c.b16 %v742_v45, %v838_v42  ;;  %424 = vst [vmem:[#allocation2 + $0x18] sm:$0xf] %v423_v43  ;;  %v370_v43 = vrot.slane %v366_v30, 4  ;;  %v372_v44 = vshrl.u32 %v299_v39, 16  ;;  %v293_v30 = vld [vmem:[%s1972_s29] sm:$0xf] }
  0x25   : > { %903 = vrot.lane.b32.xlu1 %v893_v47, %s1896_s30  ;;  %427 = vst [vmem:[#allocation2 + $0x1c] sm:$0x1] %v426_v46  ;;  %v750_v10 = vpack.c.b16 %v742_v45, %v702_v58  ;;  %v710_v25 = vpack.c.b16 %v702_v58, %v702_v58  ;;  %vm1425_vm1 = vcmask 64512  }
  0x26   : > { %v854_v51 = vrot.slane %v846_v49, 1  ;;  %436 = vst [vmem:[#allocation2 + $0x28] sm:$0xf] %v435_v48  ;;  %v441_v49 = vsel %vm1986_vm4, %v369_v37, %v440_v35  ;;  %v374_v52 = vrot.slane %v372_v44, 7 }
  0x27   : > { %439 = vst [vmem:[#allocation2 + $0x2c] sm:$0x1] %v438_v50  ;;  %v779_v24 = vshll.u32 %v750_v10, 16  ;;  %v777_v41 = vshrl.u32 %v750_v10, 16  ;;  %v2071_v50 = vld [vmem:[#allocation2 + $0x20] sm:$0xf] }
  0x28   : > { %865 = vrot.lane.b32.xlu0 %v854_v51, %s1897_s8  ;;  %442 = vst [vmem:[#allocation2 + $0x30] sm:$0xf] %v441_v49  ;;  %v444_v51 = vsel %vm1994_vm5, %v370_v43, %v443_v38 }
  0x29   : > { %v476_v53 = vld [vmem:[#allocation2 + $0x10] sm:$0xe]  ;;  %v781_v42 = vrot.slane %v779_v24, 1  ;;  %445 = vst [vmem:[#allocation2 + $0x34] sm:$0x1] %v444_v51 }
  0x2a   : > { %v2043_v54 = vld [vmem:[#allocation2 + $0x10] sm:$0xf]  ;;  %v468_v55 = vld [vmem:[#allocation2 + $0x14] sm:$0x1]  ;;  %v653_v56 = vunpack.c.l.b16 %v476_v53  ;;  %v933_v53 = vpack.c.b16 %v925_v36, %v2027_v40 }
  0x2b   : > { %v551_v57 = vunpack.c.l.b16 %v2043_v54  ;;  %v552_v59 = vunpack.c.l.b16 %v468_v55  ;;  %v477_v60 = vld [vmem:[#allocation2 + $0x18] sm:$0xe]  ;;  %v470_v55 = vld [vmem:[#allocation2 + $0x24] sm:$0x1] }
  0x2c   : > { %v2046_v61 = vld [vmem:[#allocation2 + $0x18] sm:$0xf]  ;;  %v469_v63 = vld [vmem:[#allocation2 + $0x1c] sm:$0x1]  ;;  %v654_v5 = vunpack.c.l.b16 %v477_v60  ;;  %v956_v40 = vshll.u32 %v933_v53, 16 }
  0x2d   : > { %v484_v62 = vld [vmem:[#allocation2 + $0x18] sm:$0xf]  ;;  %v553_v0 = vunpack.c.l.b16 %v2046_v61  ;;  %v661_v2 = vpack.c.b16 %v552_v59, %v653_v56  ;;  %v565_v3 = vpack.c.b16 %v552_v59, %v551_v57  ;;  %v554_v4 = vunpack.c.l.b16 %v469_v63  ;;  %v2049_v6 = vld [vmem:[#allocation2 + $0x1c] sm:$0x1]  ;;  %v510_v20 = vld [vmem:[#allocation2 + $0x28] sm:$0xf] }
  0x2e   : > { %v701_v1 = vunpack.c.l.b16 %v484_v62  ;;  %v741_v16 = vunpack.c.l.b16 %v2049_v6  ;;  %v2055_v21 = vld [vmem:[#allocation2 + $0x2c] sm:$0x1]  ;;  %v886_v28 = vunpack.c.l.b16 %v510_v20  ;;  %v500_v48 = vld [vmem:[#allocation2 + $0x18] sm:$0xe]  ;;  %v375_v56 = vshll.u32 %v299_v39, 16 }
  0x2f   : > { %v669_v12 = vrot.slane %v661_v2, 1  ;;  %v586_v13 = vshrl.u32 %v565_v3, 16  ;;  %v588_v14 = vshll.u32 %v565_v3, 16  ;;  %v566_v15 = vpack.c.b16 %v554_v4, %v553_v0  ;;  %v2078_v59 = vld [vmem:[#allocation2 + $0x28] sm:$0xf] }
  0x30   : > { %v709_v8 = vpack.c.b16 %v701_v1, %v701_v1  ;;  %v662_v19 = vpack.c.b16 %v554_v4, %v654_v5  ;;  %v749_v27 = vpack.c.b16 %v741_v16, %v701_v1  ;;  %v926_v29 = vunpack.c.l.b16 %v2055_v21  ;;  %v446_v3 = vld [vmem:[#allocation2 + $0x38] sm:$0xf]  ;;  %v471_v5 = vld [vmem:[#allocation2 + $0x2c] sm:$0x1]  ;;  %v478_v20 = vld [vmem:[#allocation2 + $0x20] sm:$0xe] }
  0x31   : > { %679 = vrot.lane.b32.xlu1 %v669_v12, %s1899_s10  ;;  %v590_v18 = vrot.slane %v588_v14, 1  ;;  %v595_v22 = vshll.u32 %v566_v15, 16  ;;  %v593_v32 = vshrl.u32 %v566_v15, 16  ;;  %v782_v57 = vor.u32 %v781_v42, %v777_v41  ;;  %v479_v39 = vld [vmem:[#allocation2 + $0x28] sm:$0xe] }
  0x32   : > { %719 = vrot.lane.b32.xlu2 %v709_v8, %s1898_s9  ;;  %v670_v31 = vrot.slane %v662_v19, 1  ;;  %v772_v46 = vshll.u32 %v749_v27, 16  ;;  %v934_v47 = vpack.c.b16 %v926_v29, %v886_v28  ;;  %v894_v58 = vpack.c.b16 %v886_v28, %v886_v28  ;;  %v449_v19 = vld [vmem:[#allocation2 + $0x3c] sm:$0x1]  ;;  %v486_v42 = vld [vmem:[#allocation2 + $0x28] sm:$0xf] }
  0x33   : > { %v591_v23 = vor.u32 %v590_v18, %v586_v13  ;;  %v597_v33 = vrot.slane %v595_v22, 1  ;;  %v837_v60 = vunpack.c.l.b16 %v500_v48  ;;  %v555_v62 = vunpack.c.l.b16 %v2071_v50  ;;  %v494_v43 = vld [vmem:[#allocation2 + $0x2c] sm:$0x1]  ;;  %v508_v9 = vld [vmem:[#allocation2 + $0x18] sm:$0xf] }
  0x34   : > { %v770_v63 = vshrl.u32 %v749_v27, 16  ;;  %v774_v0 = vrot.slane %v772_v46, 1  ;;  %v963_v1 = vshll.u32 %v934_v47, 16  ;;  %v377_v2 = vor.u32 %v375_v56, %v374_v52  ;;  %v413_v46 = vld [vmem:[#allocation2 + $0xc] sm:$0x1] }
  0x35   : > { %631 = vrot.lane.b32.xlu0 %v591_v23, %s1900_s11  ;;  %v598_v45 = vor.u32 %v597_v33, %v593_v32  ;;  %v556_v4 = vunpack.c.l.b16 %v470_v55  ;;  %v557_v8 = vunpack.c.l.b16 %v2078_v59  ;;  %v845_v10 = vpack.c.b16 %v741_v16, %v837_v60  ;;  %v487_v56 = vld [vmem:[#allocation2 + $0x30] sm:$0xf]  ;;  %v495_v60 = vld [vmem:[#allocation2 + $0x34] sm:$0x1] }
  0x36   : > { %v447_v7 = vsel %vm1986_vm4, %v377_v2, %v446_v3  ;;  %v378_v13 = vrot.slane %v374_v52, 4  ;;  %v775_v14 = vor.u32 %v774_v0, %v770_v63  ;;  %v961_v15 = vshrl.u32 %v934_v47, 16  ;;  %v502_v3 = vld [vmem:[#allocation2 + $0x28] sm:$0xe] }
  0x37   : > { %v567_v12 = vpack.c.b16 %v556_v4, %v555_v62  ;;  %448 = vst [vmem:[#allocation2 + $0x38] sm:$0xf] %v447_v7  ;;  %v965_v17 = vrot.slane %v963_v1, 1  ;;  %v558_v18 = vunpack.c.l.b16 %v471_v5  ;;  %v954_v23 = vshrl.u32 %v933_v53, 16 }
  0x38   : > { %v450_v22 = vsel %vm1994_vm5, %v378_v13, %v449_v19  ;;  %v853_v6 = vrot.slane %v845_v10, 1  ;;  %v655_v27 = vunpack.c.l.b16 %v478_v20  ;;  %v327_v41 = vshll.u32 %v293_v30, 16  ;;  %v2105_v19 = vld [vmem:[#allocation2 + $0x34] sm:$0x1]  ;;  %v2107_v20 = vld [vmem:[#allocation2] sm:$0xf] }
  0x39   : > { %681 = vrot.lane.b32.xlu1 %v670_v31, %s1899_s10  ;;  %451 = vst [vmem:[#allocation2 + $0x3c] sm:$0x1] %v450_v22  ;;  %v602_v16 = vshll.u32 %v567_v12, 16  ;;  %v966_v24 = vor.u32 %v965_v17, %v961_v15  ;;  %v568_v28 = vpack.c.b16 %v558_v18, %v557_v8  ;;  %v324_v31 = vshrl.u32 %v293_v30, 16  ;;  %v2109_v22 = vld [vmem:[#allocation2 + $0x4] sm:$0x1] }
  0x3a   : > { %721 = vrot.lane.b32.xlu2 %v710_v25, %s1898_s9  ;;  %v958_v25 = vrot.slane %v956_v40, 1  ;;  %v600_v32 = vshrl.u32 %v567_v12, 16  ;;  %v663_v37 = vpack.c.b16 %v556_v4, %v655_v27  ;;  %v656_v48 = vunpack.c.l.b16 %v479_v39 }
  0x3b   : > { %v604_v33 = vrot.slane %v602_v16, 1  ;;  %v326_v34 = vrot.slane %v324_v31, 7  ;;  %v609_v38 = vshll.u32 %v568_v28, 16  ;;  %v607_v52 = vshrl.u32 %v568_v28, 16 }
  0x3c   : > { %v959_v35 = vor.u32 %v958_v25, %v954_v23  ;;  %v671_v51 = vrot.slane %v663_v37, 1  ;;  %v664_v63 = vpack.c.b16 %v558_v18, %v656_v48  ;;  %v704_v2 = vunpack.c.l.b16 %v487_v56  ;;  %v503_v18 = vld [vmem:[#allocation2 + $0x30] sm:$0xe] }
  0x3d   : > { %633 = vrot.lane.b32.xlu0 %v598_v45, %s1900_s11  ;;  %v329_v44 = vor.u32 %v327_v41, %v326_v34  ;;  %v407_v45 = vld [vmem:[#allocation2 + $0x8] sm:$0xf]  ;;  %v605_v47 = vor.u32 %v604_v33, %v600_v32  ;;  %v330_v49 = vrot.slane %v326_v34, 4  ;;  %v611_v53 = vrot.slane %v609_v38, 1  ;;  %v511_v23 = vld [vmem:[#allocation2 + $0x30] sm:$0xf] }
  0x3e   : > { %v744_v4 = vunpack.c.l.b16 %v495_v60  ;;  %v839_v5 = vunpack.c.l.b16 %v502_v3  ;;  %v672_v40 = vrot.slane %v664_v63, 1  ;;  %v712_v8 = vpack.c.b16 %v704_v2, %v704_v2  ;;  %v512_v33 = vld [vmem:[#allocation2 + $0x38] sm:$0xf] }
  0x3f   : > { %v408_v55 = vsel %vm1986_vm4, %v329_v44, %v407_v45  ;;  %v414_v62 = vsel %vm1994_vm5, %v330_v49, %v413_v46  ;;  %v612_v1 = vor.u32 %v611_v53, %v607_v52  ;;  %v927_v25 = vunpack.c.l.b16 %v2105_v19 }
  0x40   : > { %409 = vst [vmem:[#allocation2 + $0x8] sm:$0xf] %v408_v55  ;;  %v752_v10 = vpack.c.b16 %v744_v4, %v704_v2  ;;  %v547_v30 = vunpack.c.l.b16 %v2107_v20  ;;  %v548_v31 = vunpack.c.l.b16 %v2109_v22  ;;  %v2115_v32 = vld [vmem:[#allocation2 + $0x3c] sm:$0x1]  ;;  %v887_v34 = vunpack.c.l.b16 %v511_v23 }
  0x41   : > { %817 = vrot.lane.b32.xlu1 %v782_v57, %s1901_s12  ;;  %v703_v57 = vunpack.c.l.b16 %v486_v42  ;;  %415 = vst [vmem:[#allocation2 + $0xc] sm:$0x1] %v414_v62  ;;  %v888_v41 = vunpack.c.l.b16 %v512_v33  ;;  %v300_v23 = vld [vmem:[%s1972_s29 + $0x1c] sm:$0xf] }
  0x42   : > { %905 = vrot.lane.b32.xlu2 %v894_v58, %s1896_s30  ;;  %v743_v58 = vunpack.c.l.b16 %v494_v43  ;;  %v793_v17 = vshll.u32 %v752_v10, 16  ;;  %v791_v27 = vshrl.u32 %v752_v10, 16  ;;  %v935_v38 = vpack.c.b16 %v927_v25, %v887_v34 }
  0x43   : > { %v711_v15 = vpack.c.b16 %v703_v57, %v703_v57  ;;  %v563_v42 = vpack.c.b16 %v548_v31, %v547_v30  ;;  %v896_v49 = vpack.c.b16 %v888_v41, %v888_v41 }
  0x44   : > { %v751_v0 = vpack.c.b16 %v743_v58, %v703_v57  ;;  %v847_v12 = vpack.c.b16 %v743_v58, %v839_v5  ;;  %v795_v28 = vrot.slane %v793_v17, 1  ;;  %v968_v55 = vshrl.u32 %v935_v38, 16 }
  0x45   : > { %815 = vrot.lane.b32.xlu0 %v775_v14, %s1901_s12  ;;  %v895_v58 = vpack.c.b16 %v887_v34, %v887_v34  ;;  %v572_v60 = vshrl.u32 %v563_v42, 16 }
  0x46   : > { %v786_v7 = vshll.u32 %v751_v0, 16  ;;  %v784_v13 = vshrl.u32 %v751_v0, 16  ;;  %v796_v39 = vor.u32 %v795_v28, %v791_v27  ;;  %v380_v27 = vshrl.u32 %v300_v23, 16 }
  0x47   : > { %v2122_v43 = vld [vmem:[#allocation2 + $0x8] sm:$0xf]  ;;  %v383_v28 = vshll.u32 %v300_v23, 16  ;;  %v1849_v23 = vld [vmem:[%s2547_s1 + $0x38] sm:$0xff] }
  0x48   : > { %v788_v14 = vrot.slane %v786_v7, 1  ;;  %v467_v44 = vld [vmem:[#allocation2 + $0xc] sm:$0x1]  ;;  %v549_v48 = vunpack.c.l.b16 %v2122_v43  ;;  %v475_v63 = vld [vmem:[#allocation2 + $0x8] sm:$0xe]  ;;  %1852 = vmatpush.bf16.msra.mxu3 %v1849_v23  ;;  %1294 = vmatpush.bf16.msra.mxu0 %v1849_v23 }
  0x49   : > { %1001 = vrot.lane.b32.xlu1 %v966_v24, %s1902_s13  ;;  %v840_v24 = vunpack.c.l.b16 %v503_v18  ;;  %v550_v52 = vunpack.c.l.b16 %v467_v44  ;;  %v482_v0 = vld [vmem:[#allocation2 + $0x8] sm:$0xf]  ;;  %v652_v7 = vunpack.c.l.b16 %v475_v63 }
  0x4a   : > { %863 = vrot.lane.b32.xlu2 %v853_v6, %s1897_s8  ;;  %v855_v6 = vrot.slane %v847_v12, 1  ;;  %v789_v16 = vor.u32 %v788_v14, %v784_v13  ;;  %v474_v12 = vld [vmem:[#allocation2] sm:$0xe] }
  0x4b   : > { %v848_v37 = vpack.c.b16 %v744_v4, %v840_v24  ;;  %v564_v57 = vpack.c.b16 %v550_v52, %v549_v48  ;;  %v660_v17 = vpack.c.b16 %v550_v52, %v652_v7  ;;  %v651_v18 = vunpack.c.l.b16 %v474_v12  ;;  %v2142_v52 = vld [vmem:[#allocation2 + $0x30] sm:$0xf]  ;;  %v2157_v7 = vld [vmem:[#allocation2 + $0x1c] sm:$0x1]  ;;  %v2161_v12 = vld [vmem:[#allocation2 + $0x38] sm:$0xf] }
  0x4d   : > { %999 = vrot.lane.b32.xlu0 %v959_v35, %s1902_s13  ;;  %v928_v35 = vunpack.c.l.b16 %v2115_v32  ;;  %v856_v46 = vrot.slane %v848_v37, 1  ;;  %v581_v5 = vshll.u32 %v564_v57, 16  ;;  %v579_v13 = vshrl.u32 %v564_v57, 16 }
  0x4e   : > { %v668_v30 = vrot.slane %v660_v17, 1  ;;  %v659_v33 = vpack.c.b16 %v548_v31, %v651_v18  ;;  %v2144_v31 = vld [vmem:[#allocation2 + $0x34] sm:$0x1]  ;;  %v507_v17 = vld [vmem:[#allocation2 + $0x10] sm:$0xf] }
  0x4f   : > { %v936_v45 = vpack.c.b16 %v928_v35, %v888_v41  ;;  %v583_v14 = vrot.slane %v581_v5, 1  ;;  %v452_v41 = vld [vmem:[#allocation2 + $0x40] sm:$0xf]  ;;  %v560_v63 = vunpack.c.l.b16 %v2144_v31  ;;  %v515_v18 = vld [vmem:[#allocation2 + $0x14] sm:$0x1] }
  0x51   : > { %683 = vrot.lane.b32.xlu1 %v671_v51, %s1899_s10  ;;  %v574_v51 = vshll.u32 %v563_v42, 16  ;;  %v977_v53 = vshll.u32 %v936_v45, 16  ;;  %v975_v2 = vshrl.u32 %v936_v45, 16  ;;  %v584_v24 = vor.u32 %v583_v14, %v579_v13  ;;  %v455_v42 = vld [vmem:[#allocation2 + $0x44] sm:$0x1] }
  0x52   : > { %635 = vrot.lane.b32.xlu2 %v605_v47, %s1900_s11  ;;  %v970_v47 = vshll.u32 %v935_v38, 16  ;;  %v884_v13 = vunpack.c.l.b16 %v508_v9  ;;  %v523_v9 = vld [vmem:[#allocation2 + $0x10] sm:$0xe] }
  0x53   : > { %v576_v62 = vrot.slane %v574_v51, 1  ;;  %v979_v3 = vrot.slane %v977_v53, 1  ;;  %v499_v51 = vld [vmem:[#allocation2 + $0x10] sm:$0xe] }
  0x54   : > { %v972_v56 = vrot.slane %v970_v47, 1  ;;  %v667_v47 = vrot.slane %v659_v33, 1 }
  0x55   : > { %637 = vrot.lane.b32.xlu0 %v612_v1, %s1900_s11  ;;  %v2130_v1 = vld [vmem:[#allocation2 + $0xc] sm:$0x1] }
  0x56   : > { %v973_v4 = vor.u32 %v972_v56, %v968_v55  ;;  %v739_v10 = vunpack.c.l.b16 %v2130_v1 }
  0x59   : > { %725 = vrot.lane.b32.xlu1 %v712_v8, %s1898_s9  ;;  %v699_v8 = vunpack.c.l.b16 %v482_v0  ;;  %v498_v0 = vld [vmem:[#allocation2 + $0x8] sm:$0xe] }
  0x5a   : > { %685 = vrot.lane.b32.xlu2 %v672_v40, %s1899_s10  ;;  %v577_v40 = vor.u32 %v576_v62, %v572_v60  ;;  %v836_v60 = vunpack.c.l.b16 %v499_v51  ;;  %v559_v62 = vunpack.c.l.b16 %v2142_v52  ;;  %v835_v5 = vunpack.c.l.b16 %v498_v0 }
  0x5b   : > { %v747_v22 = vpack.c.b16 %v739_v10, %v699_v8  ;;  %v707_v56 = vpack.c.b16 %v699_v8, %v699_v8  ;;  %v2159_v8 = vld [vmem:[#allocation2 + $0x3c] sm:$0x1] }
  0x5d   : > { %723 = vrot.lane.b32.xlu0 %v711_v15, %s1898_s9  ;;  %v980_v15 = vor.u32 %v979_v3, %v975_v2  ;;  %v758_v34 = vshll.u32 %v747_v22, 16  ;;  %v756_v48 = vshrl.u32 %v747_v22, 16  ;;  %v562_v22 = vunpack.c.l.b16 %v2159_v8 }
  0x61   : > { %867 = vrot.lane.b32.xlu1 %v855_v6, %s1897_s8  ;;  %v483_v6 = vld [vmem:[#allocation2 + $0x10] sm:$0xf] }
  0x62   : > { %819 = vrot.lane.b32.xlu2 %v789_v16, %s1901_s12  ;;  %v491_v16 = vld [vmem:[#allocation2 + $0x14] sm:$0x1]  ;;  %v700_v37 = vunpack.c.l.b16 %v483_v6  ;;  %v561_v6 = vunpack.c.l.b16 %v2161_v12 }
  0x63   : > { %v740_v38 = vunpack.c.l.b16 %v491_v16 }
  0x64   : > { %v708_v11 = vpack.c.b16 %v700_v37, %v700_v37 }
  0x65   : > { %821 = vrot.lane.b32.xlu0 %v796_v39, %s1901_s12  ;;  %v382_v39 = vrot.slane %v380_v27, 7  ;;  %v748_v44 = vpack.c.b16 %v740_v38, %v700_v37  ;;  %v1848_v37 = vld [vmem:[%s2547_s1 + $0x30] sm:$0xff] }
  0x66   : > { %1853 = vmatpush.bf16.msra.mxu3 %v1848_v37  ;;  %1295 = vmatpush.bf16.msra.mxu0 %v1848_v37 }
  0x67   : > { %v385_v45 = vor.u32 %v383_v28, %v382_v39  ;;  %v765_v57 = vshll.u32 %v748_v44, 16  ;;  %v763_v2 = vshrl.u32 %v748_v44, 16  ;;  %v883_v28 = vunpack.c.l.b16 %v507_v17 }
  0x69   : > { %909 = vrot.lane.b32.xlu1 %v896_v49, %s1896_s30  ;;  %v760_v49 = vrot.slane %v758_v34, 1  ;;  %v453_v53 = vsel %vm1986_vm4, %v385_v45, %v452_v41  ;;  %v767_v3 = vrot.slane %v765_v57, 1  ;;  %v570_v34 = vpack.c.b16 %v562_v22, %v561_v6  ;;  %v2203_v6 = vld [vmem:[#allocation2 + $0x3c] sm:$0x1] }
  0x6a   : > { %869 = vrot.lane.b32.xlu2 %v856_v46, %s1897_s8  ;;  %v386_v46 = vrot.slane %v382_v39, 4  ;;  %454 = vst [vmem:[#allocation2 + $0x40] sm:$0xf] %v453_v53  ;;  %v891_v44 = vpack.c.b16 %v883_v28, %v883_v28  ;;  %v892_v57 = vpack.c.b16 %v884_v13, %v884_v13  ;;  %vm1431_vm4 = vcmask 113664  }
  0x6b   : > { %v768_v14 = vor.u32 %v767_v3, %v763_v2  ;;  %v623_v45 = vshll.u32 %v570_v34, 16  ;;  %v621_v53 = vshrl.u32 %v570_v34, 16  ;;  %v524_v2 = vld [vmem:[#allocation2 + $0x18] sm:$0xe] }
  0x6c   : > { %v456_v55 = vsel %vm1994_vm5, %v386_v46, %v455_v42  ;;  %v1847_v46 = vld [vmem:[%s2547_s1 + $0x28] sm:$0xff]  ;;  %vm1661_vm5 = vcmask 60416  }
  0x6d   : > { %907 = vrot.lane.b32.xlu0 %v895_v58, %s1896_s30  ;;  %457 = vst [vmem:[#allocation2 + $0x44] sm:$0x1] %v456_v55  ;;  %v761_v58 = vor.u32 %v760_v49, %v756_v48  ;;  %1854 = vmatpush.bf16.msra.mxu3 %v1847_v46  ;;  %v625_v55 = vrot.slane %v623_v45, 1 }
  0x6e   : > { %1296 = vmatpush.bf16.msra.mxu0 %v1847_v46 }
  0x71   : > { %627 = vrot.lane.b32.xlu1 %v577_v40, %s1900_s11  ;;  %v569_v40 = vpack.c.b16 %v560_v63, %v559_v62  ;;  %v480_v62 = vld [vmem:[#allocation2 + $0x30] sm:$0xe] }
  0x72   : > { %1003 = vrot.lane.b32.xlu2 %v973_v4, %s1902_s13  ;;  %v844_v4 = vpack.c.b16 %v740_v38, %v836_v60 }
  0x73   : > { %v616_v27 = vshll.u32 %v569_v40, 16 }
  0x74   : > { %v852_v16 = vrot.slane %v844_v4, 1  ;;  %v2192_v60 = vld [vmem:[#allocation2 + $0x44] sm:$0x1]  ;;  %v1019_v4 = vunpack.c.l.b16 %v523_v9 }
  0x75   : > { %1005 = vrot.lane.b32.xlu0 %v980_v15, %s1902_s13  ;;  %v924_v15 = vunpack.c.l.b16 %v2157_v7  ;;  %v618_v38 = vrot.slane %v616_v27, 1  ;;  %v746_v17 = vunpack.c.l.b16 %v2192_v60  ;;  %v488_v27 = vld [vmem:[#allocation2 + $0x38] sm:$0xf]  ;;  %v1844_v7 = vld [vmem:[%s2547_s1 + $0x10] sm:$0xff] }
  0x77   : > { %v932_v33 = vpack.c.b16 %v924_v15, %v884_v13  ;;  %v657_v13 = vunpack.c.l.b16 %v480_v62  ;;  %v1842_v62 = vld [vmem:[%s2547_s1] sm:$0xff] }
  0x79   : > { %677 = vrot.lane.b32.xlu1 %v668_v30, %s1899_s10  ;;  %v923_v30 = vunpack.c.l.b16 %v515_v18  ;;  %v949_v42 = vshll.u32 %v932_v33, 16  ;;  %v947_v49 = vshrl.u32 %v932_v33, 16  ;;  %v1845_v18 = vld [vmem:[%s2547_s1 + $0x18] sm:$0xff] }
  0x7a   : > { %629 = vrot.lane.b32.xlu2 %v584_v24, %s1900_s11  ;;  %v843_v24 = vpack.c.b16 %v739_v10, %v835_v5  ;;  %v614_v10 = vshrl.u32 %v569_v40, 16  ;;  %v1020_v5 = vunpack.c.l.b16 %v524_v2  ;;  %v626_v40 = vor.u32 %v625_v55, %v621_v53  ;;  %v514_v2 = vld [vmem:[#allocation2 + $0x48] sm:$0xf] }
  0x7b   : > { %v931_v41 = vpack.c.b16 %v923_v30, %v883_v28  ;;  %v951_v51 = vrot.slane %v949_v42, 1  ;;  %v481_v28 = vld [vmem:[#allocation2 + $0x38] sm:$0xe] }
  0x7c   : > { %v851_v1 = vrot.slane %v843_v24, 1  ;;  %v1028_v24 = vpack.c.b16 %v924_v15, %v1020_v5  ;;  %v1850_v15 = vld [vmem:[%s2547_s1 + $0x40] sm:$0xff]  ;;  %v658_v42 = vunpack.c.l.b16 %v481_v28 }
  0x7d   : > { %675 = vrot.lane.b32.xlu0 %v667_v47, %s1899_s10  ;;  %v619_v47 = vor.u32 %v618_v38, %v614_v10  ;;  %v942_v48 = vshll.u32 %v931_v41, 16  ;;  %v940_v3 = vshrl.u32 %v931_v41, 16  ;;  %v952_v23 = vor.u32 %v951_v51, %v947_v49  ;;  %1330 = vmatpush.bf16.msra.mxu1 %v1850_v15  ;;  %v1843_v49 = vld [vmem:[%s2547_s1 + $0x8] sm:$0xff]  ;;  %v513_v28 = vld [vmem:[#allocation2 + $0x40] sm:$0xf] }
  0x7e   : > { %v1036_v34 = vrot.slane %v1028_v24, 1  ;;  %v745_v10 = vunpack.c.l.b16 %v2203_v6  ;;  %v705_v41 = vunpack.c.l.b16 %v488_v27  ;;  %v666_v55 = vpack.c.b16 %v562_v22, %v658_v42  ;;  %v2243_v22 = vld [vmem:[#allocation2 + $0x4c] sm:$0x1] }
  0x80   : > { %v1181_v45 = vunpack.c.l.b16 %v1036_v34  ;;  %v713_v53 = vpack.c.b16 %v705_v41, %v705_v41  ;;  %v674_v9 = vrot.slane %v666_v55, 1  ;;  %v890_v34 = vunpack.c.l.b16 %v514_v2 }
  0x81   : > { %811 = vrot.lane.b32.xlu1 %v761_v58, %s1901_s12  ;;  %v489_v58 = vld [vmem:[#allocation2 + $0x40] sm:$0xf] }
  0x82   : > { %715 = vrot.lane.b32.xlu2 %v707_v56, %s1898_s9  ;;  %v1846_v56 = vld [vmem:[%s2547_s1 + $0x20] sm:$0xff] }
  0x83   : > { %1855 = vmatpush.bf16.msra.mxu3 %v1846_v56  ;;  %1297 = vmatpush.bf16.msra.mxu0 %v1846_v56 }
  0x85   : > { %717 = vrot.lane.b32.xlu0 %v708_v11, %s1898_s9  ;;  %v944_v11 = vrot.slane %v942_v48, 1 }
  0x87   : > { %1856 = vmatpush.bf16.msra.mxu3 %v1845_v18  ;;  %1298 = vmatpush.bf16.msra.mxu0 %v1845_v18  ;;  %v945_v37 = vor.u32 %v944_v11, %v940_v3  ;;  %v504_v3 = vld [vmem:[#allocation2 + $0x38] sm:$0xe]  ;;  %v525_v11 = vld [vmem:[#allocation2 + $0x20] sm:$0xe] }
  0x88   : > { %v841_v27 = vunpack.c.l.b16 %v504_v3 }
  0x89   : > { %861 = vrot.lane.b32.xlu1 %v852_v16, %s1897_s8  ;;  %v1027_v16 = vpack.c.b16 %v923_v30, %v1019_v4  ;;  %v665_v30 = vpack.c.b16 %v560_v63, %v657_v13  ;;  %v526_v4 = vld [vmem:[#allocation2 + $0x28] sm:$0xe]  ;;  %v1021_v13 = vunpack.c.l.b16 %v525_v11 }
  0x8a   : > { %813 = vrot.lane.b32.xlu2 %v768_v14, %s1901_s12  ;;  %v2196_v14 = vunpack.c.l.b16 %v489_v58  ;;  %v1022_v18 = vunpack.c.l.b16 %v526_v4  ;;  %v898_v4 = vpack.c.b16 %v890_v34, %v890_v34 }
  0x8b   : > { %v1035_v33 = vrot.slane %v1027_v16, 1  ;;  %1857 = vmatpush.bf16.msra.mxu3 %v1844_v7  ;;  %1299 = vmatpush.bf16.msra.mxu0 %v1844_v7  ;;  %v673_v48 = vrot.slane %v665_v30, 1  ;;  %v2253_v7 = vld [vmem:[#allocation2 + $0x44] sm:$0x1] }
  0x8c   : > { %v2181_v39 = vpop.permute.xlu2 %719  ;;  %v714_v24 = vpack.c.b16 %v2196_v14, %v2196_v14  ;;  %v1030_v30 = vpack.c.b16 %v926_v29, %v1022_v18  ;;  %v929_v21 = vunpack.c.l.b16 %v2253_v7 }
  0x8d   : > { %859 = vrot.lane.b32.xlu0 %v851_v1, %s1897_s8  ;;  %v754_v1 = vpack.c.b16 %v746_v17, %v2196_v14 }
  0x8e   : > { %v1038_v42 = vrot.slane %v1030_v30, 1 }
  0x8f   : > { %v807_v63 = vshll.u32 %v754_v1, 16  ;;  %1858 = vmatpush.bf16.msra.mxu3 %v1843_v49  ;;  %1300 = vmatpush.bf16.msra.mxu0 %v1843_v49  ;;  %v805_v56 = vshrl.u32 %v754_v1, 16  ;;  %v1029_v1 = vpack.c.b16 %v925_v36, %v1021_v13 }
  0x90   : > { %v1185_v36 = vunpack.c.l.b16 %v1038_v42 }
  0x91   : > { %639 = vrot.lane.b32.xlu1 %v619_v47, %s1900_s11  ;;  %v753_v47 = vpack.c.b16 %v745_v10, %v705_v41  ;;  %v1037_v41 = vrot.slane %v1029_v1, 1 }
  0x92   : > { %899 = vrot.lane.b32.xlu2 %v891_v44, %s1896_s30  ;;  %v1179_v44 = vunpack.c.l.b16 %v1035_v33  ;;  %v505_v33 = vld [vmem:[#allocation2 + $0x40] sm:$0xe] }
  0x93   : > { %v800_v58 = vshll.u32 %v753_v47, 16  ;;  %1859 = vmatpush.bf16.msra.mxu3 %v1842_v62  ;;  %1301 = vmatpush.bf16.msra.mxu0 %v1842_v62  ;;  %v1183_v29 = vunpack.c.l.b16 %v1037_v41 }
  0x94   : > { %v2194_v0 = vpop.permute.xlu2 %721  ;;  %v1217_v31 = vpack.c.b16 %v1181_v45, %v1179_v44  ;;  %v889_v44 = vunpack.c.l.b16 %v513_v28  ;;  %v842_v45 = vunpack.c.l.b16 %v505_v33 }
  0x95   : > { %901 = vrot.lane.b32.xlu0 %v892_v57, %s1896_s30  ;;  %v809_v57 = vrot.slane %v807_v63, 1  ;;  %v802_v16 = vrot.slane %v800_v58, 1 }
  0x96   : > { %1805 = vmatmul.msk.bf16.vlgmr.msra.gmra.mxu1 %vm1043_vm6, %v1217_v31  ;;  %v849_v31 = vpack.c.b16 %v745_v10, %v841_v27  ;;  %v850_v6 = vpack.c.b16 %v746_v17, %v842_v45  ;;  %v937_v55 = vpack.c.b16 %v929_v21, %v889_v44 }
  0x97   : > { %v2221_v38 = vpop.permute.xlu1 %903 }
  0x98   : > { %v857_v49 = vrot.slane %v849_v31, 1  ;;  %v858_v58 = vrot.slane %v850_v6, 1  ;;  %v984_v2 = vshll.u32 %v937_v55, 16  ;;  %v982_v13 = vshrl.u32 %v937_v55, 16  ;;  %v527_v31 = vld [vmem:[#allocation2 + $0x30] sm:$0xe] }
  0x99   : > { %997 = vrot.lane.b32.xlu1 %v952_v23, %s1902_s13  ;;  %v810_v23 = vor.u32 %v809_v57, %v805_v56 }
  0x9a   : > { %641 = vrot.lane.b32.xlu2 %v626_v40, %s1900_s11  ;;  %v2231_v51 = vpop.permute.xlu0 %865  ;;  %v798_v40 = vshrl.u32 %v753_v47, 16  ;;  %v986_v18 = vrot.slane %v984_v2, 1 }
  0x9c   : > { %v2223_v46 = vpop.permute.xlu2 %905  ;;  %v803_v14 = vor.u32 %v802_v16, %v798_v40 }
  0x9d   : > { %995 = vrot.lane.b32.xlu0 %v945_v37, %s1902_s13  ;;  %v930_v37 = vunpack.c.l.b16 %v2243_v22 }
  0x9f   : > { %v938_v26 = vpack.c.b16 %v930_v37, %v890_v34 }
  0xa1   : > { %727 = vrot.lane.b32.xlu1 %v713_v53, %s1898_s9  ;;  %v897_v53 = vpack.c.b16 %v889_v44, %v889_v44  ;;  %v991_v10 = vshll.u32 %v938_v26, 16  ;;  %v989_v62 = vshrl.u32 %v938_v26, 16 }
  0xa2   : > { %687 = vrot.lane.b32.xlu2 %v673_v48, %s1899_s10  ;;  %v1219_v48 = vpack.c.b16 %v1185_v36, %v1183_v29  ;;  %v1023_v29 = vunpack.c.l.b16 %v527_v31  ;;  %v529_v31 = vld [vmem:[#allocation2 + $0x40] sm:$0xe] }
  0xa3   : > { %v680_v5 = vpop.permute.xlu1 %679 }
  0xa4   : > { %v2241_v8 = vpop.permute.xlu2 %863 }
  0xa5   : > { %689 = vrot.lane.b32.xlu0 %v674_v9, %s1899_s10  ;;  %v993_v9 = vrot.slane %v991_v10, 1  ;;  %s1904_s10 = smov 122  }
  0xa6   : > { %1806 = vmatmul.msk.bf16.gmra.mxu1 %vm1043_vm6, %v1219_v48 }
  0xa7   : > { %v632_v15 = vpop.permute.xlu0 %631  ;;  %v994_v40 = vor.u32 %v993_v9, %v989_v62 }
  0xa8   : > { %v1052_v60 = vsel %vm1043_vm6, %v2043_v54, %v632_v15 }
  0xa9   : > { %825 = vrot.lane.b32.xlu1 %v810_v23, %s1901_s12 }
  0xaa   : > { %729 = vrot.lane.b32.xlu2 %v714_v24, %s1898_s9  ;;  %s1903_s9 = smov 120  }
  0xab   : > { %v682_v47 = vpop.permute.xlu1 %681 }
  0xac   : > { %v2262_v63 = vpop.permute.xlu2 %635 }
  0xad   : > { %823 = vrot.lane.b32.xlu0 %v803_v14, %s1901_s12  ;;  %v1058_v62 = vsel %vm1043_vm6, %v2071_v50, %v2262_v63  ;;  %s1905_s12 = smov 126  }
  0xaf   : > { %v634_v56 = vpop.permute.xlu0 %633 }
  0xb0   : > { %v1055_v57 = vsel %vm1043_vm6, %v2046_v61, %v634_v56  ;;  %v1074_v61 = vsel %vm1068_vm7, %v1052_v60, %v680_v5  ;;  %v987_v5 = vor.u32 %v986_v18, %v982_v13 }
  0xb1   : > { %911 = vrot.lane.b32.xlu1 %v897_v53, %s1896_s30  ;;  %v1076_v17 = vsel %vm1068_vm7, %v1055_v57, %v682_v47  ;;  %v1091_v24 = vsel %vm1085_vm8, %v1074_v61, %v2181_v39  ;;  %v1031_v47 = vpack.c.b16 %v927_v25, %v1023_v29 }
  0xb2   : > { %871 = vrot.lane.b32.xlu2 %v857_v49, %s1897_s8  ;;  %v1093_v23 = vsel %vm1085_vm8, %v1076_v17, %v2194_v0 }
  0xb3   : > { %v818_v3 = vpop.permute.xlu1 %817  ;;  %v1039_v49 = vrot.slane %v1031_v47, 1 }
  0xb4   : > { %v686_v11 = vpop.permute.xlu2 %685  ;;  %v1110_v54 = vsel %vm1102_vm9, %v1093_v23, %v818_v3 }
  0xb5   : > { %873 = vrot.lane.b32.xlu0 %v858_v58, %s1897_s8  ;;  %v1127_v28 = vsel %vm1119_vm10, %v1110_v54, %v2231_v51  ;;  %v1187_v6 = vunpack.c.l.b16 %v1039_v49 }
  0xb6   : > { %v1144_v34 = vsel %vm1136_vm11, %v1127_v28, %v2223_v46  ;;  %v528_v46 = vld [vmem:[#allocation2 + $0x38] sm:$0xe] }
  0xb7   : > { %v816_v16 = vpop.permute.xlu0 %815  ;;  %v1024_v36 = vunpack.c.l.b16 %v528_v46  ;;  %v530_v46 = vld [vmem:[#allocation2 + $0x48] sm:$0xe] }
  0xb8   : > { %v1108_v27 = vsel %vm1102_vm9, %v1091_v24, %v816_v16  ;;  %v1026_v47 = vunpack.c.l.b16 %v530_v46 }
  0xb9   : > { %1009 = vrot.lane.b32.xlu1 %v994_v40, %s1902_s13  ;;  %v1125_v33 = vsel %vm1119_vm10, %v1108_v27, %v2241_v8 }
  0xba   : > { %913 = vrot.lane.b32.xlu2 %v898_v4, %s1896_s30  ;;  %v1142_v30 = vsel %vm1136_vm11, %v1125_v33, %v2221_v38  ;;  %v1032_v38 = vpack.c.b16 %v928_v35, %v1024_v36  ;;  %v1025_v36 = vunpack.c.l.b16 %v529_v31 }
  0xbb   : > { %v1002_v0 = vpop.permute.xlu1 %1001 }
  0xbc   : > { %v1161_v39 = vsel %vm1153_vm12, %v1144_v34, %v1002_v0  ;;  %v820_v1 = vpop.permute.xlu2 %819  ;;  %v1040_v53 = vrot.slane %v1032_v38, 1  ;;  %v1033_v49 = vpack.c.b16 %v929_v21, %v1025_v36 }
  0xbd   : > { %1007 = vrot.lane.b32.xlu0 %v987_v5, %s1902_s13  ;;  %v1184_v41 = vunpack.c.l.b16 %v1161_v39  ;;  %s1906_s13 = smov 118  }
  0xbe   : > { %v1189_v10 = vunpack.c.l.b16 %v1040_v53  ;;  %v1034_v53 = vpack.c.b16 %v930_v37, %v1026_v47 }
  0xbf   : > { %v1000_v15 = vpop.permute.xlu0 %999 }
  0xc0   : > { %v1159_v51 = vsel %vm1153_vm12, %v1142_v30, %v1000_v15  ;;  %v1221_v57 = vpack.c.b16 %v1189_v10, %v1187_v6 }
  0xc1   : > { %v1182_v42 = vunpack.c.l.b16 %v1159_v51 }
  0xc2   : > { %1807 = vmatmul.msk.bf16.gmra.mxu1 %vm1043_vm6, %v1221_v57  ;;  %v1041_v57 = vrot.slane %v1033_v49, 1 }
  0xc3   : > { %v684_v14 = vpop.permute.xlu1 %683  ;;  %v1218_v44 = vpack.c.b16 %v1184_v41, %v1182_v42 }
  0xc4   : > { %v870_v45 = vpop.permute.xlu2 %869  ;;  %v1078_v32 = vsel %vm1068_vm7, %v1058_v62, %v684_v14 }
  0xc5   : > { %1307 = vmatmul.bf16.vlgmr.msra.gmra.mxu3 %v1218_v44 }
  0xc7   : > { %v638_v8 = vpop.permute.xlu0 %637 }
  0xc8   : > { %v1061_v35 = vsel %vm1043_vm6, %v2078_v59, %v638_v8 }
  0xc9   : > { %v1080_v60 = vsel %vm1068_vm7, %v1061_v35, %v686_v11 }
  0xcb   : > { %v726_v26 = vpop.permute.xlu1 %725 }
  0xcc   : > { %v1004_v55 = vpop.permute.xlu2 %1003  ;;  %v1097_v3 = vsel %vm1085_vm8, %v1080_v60, %v726_v26 }
  0xcf   : > { %v724_v48 = vpop.permute.xlu0 %723 }
  0xd0   : > { %v1095_v9 = vsel %vm1085_vm8, %v1078_v32, %v724_v48  ;;  %v1191_v32 = vunpack.c.l.b16 %v1041_v57 }
  0xd1   : > { %v1112_v17 = vsel %vm1102_vm9, %v1095_v9, %v820_v1 }
  0xd3   : > { %v868_v56 = vpop.permute.xlu1 %867 }
  0xd4   : > { %v630_v25 = vpop.permute.xlu2 %629  ;;  %v1129_v4 = vsel %vm1119_vm10, %v1112_v17, %v868_v56 }
  0xd5   : > { %v1049_v15 = vsel %vm1043_vm6, %v2122_v43, %v630_v25 }
  0xd7   : > { %v822_v58 = vpop.permute.xlu0 %821 }
  0xd8   : > { %v1114_v50 = vsel %vm1102_vm9, %v1097_v3, %v822_v58  ;;  %v1042_v58 = vrot.slane %v1034_v53, 1 }
  0xd9   : > { %v1131_v40 = vsel %vm1119_vm10, %v1114_v50, %v870_v45 }
  0xda   : > { %v1193_v35 = vunpack.c.l.b16 %v1042_v58 }
  0xdb   : > { %v910_v19 = vpop.permute.xlu1 %909 }
  0xdc   : > { %v716_v13 = vpop.permute.xlu2 %715  ;;  %v1148_v18 = vsel %vm1136_vm11, %v1131_v40, %v910_v19  ;;  %v1223_v21 = vpack.c.b16 %v1193_v35, %v1191_v32 }
  0xde   : > { %1808 = vmatmul.msk.bf16.gmra.mxu1 %vm1043_vm6, %v1223_v21 }
  0xdf   : > { %v908_v2 = vpop.permute.xlu0 %907 }
  0xe0   : > { %v1146_v63 = vsel %vm1136_vm11, %v1129_v4, %v908_v2 }
  0xe1   : > { %v1163_v59 = vsel %vm1153_vm12, %v1146_v63, %v1004_v55 }
  0xe2   : > { %v1186_v16 = vunpack.c.l.b16 %v1163_v59 }
  0xe3   : > { %v628_v61 = vpop.permute.xlu1 %627 }
  0xe4   : > { %v814_v28 = vpop.permute.xlu2 %813  ;;  %v1046_v41 = vsel %vm1043_vm6, %v2107_v20, %v628_v61 }
  0xe7   : > { %v1006_v23 = vpop.permute.xlu0 %1005 }
  0xe8   : > { %v1165_v11 = vsel %vm1153_vm12, %v1148_v18, %v1006_v23 }
  0xe9   : > { %v1188_v54 = vunpack.c.l.b16 %v1165_v11 }
  0xeb   : > { %v1220_v24 = vpack.c.b16 %v1188_v54, %v1186_v16  ;;  %v678_v27 = vpop.permute.xlu1 %677 }
  0xec   : > { %v900_v34 = vpop.permute.xlu2 %899  ;;  %v1072_v42 = vsel %vm1068_vm7, %v1049_v15, %v678_v27 }
  0xed   : > { %1312 = vmatmul.bf16.gmra.mxu3 %v1220_v24 }
  0xef   : > { %v676_v5 = vpop.permute.xlu0 %675 }
  0xf0   : > { %v1070_v14 = vsel %vm1068_vm7, %v1046_v41, %v676_v5 }
  0xf1   : > { %v1087_v45 = vsel %vm1085_vm8, %v1070_v14, %v716_v13 }
  0xf3   : > { %v812_v0 = vpop.permute.xlu1 %811 }
  0xf4   : > { %v642_v51 = vpop.permute.xlu2 %641  ;;  %v1104_v26 = vsel %vm1102_vm9, %v1087_v45, %v812_v0 }
  0xf5   : > { %v1067_v4 = vsel %vm1043_vm6, %v2161_v12, %v642_v51 }
  0xf7   : > { %v718_v33 = vpop.permute.xlu0 %717 }
  0xf8   : > { %v1089_v8 = vsel %vm1085_vm8, %v1072_v42, %v718_v33 }
  0xf9   : > { %v1106_v29 = vsel %vm1102_vm9, %v1089_v8, %v814_v28 }
  0xfb   : > { %v862_v39 = vpop.permute.xlu1 %861 }
  0xfc   : > { %v1123_v20 = vsel %vm1119_vm10, %v1106_v29, %v862_v39  ;;  %v688_v6 = vpop.permute.xlu2 %687 }
  0xff   : > { %v860_v1 = vpop.permute.xlu0 %859 }
 0x100   : > { %v1121_v38 = vsel %vm1119_vm10, %v1104_v26, %v860_v1 }
 0x101   : > { %v1138_v56 = vsel %vm1136_vm11, %v1121_v38, %v900_v34 }
 0x103   : > { %v640_v30 = vpop.permute.xlu1 %639 }
 0x104   : > { %v730_v22 = vpop.permute.xlu2 %729  ;;  %v1064_v63 = vsel %vm1043_vm6, %v2142_v52, %v640_v30 }
 0x105   : > { %v1082_v13 = vsel %vm1068_vm7, %v1064_v63, %v688_v6 }
 0x107   : > { %v902_v44 = vpop.permute.xlu0 %901 }
 0x108   : > { %v1140_v48 = vsel %vm1136_vm11, %v1123_v20, %v902_v44  ;;  %v1883_v44 = vld [vmem:[%s2548_s2] ss:$0 sm:$0xff] }
 0x10b   : > { %v998_v43 = vpop.permute.xlu1 %997 }
 0x10c   : > { %v1157_v10 = vsel %vm1153_vm12, %v1140_v48, %v998_v43  ;;  %v872_v17 = vpop.permute.xlu2 %871 }
 0x10d   : > { %v1180_v19 = vunpack.c.l.b16 %v1157_v10 }
 0x10f   : > { %v996_v55 = vpop.permute.xlu0 %995 }
 0x110   : > { %v1155_v62 = vsel %vm1153_vm12, %v1138_v56, %v996_v55 }
 0x111   : > { %v1178_v25 = vunpack.c.l.b16 %v1155_v62 }
 0x113   : > { %v728_v9 = vpop.permute.xlu1 %727  ;;  %v1216_v7 = vpack.c.b16 %v1180_v19, %v1178_v25  ;;  %v1332_v39 = vpop.f32.mrf.mxu1 }
 0x114   : > { %v1099_v18 = vsel %vm1085_vm8, %v1082_v13, %v728_v9  ;;  %v914_v11 = vpop.permute.xlu2 %913 }
 0x115   : > { %1302 = vmatmul.bf16.vlgmr.msra.gmra.mxu0 %v1216_v7 }
 0x117   : > { %v690_v37 = vpop.permute.xlu0 %689 }
 0x118   : > { %v1084_v50 = vsel %vm1068_vm7, %v1067_v4, %v690_v37 }
 0x119   : > { %v1101_v40 = vsel %vm1085_vm8, %v1084_v50, %v730_v22 }
 0x11b   : > { %v826_v2 = vpop.permute.xlu1 %825  ;;  %v1334_v1 = vpop.f32.mrf.mxu1 }
 0x11c   : > { %v1118_v59 = vsel %vm1102_vm9, %v1101_v40, %v826_v2 }
 0x11f   : > { %v824_v60 = vpop.permute.xlu0 %823 }
 0x120   : > { %v1116_v54 = vsel %vm1102_vm9, %v1099_v18, %v824_v60 }
 0x121   : > { %v1133_v24 = vsel %vm1119_vm10, %v1116_v54, %v872_v17 }
 0x123   : > { %v912_v3 = vpop.permute.xlu1 %911  ;;  %v1337_v15 = vpop.f32.mrf.mxu1 }
 0x124   : > { %v1150_v27 = vsel %vm1136_vm11, %v1133_v24, %v912_v3 }
 0x127   : > { %v874_v61 = vpop.permute.xlu0 %873 }
 0x128   : > { %v1135_v23 = vsel %vm1119_vm10, %v1118_v59, %v874_v61 }
 0x129   : > { %v1152_v16 = vsel %vm1136_vm11, %v1135_v23, %v914_v11 }
 0x12b   : > { %v1010_v12 = vpop.permute.xlu1 %1009  ;;  %v1339_v42 = vpop.f32.mrf.mxu1 }
 0x12c   : > { %v1169_v52 = vsel %vm1153_vm12, %v1152_v16, %v1010_v12 }
 0x12d   : > { %v1192_v0 = vunpack.c.l.b16 %v1169_v52 }
 0x12f   : > { %v1008_v5 = vpop.permute.xlu0 %1007 }
 0x130   : > { %v1167_v28 = vsel %vm1153_vm12, %v1150_v27, %v1008_v5 }
 0x131   : > { %v1190_v33 = vunpack.c.l.b16 %v1167_v28 }
 0x133   : > { %v1222_v34 = vpack.c.b16 %v1192_v0, %v1190_v33 }
 0x135   : > { %1317 = vmatmul.bf16.gmra.mxu3 %v1222_v34 }
 0x13f   : > { %v1342_v45 = vpop.f32.mrf.mxu1 }
 0x147   : > { %v1344_v20 = vpop.f32.mrf.mxu1 }
 0x148   : > { %v1308_v30 = vpop.f32.mrf.mxu3 }
 0x149   : > { %v1309_v29 = vadd.f32 %v1883_v44, %v1308_v30 }
 0x14b   : > { %v2366_v38 = vadd.f32 %v1337_v15, %v1309_v29 }
 0x14d   : > { %v1355_v6 = vsel %vm1043_vm6, %v2366_v38, 0.0 }
 0x150   : > { %v1310_v41 = vpop.f32.mrf.mxu3 }
 0x151   : > { %v1311_v48 = vadd.f32 %v1883_v44, %v1310_v41 }
 0x153   : > { %v2372_v10 = vadd.f32 %v1339_v42, %v1311_v48 }
 0x155   : > { %v1357_v62 = vsel %vm1043_vm6, %v2372_v10, 0.0 }
 0x15b   : > { %v1347_v57 = vpop.f32.mrf.mxu1 }
 0x163   : > { %v1349_v4 = vpop.f32.mrf.mxu1 }
 0x170   : > { %v1313_v8 = vpop.f32.mrf.mxu3 }
 0x171   : > { %v1314_v55 = vadd.f32 %v1883_v44, %v1313_v8 }
 0x173   : > { %v2376_v19 = vadd.f32 %v1342_v45, %v1314_v55 }
 0x175   : > { %v1359_v9 = vsel %vm1043_vm6, %v2376_v19, 0.0 }
 0x178   : > { %v1315_v47 = vpop.f32.mrf.mxu3 }
 0x179   : > { %v1316_v25 = vadd.f32 %v1883_v44, %v1315_v47 }
 0x17b   : > { %v2380_v7 = vadd.f32 %v1344_v20, %v1316_v25 }
 0x17d   : > { %v1361_v2 = vsel %vm1043_vm6, %v2380_v7, 0.0 }
 0x192   : > { %v1303_v51 = vpop.f32.mrf.mxu0 }
 0x193   : > { %v1304_v46 = vadd.f32 %v1883_v44, %v1303_v51 }
 0x195   : > { %v2362_v43 = vadd.f32 %v1332_v39, %v1304_v46 }
 0x197   : > { %v1352_v49 = vsel %vm1043_vm6, %v2362_v43, 0.0 }
 0x19a   : > { %v1305_v14 = vpop.f32.mrf.mxu0 }
 0x19b   : > { %v1306_v31 = vadd.f32 %v1883_v44, %v1305_v14 }
 0x19d   : > { %v2360_v26 = vadd.f32 %v1334_v1, %v1306_v31 }
 0x19f   : > { %v1353_v36 = vsel %vm1043_vm6, %v2360_v26, 0.0 }
 0x1a0   : > { %v1354_v53 = vadd.f32 %v1353_v36, %v1352_v49 }
 0x1a2   : > { %v1356_v56 = vadd.f32 %v1355_v6, %v1354_v53 }
 0x1a4   : > { %v1358_v35 = vadd.f32 %v1357_v62, %v1356_v56 }
 0x1a6   : > { %v1360_v22 = vadd.f32 %v1359_v9, %v1358_v35 }
 0x1a8   : > { %v1362_v3 = vadd.f32 %v1361_v2, %v1360_v22 }
 0x1b8   : > { %v1318_v58 = vpop.f32.mrf.mxu3 }
 0x1b9   : > { %v1319_v32 = vadd.f32 %v1883_v44, %v1318_v58 }
 0x1bb   : > { %v2382_v21 = vadd.f32 %v1347_v57, %v1319_v32 }
 0x1bd   : > { %v1363_v60 = vsel %vm1043_vm6, %v2382_v21, 0.0 }
 0x1be   : > { %v1364_v63 = vadd.f32 %v1363_v60, %v1362_v3 }
 0x1c0   : > { %v1320_v37 = vpop.f32.mrf.mxu3 }
 0x1c1   : > { %v1321_v17 = vadd.f32 %v1883_v44, %v1320_v37 }
 0x1c3   : > { %v2388_v50 = vadd.f32 %v1349_v4, %v1321_v17 }
 0x1c5   : > { %v1365_v61 = vsel %vm1043_vm6, %v2388_v50, 0.0 }
 0x1c6   : > { %v1366_v40 = vadd.f32 %v1365_v61, %v1364_v63 }
 0x1c8   : > { %v1367_v13 = vrot.slane %v1366_v40, 4 }
 0x1ca   : > { %v1368_v59 = vadd.f32 %v1367_v13, %v1366_v40 }
 0x1cc   : > { %v1369_v18 = vrot.slane %v1368_v59, 2 }
 0x1ce   : > { %v1370_v23 = vadd.f32 %v1369_v18, %v1368_v59 }
 0x1d0   : > { %v1371_v11 = vrot.slane %v1370_v23, 1 }
 0x1d2   : > { %v1372_v54 = vadd.f32 %v1371_v11, %v1370_v23 }
 0x1d4   : > { %1396 = vrot.lane.b32.xlu1 %v1372_v54, %s1903_s9  ;;  %1390 = vrot.lane.b32.xlu2 %v1372_v54, %s1904_s10  ;;  %v1374_v12 = vsel %vm1373_vm13, %v1372_v54, 0.0 }
 0x1d5   : > { %1378 = vrot.lane.b32.xlu0 %v1372_v54, %s1905_s12 }
 0x1dc   : > { %1402 = vrot.lane.b32.xlu2 %v1372_v54, %s1906_s13 }
 0x1dd   : > { %1384 = vrot.lane.b32.xlu0 %v1372_v54, %s1907_s18 }
 0x1e4   : > { %1414 = vrot.lane.b32.xlu2 %v1372_v54, %s1908_s19 }
 0x1e5   : > { %1408 = vrot.lane.b32.xlu0 %v1372_v54, %s1909_s20 }
 0x20d   : > { %1375 = vadd.xlane.f32.xlu2 %v1374_v12 }
 0x22e   : > { %v1391_v16 = vpop.permute.xlu2 %1390 }
 0x22f   : > { %v1393_v39 = vsel %vm1373_vm13, %v1391_v16, 0.0 }
 0x236   : > { %v1403_v24 = vpop.permute.xlu2 %1402 }
 0x237   : > { %v1405_v15 = vsel %vm1373_vm13, %v1403_v24, 0.0 }
 0x23e   : > { %v1415_v0 = vpop.permute.xlu2 %1414 }
 0x23f   : > { %v1417_v34 = vsel %vm1373_vm13, %v1415_v0, 0.0 }
 0x246   : > { %v1397_v52 = vpop.permute.xlu1 %1396 }
 0x247   : > { %v1379_v27 = vpop.permute.xlu0 %1378  ;;  %v1399_v5 = vsel %vm1373_vm13, %v1397_v52, 0.0 }
 0x248   : > { %v1381_v28 = vsel %vm1373_vm13, %v1379_v27, 0.0  ;;  %1400 = vadd.xlane.f32.xlu2 %v1399_v5 }
 0x249   : > { %1382 = vadd.xlane.f32.xlu1 %v1381_v28 }
 0x24f   : > { %v1385_v33 = vpop.permute.xlu0 %1384 }
 0x250   : > { %v1387_v1 = vsel %vm1373_vm13, %v1385_v33, 0.0  ;;  %1418 = vadd.xlane.f32.xlu2 %v1417_v34 }
 0x251   : > { %1394 = vadd.xlane.f32.xlu1 %v1393_v39  ;;  %1388 = vadd.xlane.f32.xlu0 %v1387_v1 }
 0x257   : > { %v1409_v30 = vpop.permute.xlu0 %1408 }
 0x258   : > { %v1411_v51 = vsel %vm1373_vm13, %v1409_v30, 0.0 }
 0x259   : > { %1406 = vadd.xlane.f32.xlu1 %v1405_v15  ;;  %1412 = vadd.xlane.f32.xlu0 %v1411_v51  ;;  %v1851_v51 = vld [vmem:[%s2551_s5] sm:$0xff] }
 0x25a   : > { %1631 = vmatpush.bf16.msra.mxu2 %v1851_v51 }
 0x280   : > { %v1376_v41 = vpop.xlane.xlu2 %1375 }
 0x2bb   : > { %v1401_v14 = vpop.xlane.xlu2 %1400 }
 0x2bc   : > { %v1383_v42 = vpop.xlane.xlu1 %1382 }
 0x2bd   : > { %v1420_v45 = vsel %vm1373_vm13, %v1376_v41, %v1383_v42  ;;  %v1838_v41 = vld [vmem:[%s1972_s29] sm:$0xff]  ;;  %v1839_v42 = vld [vmem:[%s1972_s29 + $0x8] sm:$0xff] }
 0x2be   : > { %1829 = vmatmul.msk.bf16.vlgmr.msra.gmra.mxu2 %vm1043_vm6, %v1838_v41 }
 0x2c3   : > { %v1419_v48 = vpop.xlane.xlu2 %1418 }
 0x2c4   : > { %v1395_v44 = vpop.xlane.xlu1 %1394  ;;  %v1389_v8 = vpop.xlane.xlu0 %1388 }
 0x2c5   : > { %v1422_v31 = vsel %vm1421_vm14, %v1420_v45, %v1389_v8  ;;  %v1841_v8 = vld [vmem:[%s1972_s29 + $0x18] sm:$0xff] }
 0x2c6   : > { %v1424_v46 = vsel %vm1423_vm15, %v1422_v31, %v1395_v44 }
 0x2c7   : > { %v1426_v36 = vsel %vm1425_vm1, %v1424_v46, %v1401_v14  ;;  %v1840_v14 = vld [vmem:[%s1972_s29 + $0x10] sm:$0xff] }
 0x2cc   : > { %v1407_v29 = vpop.xlane.xlu1 %1406  ;;  %v1413_v47 = vpop.xlane.xlu0 %1412 }
 0x2cd   : > { %v1428_v20 = vsel %vm1427_vm2, %v1426_v36, %v1407_v29 }
 0x2ce   : > { %v1430_v49 = vsel %vm1429_vm3, %v1428_v20, %v1413_v47  ;;  %1830 = vmatmul.msk.bf16.gmra.mxu2 %vm1043_vm6, %v1839_v42 }
 0x2cf   : > { %v1432_v53 = vsel %vm1431_vm4, %v1430_v49, %v1419_v48 }
 0x2d0   : > { %v1433_v6 = vmul.f32 0.0078125, %v1432_v53 }
 0x2d2   : > { %v1434_v55 = vperm.slane %v1433_v6, 0 }
 0x2d4   : > { %v2415_v56 = vsub.f32 %v2362_v43, %v1434_v55  ;;  %v2418_v57 = vsub.f32 %v2360_v26, %v1434_v55  ;;  %v2421_v58 = vsub.f32 %v2366_v38, %v1434_v55  ;;  %v2424_v62 = vsub.f32 %v2372_v10, %v1434_v55 }
 0x2d5   : > { %v2427_v25 = vsub.f32 %v2376_v19, %v1434_v55  ;;  %v2436_v26 = vsub.f32 %v2380_v7, %v1434_v55  ;;  %v2443_v22 = vsub.f32 %v2382_v21, %v1434_v55  ;;  %v2449_v7 = vsub.f32 %v2388_v50, %v1434_v55 }
 0x2d6   : > { %v1443_v32 = vmul.f32 %v2415_v56, %v2415_v56  ;;  %v1444_v35 = vmul.f32 %v2418_v57, %v2418_v57  ;;  %v1445_v43 = vmul.f32 %v2421_v58, %v2421_v58  ;;  %v1446_v38 = vmul.f32 %v2424_v62, %v2424_v62 }
 0x2d7   : > { %v1447_v37 = vmul.f32 %v2427_v25, %v2427_v25  ;;  %v1448_v17 = vmul.f32 %v2436_v26, %v2436_v26  ;;  %v1449_v63 = vmul.f32 %v2443_v22, %v2443_v22  ;;  %v1450_v40 = vmul.f32 %v2449_v7, %v2449_v7 }
 0x2d8   : > { %v1451_v10 = vsel %vm1043_vm6, %v1443_v32, 0.0  ;;  %v1452_v19 = vsel %vm1043_vm6, %v1444_v35, 0.0  ;;  %v1454_v2 = vsel %vm1043_vm6, %v1445_v43, 0.0  ;;  %v1456_v3 = vsel %vm1043_vm6, %v1446_v38, 0.0 }
 0x2d9   : > { %v1453_v9 = vadd.f32 %v1452_v19, %v1451_v10  ;;  %v1458_v21 = vsel %vm1043_vm6, %v1447_v37, 0.0  ;;  %v1460_v13 = vsel %vm1043_vm6, %v1448_v17, 0.0  ;;  %v1462_v50 = vsel %vm1043_vm6, %v1449_v63, 0.0 }
 0x2da   : > { %v1464_v23 = vsel %vm1043_vm6, %v1450_v40, 0.0 }
 0x2db   : > { %v1455_v60 = vadd.f32 %v1454_v2, %v1453_v9 }
 0x2dd   : > { %v1457_v4 = vadd.f32 %v1456_v3, %v1455_v60 }
 0x2de   : > { %1831 = vmatmul.msk.bf16.gmra.mxu2 %vm1043_vm6, %v1840_v14 }
 0x2df   : > { %v1459_v61 = vadd.f32 %v1458_v21, %v1457_v4 }
 0x2e1   : > { %v1461_v59 = vadd.f32 %v1460_v13, %v1459_v61 }
 0x2e3   : > { %v1463_v18 = vadd.f32 %v1462_v50, %v1461_v59 }
 0x2e5   : > { %v1465_v11 = vadd.f32 %v1464_v23, %v1463_v18 }
 0x2e7   : > { %v1466_v54 = vrot.slane %v1465_v11, 4 }
 0x2e9   : > { %v1467_v12 = vadd.f32 %v1466_v54, %v1465_v11 }
 0x2eb   : > { %v1468_v16 = vrot.slane %v1467_v12, 2 }
 0x2ed   : > { %v1469_v24 = vadd.f32 %v1468_v16, %v1467_v12 }
 0x2ee   : > { %1832 = vmatmul.msk.bf16.gmra.mxu2 %vm1043_vm6, %v1841_v8 }
 0x2ef   : > { %v1470_v52 = vrot.slane %v1469_v24, 1 }
 0x2f1   : > { %v1471_v27 = vadd.f32 %v1470_v52, %v1469_v24 }
 0x2f3   : > { %1488 = vrot.lane.b32.xlu2 %v1471_v27, %s1904_s10  ;;  %1482 = vrot.lane.b32.xlu1 %v1471_v27, %s1907_s18  ;;  %v1472_v5 = vsel %vm1373_vm13, %v1471_v27, 0.0 }
 0x2f4   : > { %1476 = vrot.lane.b32.xlu0 %v1471_v27, %s1905_s12 }
 0x2fb   : > { %1494 = vrot.lane.b32.xlu1 %v1471_v27, %s1903_s9 }
 0x325   : > { %1473 = vadd.xlane.f32.xlu1 %v1472_v5 }
 0x341   : > { %v1633_v6 = vpop.f32.mrf.mxu2 }
 0x342   : > { %v1653_v55 = vpack.c.bf16 %v1633_v6, %v1633_v6 }
 0x344   : > { %1662 = vst.msk [vmem:[%s2494_s25] sm:$0xf] %vm1661_vm5, %v1653_v55 }
 0x349   : > { %v1635_v32 = vpop.f32.mrf.mxu2 }
 0x34a   : > { %v1654_v35 = vpack.c.bf16 %v1635_v32, %v1635_v32 }
 0x34c   : > { %1663 = vst.msk [vmem:[%s2494_s25 + $0x4] sm:$0xf] %vm1661_vm5, %v1654_v35 }
 0x34d   : > { %v1489_v28 = vpop.permute.xlu2 %1488 }
 0x34e   : > { %v1491_v0 = vsel %vm1373_vm13, %v1489_v28, 0.0 }
 0x34f   : > { %1492 = vadd.xlane.f32.xlu0 %v1491_v0  ;;  %v1537_v0 = vld [vmem:[%s2549_s3] sm:$0x1] }
 0x351   : > { %v1638_v43 = vpop.f32.mrf.mxu2 }
 0x352   : > { %v1655_v38 = vpack.c.bf16 %v1638_v43, %v1638_v43 }
 0x354   : > { %1664 = vst.msk [vmem:[%s2494_s25 + $0x8] sm:$0xf] %vm1661_vm5, %v1655_v38 }
 0x359   : > { %v1640_v10 = vpop.f32.mrf.mxu2 }
 0x35a   : > { %v1656_v19 = vpack.c.bf16 %v1640_v10, %v1640_v10 }
 0x35c   : > { %1665 = vst.msk [vmem:[%s2494_s25 + $0xc] sm:$0xf] %vm1661_vm5, %v1656_v19 }
 0x361   : > { %v1643_v9 = vpop.f32.mrf.mxu2 }
 0x362   : > { %v1657_v60 = vpack.c.bf16 %v1643_v9, %v1643_v9 }
 0x364   : > { %1666 = vst.msk [vmem:[%s2494_s25 + $0x10] sm:$0xf] %vm1661_vm5, %v1657_v60 }
 0x365   : > { %v1483_v33 = vpop.permute.xlu1 %1482 }
 0x366   : > { %v1477_v34 = vpop.permute.xlu0 %1476  ;;  %v1485_v15 = vsel %vm1373_vm13, %v1483_v33, 0.0 }
 0x367   : > { %v1479_v39 = vsel %vm1373_vm13, %v1477_v34, 0.0 }
 0x368   : > { %1480 = vadd.xlane.f32.xlu2 %v1479_v39 }
 0x369   : > { %v1645_v2 = vpop.f32.mrf.mxu2 }
 0x36a   : > { %v1658_v17 = vpack.c.bf16 %v1645_v2, %v1645_v2 }
 0x36c   : > { %1667 = vst.msk [vmem:[%s2494_s25 + $0x14] sm:$0xf] %vm1661_vm5, %v1658_v17 }
 0x36d   : > { %v1495_v1 = vpop.permute.xlu1 %1494 }
 0x36e   : > { %v1497_v30 = vsel %vm1373_vm13, %v1495_v1, 0.0  ;;  %v1884_v1 = vld [vmem:[%s2550_s4] ss:$0 sm:$0xff] }
 0x36f   : > { %1498 = vadd.xlane.f32.xlu1 %v1497_v30 }
 0x370   : > { %1486 = vadd.xlane.f32.xlu2 %v1485_v15 }
 0x371   : > { %v1648_v4 = vpop.f32.mrf.mxu2 }
 0x372   : > { %v1659_v11 = vpack.c.bf16 %v1648_v4, %v1648_v4 }
 0x374   : > { %1668 = vst.msk [vmem:[%s2494_s25 + $0x18] sm:$0xf] %vm1661_vm5, %v1659_v11 }
 0x379   : > { %v1650_v18 = vpop.f32.mrf.mxu2 }
 0x37a   : > { %v1660_v54 = vpack.c.bf16 %v1650_v18, %v1650_v18 }
 0x37c   : > { %1669 = vst.msk [vmem:[%s2494_s25 + $0x1c] sm:$0xf] %vm1661_vm5, %v1660_v54 }
 0x388   : > { %1500 = vrot.lane.b32.xlu2 %v1471_v27, %s1906_s13 }
 0x390   : > { %1506 = vrot.lane.b32.xlu2 %v1471_v27, %s1909_s20 }
 0x398   : > { %1512 = vrot.lane.b32.xlu2 %v1471_v27, %s1908_s19  ;;  %v1474_v45 = vpop.xlane.xlu1 %1473 }
 0x3c2   : > { %v1493_v37 = vpop.xlane.xlu0 %1492 }
 0x3db   : > { %v1481_v44 = vpop.xlane.xlu2 %1480 }
 0x3dc   : > { %v1518_v31 = vsel %vm1373_vm13, %v1474_v45, %v1481_v44 }
 0x3e2   : > { %v1499_v21 = vpop.xlane.xlu1 %1498 }
 0x3e3   : > { %v1487_v46 = vpop.xlane.xlu2 %1486 }
 0x3e4   : > { %v1519_v29 = vsel %vm1421_vm14, %v1518_v31, %v1487_v46 }
 0x3e5   : > { %v1520_v63 = vsel %vm1423_vm15, %v1519_v29, %v1493_v37 }
 0x3e6   : > { %v1521_v40 = vsel %vm1425_vm1, %v1520_v63, %v1499_v21 }
 0x3eb   : > { %v1501_v36 = vpop.permute.xlu2 %1500 }
 0x3ec   : > { %v1503_v47 = vsel %vm1373_vm13, %v1501_v36, 0.0 }
 0x3ed   : > { %1504 = vadd.xlane.f32.xlu0 %v1503_v47 }
 0x3f3   : > { %v1507_v20 = vpop.permute.xlu2 %1506 }
 0x3f4   : > { %v1509_v48 = vsel %vm1373_vm13, %v1507_v20, 0.0 }
 0x3f5   : > { %1510 = vadd.xlane.f32.xlu2 %v1509_v48 }
 0x3fb   : > { %v1513_v49 = vpop.permute.xlu2 %1512 }
 0x3fc   : > { %v1515_v53 = vsel %vm1373_vm13, %v1513_v49, 0.0 }
 0x3fd   : > { %1516 = vadd.xlane.f32.xlu0 %v1515_v53 }
 0x460   : > { %v1505_v3 = vpop.xlane.xlu0 %1504 }
 0x461   : > { %v1522_v13 = vsel %vm1427_vm2, %v1521_v40, %v1505_v3 }
 0x468   : > { %v1511_v61 = vpop.xlane.xlu2 %1510 }
 0x469   : > { %v1523_v59 = vsel %vm1429_vm3, %v1522_v13, %v1511_v61 }
 0x470   : > { %v1517_v50 = vpop.xlane.xlu0 %1516 }
 0x471   : > { %v1524_v23 = vsel %vm1431_vm4, %v1523_v59, %v1517_v50 }
 0x472   : > { %v1525_v12 = vmul.f32 0.0078125, %v1524_v23 }
 0x474   : > { %v1526_v16 = vadd.f32 1e-05, %v1525_v12 }
 0x476   : > { %1885 = vrsqrt.f32 %v1526_v16  ;;  %vm1533_vm7 = vweird.f32 %v1526_v16 }
 0x47c   : > { %v1886_v24 = vpop.eup %1885 }
 0x47d   : > { %v1528_v52 = vmul.f32 %v1886_v24, %v1526_v16  ;;  %vm1534_vm6 = vweird.f32 %v1886_v24 }
 0x47e   : > { %vm1535_vm8 = vmor %vm1533_vm7, %vm1534_vm6 }
 0x47f   : > { %v1529_v27 = vmul.f32 %v1886_v24, %v1528_v52 }
 0x481   : > { %v1530_v5 = vmul.f32 0.5, %v1529_v27 }
 0x483   : > { %v1531_v28 = vsub.f32 1.5, %v1530_v5 }
 0x485   : > { %v1532_v33 = vmul.f32 %v1886_v24, %v1531_v28 }
 0x487   : > { %v1536_v34 = vsel %vm1535_vm8, %v1886_v24, %v1532_v33 }
 0x488   : > { %v1538_v39 = vmul.f32 %v1537_v0, %v1536_v34 }
 0x48a   : > { %v1539_v30 = vperm.slane %v1538_v39, 0 }
 0x48c   : > { %v1540_v15 = vmul.f32 %v1539_v30, %v2415_v56  ;;  %v1541_v51 = vmul.f32 %v1539_v30, %v2418_v57  ;;  %v1542_v41 = vmul.f32 %v1539_v30, %v2421_v58  ;;  %v1543_v42 = vmul.f32 %v1539_v30, %v2424_v62 }
 0x48d   : > { %v1544_v14 = vmul.f32 %v1539_v30, %v2427_v25  ;;  %v1545_v44 = vmul.f32 %v1539_v30, %v2436_v26  ;;  %v1546_v8 = vmul.f32 %v1539_v30, %v2443_v22  ;;  %v1547_v45 = vmul.f32 %v1539_v30, %v2449_v7 }
 0x48e   : > { %v1552_v31 = vadd.f32 %v1884_v1, %v1540_v15  ;;  %v1553_v46 = vadd.f32 %v1884_v1, %v1541_v51  ;;  %v1554_v29 = vadd.f32 %v1884_v1, %v1542_v41  ;;  %v1555_v36 = vadd.f32 %v1884_v1, %v1543_v42 }
 0x48f   : > { %v1556_v56 = vadd.f32 %v1884_v1, %v1544_v14  ;;  %v1557_v47 = vadd.f32 %v1884_v1, %v1545_v44  ;;  %v1558_v57 = vadd.f32 %v1884_v1, %v1546_v8  ;;  %v1559_v20 = vadd.f32 %v1884_v1, %v1547_v45 }
 0x490   : > { %v1560_v58 = vmax.f32 %v1552_v31, 0.0  ;;  %v1561_v48 = vmax.f32 %v1553_v46, 0.0  ;;  %v1562_v62 = vmax.f32 %v1554_v29, 0.0  ;;  %v1563_v49 = vmax.f32 %v1555_v36, 0.0 }
 0x491   : > { %v1564_v25 = vmax.f32 %v1556_v56, 0.0  ;;  %v1565_v26 = vmax.f32 %v1557_v47, 0.0  ;;  %v1566_v22 = vmax.f32 %v1558_v57, 0.0  ;;  %v1567_v55 = vmax.f32 %v1559_v20, 0.0 }
 0x492   : > { %v1568_v7 = vpack.c.bf16 %v1560_v58, %v1560_v58  ;;  %v1569_v53 = vpack.c.bf16 %v1561_v48, %v1561_v48  ;;  %v1570_v6 = vpack.c.bf16 %v1562_v62, %v1562_v62  ;;  %v1571_v32 = vpack.c.bf16 %v1563_v49, %v1563_v49 }
 0x493   : > { %v1572_v35 = vpack.c.bf16 %v1564_v25, %v1564_v25  ;;  %v1573_v43 = vpack.c.bf16 %v1565_v26, %v1565_v26  ;;  %v1574_v38 = vpack.c.bf16 %v1566_v22, %v1566_v22  ;;  %v1575_v10 = vpack.c.bf16 %v1567_v55, %v1567_v55 }
 0x494   : > { %1576 = vst.msk [vmem:[%s286_s17] sm:$0xf] %vm301_vm0, %v1568_v7 }
 0x495   : > { %1577 = vst.msk [vmem:[%s286_s17 + $0x4] sm:$0xf] %vm301_vm0, %v1569_v53 }
 0x496   : > { %1578 = vst.msk [vmem:[%s286_s17 + $0x8] sm:$0xf] %vm301_vm0, %v1570_v6 }
 0x497   : > { %1579 = vst.msk [vmem:[%s286_s17 + $0xc] sm:$0xf] %vm301_vm0, %v1571_v32 }
 0x498   : > { %1580 = vst.msk [vmem:[%s286_s17 + $0x10] sm:$0xf] %vm301_vm0, %v1572_v35 }
 0x499   : > { %1581 = vst.msk [vmem:[%s286_s17 + $0x14] sm:$0xf] %vm301_vm0, %v1573_v43 }
 0x49a   : > { %1582 = vst.msk [vmem:[%s286_s17 + $0x18] sm:$0xf] %vm301_vm0, %v1574_v38 }
 0x49b   : > { %1583 = vst.msk [vmem:[%s286_s17 + $0x1c] sm:$0xf] %vm301_vm0, %v1575_v10 }
 0x49c PF: > { %s18_s24 = sadd.s32 1, %s1893_s24  }
 0x49d   : > { %p15_p4 = scmp.ge.s32.totalorder %s18_s24, 4  }
 0x49f   :  { %17 = sbr.rel (!%p15_p4) target bundleno = 1 (0x1), region = 88 }

// kernel: improved_synthesis_forward.4
= control target key start
LH: loop header
LB: loop body
LE: loop exit
PB: predicated region body
PF: predicated region fallthrough
CT: control target
= control target key end

     0   :  { %s1827_s18 = smov 0   ;;  %s2449_s0 = inlined_call_operand.vmem [shape: bf16[2,8,8,16], index: 0, kind: input, shape index: {}]   ;;  %s2450_s1 = inlined_call_operand.vmem [shape: bf16[144,64], index: 1, kind: input, shape index: {}]   ;;  %s2451_s2 = inlined_call_operand.vmem [shape: f32[1,64], index: 2, kind: input, shape index: {}]   ;;  %s2452_s3 = inlined_call_operand.vmem [shape: f32[1,64], index: 3, kind: input, shape index: {}]   ;;  %s2453_s4 = inlined_call_operand.vmem [shape: f32[1,64], index: 4, kind: input, shape index: {}]   ;;  %s2454_s5 = inlined_call_operand.vmem [shape: bf16[2,8,2,8,32], index: 5, kind: output, shape index: {}]  }
   0x1 LB: > { %s1667_s19 = sadd.s32 4294967295, %s1780_s18   ;;  %p1671_p0 = scmp.ge.s32.totalorder %s1780_s18, 1  ;;  %s1780_s18 = sphi %s1827_s18, %s15_s18  }
   0x2   : > { %p187_p1 = scmp.lt.s32.totalorder %s1780_s18, 3 }
   0x4   : > { %p188_p2 = pnand %p1671_p0, %p187_p1 }
   0x5   : > { %p215_p3 = scmp.lt.s32.totalorder (!%p188_p2), %s1667_s19, 1  ;;  %s1783_s24 = smov (!%p188_p2), 32  }
   0x6   : > { %191 = sbr.rel (%p188_p2) target bundleno = 1671 (0x687), region = 40  ;;  %s1784_s25 = smov (!%p188_p2), 16  }
   0x7   : > { %s1785_s26 = smov (!%p188_p2), 48   ;;  %s1786_s27 = smov (!%p188_p2), 80  }
   0x8   : > { %s1787_s28 = smov (!%p188_p2), 64   ;;  %s1788_s29 = smov (!%p188_p2), 96  }
   0x9   : > { %s1789_s30 = smov (!%p188_p2), 112   ;;  %s1790_s9 = smov (!%p188_p2), 122  }
   0xa   : > { %s1791_s10 = smov (!%p188_p2), 124   ;;  %s1792_s11 = smov (!%p188_p2), 126  }
   0xb   : > { %vm234_vm0 = vcmask 125952   ;;  %vm236_vm1 = vcmask 122880   ;;  %v1782_v0 = vmov 0   ;;  %s2460_s19 = smov (!%p215_p3, %s1667_s19), 1  ;;  %vm338_vm2 = vsmask.f32 7938 }
   0xc   : > { %235 = vst.msk [vmem:[#allocation2] sm:$0xf] %vm234_vm0, %v1782_v0  ;;  %s1726_s20 = sshll.u32 %s2460_s19, 5  ;;  %vm344_vm3 = vsmask.f32 256  ;;  %vm1882_vm4 = vmand %vm234_vm0, %vm338_vm2  ;;  %vm976_vm6 = vcmask 130048  }
   0xd   : > { %237 = vst.msk [vmem:[#allocation2 + $0x4] sm:$0x1] %vm236_vm1, %v1782_v0  ;;  %s1853_s23 = scalar_lea.vmem %s2449_s0, %s1726_s20  ;;  %vm1897_vm5 = vmand %vm236_vm1, %vm344_vm3  ;;  %vm1001_vm7 = vcmask 261120   ;;  %vm1018_vm8 = vcmask 392192   ;;  %vm1035_vm9 = vcmask 523264   ;;  %vm1069_vm10 = vcmask 785408  }
   0xe   : > { %238 = vst.msk [vmem:[#allocation2 + $0x8] sm:$0xf] %vm234_vm0, %v1782_v0  ;;  %v227_v1 = vld [vmem:[%s1853_s23 + $0x4] sm:$0xf]  ;;  %v226_v2 = vld [vmem:[%s1853_s23] sm:$0xf] }
   0xf   : > { %239 = vst.msk [vmem:[#allocation2 + $0xc] sm:$0x1] %vm236_vm1, %v1782_v0  ;;  %v265_v8 = vshrl.u32 %v227_v1, 16  ;;  %v268_v10 = vshll.u32 %v227_v1, 16  ;;  %v257_v11 = vshrl.u32 %v226_v2, 16  ;;  %v260_v13 = vshll.u32 %v226_v2, 16 }
  0x10   : > { %240 = vst.msk [vmem:[#allocation2 + $0x10] sm:$0xf] %vm234_vm0, %v1782_v0  ;;  %v229_v14 = vld [vmem:[%s1853_s23 + $0xc] sm:$0xf]  ;;  %v231_v21 = vld [vmem:[%s1853_s23 + $0x14] sm:$0xf] }
  0x11   : > { %241 = vst.msk [vmem:[#allocation2 + $0x14] sm:$0x1] %vm236_vm1, %v1782_v0  ;;  %v1867_v12 = vrot.slane %v265_v8, 7  ;;  %v259_v17 = vrot.slane %v257_v11, 7  ;;  %v281_v18 = vshrl.u32 %v229_v14, 16  ;;  %v284_v20 = vshll.u32 %v229_v14, 16 }
  0x12   : > { %242 = vst.msk [vmem:[#allocation2 + $0x18] sm:$0xf] %vm234_vm0, %v1782_v0  ;;  %v297_v29 = vshrl.u32 %v231_v21, 16  ;;  %v300_v30 = vshll.u32 %v231_v21, 16  ;;  %v230_v41 = vld [vmem:[%s1853_s23 + $0x10] sm:$0xf] }
  0x13   : > { %v407_v3 = vld [vmem:[#allocation2] sm:$0xe]  ;;  %243 = vst.msk [vmem:[#allocation2 + $0x1c] sm:$0x1] %vm236_vm1, %v1782_v0  ;;  %v270_v25 = vor.u32 %v268_v10, %v1867_v12  ;;  %v262_v27 = vor.u32 %v260_v13, %v259_v17  ;;  %v283_v28 = vrot.slane %v281_v18, 7  ;;  %v289_v44 = vshrl.u32 %v230_v41, 16 }
  0x14   : > { %v391_v4 = vld [vmem:[#allocation2] sm:$0xf]  ;;  %v399_v5 = vld [vmem:[#allocation2 + $0x4] sm:$0x1]  ;;  %v584_v6 = vunpack.c.l.b16 %v407_v3  ;;  %244 = vst.msk [vmem:[#allocation2 + $0x20] sm:$0xf] %vm234_vm0, %v1782_v0 }
  0x15   : > { %v480_v7 = vunpack.c.l.b16 %v391_v4  ;;  %v481_v9 = vunpack.c.l.b16 %v399_v5  ;;  %245 = vst.msk [vmem:[#allocation2 + $0x24] sm:$0x1] %vm236_vm1, %v1782_v0  ;;  %v340_v32 = vld [vmem:[#allocation2 + $0x8] sm:$0xf]  ;;  %v286_v33 = vor.u32 %v284_v20, %v283_v28  ;;  %v287_v34 = vrot.slane %v283_v28, 4  ;;  %s1793_s12 = smov 116  }
  0x16   : > { %246 = vst.msk [vmem:[#allocation2 + $0x28] sm:$0xf] %vm234_vm0, %v1782_v0  ;;  %v299_v36 = vrot.slane %v297_v29, 7  ;;  %v341_v42 = vsel %vm1882_vm4, %v262_v27, %v340_v32  ;;  %v292_v47 = vshll.u32 %v230_v41, 16  ;;  %v263_v48 = vrot.slane %v259_v17, 4  ;;  %s1794_s13 = smov 118  }
  0x17   : > { %v592_v15 = vpack.c.b16 %v481_v9, %v584_v6  ;;  %247 = vst.msk [vmem:[#allocation2 + $0x2c] sm:$0x1] %vm236_vm1, %v1782_v0  ;;  %v496_v16 = vpack.c.b16 %v481_v9, %v480_v7  ;;  %v349_v19 = vld [vmem:[#allocation2 + $0x10] sm:$0xf]  ;;  %v291_v50 = vrot.slane %v289_v44, 7  ;;  %v271_v59 = vrot.slane %v1867_v12, 4 }
  0x18   : > { %248 = vst.msk [vmem:[#allocation2 + $0x30] sm:$0xf] %vm234_vm0, %v1782_v0  ;;  %v350_v38 = vsel %vm1882_vm4, %v270_v25, %v349_v19  ;;  %v302_v43 = vor.u32 %v300_v30, %v299_v36  ;;  %v346_v51 = vld [vmem:[#allocation2 + $0xc] sm:$0x1]  ;;  %v228_v57 = vld [vmem:[%s1853_s23 + $0x8] sm:$0xf] }
  0x19   : > { %v600_v22 = vrot.slane %v592_v15, 1  ;;  %249 = vst.msk [vmem:[#allocation2 + $0x34] sm:$0x1] %vm236_vm1, %v1782_v0  ;;  %v505_v23 = vshrl.u32 %v496_v16, 16  ;;  %v507_v24 = vshll.u32 %v496_v16, 16  ;;  %v294_v55 = vor.u32 %v292_v47, %v291_v50  ;;  %s1795_s14 = smov 120  }
  0x1a   : > { %250 = vst.msk [vmem:[#allocation2 + $0x38] sm:$0xf] %vm234_vm0, %v1782_v0  ;;  %v295_v56 = vrot.slane %v291_v50, 4  ;;  %v347_v58 = vsel %vm1897_vm5, %v263_v48, %v346_v51  ;;  %v273_v60 = vshrl.u32 %v228_v57, 16  ;;  %v352_v63 = vld [vmem:[#allocation2 + $0x14] sm:$0x1] }
  0x1b   : > { %608 = vrot.lane.b32.xlu1 %v600_v22, %s1783_s24  ;;  %251 = vst.msk [vmem:[#allocation2 + $0x3c] sm:$0x1] %vm236_vm1, %v1782_v0  ;;  %v509_v31 = vrot.slane %v507_v24, 1  ;;  %v361_v35 = vld [vmem:[#allocation2 + $0x20] sm:$0xf]  ;;  %v276_v2 = vshll.u32 %v228_v57, 16  ;;  %v353_v5 = vsel %vm1897_vm5, %v271_v59, %v352_v63 }
  0x1c   : > { %252 = vst.msk [vmem:[#allocation2 + $0x40] sm:$0xf] %vm234_vm0, %v1782_v0  ;;  %v364_v40 = vld [vmem:[#allocation2 + $0x24] sm:$0x1]  ;;  %v362_v45 = vsel %vm1882_vm4, %v286_v33, %v361_v35  ;;  %v1923_v1 = vrot.slane %v273_v60, 7  ;;  %vm1052_vm11 = vcmask 654336  }
  0x1d   : > { %253 = vst.msk [vmem:[#allocation2 + $0x44] sm:$0x1] %vm236_vm1, %v1782_v0  ;;  %v510_v37 = vor.u32 %v509_v31, %v505_v23  ;;  %v365_v49 = vsel %vm1897_vm5, %v287_v34, %v364_v40  ;;  %v367_v53 = vld [vmem:[#allocation2 + $0x28] sm:$0xf]  ;;  %v355_v20 = vld [vmem:[#allocation2 + $0x18] sm:$0xf] }
  0x1e   : > { %254 = vst.msk [vmem:[#allocation2 + $0x48] sm:$0xf] %vm234_vm0, %v1782_v0  ;;  %v370_v54 = vld [vmem:[#allocation2 + $0x2c] sm:$0x1]  ;;  %v368_v61 = vsel %vm1882_vm4, %v294_v55, %v367_v53  ;;  %v278_v8 = vor.u32 %v276_v2, %v1923_v1  ;;  %v232_v57 = vld [vmem:[%s1853_s23 + $0x18] sm:$0xf] }
  0x1f   : > { %255 = vst.msk [vmem:[#allocation2 + $0x4c] sm:$0x1] %vm236_vm1, %v1782_v0  ;;  %560 = vrot.lane.b32.xlu0 %v510_v37, %s1784_s25  ;;  %v373_v46 = vld [vmem:[#allocation2 + $0x30] sm:$0xf]  ;;  %v371_v62 = vsel %vm1897_vm5, %v295_v56, %v370_v54  ;;  %v303_v0 = vrot.slane %v299_v36, 4  ;;  %vm1086_vm12 = vcmask 916480  }
  0x20   : > { %351 = vst [vmem:[#allocation2 + $0x10] sm:$0xf] %v350_v38  ;;  %v374_v52 = vsel %vm1882_vm4, %v302_v43, %v373_v46  ;;  %v376_v3 = vld [vmem:[#allocation2 + $0x34] sm:$0x1]  ;;  %v356_v27 = vsel %vm1882_vm4, %v278_v8, %v355_v20  ;;  %v279_v8 = vrot.slane %v1923_v1, 4  ;;  %s1796_s15 = smov 114  }
  0x21   : > { %342 = vst [vmem:[#allocation2 + $0x8] sm:$0xf] %v341_v42  ;;  %v377_v9 = vsel %vm1897_vm5, %v303_v0, %v376_v3  ;;  %v305_v3 = vshrl.u32 %v232_v57, 16  ;;  %vm1319_vm13 = vcmask 8192   ;;  %vm1366_vm14 = vcmask 15360  }
  0x22   : > { %363 = vst [vmem:[#allocation2 + $0x20] sm:$0xf] %v362_v45  ;;  %vm1368_vm15 = vcmask 31744   ;;  %vm1370_vm0 = vcmask 48128   ;;  %vm1372_vm1 = vcmask 64512   ;;  %vm1374_vm2 = vcmask 80896  }
  0x23   : > { %366 = vst [vmem:[#allocation2 + $0x24] sm:$0x1] %v365_v49  ;;  %vm1376_vm3 = vcmask 97280  }
  0x24   : > { %375 = vst [vmem:[#allocation2 + $0x30] sm:$0xf] %v374_v52 }
  0x25   : > { %369 = vst [vmem:[#allocation2 + $0x28] sm:$0xf] %v368_v61 }
  0x26   : > { %348 = vst [vmem:[#allocation2 + $0xc] sm:$0x1] %v347_v58 }
  0x27   : > { %v416_v4 = vld [vmem:[#allocation2 + $0x10] sm:$0xf]  ;;  %372 = vst [vmem:[#allocation2 + $0x2c] sm:$0x1] %v371_v62 }
  0x28   : > { %v1927_v6 = vunpack.c.l.b16 %v416_v4  ;;  %v415_v7 = vld [vmem:[#allocation2 + $0x8] sm:$0xf]  ;;  %354 = vst [vmem:[#allocation2 + $0x14] sm:$0x1] %v353_v5 }
  0x29   : > { %v632_v10 = vunpack.c.l.b16 %v415_v7  ;;  %v411_v11 = vld [vmem:[#allocation2 + $0x20] sm:$0xe]  ;;  %v431_v16 = vld [vmem:[#allocation2 + $0x8] sm:$0xe]  ;;  %378 = vst [vmem:[#allocation2 + $0x34] sm:$0x1] %v377_v9 }
  0x2a   : > { %v1932_v12 = vld [vmem:[#allocation2 + $0x20] sm:$0xf]  ;;  %v641_v13 = vpack.c.b16 %v1927_v6, %v1927_v6  ;;  %v403_v14 = vld [vmem:[#allocation2 + $0x24] sm:$0x1]  ;;  %v588_v15 = vunpack.c.l.b16 %v411_v11  ;;  %v408_v24 = vld [vmem:[#allocation2 + $0x8] sm:$0xe]  ;;  %v768_v31 = vunpack.c.l.b16 %v431_v16 }
  0x2b   : > { %v640_v17 = vpack.c.b16 %v632_v10, %v632_v10  ;;  %v489_v18 = vunpack.c.l.b16 %v403_v14  ;;  %v420_v19 = vld [vmem:[#allocation2 + $0x30] sm:$0xf]  ;;  %v488_v21 = vunpack.c.l.b16 %v1932_v12  ;;  %v1940_v25 = vld [vmem:[#allocation2 + $0x8] sm:$0xf]  ;;  %357 = vst [vmem:[#allocation2 + $0x18] sm:$0xf] %v356_v27  ;;  %v585_v37 = vunpack.c.l.b16 %v408_v24 }
  0x2c   : > { %650 = vrot.lane.b32.xlu1 %v641_v13, %s1785_s26  ;;  %v1938_v22 = vunpack.c.l.b16 %v420_v19  ;;  %v419_v23 = vld [vmem:[#allocation2 + $0x28] sm:$0xf]  ;;  %v482_v42 = vunpack.c.l.b16 %v1940_v25  ;;  %v308_v7 = vshll.u32 %v232_v57, 16  ;;  %v358_v9 = vld [vmem:[#allocation2 + $0x1c] sm:$0x1] }
  0x2d   : > { %648 = vrot.lane.b32.xlu0 %v640_v17, %s1785_s26  ;;  %v596_v28 = vpack.c.b16 %v489_v18, %v588_v15  ;;  %v636_v29 = vunpack.c.l.b16 %v419_v23  ;;  %v423_v30 = vld [vmem:[#allocation2 + $0xc] sm:$0x1]  ;;  %v412_v35 = vld [vmem:[#allocation2 + $0x28] sm:$0xe]  ;;  %v500_v38 = vpack.c.b16 %v489_v18, %v488_v21  ;;  %v432_v14 = vld [vmem:[#allocation2 + $0x10] sm:$0xe]  ;;  %v359_v20 = vsel %vm1897_vm5, %v279_v8, %v358_v9 }
  0x2e   : > { %v400_v32 = vld [vmem:[#allocation2 + $0xc] sm:$0x1]  ;;  %v672_v33 = vunpack.c.l.b16 %v423_v30  ;;  %v645_v40 = vpack.c.b16 %v1938_v22, %v1938_v22  ;;  %v589_v46 = vunpack.c.l.b16 %v412_v35  ;;  %v1949_v47 = vld [vmem:[#allocation2 + $0x28] sm:$0xf]  ;;  %v307_v15 = vrot.slane %v305_v3, 7 }
  0x2f   : > { %v404_v34 = vld [vmem:[#allocation2 + $0x2c] sm:$0x1]  ;;  %v604_v36 = vrot.slane %v596_v28, 1  ;;  %v483_v41 = vunpack.c.l.b16 %v400_v32  ;;  %v644_v43 = vpack.c.b16 %v636_v29, %v636_v29  ;;  %v535_v49 = vshll.u32 %v500_v38, 16  ;;  %v424_v2 = vld [vmem:[#allocation2 + $0x14] sm:$0x1] }
  0x30   : > { %v776_v44 = vpack.c.b16 %v672_v33, %v768_v31  ;;  %v491_v45 = vunpack.c.l.b16 %v404_v34  ;;  %v680_v50 = vpack.c.b16 %v672_v33, %v632_v10  ;;  %v490_v54 = vunpack.c.l.b16 %v1949_v47  ;;  %v1954_v55 = vld [vmem:[#allocation2 + $0x2c] sm:$0x1]  ;;  %v379_v19 = vld [vmem:[#allocation2 + $0x38] sm:$0xf]  ;;  %360 = vst [vmem:[#allocation2 + $0x1c] sm:$0x1] %v359_v20 }
  0x31   : > { %616 = vrot.lane.b32.xlu2 %v604_v36, %s1783_s24  ;;  %v593_v48 = vpack.c.b16 %v483_v41, %v585_v37  ;;  %v497_v53 = vpack.c.b16 %v483_v41, %v482_v42  ;;  %v533_v56 = vshrl.u32 %v500_v38, 16  ;;  %v537_v59 = vrot.slane %v535_v49, 1  ;;  %v382_v21 = vld [vmem:[#allocation2 + $0x3c] sm:$0x1]  ;;  %v428_v35 = vld [vmem:[#allocation2 + $0x34] sm:$0x1] }
  0x32   : > { %v784_v51 = vrot.slane %v776_v44, 1  ;;  %v597_v52 = vpack.c.b16 %v491_v45, %v589_v46  ;;  %v691_v60 = vshll.u32 %v680_v50, 16  ;;  %v676_v61 = vunpack.c.l.b16 %v1954_v55  ;;  %v440_v42 = vld [vmem:[#allocation2 + $0x10] sm:$0xf]  ;;  %v1974_v44 = vld [vmem:[#allocation2 + $0x14] sm:$0x1] }
  0x33   : > { %v601_v58 = vrot.slane %v593_v48, 1  ;;  %v514_v63 = vshll.u32 %v497_v53, 16  ;;  %v501_v0 = vpack.c.b16 %v491_v45, %v490_v54  ;;  %v689_v4 = vshrl.u32 %v680_v50, 16  ;;  %v1989_v8 = vld [vmem:[#allocation2 + $0x14] sm:$0x1] }
  0x34   : > { %658 = vrot.lane.b32.xlu1 %v645_v40, %s1785_s26  ;;  %v605_v62 = vrot.slane %v597_v52, 1  ;;  %v512_v5 = vshrl.u32 %v497_v53, 16  ;;  %v538_v10 = vor.u32 %v537_v59, %v533_v56  ;;  %v693_v11 = vrot.slane %v691_v60, 1 }
  0x35   : > { %656 = vrot.lane.b32.xlu0 %v644_v43, %s1785_s26  ;;  %v684_v13 = vpack.c.b16 %v676_v61, %v636_v29  ;;  %v516_v16 = vrot.slane %v514_v63, 1  ;;  %v542_v17 = vshll.u32 %v501_v0, 16  ;;  %v673_v18 = vunpack.c.l.b16 %v424_v2 }
  0x36   : > { %v310_v1 = vor.u32 %v308_v7, %v307_v15  ;;  %v769_v23 = vunpack.c.l.b16 %v432_v14  ;;  %v311_v24 = vrot.slane %v307_v15, 4  ;;  %v694_v27 = vor.u32 %v693_v11, %v689_v4  ;;  %v1987_v7 = vld [vmem:[#allocation2 + $0x10] sm:$0xf] }
  0x37   : > { %v540_v28 = vshrl.u32 %v501_v0, 16  ;;  %v719_v30 = vshll.u32 %v684_v13, 16  ;;  %v517_v31 = vor.u32 %v516_v16, %v512_v5  ;;  %v544_v32 = vrot.slane %v542_v17, 1  ;;  %v1984_v3 = vld [vmem:[#allocation2 + $0x1c] sm:$0x1] }
  0x38   : > { %v380_v29 = vsel %vm1882_vm4, %v310_v1, %v379_v19  ;;  %v681_v33 = vpack.c.b16 %v673_v18, %v1927_v6  ;;  %v383_v34 = vsel %vm1897_vm5, %v311_v24, %v382_v21  ;;  %v717_v36 = vshrl.u32 %v684_v13, 16 }
  0x39   : > { %792 = vrot.lane.b32.xlu2 %v784_v51, %s1786_s27  ;;  %381 = vst [vmem:[#allocation2 + $0x38] sm:$0xf] %v380_v29  ;;  %v721_v37 = vrot.slane %v719_v30, 1  ;;  %v545_v38 = vor.u32 %v544_v32, %v540_v28  ;;  %v777_v40 = vpack.c.b16 %v673_v18, %v769_v23  ;;  %v677_v43 = vunpack.c.l.b16 %v428_v35  ;;  %v441_v51 = vld [vmem:[#allocation2 + $0x18] sm:$0xf] }
  0x3a   : > { %384 = vst [vmem:[#allocation2 + $0x3c] sm:$0x1] %v383_v34  ;;  %v698_v41 = vshll.u32 %v681_v33, 16  ;;  %v816_v45 = vunpack.c.l.b16 %v440_v42  ;;  %v856_v46 = vunpack.c.l.b16 %v1974_v44  ;;  %v696_v49 = vshrl.u32 %v681_v33, 16  ;;  %v2003_v23 = vld [vmem:[#allocation2 + $0x34] sm:$0x1] }
  0x3b   : > { %v722_v6 = vor.u32 %v721_v37, %v717_v36  ;;  %v785_v48 = vrot.slane %v777_v40, 1  ;;  %v685_v52 = vpack.c.b16 %v677_v43, %v1938_v22  ;;  %v817_v53 = vunpack.c.l.b16 %v441_v51  ;;  %v435_v22 = vld [vmem:[#allocation2 + $0x28] sm:$0xe]  ;;  %v2015_v40 = vld [vmem:[#allocation2 + $0x18] sm:$0xf] }
  0x3c   : > { %610 = vrot.lane.b32.xlu1 %v601_v58, %s1783_s24  ;;  %v700_v50 = vrot.slane %v698_v41, 1  ;;  %v864_v54 = vpack.c.b16 %v856_v46, %v816_v45  ;;  %v436_v58 = vld [vmem:[#allocation2 + $0x30] sm:$0xe]  ;;  %v772_v11 = vunpack.c.l.b16 %v435_v22  ;;  %v857_v13 = vunpack.c.l.b16 %v1984_v3 }
  0x3d   : > { %618 = vrot.lane.b32.xlu0 %v605_v62, %s1783_s24  ;;  %v726_v57 = vshll.u32 %v685_v52, 16  ;;  %v825_v59 = vpack.c.b16 %v817_v53, %v817_v53  ;;  %v824_v62 = vpack.c.b16 %v816_v45, %v816_v45  ;;  %v724_v63 = vshrl.u32 %v685_v52, 16 }
  0x3e   : > { %v701_v56 = vor.u32 %v700_v50, %v696_v49  ;;  %v875_v60 = vshll.u32 %v864_v54, 16  ;;  %v773_v2 = vunpack.c.l.b16 %v436_v58  ;;  %v873_v4 = vshrl.u32 %v864_v54, 16  ;;  %v409_v50 = vld [vmem:[#allocation2 + $0x10] sm:$0xe] }
  0x3f   : > { %v728_v0 = vrot.slane %v726_v57, 1  ;;  %v484_v16 = vunpack.c.l.b16 %v1987_v7  ;;  %v485_v17 = vunpack.c.l.b16 %v1989_v8  ;;  %v780_v1 = vpack.c.b16 %v676_v61, %v772_v11  ;;  %v2028_v11 = vld [vmem:[#allocation2 + $0x30] sm:$0xf] }
  0x40   : > { %v877_v5 = vrot.slane %v875_v60, 1  ;;  %v445_v15 = vld [vmem:[#allocation2 + $0x38] sm:$0xf]  ;;  %v865_v21 = vpack.c.b16 %v857_v13, %v817_v53  ;;  %v860_v29 = vunpack.c.l.b16 %v2003_v23  ;;  %v486_v52 = vunpack.c.l.b16 %v2015_v40 }
  0x41   : > { %568 = vrot.lane.b32.xlu2 %v538_v10, %s1784_s25  ;;  %v729_v9 = vor.u32 %v728_v0, %v724_v63  ;;  %v781_v10 = vpack.c.b16 %v677_v43, %v773_v2  ;;  %v1993_v14 = vld [vmem:[#allocation2 + $0x3c] sm:$0x1]  ;;  %v821_v24 = vunpack.c.l.b16 %v445_v15  ;;  %v498_v28 = vpack.c.b16 %v485_v17, %v484_v16  ;;  %v2020_v53 = vld [vmem:[#allocation2 + $0x38] sm:$0xf]  ;;  %v405_v15 = vld [vmem:[#allocation2 + $0x34] sm:$0x1] }
  0x42   : > { %v878_v18 = vor.u32 %v877_v5, %v873_v4  ;;  %v861_v19 = vunpack.c.l.b16 %v1993_v14  ;;  %v788_v55 = vrot.slane %v780_v1, 1  ;;  %v880_v37 = vshrl.u32 %v865_v21, 16  ;;  %v402_v43 = vld [vmem:[#allocation2 + $0x1c] sm:$0x1]  ;;  %v385_v1 = vld [vmem:[#allocation2 + $0x40] sm:$0xf] }
  0x43   : > { %v789_v20 = vrot.slane %v781_v10, 1  ;;  %v521_v32 = vshll.u32 %v498_v28, 16  ;;  %v829_v33 = vpack.c.b16 %v821_v24, %v821_v24  ;;  %v519_v41 = vshrl.u32 %v498_v28, 16  ;;  %v2022_v54 = vld [vmem:[#allocation2 + $0x3c] sm:$0x1] }
  0x44   : > { %744 = vrot.lane.b32.xlu1 %v694_v27, %s1787_s28  ;;  %v444_v27 = vld [vmem:[#allocation2 + $0x30] sm:$0xf]  ;;  %v869_v30 = vpack.c.b16 %v861_v19, %v821_v24  ;;  %v494_v63 = vunpack.c.l.b16 %v2020_v53  ;;  %v495_v0 = vunpack.c.l.b16 %v2022_v54 }
  0x45   : > { %562 = vrot.lane.b32.xlu0 %v517_v31, %s1784_s25  ;;  %v820_v61 = vunpack.c.l.b16 %v444_v27  ;;  %v882_v31 = vshll.u32 %v865_v21, 16  ;;  %v523_v42 = vrot.slane %v521_v32, 1  ;;  %v388_v21 = vld [vmem:[#allocation2 + $0x44] sm:$0x1]  ;;  %v493_v32 = vunpack.c.l.b16 %v405_v15 }
  0x46   : > { %v910_v34 = vshll.u32 %v869_v30, 16  ;;  %v908_v45 = vshrl.u32 %v869_v30, 16  ;;  %v503_v27 = vpack.c.b16 %v495_v0, %v494_v63 }
  0x47   : > { %v868_v35 = vpack.c.b16 %v860_v29, %v820_v61  ;;  %v828_v36 = vpack.c.b16 %v820_v61, %v820_v61  ;;  %v524_v58 = vor.u32 %v523_v42, %v519_v41  ;;  %v414_v42 = vld [vmem:[#allocation2 + $0x38] sm:$0xe] }
  0x49   : > { %570 = vrot.lane.b32.xlu2 %v545_v38, %s1784_s25  ;;  %v884_v38 = vrot.slane %v882_v31, 1  ;;  %v903_v49 = vshll.u32 %v868_v35, 16  ;;  %v901_v5 = vshrl.u32 %v868_v35, 16  ;;  %v492_v31 = vunpack.c.l.b16 %v2028_v11 }
  0x4b   : > { %v885_v51 = vor.u32 %v884_v38, %v880_v37  ;;  %v554_v37 = vshrl.u32 %v503_v27, 16 }
  0x4c   : > { %752 = vrot.lane.b32.xlu1 %v722_v6, %s1787_s28  ;;  %v410_v6 = vld [vmem:[#allocation2 + $0x18] sm:$0xe] }
  0x4d   : > { %794 = vrot.lane.b32.xlu0 %v785_v48, %s1786_s27  ;;  %v912_v48 = vrot.slane %v910_v34, 1  ;;  %v587_v60 = vunpack.c.l.b16 %v410_v6  ;;  %v556_v34 = vshll.u32 %v503_v27, 16  ;;  %v413_v6 = vld [vmem:[#allocation2 + $0x30] sm:$0xe] }
  0x4f   : > { %v913_v4 = vor.u32 %v912_v48, %v908_v45  ;;  %v558_v38 = vrot.slane %v556_v34, 1  ;;  %v418_v45 = vld [vmem:[#allocation2 + $0x20] sm:$0xf]  ;;  %v426_v48 = vld [vmem:[#allocation2 + $0x24] sm:$0x1] }
  0x51   : > { %746 = vrot.lane.b32.xlu2 %v701_v56, %s1787_s28  ;;  %v233_v56 = vld [vmem:[%s1853_s23 + $0x1c] sm:$0xf] }
  0x52   : > { %v313_v57 = vshrl.u32 %v233_v56, 16  ;;  %v316_v22 = vshll.u32 %v233_v56, 16 }
  0x54   : > { %834 = vrot.lane.b32.xlu1 %v825_v59, %s1788_s29  ;;  %v487_v59 = vunpack.c.l.b16 %v402_v43  ;;  %v315_v2 = vrot.slane %v313_v57, 7  ;;  %v635_v57 = vunpack.c.l.b16 %v418_v45 }
  0x55   : > { %832 = vrot.lane.b32.xlu0 %v824_v62, %s1788_s29  ;;  %v586_v62 = vunpack.c.l.b16 %v409_v50  ;;  %v559_v50 = vor.u32 %v558_v38, %v554_v37 }
  0x56   : > { %v499_v10 = vpack.c.b16 %v487_v59, %v486_v52  ;;  %v318_v16 = vor.u32 %v316_v22, %v315_v2  ;;  %v590_v52 = vunpack.c.l.b16 %v413_v6  ;;  %v442_v6 = vld [vmem:[#allocation2 + $0x20] sm:$0xf] }
  0x57   : > { %v594_v24 = vpack.c.b16 %v485_v17, %v586_v62  ;;  %v417_v17 = vld [vmem:[#allocation2 + $0x18] sm:$0xf] }
  0x58   : > { %v386_v28 = vsel %vm1882_vm4, %v318_v16, %v385_v1  ;;  %v528_v61 = vshll.u32 %v499_v10, 16  ;;  %v526_v26 = vshrl.u32 %v499_v10, 16  ;;  %v634_v39 = vunpack.c.l.b16 %v417_v17  ;;  %v429_v17 = vld [vmem:[#allocation2 + $0x3c] sm:$0x1] }
  0x59   : > { %754 = vrot.lane.b32.xlu2 %v729_v9, %s1787_s28  ;;  %v905_v9 = vrot.slane %v903_v49, 1  ;;  %387 = vst [vmem:[#allocation2 + $0x40] sm:$0xf] %v386_v28  ;;  %v602_v8 = vrot.slane %v594_v24, 1  ;;  %v598_v63 = vpack.c.b16 %v493_v32, %v590_v52  ;;  %v433_v28 = vld [vmem:[#allocation2 + $0x18] sm:$0xe]  ;;  %v678_v38 = vunpack.c.l.b16 %v429_v17 }
  0x5a   : > { %v530_v35 = vrot.slane %v528_v61, 1  ;;  %v642_v49 = vpack.c.b16 %v634_v39, %v634_v39  ;;  %vm1378_vm4 = vcmask 113664  }
  0x5c   : > { %928 = vrot.lane.b32.xlu1 %v878_v18, %s1789_s30  ;;  %v319_v18 = vrot.slane %v315_v2, 4  ;;  %v531_v41 = vor.u32 %v530_v35, %v526_v26 }
  0x5d   : > { %802 = vrot.lane.b32.xlu0 %v789_v20, %s1786_s27  ;;  %v595_v20 = vpack.c.b16 %v487_v59, %v587_v60  ;;  %v425_v59 = vld [vmem:[#allocation2 + $0x1c] sm:$0x1] }
  0x5e   : > { %v389_v30 = vsel %vm1897_vm5, %v319_v18, %v388_v21  ;;  %v674_v22 = vunpack.c.l.b16 %v425_v59 }
  0x5f   : > { %390 = vst [vmem:[#allocation2 + $0x44] sm:$0x1] %v389_v30 }
  0x60   : > { %v682_v15 = vpack.c.b16 %v674_v22, %v634_v39  ;;  %v422_v24 = vld [vmem:[#allocation2 + $0x40] sm:$0xf] }
  0x61   : > { %800 = vrot.lane.b32.xlu2 %v788_v55, %s1786_s27  ;;  %v906_v55 = vor.u32 %v905_v9, %v901_v5  ;;  %v606_v5 = vrot.slane %v598_v63, 1  ;;  %v421_v9 = vld [vmem:[#allocation2 + $0x38] sm:$0xf]  ;;  %v639_v61 = vunpack.c.l.b16 %v422_v24  ;;  %v2065_v63 = vld [vmem:[#allocation2 + $0x2c] sm:$0x1] }
  0x62   : > { %v638_v16 = vunpack.c.l.b16 %v421_v9  ;;  %v705_v21 = vshll.u32 %v682_v15, 16 }
  0x64   : > { %842 = vrot.lane.b32.xlu1 %v829_v33, %s1788_s29  ;;  %v603_v33 = vrot.slane %v595_v20, 1  ;;  %v434_v20 = vld [vmem:[#allocation2 + $0x20] sm:$0xe]  ;;  %v646_v30 = vpack.c.b16 %v638_v16, %v638_v16  ;;  %v707_v34 = vrot.slane %v705_v21, 1  ;;  %v686_v45 = vpack.c.b16 %v678_v38, %v638_v16 }
  0x65   : > { %840 = vrot.lane.b32.xlu0 %v828_v36, %s1788_s29  ;;  %v502_v36 = vpack.c.b16 %v493_v32, %v492_v31  ;;  %v859_v16 = vunpack.c.l.b16 %v2065_v63 }
  0x66   : > { %v430_v27 = vld [vmem:[#allocation2 + $0x44] sm:$0x1]  ;;  %v733_v59 = vshll.u32 %v686_v45, 16  ;;  %v731_v9 = vshrl.u32 %v686_v45, 16 }
  0x67   : > { %v549_v43 = vshll.u32 %v502_v36, 16  ;;  %v547_v54 = vshrl.u32 %v502_v36, 16  ;;  %v679_v31 = vunpack.c.l.b16 %v430_v27 }
  0x69   : > { %930 = vrot.lane.b32.xlu2 %v885_v51, %s1789_s30  ;;  %v591_v51 = vunpack.c.l.b16 %v414_v42  ;;  %v551_v56 = vrot.slane %v549_v43, 1  ;;  %v687_v36 = vpack.c.b16 %v679_v31, %v639_v61 }
  0x6b   : > { %v599_v60 = vpack.c.b16 %v495_v0, %v591_v51  ;;  %v552_v62 = vor.u32 %v551_v56, %v547_v54  ;;  %v643_v0 = vpack.c.b16 %v635_v57, %v635_v57  ;;  %v740_v42 = vshll.u32 %v687_v36, 16  ;;  %v1735_v54 = vld [vmem:[%s2450_s1 + $0x38] sm:$0xff] }
  0x6c   : > { %564 = vrot.lane.b32.xlu1 %v524_v58, %s1784_s25  ;;  %v675_v58 = vunpack.c.l.b16 %v426_v48  ;;  %v738_v51 = vshrl.u32 %v687_v36, 16  ;;  %1227 = vmatpush.bf16.msra.mxu0 %v1735_v54  ;;  %v1732_v36 = vld [vmem:[%s2450_s1 + $0x20] sm:$0xff] }
  0x6d   : > { %938 = vrot.lane.b32.xlu0 %v913_v4, %s1789_s30  ;;  %v607_v4 = vrot.slane %v599_v60, 1  ;;  %v742_v52 = vrot.slane %v740_v42, 1  ;;  %v437_v60 = vld [vmem:[#allocation2 + $0x38] sm:$0xe]  ;;  %1737 = vmatpush.bf16.msra.mxu2 %v1735_v54 }
  0x6e   : > { %v683_v2 = vpack.c.b16 %v675_v58, %v635_v57  ;;  %v647_v57 = vpack.c.b16 %v639_v61, %v639_v61 }
  0x70   : > { %v712_v10 = vshll.u32 %v683_v2, 16  ;;  %v710_v18 = vshrl.u32 %v683_v2, 16 }
  0x71   : > { %936 = vrot.lane.b32.xlu2 %v906_v55, %s1789_s30  ;;  %v771_v55 = vunpack.c.l.b16 %v434_v20  ;;  %v2072_v20 = vld [vmem:[#allocation2 + $0x24] sm:$0x1] }
  0x72   : > { %v714_v1 = vrot.slane %v712_v10, 1  ;;  %v735_v10 = vrot.slane %v733_v59, 1  ;;  %v858_v61 = vunpack.c.l.b16 %v2072_v20 }
  0x73   : > { %v779_v35 = vpack.c.b16 %v675_v58, %v771_v55  ;;  %v438_v58 = vld [vmem:[#allocation2 + $0x40] sm:$0xe]  ;;  %v2083_v55 = vld [vmem:[#allocation2 + $0x4c] sm:$0x1] }
  0x74   : > { %614 = vrot.lane.b32.xlu1 %v603_v33, %s1783_s24  ;;  %v715_v32 = vor.u32 %v714_v1, %v710_v18  ;;  %v703_v33 = vshrl.u32 %v682_v15, 16  ;;  %v1734_v18 = vld [vmem:[%s2450_s1 + $0x30] sm:$0xff]  ;;  %v1733_v1 = vld [vmem:[%s2450_s1 + $0x28] sm:$0xff]  ;;  %v736_v24 = vor.u32 %v735_v10, %v731_v9 }
  0x75   : > { %612 = vrot.lane.b32.xlu0 %v602_v8, %s1783_s24  ;;  %v770_v8 = vunpack.c.l.b16 %v433_v28  ;;  %1228 = vmatpush.bf16.msra.mxu0 %v1734_v18  ;;  %v1730_v9 = vld [vmem:[%s2450_s1 + $0x10] sm:$0xff] }
  0x76   : > { %v708_v39 = vor.u32 %v707_v34, %v703_v33  ;;  %1738 = vmatpush.bf16.msra.mxu2 %v1734_v18  ;;  %v2088_v33 = vld [vmem:[#allocation2 + $0x44] sm:$0x1] }
  0x77   : > { %v778_v37 = vpack.c.b16 %v674_v22, %v770_v8  ;;  %v743_v22 = vor.u32 %v742_v52, %v738_v51  ;;  %v446_v8 = vld [vmem:[#allocation2 + $0x40] sm:$0xf] }
  0x79   : > { %566 = vrot.lane.b32.xlu2 %v531_v41, %s1784_s25  ;;  %v787_v41 = vrot.slane %v779_v35, 1  ;;  %v786_v43 = vrot.slane %v778_v37, 1  ;;  %1229 = vmatpush.bf16.msra.mxu0 %v1733_v1  ;;  %v863_v35 = vunpack.c.l.b16 %v2083_v55 }
  0x7a   : > { %1739 = vmatpush.bf16.msra.mxu2 %v1733_v1 }
  0x7c   : > { %652 = vrot.lane.b32.xlu1 %v642_v49, %s1785_s26 }
  0x7d   : > { %574 = vrot.lane.b32.xlu0 %v559_v50, %s1784_s25  ;;  %v818_v50 = vunpack.c.l.b16 %v442_v6  ;;  %1230 = vmatpush.bf16.msra.mxu0 %v1732_v36  ;;  %v1731_v6 = vld [vmem:[%s2450_s1 + $0x18] sm:$0xff] }
  0x7e   : > { %1740 = vmatpush.bf16.msra.mxu2 %v1732_v36 }
  0x7f   : > { %v826_v2 = vpack.c.b16 %v818_v50, %v818_v50 }
  0x81   : > { %572 = vrot.lane.b32.xlu2 %v552_v62, %s1784_s25  ;;  %v443_v62 = vld [vmem:[#allocation2 + $0x28] sm:$0xf]  ;;  %1231 = vmatpush.bf16.msra.mxu0 %v1731_v6 }
  0x82   : > { %v819_v15 = vunpack.c.l.b16 %v443_v62  ;;  %1741 = vmatpush.bf16.msra.mxu2 %v1731_v6 }
  0x84   : > { %622 = vrot.lane.b32.xlu1 %v607_v4, %s1783_s24  ;;  %v775_v4 = vunpack.c.l.b16 %v438_v58  ;;  %v867_v28 = vpack.c.b16 %v859_v16, %v819_v15 }
  0x85   : > { %620 = vrot.lane.b32.xlu0 %v606_v5, %s1783_s24  ;;  %v774_v5 = vunpack.c.l.b16 %v437_v60  ;;  %1232 = vmatpush.bf16.msra.mxu0 %v1730_v9 }
  0x86   : > { %v783_v21 = vpack.c.b16 %v679_v31, %v775_v4  ;;  %v896_v37 = vshll.u32 %v867_v28, 16  ;;  %v894_v45 = vshrl.u32 %v867_v28, 16  ;;  %1742 = vmatpush.bf16.msra.mxu2 %v1730_v9  ;;  %v456_v28 = vld [vmem:[#allocation2 + $0x10] sm:$0xe] }
  0x87   : > { %v782_v27 = vpack.c.b16 %v678_v38, %v774_v5  ;;  %v866_v38 = vpack.c.b16 %v858_v61, %v818_v50  ;;  %v827_v50 = vpack.c.b16 %v819_v15, %v819_v15  ;;  %v1729_v15 = vld [vmem:[%s2450_s1 + $0x8] sm:$0xff] }
  0x88   : > { %v791_v31 = vrot.slane %v783_v21, 1  ;;  %v898_v52 = vrot.slane %v896_v37, 1  ;;  %v459_v37 = vld [vmem:[#allocation2 + $0x28] sm:$0xe] }
  0x89   : > { %654 = vrot.lane.b32.xlu2 %v643_v0, %s1785_s26  ;;  %v889_v54 = vshll.u32 %v866_v38, 16  ;;  %1233 = vmatpush.bf16.msra.mxu0 %v1729_v15  ;;  %v955_v6 = vunpack.c.l.b16 %v459_v37 }
  0x8a   : > { %1743 = vmatpush.bf16.msra.mxu2 %v1729_v15 }
  0x8b   : > { %v2049_v26 = vpop.permute.xlu2 %616  ;;  %v891_v4 = vrot.slane %v889_v54, 1 }
  0x8c   : > { %660 = vrot.lane.b32.xlu1 %v646_v30, %s1785_s26  ;;  %v447_v30 = vld [vmem:[#allocation2 + $0x48] sm:$0xf] }
  0x8d   : > { %750 = vrot.lane.b32.xlu0 %v715_v32, %s1787_s28  ;;  %v2057_v49 = vpop.permute.xlu1 %608  ;;  %v2092_v17 = vunpack.c.l.b16 %v447_v30  ;;  %v457_v30 = vld [vmem:[#allocation2 + $0x18] sm:$0xe] }
  0x8e   : > { %v953_v36 = vunpack.c.l.b16 %v457_v30 }
  0x8f   : > { %v871_v51 = vpack.c.b16 %v863_v35, %v2092_v17  ;;  %v831_v63 = vpack.c.b16 %v2092_v17, %v2092_v17 }
  0x90   : > { %v961_v54 = vpack.c.b16 %v857_v13, %v953_v36 }
  0x91   : > { %748 = vrot.lane.b32.xlu2 %v708_v39, %s1787_s28  ;;  %v2063_v56 = vpop.permute.xlu0 %560  ;;  %v790_v39 = vrot.slane %v782_v27, 1  ;;  %v924_v62 = vshll.u32 %v871_v51, 16  ;;  %v922_v18 = vshrl.u32 %v871_v51, 16  ;;  %v1728_v51 = vld [vmem:[%s2450_s1] sm:$0xff] }
  0x92   : > { %1234 = vmatpush.bf16.msra.mxu0 %v1728_v51  ;;  %1744 = vmatpush.bf16.msra.mxu2 %v1728_v51 }
  0x93   : > { %v2054_v48 = vpop.permute.xlu2 %792  ;;  %v926_v1 = vrot.slane %v924_v62, 1  ;;  %v963_v62 = vpack.c.b16 %v859_v16, %v955_v6 }
  0x94   : > { %798 = vrot.lane.b32.xlu1 %v787_v41, %s1786_s27  ;;  %v862_v41 = vunpack.c.l.b16 %v2088_v33 }
  0x95   : > { %796 = vrot.lane.b32.xlu0 %v786_v43, %s1786_s27  ;;  %v822_v43 = vunpack.c.l.b16 %v446_v8  ;;  %v952_v8 = vunpack.c.l.b16 %v456_v28 }
  0x97   : > { %v830_v60 = vpack.c.b16 %v822_v43, %v822_v43 }
  0x99   : > { %662 = vrot.lane.b32.xlu2 %v647_v57, %s1785_s26  ;;  %v870_v57 = vpack.c.b16 %v862_v41, %v822_v43 }
  0x9b   : > { %v2074_v0 = vpop.permute.xlu2 %568  ;;  %v917_v5 = vshll.u32 %v870_v57, 16 }
  0x9c   : > { %836 = vrot.lane.b32.xlu1 %v826_v2, %s1788_s29  ;;  %v899_v2 = vor.u32 %v898_v52, %v894_v45  ;;  %v927_v45 = vor.u32 %v926_v1, %v922_v18  ;;  %v960_v52 = vpack.c.b16 %v856_v46, %v952_v8  ;;  %v971_v46 = vrot.slane %v963_v62, 1 }
  0x9d   : > { %758 = vrot.lane.b32.xlu0 %v743_v22, %s1787_s28  ;;  %v887_v22 = vshrl.u32 %v866_v38, 16  ;;  %v919_v27 = vrot.slane %v917_v5, 1 }
  0x9e   : > { %v2086_v32 = vpop.permute.xlu1 %650  ;;  %v1118_v20 = vunpack.c.l.b16 %v971_v46 }
  0x9f   : > { %v2090_v34 = vpop.permute.xlu0 %648  ;;  %v892_v21 = vor.u32 %v891_v4, %v887_v22  ;;  %v969_v22 = vrot.slane %v961_v54, 1 }
  0xa1   : > { %756 = vrot.lane.b32.xlu2 %v736_v24, %s1787_s28  ;;  %v915_v24 = vshrl.u32 %v870_v57, 16  ;;  %v1114_v13 = vunpack.c.l.b16 %v969_v22 }
  0xa3   : > { %v2102_v42 = vpop.permute.xlu2 %570  ;;  %v920_v57 = vor.u32 %v919_v27, %v915_v24  ;;  %v461_v24 = vld [vmem:[#allocation2 + $0x38] sm:$0xe] }
  0xa4   : > { %806 = vrot.lane.b32.xlu1 %v791_v31, %s1786_s27  ;;  %v957_v30 = vunpack.c.l.b16 %v461_v24 }
  0xa5   : > { %804 = vrot.lane.b32.xlu0 %v790_v39, %s1786_s27  ;;  %v458_v39 = vld [vmem:[#allocation2 + $0x20] sm:$0xe] }
  0xa6   : > { %v2114_v58 = vpop.permute.xlu1 %658  ;;  %v954_v43 = vunpack.c.l.b16 %v458_v39  ;;  %v965_v36 = vpack.c.b16 %v861_v19, %v957_v30 }
  0xa7   : > { %v2116_v59 = vpop.permute.xlu0 %656 }
  0xa8   : > { %v973_v6 = vrot.slane %v965_v36, 1 }
  0xa9   : > { %838 = vrot.lane.b32.xlu2 %v827_v50, %s1788_s29  ;;  %v1736_v50 = vld [vmem:[%s2450_s1 + $0x40] sm:$0xff] }
  0xaa   : > { %1263 = vmatpush.bf16.msra.mxu1 %v1736_v50  ;;  %1745 = vmatpush.bf16.msra.mxu3 %v1736_v50 }
  0xab   : > { %v2122_v10 = vpop.permute.xlu2 %746 }
  0xac   : > { %844 = vrot.lane.b32.xlu1 %v830_v60, %s1788_s29  ;;  %v962_v60 = vpack.c.b16 %v858_v61, %v954_v43 }
  0xad   : > { %934 = vrot.lane.b32.xlu0 %v899_v2, %s1789_s30  ;;  %v968_v2 = vrot.slane %v960_v52, 1  ;;  %v1122_v52 = vunpack.c.l.b16 %v973_v6 }
  0xae   : > { %v611_v31 = vpop.permute.xlu1 %610  ;;  %v970_v44 = vrot.slane %v962_v60, 1 }
  0xaf   : > { %v2129_v38 = vpop.permute.xlu0 %618  ;;  %v1112_v3 = vunpack.c.l.b16 %v968_v2 }
  0xb0   : > { %v1116_v16 = vunpack.c.l.b16 %v970_v44 }
  0xb1   : > { %932 = vrot.lane.b32.xlu2 %v892_v21, %s1789_s30  ;;  %v1150_v5 = vpack.c.b16 %v1114_v13, %v1112_v3  ;;  %v460_v21 = vld [vmem:[#allocation2 + $0x30] sm:$0xe]  ;;  %v991_v3 = vsel %vm976_vm6, %v1932_v12, %v2074_v0 }
  0xb2   : > { %v1152_v15 = vpack.c.b16 %v1118_v20, %v1116_v16  ;;  %v956_v28 = vunpack.c.l.b16 %v460_v21  ;;  %v994_v16 = vsel %vm976_vm6, %v1949_v47, %v2102_v42 }
  0xb3   : > { %v2146_v4 = vpop.permute.xlu2 %754  ;;  %1712 = vmatmul.msk.bf16.vlgmr.msra.gmra.mxu1 %vm976_vm6, %v1150_v5  ;;  %v1013_v5 = vsel %vm1001_vm7, %v994_v16, %v2129_v38 }
  0xb4   : > { %942 = vrot.lane.b32.xlu1 %v927_v45, %s1789_s30  ;;  %1713 = vmatmul.msk.bf16.vlgmr.msra.gmra.mxu3 %vm976_vm6, %v1152_v15  ;;  %v964_v8 = vpack.c.b16 %v860_v29, %v956_v28  ;;  %v1773_v45 = vld [vmem:[#allocation2] sm:$0xf]  ;;  %v1030_v0 = vsel %vm1018_vm8, %v1013_v5, %v2114_v58 }
  0xb5   : > { %940 = vrot.lane.b32.xlu0 %v920_v57, %s1789_s30 }
  0xb6   : > { %v745_v61 = vpop.permute.xlu1 %744  ;;  %v972_v43 = vrot.slane %v964_v8, 1 }
  0xb7   : > { %v563_v9 = vpop.permute.xlu0 %562 }
  0xb8   : > { %v982_v17 = vsel %vm976_vm6, %v1940_v25, %v563_v9  ;;  %v979_v25 = vsel %vm976_vm6, %v1773_v45, %v2063_v56  ;;  %v1120_v50 = vunpack.c.l.b16 %v972_v43 }
  0xb9   : > { %846 = vrot.lane.b32.xlu2 %v831_v63, %s1788_s29  ;;  %v1005_v39 = vsel %vm1001_vm7, %v982_v17, %v611_v31  ;;  %v1003_v29 = vsel %vm1001_vm7, %v979_v25, %v2057_v49  ;;  %v462_v25 = vld [vmem:[#allocation2 + $0x40] sm:$0xe] }
  0xba   : > { %v1022_v51 = vsel %vm1018_vm8, %v1005_v39, %v2086_v32  ;;  %v1154_v19 = vpack.c.b16 %v1122_v52, %v1120_v50  ;;  %v1020_v56 = vsel %vm1018_vm8, %v1003_v29, %v2090_v34  ;;  %v958_v52 = vunpack.c.l.b16 %v462_v25 }
  0xbb   : > { %v801_v18 = vpop.permute.xlu2 %800  ;;  %v1039_v31 = vsel %vm1035_vm9, %v1022_v51, %v2122_v10  ;;  %v1037_v32 = vsel %vm1035_vm9, %v1020_v56, %v745_v61  ;;  %v463_v51 = vld [vmem:[#allocation2 + $0x48] sm:$0xe] }
  0xbc   : > { %v1054_v49 = vsel %vm1052_vm11, %v1037_v32, %v2054_v48  ;;  %v1011_v48 = vsel %vm1001_vm7, %v991_v3, %v2049_v26  ;;  %v1047_v26 = vsel %vm1035_vm9, %v1030_v0, %v2146_v4 }
  0xbd   : > { %v1028_v20 = vsel %vm1018_vm8, %v1011_v48, %v2116_v59 }
  0xbe   : > { %v753_v1 = vpop.permute.xlu1 %752 }
  0xbf   : > { %v795_v27 = vpop.permute.xlu0 %794  ;;  %v1045_v9 = vsel %vm1035_vm9, %v1028_v20, %v753_v1 }
  0xc0   : > { %v1056_v54 = vsel %vm1052_vm11, %v1039_v31, %v795_v27  ;;  %v1062_v15 = vsel %vm1052_vm11, %v1045_v9, %v801_v18 }
  0xc3   : > { %v931_v37 = vpop.permute.xlu2 %930 }
  0xc4   : > { %1714 = vmatmul.msk.bf16.gmra.mxu3 %vm976_vm6, %v1154_v19 }
  0xc6   : > { %v835_v23 = vpop.permute.xlu1 %834 }
  0xc7   : > { %v833_v14 = vpop.permute.xlu0 %832  ;;  %v1073_v57 = vsel %vm1069_vm10, %v1056_v54, %v835_v23  ;;  %v959_v23 = vunpack.c.l.b16 %v463_v51 }
  0xc8   : > { %v1090_v62 = vsel %vm1086_vm12, %v1073_v57, %v931_v37  ;;  %v1071_v10 = vsel %vm1069_vm10, %v1054_v49, %v833_v14  ;;  %v966_v14 = vpack.c.b16 %v862_v41, %v958_v52  ;;  %v1769_v52 = vld [vmem:[%s2451_s2] ss:$0 sm:$0xff] }
  0xc9   : > { %v1113_v44 = vunpack.c.l.b16 %v1090_v62  ;;  %v967_v19 = vpack.c.b16 %v863_v35, %v959_v23 }
  0xca   : > { %v974_v29 = vrot.slane %v966_v14, 1 }
  0xcb   : > { %v937_v60 = vpop.permute.xlu2 %936  ;;  %v975_v31 = vrot.slane %v967_v19, 1 }
  0xcc   : > { %v1124_v54 = vunpack.c.l.b16 %v974_v29 }
  0xcd   : > { %v1126_v32 = vunpack.c.l.b16 %v975_v31 }
  0xce   : > { %v929_v2 = vpop.permute.xlu1 %928 }
  0xcf   : > { %v1088_v34 = vsel %vm1086_vm12, %v1071_v10, %v929_v2  ;;  %v803_v22 = vpop.permute.xlu0 %802  ;;  %v1156_v62 = vpack.c.b16 %v1126_v32, %v1124_v54 }
  0xd0   : > { %v1111_v46 = vunpack.c.l.b16 %v1088_v34  ;;  %v1064_v59 = vsel %vm1052_vm11, %v1047_v26, %v803_v22 }
  0xd2   : > { %v1149_v13 = vpack.c.b16 %v1113_v44, %v1111_v46 }
  0xd3   : > { %v567_v63 = vpop.permute.xlu2 %566 }
  0xd4   : > { %1235 = vmatmul.bf16.vlgmr.msra.gmra.mxu0 %v1149_v13  ;;  %1715 = vmatmul.msk.bf16.gmra.mxu3 %vm976_vm6, %v1156_v62  ;;  %v988_v33 = vsel %vm976_vm6, %v2015_v40, %v567_v63 }
  0xd6   : > { %v843_v61 = vpop.permute.xlu1 %842 }
  0xd7   : > { %v841_v12 = vpop.permute.xlu0 %840  ;;  %v1081_v38 = vsel %vm1069_vm10, %v1064_v59, %v843_v61 }
  0xd8   : > { %v1079_v47 = vsel %vm1069_vm10, %v1062_v15, %v841_v12 }
  0xd9   : > { %v1096_v24 = vsel %vm1086_vm12, %v1079_v47, %v937_v60 }
  0xda   : > { %v1119_v58 = vunpack.c.l.b16 %v1096_v24 }
  0xdb   : > { %v573_v42 = vpop.permute.xlu2 %572 }
  0xdc   : > { %v997_v0 = vsel %vm976_vm6, %v2028_v11, %v573_v42 }
  0xde   : > { %v565_v21 = vpop.permute.xlu1 %564 }
  0xdf   : > { %v939_v1 = vpop.permute.xlu0 %938  ;;  %v985_v55 = vsel %vm976_vm6, %v1987_v7, %v565_v21 }
  0xe0   : > { %v1098_v17 = vsel %vm1086_vm12, %v1081_v38, %v939_v1 }
  0xe1   : > { %v1121_v27 = vunpack.c.l.b16 %v1098_v17 }
  0xe3   : > { %v1153_v28 = vpack.c.b16 %v1121_v27, %v1119_v58  ;;  %v655_v30 = vpop.permute.xlu2 %654 }
  0xe5   : > { %1245 = vmatmul.bf16.vlgmr.msra.gmra.mxu2 %v1153_v28 }
  0xe6   : > { %v615_v18 = vpop.permute.xlu1 %614 }
  0xe7   : > { %v613_v8 = vpop.permute.xlu0 %612  ;;  %v1009_v22 = vsel %vm1001_vm7, %v988_v33, %v615_v18 }
  0xe8   : > { %v1007_v35 = vsel %vm1001_vm7, %v985_v55, %v613_v8  ;;  %v1026_v13 = vsel %vm1018_vm8, %v1009_v22, %v655_v30 }
  0xeb   : > { %v749_v39 = vpop.permute.xlu2 %748 }
  0xee   : > { %v653_v36 = vpop.permute.xlu1 %652 }
  0xef   : > { %v575_v4 = vpop.permute.xlu0 %574  ;;  %v1024_v41 = vsel %vm1018_vm8, %v1007_v35, %v653_v36 }
  0xf0   : > { %v1041_v46 = vsel %vm1035_vm9, %v1024_v41, %v749_v39  ;;  %v1000_v48 = vsel %vm976_vm6, %v2020_v53, %v575_v4 }
  0xf3   : > { %v663_v6 = vpop.permute.xlu2 %662 }
  0xf6   : > { %v623_v37 = vpop.permute.xlu1 %622 }
  0xf7   : > { %v621_v43 = vpop.permute.xlu0 %620  ;;  %v1017_v20 = vsel %vm1001_vm7, %v1000_v48, %v623_v37 }
  0xf8   : > { %v1034_v47 = vsel %vm1018_vm8, %v1017_v20, %v663_v6  ;;  %v1015_v26 = vsel %vm1001_vm7, %v997_v0, %v621_v43 }
  0xfb   : > { %v757_v56 = vpop.permute.xlu2 %756 }
  0xfe   : > { %v661_v45 = vpop.permute.xlu1 %660 }
  0xff   : > { %v751_v50 = vpop.permute.xlu0 %750  ;;  %v1032_v53 = vsel %vm1018_vm8, %v1015_v26, %v661_v45 }
 0x100   : > { %v1043_v40 = vsel %vm1035_vm9, %v1026_v13, %v751_v50  ;;  %v1049_v27 = vsel %vm1035_vm9, %v1032_v53, %v757_v56 }
 0x103   : > { %v839_v10 = vpop.permute.xlu2 %838 }
 0x106   : > { %v799_v57 = vpop.permute.xlu1 %798 }
 0x107   : > { %v797_v60 = vpop.permute.xlu0 %796  ;;  %v1060_v7 = vsel %vm1052_vm11, %v1043_v40, %v799_v57 }
 0x108   : > { %v1058_v16 = vsel %vm1052_vm11, %v1041_v46, %v797_v60  ;;  %v1077_v9 = vsel %vm1069_vm10, %v1060_v7, %v839_v10 }
 0x10b   : > { %v933_v3 = vpop.permute.xlu2 %932 }
 0x10e   : > { %v837_v49 = vpop.permute.xlu1 %836 }
 0x10f   : > { %v759_v2 = vpop.permute.xlu0 %758  ;;  %v1075_v63 = vsel %vm1069_vm10, %v1058_v16, %v837_v49 }
 0x110   : > { %v1092_v61 = vsel %vm1086_vm12, %v1075_v63, %v933_v3  ;;  %v1051_v24 = vsel %vm1035_vm9, %v1034_v47, %v759_v2 }
 0x111   : > { %v1115_v59 = vunpack.c.l.b16 %v1092_v61 }
 0x113   : > { %v847_v1 = vpop.permute.xlu2 %846 }
 0x116   : > { %v807_v34 = vpop.permute.xlu1 %806 }
 0x117   : > { %v805_v44 = vpop.permute.xlu0 %804  ;;  %v1068_v38 = vsel %vm1052_vm11, %v1051_v24, %v807_v34 }
 0x118   : > { %v1085_v11 = vsel %vm1069_vm10, %v1068_v38, %v847_v1  ;;  %v1066_v42 = vsel %vm1052_vm11, %v1049_v27, %v805_v44 }
 0x11e   : > { %v845_v5 = vpop.permute.xlu1 %844 }
 0x11f   : > { %v935_v12 = vpop.permute.xlu0 %934  ;;  %v1083_v28 = vsel %vm1069_vm10, %v1066_v42, %v845_v5 }
 0x120   : > { %v1094_v15 = vsel %vm1086_vm12, %v1077_v9, %v935_v12 }
 0x121   : > { %v1117_v21 = vunpack.c.l.b16 %v1094_v15 }
 0x123   : > { %v1151_v17 = vpack.c.b16 %v1117_v21, %v1115_v59 }
 0x125   : > { %1240 = vmatmul.bf16.gmra.mxu0 %v1151_v17 }
 0x126   : > { %v943_v58 = vpop.permute.xlu1 %942 }
 0x127   : > { %v1102_v18 = vsel %vm1086_vm12, %v1085_v11, %v943_v58  ;;  %v941_v30 = vpop.permute.xlu0 %940 }
 0x128   : > { %v1125_v8 = vunpack.c.l.b16 %v1102_v18  ;;  %v1100_v36 = vsel %vm1086_vm12, %v1083_v28, %v941_v30 }
 0x129   : > { %v1123_v4 = vunpack.c.l.b16 %v1100_v36 }
 0x12b   : > { %v1155_v39 = vpack.c.b16 %v1125_v8, %v1123_v4 }
 0x12d   : > { %1250 = vmatmul.bf16.gmra.mxu2 %v1155_v39 }
 0x130   : > { %v1265_v45 = vpop.f32.mrf.mxu1 }
 0x137   : > { %v1270_v37 = vpop.f32.mrf.mxu3 }
 0x138   : > { %v1267_v14 = vpop.f32.mrf.mxu1 }
 0x13f   : > { %v1272_v6 = vpop.f32.mrf.mxu3 }
 0x147   : > { %v1275_v50 = vpop.f32.mrf.mxu3 }
 0x14f   : > { %v1277_v60 = vpop.f32.mrf.mxu3 }
 0x151   : > { %v1236_v43 = vpop.f32.mrf.mxu0 }
 0x152   : > { %v1237_v29 = vadd.f32 %v1769_v52, %v1236_v43 }
 0x154   : > { %v2246_v54 = vadd.f32 %v1265_v45, %v1237_v29 }
 0x156   : > { %v1285_v10 = vsel %vm1035_vm9, %v2246_v54, 0.0 }
 0x157   : > { %v1280_v13 = vpop.f32.mrf.mxu3 }
 0x159   : > { %v1238_v25 = vpop.f32.mrf.mxu0 }
 0x15a   : > { %v1239_v23 = vadd.f32 %v1769_v52, %v1238_v25 }
 0x15c   : > { %v2244_v56 = vadd.f32 %v1267_v14, %v1239_v23 }
 0x15e   : > { %v1286_v62 = vsel %vm1035_vm9, %v2244_v56, 0.0 }
 0x15f   : > { %v1287_v35 = vadd.f32 %v1286_v62, %v1285_v10  ;;  %v1282_v15 = vpop.f32.mrf.mxu3 }
 0x168   : > { %v1246_v51 = vpop.f32.mrf.mxu2 }
 0x169   : > { %v1247_v2 = vadd.f32 %v1769_v52, %v1246_v51 }
 0x16b   : > { %v2258_v22 = vadd.f32 %v1275_v50, %v1247_v2 }
 0x16d   : > { %v1292_v63 = vsel %vm1035_vm9, %v2258_v22, 0.0 }
 0x170   : > { %v1248_v57 = vpop.f32.mrf.mxu2 }
 0x171   : > { %v1249_v44 = vadd.f32 %v1769_v52, %v1248_v57 }
 0x173   : > { %v2264_v7 = vadd.f32 %v1277_v60, %v1249_v44 }
 0x175   : > { %v1294_v61 = vsel %vm1035_vm9, %v2264_v7, 0.0 }
 0x1a2   : > { %v1241_v19 = vpop.f32.mrf.mxu0 }
 0x1a3   : > { %v1242_v31 = vadd.f32 %v1769_v52, %v1241_v19 }
 0x1a5   : > { %v2248_v32 = vadd.f32 %v1270_v37, %v1242_v31 }
 0x1a7   : > { %v1288_v33 = vsel %vm1035_vm9, %v2248_v32, 0.0 }
 0x1a8   : > { %v1289_v34 = vadd.f32 %v1288_v33, %v1287_v35 }
 0x1aa   : > { %v1243_v49 = vpop.f32.mrf.mxu0 }
 0x1ab   : > { %v1244_v55 = vadd.f32 %v1769_v52, %v1243_v49 }
 0x1ad   : > { %v2256_v41 = vadd.f32 %v1272_v6, %v1244_v55 }
 0x1af   : > { %v1290_v46 = vsel %vm1035_vm9, %v2256_v41, 0.0 }
 0x1b0   : > { %v1291_v3 = vadd.f32 %v1290_v46, %v1289_v34  ;;  %v1251_v16 = vpop.f32.mrf.mxu2 }
 0x1b1   : > { %v1252_v40 = vadd.f32 %v1769_v52, %v1251_v16 }
 0x1b2   : > { %v1293_v48 = vadd.f32 %v1292_v63, %v1291_v3 }
 0x1b3   : > { %v2266_v20 = vadd.f32 %v1280_v13, %v1252_v40 }
 0x1b4   : > { %v1295_v5 = vadd.f32 %v1294_v61, %v1293_v48 }
 0x1b5   : > { %v1296_v12 = vsel %vm1035_vm9, %v2266_v20, 0.0 }
 0x1b6   : > { %v1297_v26 = vadd.f32 %v1296_v12, %v1295_v5 }
 0x1b8   : > { %v1253_v9 = vpop.f32.mrf.mxu2 }
 0x1b9   : > { %v1254_v0 = vadd.f32 %v1769_v52, %v1253_v9 }
 0x1bb   : > { %v2272_v47 = vadd.f32 %v1282_v15, %v1254_v0 }
 0x1bd   : > { %v1298_v59 = vsel %vm1035_vm9, %v2272_v47, 0.0 }
 0x1be   : > { %v1299_v21 = vadd.f32 %v1298_v59, %v1297_v26 }
 0x1c0   : > { %v1300_v53 = vrot.slane %v1299_v21, 4 }
 0x1c2   : > { %v1301_v24 = vadd.f32 %v1300_v53, %v1299_v21 }
 0x1c4   : > { %v1302_v38 = vrot.slane %v1301_v24, 2 }
 0x1c6   : > { %v1303_v1 = vadd.f32 %v1302_v38, %v1301_v24 }
 0x1c8   : > { %v1304_v17 = vrot.slane %v1303_v1, 1 }
 0x1ca   : > { %v1305_v27 = vadd.f32 %v1304_v17, %v1303_v1 }
 0x1cc   : > { %1315 = vrot.lane.b32.xlu1 %v1305_v27, %s1786_s27  ;;  %1311 = vrot.lane.b32.xlu0 %v1305_v27, %s1788_s29 }
 0x1cd   : > { %1307 = vrot.lane.b32.xlu2 %v1305_v27, %s1789_s30 }
 0x227   : > { %v1308_v11 = vpop.permute.xlu2 %1307 }
 0x228   : > { %v1310_v42 = vadd.f32 %v1308_v11, %v1305_v27 }
 0x23e   : > { %v1312_v58 = vpop.permute.xlu0 %1311  ;;  %v1316_v18 = vpop.permute.xlu1 %1315 }
 0x23f   : > { %v1314_v28 = vadd.f32 %v1312_v58, %v1310_v42 }
 0x241   : > { %v1318_v30 = vadd.f32 %v1316_v18, %v1314_v28 }
 0x243   : > { %1336 = vrot.lane.b32.xlu1 %v1318_v30, %s1790_s9  ;;  %1330 = vrot.lane.b32.xlu0 %v1318_v30, %s1791_s10  ;;  %v1320_v8 = vsel %vm1319_vm13, %v1318_v30, 0.0 }
 0x244   : > { %1324 = vrot.lane.b32.xlu2 %v1318_v30, %s1792_s11 }
 0x24b   : > { %1354 = vrot.lane.b32.xlu1 %v1318_v30, %s1793_s12  ;;  %1348 = vrot.lane.b32.xlu0 %v1318_v30, %s1794_s13 }
 0x24c   : > { %1342 = vrot.lane.b32.xlu2 %v1318_v30, %s1795_s14 }
 0x254   : > { %1360 = vrot.lane.b32.xlu2 %v1318_v30, %s1796_s15 }
 0x275   : > { %1321 = vadd.xlane.f32.xlu0 %v1320_v8 }
 0x29e   : > { %v1325_v36 = vpop.permute.xlu2 %1324 }
 0x29f   : > { %v1327_v4 = vsel %vm1319_vm13, %v1325_v36, 0.0 }
 0x2a0   : > { %1328 = vadd.xlane.f32.xlu1 %v1327_v4 }
 0x2a6   : > { %v1343_v39 = vpop.permute.xlu2 %1342 }
 0x2a7   : > { %v1345_v37 = vsel %vm1319_vm13, %v1343_v39, 0.0 }
 0x2a8   : > { %1346 = vadd.xlane.f32.xlu0 %v1345_v37 }
 0x2ae   : > { %v1361_v43 = vpop.permute.xlu2 %1360 }
 0x2af   : > { %v1363_v6 = vsel %vm1319_vm13, %v1361_v43, 0.0 }
 0x2b0   : > { %1364 = vadd.xlane.f32.xlu0 %v1363_v6 }
 0x2b5   : > { %v1331_v45 = vpop.permute.xlu0 %1330  ;;  %v1337_v51 = vpop.permute.xlu1 %1336 }
 0x2b6   : > { %v1333_v25 = vsel %vm1319_vm13, %v1331_v45, 0.0  ;;  %v1339_v52 = vsel %vm1319_vm13, %v1337_v51, 0.0 }
 0x2b7   : > { %1334 = vadd.xlane.f32.xlu2 %v1333_v25 }
 0x2bd   : > { %v1349_v50 = vpop.permute.xlu0 %1348  ;;  %v1355_v14 = vpop.permute.xlu1 %1354 }
 0x2be   : > { %v1351_v23 = vsel %vm1319_vm13, %v1349_v50, 0.0  ;;  %v1357_v19 = vsel %vm1319_vm13, %v1355_v14, 0.0 }
 0x2bf   : > { %1340 = vadd.xlane.f32.xlu2 %v1339_v52  ;;  %1352 = vadd.xlane.f32.xlu1 %v1351_v23 }
 0x2c7   : > { %1358 = vadd.xlane.f32.xlu2 %v1357_v19 }
 0x2e8   : > { %v1322_v29 = vpop.xlane.xlu0 %1321 }
 0x313   : > { %v1329_v57 = vpop.xlane.xlu1 %1328 }
 0x314   : > { %v1367_v62 = vsel %vm1366_vm14, %v1322_v29, %v1329_v57 }
 0x31b   : > { %v1347_v60 = vpop.xlane.xlu0 %1346 }
 0x323   : > { %v1365_v44 = vpop.xlane.xlu0 %1364 }
 0x32a   : > { %v1335_v31 = vpop.xlane.xlu2 %1334 }
 0x32b   : > { %v1369_v10 = vsel %vm1368_vm15, %v1367_v62, %v1335_v31 }
 0x332   : > { %v1341_v49 = vpop.xlane.xlu2 %1340  ;;  %v1353_v55 = vpop.xlane.xlu1 %1352 }
 0x333   : > { %v1371_v2 = vsel %vm1370_vm0, %v1369_v10, %v1341_v49 }
 0x334   : > { %v1373_v33 = vsel %vm1372_vm1, %v1371_v2, %v1347_v60 }
 0x335   : > { %v1375_v34 = vsel %vm1374_vm2, %v1373_v33, %v1353_v55 }
 0x33a   : > { %v1359_v35 = vpop.xlane.xlu2 %1358 }
 0x33b   : > { %v1377_v46 = vsel %vm1376_vm3, %v1375_v34, %v1359_v35 }
 0x33c   : > { %v1379_v3 = vsel %vm1378_vm4, %v1377_v46, %v1365_v44 }
 0x33d   : > { %1387 = vrot.lane.b32.xlu0 %v1379_v3, %s1785_s26  ;;  %1384 = vrot.lane.b32.xlu2 %v1379_v3, %s1783_s24 }
 0x33e   : > { %1381 = vrot.lane.b32.xlu1 %v1379_v3, %s1784_s25 }
 0x397   : > { %v1385_v16 = vpop.permute.xlu2 %1384 }
 0x3af   : > { %v1388_v63 = vpop.permute.xlu0 %1387 }
 0x3b0   : > { %v1382_v13 = vpop.permute.xlu1 %1381 }
 0x3b1   : > { %v1390_v40 = vsel %vm976_vm6, %v1379_v3, %v1382_v13 }
 0x3b2   : > { %v1391_v48 = vsel %vm1001_vm7, %v1390_v40, %v1385_v16 }
 0x3b3   : > { %v1392_v61 = vsel %vm1018_vm8, %v1391_v48, %v1388_v63 }
 0x3b4   : > { %v1393_v5 = vmul.f32 0.001953125, %v1392_v61 }
 0x3b6   : > { %v1394_v9 = vperm.slane %v1393_v5, 0 }
 0x3b8   : > { %v2308_v12 = vsub.f32 %v2246_v54, %v1394_v9  ;;  %v2311_v0 = vsub.f32 %v2244_v56, %v1394_v9  ;;  %v2314_v15 = vsub.f32 %v2248_v32, %v1394_v9  ;;  %v2317_v26 = vsub.f32 %v2256_v41, %v1394_v9 }
 0x3b9   : > { %v2320_v59 = vsub.f32 %v2258_v22, %v1394_v9  ;;  %v2329_v56 = vsub.f32 %v2264_v7, %v1394_v9  ;;  %v2336_v38 = vsub.f32 %v2266_v20, %v1394_v9  ;;  %v2342_v7 = vsub.f32 %v2272_v47, %v1394_v9 }
 0x3ba   : > { %v1403_v21 = vmul.f32 %v2308_v12, %v2308_v12  ;;  %v1404_v53 = vmul.f32 %v2311_v0, %v2311_v0  ;;  %v1405_v54 = vmul.f32 %v2314_v15, %v2314_v15  ;;  %v1406_v32 = vmul.f32 %v2317_v26, %v2317_v26 }
 0x3bb   : > { %v1407_v1 = vmul.f32 %v2320_v59, %v2320_v59  ;;  %v1408_v11 = vmul.f32 %v2329_v56, %v2329_v56  ;;  %v1409_v28 = vmul.f32 %v2336_v38, %v2336_v38  ;;  %v1410_v30 = vmul.f32 %v2342_v7, %v2342_v7 }
 0x3bc   : > { %v1411_v41 = vsel %vm1035_vm9, %v1403_v21, 0.0  ;;  %v1412_v22 = vsel %vm1035_vm9, %v1404_v53, 0.0  ;;  %v1414_v17 = vsel %vm1035_vm9, %v1405_v54, 0.0  ;;  %v1416_v42 = vsel %vm1035_vm9, %v1406_v32, 0.0 }
 0x3bd   : > { %v1413_v24 = vadd.f32 %v1412_v22, %v1411_v41  ;;  %v1418_v20 = vsel %vm1035_vm9, %v1407_v1, 0.0  ;;  %v1420_v8 = vsel %vm1035_vm9, %v1408_v11, 0.0  ;;  %v1422_v47 = vsel %vm1035_vm9, %v1409_v28, 0.0 }
 0x3be   : > { %v1424_v39 = vsel %vm1035_vm9, %v1410_v30, 0.0 }
 0x3bf   : > { %v1415_v27 = vadd.f32 %v1414_v17, %v1413_v24 }
 0x3c1   : > { %v1417_v58 = vadd.f32 %v1416_v42, %v1415_v27 }
 0x3c3   : > { %v1419_v18 = vadd.f32 %v1418_v20, %v1417_v58 }
 0x3c5   : > { %v1421_v36 = vadd.f32 %v1420_v8, %v1419_v18 }
 0x3c7   : > { %v1423_v4 = vadd.f32 %v1422_v47, %v1421_v36 }
 0x3c9   : > { %v1425_v37 = vadd.f32 %v1424_v39, %v1423_v4 }
 0x3cb   : > { %v1426_v43 = vrot.slane %v1425_v37, 4 }
 0x3cd   : > { %v1427_v6 = vadd.f32 %v1426_v43, %v1425_v37  ;;  %v1523_v37 = vld [vmem:[%s2452_s3] sm:$0x1] }
 0x3cf   : > { %v1428_v45 = vrot.slane %v1427_v6, 2 }
 0x3d1   : > { %v1429_v25 = vadd.f32 %v1428_v45, %v1427_v6 }
 0x3d3   : > { %v1430_v51 = vrot.slane %v1429_v25, 1 }
 0x3d5   : > { %v1431_v50 = vadd.f32 %v1430_v51, %v1429_v25  ;;  %v1770_v51 = vld [vmem:[%s2453_s4] ss:$0 sm:$0xff] }
 0x3d7   : > { %1441 = vrot.lane.b32.xlu2 %v1431_v50, %s1786_s27  ;;  %1437 = vrot.lane.b32.xlu0 %v1431_v50, %s1788_s29 }
 0x3d8   : > { %1433 = vrot.lane.b32.xlu1 %v1431_v50, %s1789_s30  ;;  %s1727_s30 = sshll.u32 %s2460_s19, 6 }
 0x3d9   : > { %s2404_s20 = scalar_lea.vmem %s2454_s5, %s1727_s30 }
 0x431   : > { %v1442_v29 = vpop.permute.xlu2 %1441 }
 0x449   : > { %v1438_v14 = vpop.permute.xlu0 %1437 }
 0x44a   : > { %v1434_v52 = vpop.permute.xlu1 %1433 }
 0x44b   : > { %v1436_v23 = vadd.f32 %v1434_v52, %v1431_v50 }
 0x44d   : > { %v1440_v19 = vadd.f32 %v1438_v14, %v1436_v23 }
 0x44f   : > { %v1444_v31 = vadd.f32 %v1442_v29, %v1440_v19 }
 0x451   : > { %1467 = vrot.lane.b32.xlu2 %v1444_v31, %s1795_s14  ;;  %1461 = vrot.lane.b32.xlu1 %v1444_v31, %s1790_s9  ;;  %v1445_v57 = vsel %vm1319_vm13, %v1444_v31, 0.0 }
 0x452   : > { %1449 = vrot.lane.b32.xlu0 %v1444_v31, %s1792_s11 }
 0x459   : > { %1473 = vrot.lane.b32.xlu1 %v1444_v31, %s1794_s13 }
 0x45a   : > { %1455 = vrot.lane.b32.xlu0 %v1444_v31, %s1791_s10 }
 0x461   : > { %1479 = vrot.lane.b32.xlu1 %v1444_v31, %s1793_s12 }
 0x462   : > { %1485 = vrot.lane.b32.xlu0 %v1444_v31, %s1796_s15 }
 0x48b   : > { %1446 = vadd.xlane.f32.xlu1 %v1445_v57 }
 0x4ab   : > { %v1468_v35 = vpop.permute.xlu2 %1467 }
 0x4ac   : > { %v1470_v3 = vsel %vm1319_vm13, %v1468_v35, 0.0 }
 0x4c3   : > { %v1462_v60 = vpop.permute.xlu1 %1461 }
 0x4c4   : > { %v1450_v62 = vpop.permute.xlu0 %1449  ;;  %v1464_v33 = vsel %vm1319_vm13, %v1462_v60, 0.0 }
 0x4c5   : > { %v1452_v49 = vsel %vm1319_vm13, %v1450_v62, 0.0 }
 0x4c6   : > { %1453 = vadd.xlane.f32.xlu2 %v1452_v49 }
 0x4cb   : > { %v1474_v10 = vpop.permute.xlu1 %1473 }
 0x4cc   : > { %v1456_v2 = vpop.permute.xlu0 %1455  ;;  %v1476_v16 = vsel %vm1319_vm13, %v1474_v10, 0.0 }
 0x4cd   : > { %v1458_v55 = vsel %vm1319_vm13, %v1456_v2, 0.0 }
 0x4ce   : > { %1465 = vadd.xlane.f32.xlu2 %v1464_v33  ;;  %1459 = vadd.xlane.f32.xlu0 %v1458_v55 }
 0x4d3   : > { %v1480_v34 = vpop.permute.xlu1 %1479 }
 0x4d4   : > { %v1486_v44 = vpop.permute.xlu0 %1485  ;;  %v1482_v46 = vsel %vm1319_vm13, %v1480_v34, 0.0 }
 0x4d5   : > { %v1488_v13 = vsel %vm1319_vm13, %v1486_v44, 0.0 }
 0x4d6   : > { %1483 = vadd.xlane.f32.xlu2 %v1482_v46  ;;  %1471 = vadd.xlane.f32.xlu0 %v1470_v3 }
 0x4d7   : > { %1489 = vadd.xlane.f32.xlu1 %v1488_v13 }
 0x4de   : > { %1477 = vadd.xlane.f32.xlu0 %v1476_v16 }
 0x4fe   : > { %v1447_v5 = vpop.xlane.xlu1 %1446 }
 0x539   : > { %v1454_v40 = vpop.xlane.xlu2 %1453 }
 0x53a   : > { %v1491_v9 = vsel %vm1366_vm14, %v1447_v5, %v1454_v40 }
 0x541   : > { %v1460_v63 = vpop.xlane.xlu0 %1459  ;;  %v1466_v48 = vpop.xlane.xlu2 %1465 }
 0x542   : > { %v1492_v21 = vsel %vm1368_vm15, %v1491_v9, %v1460_v63 }
 0x543   : > { %v1493_v53 = vsel %vm1370_vm0, %v1492_v21, %v1466_v48 }
 0x549   : > { %v1472_v61 = vpop.xlane.xlu0 %1471  ;;  %v1484_v41 = vpop.xlane.xlu2 %1483 }
 0x54a   : > { %v1494_v54 = vsel %vm1372_vm1, %v1493_v53, %v1472_v61  ;;  %v1490_v24 = vpop.xlane.xlu1 %1489 }
 0x551   : > { %v1478_v32 = vpop.xlane.xlu0 %1477 }
 0x552   : > { %v1495_v22 = vsel %vm1374_vm2, %v1494_v54, %v1478_v32 }
 0x553   : > { %v1496_v1 = vsel %vm1376_vm3, %v1495_v22, %v1484_v41 }
 0x554   : > { %v1497_v17 = vsel %vm1378_vm4, %v1496_v1, %v1490_v24 }
 0x555   : > { %1499 = vrot.lane.b32.xlu0 %v1497_v17, %s1784_s25 }
 0x55d   : > { %1502 = vrot.lane.b32.xlu0 %v1497_v17, %s1783_s24 }
 0x565   : > { %1505 = vrot.lane.b32.xlu0 %v1497_v17, %s1785_s26 }
 0x5c7   : > { %v1500_v27 = vpop.permute.xlu0 %1499 }
 0x5c8   : > { %v1508_v42 = vsel %vm976_vm6, %v1497_v17, %v1500_v27 }
 0x5cf   : > { %v1503_v11 = vpop.permute.xlu0 %1502 }
 0x5d0   : > { %v1509_v58 = vsel %vm1001_vm7, %v1508_v42, %v1503_v11 }
 0x5d7   : > { %v1506_v28 = vpop.permute.xlu0 %1505 }
 0x5d8   : > { %v1510_v20 = vsel %vm1018_vm8, %v1509_v58, %v1506_v28  ;;  %vm1562_vm8 = vcmask 257024  }
 0x5d9   : > { %v1511_v18 = vmul.f32 0.001953125, %v1510_v20 }
 0x5db   : > { %v1512_v30 = vadd.f32 1e-05, %v1511_v18 }
 0x5dd   : > { %1771 = vrsqrt.f32 %v1512_v30  ;;  %vm1519_vm6 = vweird.f32 %v1512_v30 }
 0x5e3   : > { %v1772_v8 = vpop.eup %1771 }
 0x5e4   : > { %v1514_v36 = vmul.f32 %v1772_v8, %v1512_v30  ;;  %vm1520_vm5 = vweird.f32 %v1772_v8 }
 0x5e5   : > { %vm1521_vm7 = vmor %vm1519_vm6, %vm1520_vm5 }
 0x5e6   : > { %v1515_v47 = vmul.f32 %v1772_v8, %v1514_v36 }
 0x5e8   : > { %v1516_v4 = vmul.f32 0.5, %v1515_v47 }
 0x5ea   : > { %v1517_v39 = vsub.f32 1.5, %v1516_v4 }
 0x5ec   : > { %v1518_v43 = vmul.f32 %v1772_v8, %v1517_v39 }
 0x5ee   : > { %v1522_v6 = vsel %vm1521_vm7, %v1772_v8, %v1518_v43 }
 0x5ef   : > { %v1524_v45 = vmul.f32 %v1523_v37, %v1522_v6 }
 0x5f1   : > { %v1525_v25 = vperm.slane %v1524_v45, 0 }
 0x5f3   : > { %v1528_v50 = vmul.f32 %v1525_v25, %v2314_v15  ;;  %v1527_v52 = vmul.f32 %v1525_v25, %v2311_v0  ;;  %v1526_v23 = vmul.f32 %v1525_v25, %v2308_v12  ;;  %v1533_v14 = vmul.f32 %v1525_v25, %v2342_v7 }
 0x5f4   : > { %v1529_v19 = vmul.f32 %v1525_v25, %v2317_v26  ;;  %v1531_v29 = vmul.f32 %v1525_v25, %v2329_v56  ;;  %v1530_v31 = vmul.f32 %v1525_v25, %v2320_v59  ;;  %v1532_v57 = vmul.f32 %v1525_v25, %v2336_v38 }
 0x5f5   : > { %v1540_v60 = vadd.f32 %v1770_v51, %v1528_v50  ;;  %v1539_v62 = vadd.f32 %v1770_v51, %v1527_v52  ;;  %v1538_v49 = vadd.f32 %v1770_v51, %v1526_v23  ;;  %v1545_v10 = vadd.f32 %v1770_v51, %v1533_v14 }
 0x5f6   : > { %v1541_v15 = vadd.f32 %v1770_v51, %v1529_v19  ;;  %v1543_v2 = vadd.f32 %v1770_v51, %v1531_v29  ;;  %v1542_v0 = vadd.f32 %v1770_v51, %v1530_v31  ;;  %v1544_v33 = vadd.f32 %v1770_v51, %v1532_v57 }
 0x5f7   : > { %v1548_v12 = vmax.f32 %v1540_v60, 0.0  ;;  %v1547_v55 = vmax.f32 %v1539_v62, 0.0  ;;  %v1546_v7 = vmax.f32 %v1538_v49, 0.0  ;;  %v1553_v35 = vmax.f32 %v1545_v10, 0.0 }
 0x5f8   : > { %v1549_v26 = vmax.f32 %v1541_v15, 0.0  ;;  %v1551_v59 = vmax.f32 %v1543_v2, 0.0  ;;  %v1550_v44 = vmax.f32 %v1542_v0, 0.0  ;;  %v1552_v3 = vmax.f32 %v1544_v33, 0.0 }
 0x5f9   : > { %v1556_v56 = vpack.c.bf16 %v1548_v12, %v1548_v12  ;;  %v1555_v38 = vpack.c.bf16 %v1547_v55, %v1547_v55  ;;  %v1554_v34 = vpack.c.bf16 %v1546_v7, %v1546_v7  ;;  %v1561_v46 = vpack.c.bf16 %v1553_v35, %v1553_v35 }
 0x5fa   : > { %v1557_v13 = vpack.c.bf16 %v1549_v26, %v1549_v26  ;;  %v1559_v16 = vpack.c.bf16 %v1551_v59, %v1551_v59  ;;  %v1558_v40 = vpack.c.bf16 %v1550_v44, %v1550_v44  ;;  %v1560_v63 = vpack.c.bf16 %v1552_v3, %v1552_v3 }
 0x5fb   : > { %1583 = vrot.lane.b32.xlu1 %v1556_v56, %s1788_s29  ;;  %1565 = vst.msk [vmem:[%s2404_s20 + $0x10] sm:$0xf] %vm1562_vm8, %v1556_v56  ;;  %1581 = vrot.lane.b32.xlu0 %v1555_v38, %s1788_s29 }
 0x5fc   : > { %1564 = vst.msk [vmem:[%s2404_s20 + $0x8] sm:$0xf] %vm1562_vm8, %v1555_v38  ;;  %1579 = vrot.lane.b32.xlu2 %v1554_v34, %s1788_s29 }
 0x5fd   : > { %1563 = vst.msk [vmem:[%s2404_s20] sm:$0xf] %vm1562_vm8, %v1554_v34 }
 0x5fe   : > { %1570 = vst.msk [vmem:[%s2404_s20 + $0x38] sm:$0xf] %vm1562_vm8, %v1561_v46 }
 0x5ff   : > { %1566 = vst.msk [vmem:[%s2404_s20 + $0x18] sm:$0xf] %vm1562_vm8, %v1557_v13 }
 0x600   : > { %1568 = vst.msk [vmem:[%s2404_s20 + $0x28] sm:$0xf] %vm1562_vm8, %v1559_v16 }
 0x601   : > { %1567 = vst.msk [vmem:[%s2404_s20 + $0x20] sm:$0xf] %vm1562_vm8, %v1558_v40 }
 0x602   : > { %1569 = vst.msk [vmem:[%s2404_s20 + $0x30] sm:$0xf] %vm1562_vm8, %v1560_v63 }
 0x603   : > { %1593 = vrot.lane.b32.xlu1 %v1561_v46, %s1788_s29  ;;  %1585 = vrot.lane.b32.xlu0 %v1557_v13, %s1788_s29 }
 0x604   : > { %1589 = vrot.lane.b32.xlu2 %v1559_v16, %s1788_s29 }
 0x60b   : > { %1587 = vrot.lane.b32.xlu0 %v1558_v40, %s1788_s29 }
 0x613   : > { %1591 = vrot.lane.b32.xlu0 %v1560_v63, %s1788_s29 }
 0x656   : > { %v1580_v48 = vpop.permute.xlu2 %1579 }
 0x657   : > { %1716 = vst.msk [vmem:[%s2404_s20 + $0x4] sm:$0xf] %vm1562_vm8, %v1580_v48 }
 0x65e   : > { %v1590_v61 = vpop.permute.xlu2 %1589 }
 0x65f   : > { %1721 = vst.msk [vmem:[%s2404_s20 + $0x2c] sm:$0xf] %vm1562_vm8, %v1590_v61 }
 0x66d   : > { %v1584_v5 = vpop.permute.xlu1 %1583  ;;  %v1582_v9 = vpop.permute.xlu0 %1581 }
 0x66e   : > { %1718 = vst.msk [vmem:[%s2404_s20 + $0x14] sm:$0xf] %vm1562_vm8, %v1584_v5 }
 0x66f   : > { %1717 = vst.msk [vmem:[%s2404_s20 + $0xc] sm:$0xf] %vm1562_vm8, %v1582_v9 }
 0x675   : > { %v1594_v21 = vpop.permute.xlu1 %1593  ;;  %v1586_v53 = vpop.permute.xlu0 %1585 }
 0x676   : > { %1723 = vst.msk [vmem:[%s2404_s20 + $0x3c] sm:$0xf] %vm1562_vm8, %v1594_v21 }
 0x677   : > { %1719 = vst.msk [vmem:[%s2404_s20 + $0x1c] sm:$0xf] %vm1562_vm8, %v1586_v53 }
 0x67d   : > { %v1588_v54 = vpop.permute.xlu0 %1587 }
 0x67e   : > { %1720 = vst.msk [vmem:[%s2404_s20 + $0x24] sm:$0xf] %vm1562_vm8, %v1588_v54 }
 0x685   : > { %v1592_v32 = vpop.permute.xlu0 %1591 }
 0x686   : > { %1722 = vst.msk [vmem:[%s2404_s20 + $0x34] sm:$0xf] %vm1562_vm8, %v1592_v32 }
 0x687 PF: > { %s15_s18 = sadd.s32 1, %s1780_s18  }
 0x688   : > { %p12_p4 = scmp.ge.s32.totalorder %s15_s18, 4  }
 0x68a   :  { %14 = sbr.rel (!%p12_p4) target bundleno = 1 (0x1), region = 73 }

// kernel: improved_synthesis_forward.5
= control target key start
LH: loop header
LB: loop body
LE: loop exit
PB: predicated region body
PF: predicated region fallthrough
CT: control target
= control target key end

     0   :  { %s3597_s12 = smov 0   ;;  %s5313_s0 = inlined_call_operand.vmem [shape: bf16[2,16,16,16], index: 0, kind: input, shape index: {}]   ;;  %s5314_s1 = inlined_call_operand.vmem [shape: bf16[144,32], index: 1, kind: input, shape index: {}]   ;;  %s5315_s2 = inlined_call_operand.vmem [shape: f32[1,32], index: 2, kind: input, shape index: {}]   ;;  %s5316_s3 = inlined_call_operand.vmem [shape: f32[2,16,2,16,16], index: 3, kind: output, shape index: {}]  }
   0x1 LB: > { %s3165_s13 = sadd.s32 4294967295, %s3567_s12   ;;  %p3169_p0 = scmp.ge.s32.totalorder %s3567_s12, 1  ;;  %s3567_s12 = sphi %s3597_s12, %s13_s12  }
   0x2   : > { %p137_p1 = scmp.lt.s32.totalorder %s3567_s12, 3 }
   0x4   : > { %p138_p2 = pnand %p3169_p0, %p137_p1 }
   0x6   : > { %141 = sbr.rel (%p138_p2) target bundleno = 775 (0x307), region = 32 }
   0xb   : > { %vm204_vm0 = vcmask 125952   ;;  %vm207_vm1 = vcmask 122880   ;;  %v3569_v0 = vmov 0   ;;  %p161_p3 = scmp.lt.s32.totalorder %s3165_s13, 1  ;;  %vm1022_vm2 = vsmask.f32 7424 }
   0xc   : > { %205 = vst.msk [vmem:[#allocation2] sm:$0xf] %vm204_vm0, %v3569_v0  ;;  %s3570_s15 = smov 16   ;;  %vm260_vm3 = vsmask.f32 256  ;;  %vm1295_vm9 = vcmask 1046528  }
   0xd   : > { %206 = vst.msk [vmem:[#allocation2 + $0x4] sm:$0xf] %vm204_vm0, %v3569_v0  ;;  %s5345_s13 = smov (!%p161_p3, %s3165_s13), 1  ;;  %vm261_vm4 = vsmask.f32 4368  ;;  %vm3740_vm6 = vmand %vm207_vm1, %vm260_vm3  ;;  %s3571_s19 = smov 32  }
   0xe   : > { %208 = vst.msk [vmem:[#allocation2 + $0x8] sm:$0x1] %vm207_vm1, %v3569_v0  ;;  %s3260_s14 = sshll.u32 %s5345_s13, 7  ;;  %vm585_vm5 = vsmask.f32 7938  ;;  %vm3753_vm7 = vmor %vm260_vm3, %vm261_vm4  ;;  %vm2368_vm10 = vcmask 130048  }
   0xf   : > { %209 = vst.msk [vmem:[#allocation2 + $0xc] sm:$0xf] %vm204_vm0, %v3569_v0  ;;  %s3662_s18 = scalar_lea.vmem %s5313_s0, %s3260_s14  ;;  %vm3773_vm8 = vmand %vm204_vm0, %vm585_vm5  ;;  %s3572_s22 = smov 64   ;;  %vm2401_vm11 = vcmask 261120   ;;  %vm2434_vm12 = vcmask 392192   ;;  %vm2467_vm13 = vcmask 523264  }
  0x10   : > { %210 = vst.msk [vmem:[#allocation2 + $0x10] sm:$0xf] %vm204_vm0, %v3569_v0  ;;  %v182_v12 = vld [vmem:[%s3662_s18 + $0x28] sm:$0xf]  ;;  %v183_v13 = vld [vmem:[%s3662_s18 + $0x2c] sm:$0xf] }
  0x11   : > { %211 = vst.msk [vmem:[#allocation2 + $0x14] sm:$0x1] %vm207_vm1, %v3569_v0  ;;  %v179_v14 = vld [vmem:[%s3662_s18 + $0x1c] sm:$0xf]  ;;  %v349_v15 = vshrl.u32 %v182_v12, 16  ;;  %v357_v16 = vshrl.u32 %v183_v13, 16 }
  0x12   : > { %212 = vst.msk [vmem:[#allocation2 + $0x18] sm:$0xf] %vm204_vm0, %v3569_v0  ;;  %v178_v17 = vld [vmem:[%s3662_s18 + $0x18] sm:$0xf]  ;;  %v323_v18 = vshrl.u32 %v179_v14, 16  ;;  %v352_v27 = vshll.u32 %v182_v12, 16 }
  0x13   : > { %213 = vst.msk [vmem:[#allocation2 + $0x1c] sm:$0xf] %vm204_vm0, %v3569_v0  ;;  %v3685_v19 = vld [vmem:[%s3662_s18 + $0xc] sm:$0xf]  ;;  %v315_v20 = vshrl.u32 %v178_v17, 16  ;;  %v3694_v22 = vrot.slane %v349_v15, 7 }
  0x14   : > { %v3272_v1 = vld [vmem:[#allocation2] sm:$0xff]   ;;  %214 = vst.msk [vmem:[#allocation2 + $0x20] sm:$0x1] %vm207_vm1, %v3569_v0  ;;  %v3690_v21 = vld [vmem:[%s3662_s18 + $0x8] sm:$0xf]  ;;  %v3696_v23 = vrot.slane %v357_v16, 7 }
  0x15   : > { %v733_v2 = vld [vmem:[#allocation2 + $0x8] sm:$0x1]  ;;  %v1026_v3 = vshll.u32 %v3272_v1, 16  ;;  %215 = vst.msk [vmem:[#allocation2 + $0x24] sm:$0xf] %vm204_vm0, %v3569_v0  ;;  %v1024_v5 = vshrl.u32 %v3272_v1, 16  ;;  %v3758_v50 = vor.u32 %v352_v27, %v3694_v22 }
  0x16   : > { %v990_v4 = vunpack.c.l.b16 %v733_v2  ;;  %216 = vst.msk [vmem:[#allocation2 + $0x28] sm:$0xf] %vm204_vm0, %v3569_v0  ;;  %v3699_v24 = vld [vmem:[%s3662_s18 + $0x5c] sm:$0xf]  ;;  %v3703_v25 = vrot.slane %v323_v18, 7  ;;  %v289_v26 = vshrl.u32 %v3685_v19, 16 }
  0x17   : > { %v1028_v6 = vrot.slane %v1026_v3, 1  ;;  %217 = vst.msk [vmem:[#allocation2 + $0x2c] sm:$0x1] %vm207_vm1, %v3569_v0  ;;  %v281_v28 = vshrl.u32 %v3690_v21, 16  ;;  %v3710_v29 = vld [vmem:[%s3662_s18 + $0x3c] sm:$0xf] }
  0x18   : > { %v3631_v7 = vpack.c.b16 %v990_v4, %v990_v4  ;;  %218 = vst.msk [vmem:[#allocation2 + $0x30] sm:$0xf] %vm204_vm0, %v3569_v0  ;;  %v317_v30 = vrot.slane %v315_v20, 7  ;;  %v3715_v31 = vld [vmem:[%s3662_s18 + $0x58] sm:$0xf]  ;;  %v459_v32 = vshrl.u32 %v3699_v24, 16 }
  0x19   : > { %219 = vst.msk [vmem:[#allocation2 + $0x34] sm:$0xf] %vm204_vm0, %v3569_v0  ;;  %v1029_v8 = vor.u32 %v1028_v6, %v1024_v5  ;;  %v355_v33 = vrot.slane %v3694_v22, 4  ;;  %v360_v34 = vshll.u32 %v183_v13, 16  ;;  %v318_v35 = vshll.u32 %v178_v17, 16  ;;  %s3573_s23 = smov 48  }
  0x1a   : > { %v1031_v9 = vshll.u32 %v3631_v7, 16  ;;  %220 = vst.msk [vmem:[#allocation2 + $0x38] sm:$0x1] %vm207_vm1, %v3569_v0  ;;  %v326_v36 = vshll.u32 %v179_v14, 16  ;;  %v364_v37 = vrot.slane %v3696_v23, 4  ;;  %v330_v38 = vrot.slane %v3703_v25, 4 }
  0x1b   : > { %221 = vst.msk [vmem:[#allocation2 + $0x3c] sm:$0xf] %vm204_vm0, %v3569_v0  ;;  %v3725_v39 = vrot.slane %v289_v26, 7  ;;  %v391_v40 = vshrl.u32 %v3710_v29, 16  ;;  %v3730_v41 = vrot.slane %v281_v28, 7  ;;  %v451_v42 = vshrl.u32 %v3715_v31, 16 }
  0x1c   : > { %v1033_v10 = vrot.slane %v1031_v9, 1  ;;  %222 = vst.msk [vmem:[#allocation2 + $0x40] sm:$0xf] %vm204_vm0, %v3569_v0  ;;  %v3734_v43 = vld [vmem:[%s3662_s18 + $0x38] sm:$0xf]  ;;  %v321_v45 = vrot.slane %v317_v30, 4  ;;  %v362_v51 = vor.u32 %v360_v34, %v3696_v23  ;;  %v3761_v52 = vor.u32 %v318_v35, %v317_v30 }
  0x1d   : > { %223 = vst.msk [vmem:[#allocation2 + $0x44] sm:$0x1] %vm207_vm1, %v3569_v0  ;;  %v3744_v47 = vrot.slane %v459_v32, 7  ;;  %v3747_v48 = vld [vmem:[%s3662_s18 + $0x4c] sm:$0xf]  ;;  %v328_v53 = vor.u32 %v326_v36, %v3703_v25  ;;  %v284_v57 = vshll.u32 %v3690_v21, 16 }
  0x1e   : > { %v1034_v11 = vsel %vm1022_vm2, %v1029_v8, %v1033_v10  ;;  %224 = vst.msk [vmem:[#allocation2 + $0x48] sm:$0xf] %vm204_vm0, %v3569_v0  ;;  %v3767_v55 = vld [vmem:[%s3662_s18 + $0x48] sm:$0xf]  ;;  %v292_v58 = vshll.u32 %v3685_v19, 16  ;;  %v383_v59 = vshrl.u32 %v3734_v43, 16  ;;  %v3797_v10 = vsel %vm3753_vm7, %v355_v33, %v362_v51 }
  0x1f   : > { %1215 = vrot.lane.b32.xlu0 %v1034_v11, %s3570_s15  ;;  %225 = vst.msk [vmem:[#allocation2 + $0x4c] sm:$0xf] %vm204_vm0, %v3569_v0  ;;  %v3764_v54 = vld [vmem:[#allocation2 + $0x30] sm:$0xf]  ;;  %v393_v60 = vrot.slane %v391_v40, 7  ;;  %v287_v63 = vrot.slane %v3730_v41, 4  ;;  %v3801_v11 = vsel %vm3753_vm7, %v321_v45, %v328_v53  ;;  %v3826_v21 = vor.u32 %v284_v57, %v3730_v41 }
  0x20   : > { %226 = vst.msk [vmem:[#allocation2 + $0x50] sm:$0x1] %vm207_vm1, %v3569_v0  ;;  %v296_v1 = vrot.slane %v3725_v39, 4  ;;  %v453_v2 = vrot.slane %v451_v42, 7  ;;  %v425_v3 = vshrl.u32 %v3747_v48, 16  ;;  %v454_v5 = vshll.u32 %v3715_v31, 16 }
  0x21   : > { %227 = vst.msk [vmem:[#allocation2 + $0x54] sm:$0xf] %vm204_vm0, %v3569_v0  ;;  %v614_v46 = vld [vmem:[#allocation2 + $0x38] sm:$0x1]  ;;  %v600_v4 = vld [vmem:[#allocation2 + $0x20] sm:$0x1]  ;;  %v611_v12 = vsel %vm3773_vm8, %v3761_v52, %v3764_v54  ;;  %v294_v22 = vor.u32 %v292_v58, %v3725_v39 }
  0x22   : > { %228 = vst.msk [vmem:[#allocation2 + $0x58] sm:$0xf] %vm204_vm0, %v3569_v0  ;;  %v462_v6 = vshll.u32 %v3699_v24, 16  ;;  %v466_v8 = vrot.slane %v3744_v47, 4  ;;  %v417_v9 = vshrl.u32 %v3767_v55, 16  ;;  %v3809_v13 = vsel %vm3740_vm6, %v330_v38, %v614_v46  ;;  %s3574_s24 = smov 80  }
  0x23   : > { %229 = vst.msk [vmem:[#allocation2 + $0x5c] sm:$0x1] %vm207_vm1, %v3569_v0  ;;  %v3812_v14 = vld [vmem:[%s3662_s18 + $0x68] sm:$0xf]  ;;  %v3815_v15 = vld [vmem:[%s3662_s18 + $0x6c] sm:$0xf]  ;;  %v3852_v32 = vsel %vm3740_vm6, %v296_v1, %v600_v4  ;;  %v3868_v40 = vsel %vm3753_vm7, %v287_v63, %v294_v22  ;;  %v3882_v46 = vor.u32 %v454_v5, %v453_v2 }
  0x24   : > { %230 = vst.msk [vmem:[#allocation2 + $0x60] sm:$0xf] %vm204_vm0, %v3569_v0  ;;  %v3819_v16 = vld [vmem:[#allocation2 + $0x18] sm:$0xf]  ;;  %v385_v17 = vrot.slane %v383_v59, 7  ;;  %v386_v18 = vshll.u32 %v3734_v43, 16  ;;  %v464_v33 = vor.u32 %v462_v6, %v3744_v47 }
  0x25   : > { %231 = vst.msk [vmem:[#allocation2 + $0x64] sm:$0xf] %vm204_vm0, %v3569_v0  ;;  %v3782_v61 = vld [vmem:[#allocation2 + $0x48] sm:$0xf]  ;;  %v394_v19 = vshll.u32 %v3710_v29, 16  ;;  %v398_v20 = vrot.slane %v393_v60, 4  ;;  %v597_v41 = vsel %vm3773_vm8, %v3826_v21, %v3819_v16 }
  0x26   : > { %232 = vst.msk [vmem:[#allocation2 + $0x68] sm:$0x1] %vm207_vm1, %v3569_v0  ;;  %v485_v24 = vshrl.u32 %v3812_v14, 16  ;;  %v493_v25 = vshrl.u32 %v3815_v15, 16  ;;  %v3832_v26 = vld [vmem:[%s3662_s18 + $0x10] sm:$0xf]  ;;  %v625_v27 = vsel %vm3773_vm8, %v3758_v50, %v3782_v61  ;;  %v3862_v36 = vor.u32 %v386_v18, %v385_v17 }
  0x27   : > { %233 = vst.msk [vmem:[#allocation2 + $0x6c] sm:$0xf] %vm204_vm0, %v3569_v0  ;;  %v628_v62 = vld [vmem:[#allocation2 + $0x50] sm:$0x1]  ;;  %v457_v29 = vrot.slane %v453_v2, 4  ;;  %v3846_v31 = vrot.slane %v417_v9, 7  ;;  %v396_v38 = vor.u32 %v394_v19, %v393_v60 }
  0x28   : > { %234 = vst.msk [vmem:[#allocation2 + $0x70] sm:$0xf] %vm204_vm0, %v3569_v0  ;;  %v3844_v28 = vsel %vm3740_vm6, %v364_v37, %v628_v62  ;;  %v420_v34 = vshll.u32 %v3767_v55, 16  ;;  %v3857_v23 = vld [vmem:[%s3662_s18 + $0x14] sm:$0xf]  ;;  %v298_v35 = vshrl.u32 %v3832_v26, 16 }
  0x29   : > { %235 = vst.msk [vmem:[#allocation2 + $0x74] sm:$0x1] %vm207_vm1, %v3569_v0  ;;  %v389_v37 = vrot.slane %v385_v17, 4  ;;  %v427_v39 = vrot.slane %v425_v3, 7  ;;  %v3876_v43 = vrot.slane %v485_v24, 7  ;;  %v3878_v45 = vrot.slane %v493_v25, 7 }
  0x2a   : > { %236 = vst.msk [vmem:[#allocation2 + $0x78] sm:$0xf] %vm204_vm0, %v3569_v0  ;;  %v428_v51 = vshll.u32 %v3747_v48, 16  ;;  %v306_v55 = vshrl.u32 %v3857_v23, 16  ;;  %v3896_v57 = vsel %vm3753_vm7, %v457_v29, %v464_v33  ;;  %v3899_v58 = vor.u32 %v420_v34, %v3846_v31  ;;  %v3905_v48 = vld [vmem:[%s3662_s18] sm:$0xf] }
  0x2b   : > { %237 = vst.msk [vmem:[#allocation2 + $0x7c] sm:$0xf] %vm204_vm0, %v3569_v0  ;;  %v3874_v42 = vld [vmem:[#allocation2 + $0x60] sm:$0xf]  ;;  %v423_v59 = vrot.slane %v3846_v31, 4  ;;  %v3902_v61 = vrot.slane %v298_v35, 7  ;;  %v3911_v62 = vsel %vm3753_vm7, %v389_v37, %v396_v38 }
  0x2c   : > { %238 = vst.msk [vmem:[#allocation2 + $0x80] sm:$0x1] %vm207_vm1, %v3569_v0  ;;  %v639_v63 = vsel %vm3773_vm8, %v3862_v36, %v3874_v42  ;;  %v432_v1 = vrot.slane %v427_v39, 4  ;;  %v488_v2 = vshll.u32 %v3812_v14, 16  ;;  %v173_v3 = vld [vmem:[%s3662_s18 + $0x4] sm:$0xf]  ;;  %v430_v24 = vor.u32 %v428_v51, %v427_v39 }
  0x2d   : > { %239 = vst.msk [vmem:[#allocation2 + $0x84] sm:$0xf] %vm204_vm0, %v3569_v0  ;;  %v642_v30 = vld [vmem:[#allocation2 + $0x68] sm:$0x1]  ;;  %v491_v4 = vrot.slane %v3876_v43, 4  ;;  %v496_v5 = vshll.u32 %v3815_v15, 16 }
  0x2e   : > { %240 = vst.msk [vmem:[#allocation2 + $0x88] sm:$0xf] %vm204_vm0, %v3569_v0  ;;  %v3886_v50 = vsel %vm3740_vm6, %v398_v20, %v642_v30  ;;  %v500_v6 = vrot.slane %v3878_v45, 4  ;;  %v301_v9 = vshll.u32 %v3832_v26, 16  ;;  %v308_v17 = vrot.slane %v306_v55, 7  ;;  %s3575_s25 = smov 112  }
  0x2f   : > { %241 = vst.msk [vmem:[#allocation2 + $0x8c] sm:$0x1] %vm207_vm1, %v3569_v0  ;;  %v309_v18 = vshll.u32 %v3857_v23, 16  ;;  %v264_v14 = vshrl.u32 %v3905_v48, 16  ;;  %v272_v19 = vshrl.u32 %v173_v3, 16  ;;  %v304_v25 = vrot.slane %v3902_v61, 4 }
  0x30   : > { %242 = vst.msk [vmem:[#allocation2 + $0x90] sm:$0xf] %vm204_vm0, %v3569_v0  ;;  %v275_v26 = vshll.u32 %v173_v3, 16  ;;  %v3946_v31 = vld [vmem:[#allocation2 + $0x24] sm:$0xf]  ;;  %v498_v35 = vor.u32 %v496_v5, %v3878_v45  ;;  %v3954_v37 = vor.u32 %v301_v9, %v3902_v61  ;;  %v313_v51 = vrot.slane %v308_v17, 4 }
  0x31   : > { %243 = vst.msk [vmem:[#allocation2 + $0x94] sm:$0xf] %vm204_vm0, %v3569_v0  ;;  %v3889_v53 = vld [vmem:[#allocation2 + $0x78] sm:$0xf]  ;;  %v266_v33 = vrot.slane %v264_v14, 7  ;;  %v3948_v34 = vrot.slane %v272_v19, 7 }
  0x32   : > { %244 = vst.msk [vmem:[#allocation2 + $0x98] sm:$0x1] %vm207_vm1, %v3569_v0  ;;  %v653_v15 = vsel %vm3773_vm8, %v3899_v58, %v3889_v53  ;;  %v181_v23 = vld [vmem:[%s3662_s18 + $0x24] sm:$0xf]  ;;  %v607_v55 = vld [vmem:[#allocation2 + $0x2c] sm:$0x1]  ;;  %v3988_v47 = vsel %vm3753_vm7, %v491_v4, %v498_v35 }
  0x33   : > { %245 = vst.msk [vmem:[#allocation2 + $0x9c] sm:$0xf] %vm204_vm0, %v3569_v0  ;;  %v656_v60 = vld [vmem:[#allocation2 + $0x80] sm:$0x1]  ;;  %v340_v39 = vshrl.u32 %v181_v23, 16  ;;  %s3576_s26 = smov 96  }
  0x34   : > { %246 = vst.msk [vmem:[#allocation2 + $0xa0] sm:$0xf] %vm204_vm0, %v3569_v0  ;;  %v3939_v29 = vsel %vm3740_vm6, %v432_v1, %v656_v60  ;;  %v270_v60 = vrot.slane %v266_v33, 4  ;;  %v3979_v3 = vld [vmem:[%s3662_s18 + $0x34] sm:$0xf]  ;;  %vm2500_vm14 = vcmask 654336  }
  0x35   : > { %247 = vst.msk [vmem:[#allocation2 + $0xa4] sm:$0x1] %vm207_vm1, %v3569_v0  ;;  %v342_v1 = vrot.slane %v340_v39, 7  ;;  %v4002_v16 = vld [vmem:[#allocation2 + $0xc] sm:$0xf]  ;;  %v374_v5 = vshrl.u32 %v3979_v3, 16 }
  0x36   : > { %248 = vst.msk [vmem:[#allocation2 + $0xa8] sm:$0xf] %vm204_vm0, %v3569_v0  ;;  %v4019_v14 = vld [vmem:[#allocation2 + $0x3c] sm:$0xf]  ;;  %v621_v19 = vld [vmem:[#allocation2 + $0x44] sm:$0x1] }
  0x37   : > { %249 = vst.msk [vmem:[#allocation2 + $0xac] sm:$0xf] %vm204_vm0, %v3569_v0  ;;  %v666_v20 = vld [vmem:[#allocation2 + $0x90] sm:$0xf]  ;;  %v377_v39 = vshll.u32 %v3979_v3, 16  ;;  %vm2533_vm15 = vcmask 785408  }
  0x38   : > { %250 = vst.msk [vmem:[#allocation2 + $0xb0] sm:$0x1] %vm207_vm1, %v3569_v0  ;;  %v667_v52 = vsel %vm3773_vm8, %v3882_v46, %v666_v20  ;;  %v604_v46 = vsel %vm3773_vm8, %v3954_v37, %v3946_v31  ;;  %v4063_v42 = vld [vmem:[#allocation2 + $0x54] sm:$0xf]  ;;  %v635_v53 = vld [vmem:[#allocation2 + $0x5c] sm:$0x1] }
  0x39   : > { %251 = vst.msk [vmem:[#allocation2 + $0xb4] sm:$0xf] %vm204_vm0, %v3569_v0  ;;  %v670_v22 = vld [vmem:[#allocation2 + $0x98] sm:$0x1]  ;;  %s3261_s20 = sshll.u32 %s5345_s13, 9 }
  0x3a   : > { %252 = vst.msk [vmem:[#allocation2 + $0xb8] sm:$0xf] %vm204_vm0, %v3569_v0  ;;  %v671_v54 = vsel %vm3740_vm6, %v466_v8, %v670_v22 }
  0x3b   : > { %253 = vst.msk [vmem:[#allocation2 + $0xbc] sm:$0x1] %vm207_vm1, %v3569_v0 }
  0x3c   : > { %254 = vst.msk [vmem:[#allocation2 + $0xc0] sm:$0xf] %vm204_vm0, %v3569_v0 }
  0x3d   : > { %255 = vst.msk [vmem:[#allocation2 + $0xc4] sm:$0xf] %vm204_vm0, %v3569_v0  ;;  %v3944_v30 = vld [vmem:[#allocation2 + $0xa8] sm:$0xf] }
  0x3e   : > { %256 = vst.msk [vmem:[#allocation2 + $0xc8] sm:$0x1] %vm207_vm1, %v3569_v0 }
  0x3f   : > { %257 = vst.msk [vmem:[#allocation2 + $0xcc] sm:$0xf] %vm204_vm0, %v3569_v0 }
  0x40   : > { %258 = vst.msk [vmem:[#allocation2 + $0xd0] sm:$0xf] %vm204_vm0, %v3569_v0 }
  0x41   : > { %259 = vst.msk [vmem:[#allocation2 + $0xd4] sm:$0x1] %vm207_vm1, %v3569_v0  ;;  %v180_v0 = vld [vmem:[%s3662_s18 + $0x20] sm:$0xf]  ;;  %vm2566_vm1 = vcmask 916480  }
  0x42   : > { %626 = vst [vmem:[#allocation2 + $0x48] sm:$0xf] %v625_v27  ;;  %v3942_v27 = vor.u32 %v488_v2, %v3876_v43  ;;  %v332_v38 = vshrl.u32 %v180_v0, 16  ;;  %v311_v43 = vor.u32 %v309_v18, %v308_v17  ;;  %v335_v45 = vshll.u32 %v180_v0, 16 }
  0x43   : > { %627 = vst.msk [vmem:[#allocation2 + $0x4c] sm:$0xf] %vm204_vm0, %v3797_v10  ;;  %v684_v10 = vld [vmem:[#allocation2 + $0xb0] sm:$0x1]  ;;  %v343_v2 = vshll.u32 %v181_v23, 16  ;;  %v4017_v17 = vsel %vm3740_vm6, %v313_v51, %v607_v55 }
  0x44   : > { %630 = vst [vmem:[#allocation2 + $0x50] sm:$0x1] %v3844_v28  ;;  %v267_v28 = vshll.u32 %v3905_v48, 16  ;;  %v334_v61 = vrot.slane %v332_v38, 7  ;;  %v184_v48 = vld [vmem:[%s3662_s18 + $0x30] sm:$0xf]  ;;  %v681_v8 = vsel %vm3773_vm8, %v3942_v27, %v3944_v30  ;;  %v4013_v9 = vsel %vm3753_vm7, %v304_v25, %v311_v43 }
  0x45   : > { %612 = vst [vmem:[#allocation2 + $0x30] sm:$0xf] %v611_v12  ;;  %v3974_v12 = vsel %vm3753_vm7, %v423_v59, %v430_v24  ;;  %v593_v59 = vld [vmem:[#allocation2 + $0x14] sm:$0x1]  ;;  %v366_v4 = vshrl.u32 %v184_v48, 16  ;;  %v345_v18 = vor.u32 %v343_v2, %v342_v1  ;;  %v347_v25 = vrot.slane %v342_v1, 4 }
  0x46   : > { %613 = vst.msk [vmem:[#allocation2 + $0x34] sm:$0xf] %vm204_vm0, %v3801_v11  ;;  %v277_v11 = vor.u32 %v275_v26, %v3948_v34  ;;  %v4006_v21 = vor.u32 %v267_v28, %v266_v33  ;;  %v4035_v38 = vrot.slane %v374_v5, 7 }
  0x47   : > { %616 = vst [vmem:[#allocation2 + $0x38] sm:$0x1] %v3809_v13  ;;  %v3996_v13 = vsel %vm3740_vm6, %v500_v6, %v684_v10  ;;  %v4029_v33 = vrot.slane %v366_v4, 7  ;;  %v4061_v36 = vsel %vm3740_vm6, %v347_v25, %v621_v19 }
  0x48   : > { %598 = vst [vmem:[#allocation2 + $0x18] sm:$0xf] %v597_v41  ;;  %v279_v41 = vrot.slane %v3948_v34, 4  ;;  %v4023_v24 = vsel %vm3753_vm7, %v270_v60, %v277_v11  ;;  %v369_v34 = vshll.u32 %v184_v48, 16  ;;  %v588_v10 = vsel %vm3773_vm8, %v4006_v21, %v4002_v16 }
  0x49   : > { %599 = vst.msk [vmem:[#allocation2 + $0x1c] sm:$0xf] %vm204_vm0, %v3868_v40  ;;  %v338_v40 = vrot.slane %v334_v61, 4 }
  0x4a   : > { %v3369_v6 = vld [vmem:[#allocation2 + $0x48] sm:$0xff]   ;;  %602 = vst [vmem:[#allocation2 + $0x20] sm:$0x1] %v3852_v32  ;;  %v4025_v32 = vor.u32 %v335_v45, %v334_v61  ;;  %v4047_v55 = vsel %vm3740_vm6, %v279_v41, %v593_v59  ;;  %v372_v41 = vrot.slane %v4029_v33, 4  ;;  %v379_v59 = vor.u32 %v377_v39, %v4035_v38 }
  0x4b   : > { %v739_v20 = vld [vmem:[#allocation2 + $0x50] sm:$0x1]  ;;  %v1098_v22 = vshll.u32 %v3369_v6, 16  ;;  %668 = vst [vmem:[#allocation2 + $0x90] sm:$0xf] %v667_v52  ;;  %v1096_v0 = vshrl.u32 %v3369_v6, 16  ;;  %v4051_v28 = vsel %vm3753_vm7, %v338_v40, %v345_v18 }
  0x4c   : > { %v996_v26 = vunpack.c.l.b16 %v739_v20  ;;  %669 = vst.msk [vmem:[#allocation2 + $0x94] sm:$0xf] %vm204_vm0, %v3896_v57  ;;  %v618_v61 = vsel %vm3773_vm8, %v4025_v32, %v4019_v14  ;;  %v381_v6 = vrot.slane %v4035_v38, 4 }
  0x4d   : > { %v1100_v23 = vrot.slane %v1098_v22, 1  ;;  %v3368_v35 = vld [vmem:[#allocation2 + $0x30] sm:$0xff]   ;;  %672 = vst [vmem:[#allocation2 + $0x98] sm:$0x1] %v671_v54 }
  0x4e   : > { %v4038_v43 = vpack.c.b16 %v996_v26, %v996_v26  ;;  %v737_v51 = vld [vmem:[#allocation2 + $0x38] sm:$0x1]  ;;  %v1074_v57 = vshll.u32 %v3368_v35, 16  ;;  %640 = vst [vmem:[#allocation2 + $0x60] sm:$0xf] %v639_v63  ;;  %v1072_v60 = vshrl.u32 %v3368_v35, 16 }
  0x4f   : > { %v994_v45 = vunpack.c.l.b16 %v737_v51  ;;  %641 = vst.msk [vmem:[#allocation2 + $0x64] sm:$0xf] %vm204_vm0, %v3911_v62  ;;  %v188_v63 = vld [vmem:[%s3662_s18 + $0x40] sm:$0xf]  ;;  %v1101_v1 = vor.u32 %v1100_v23, %v1096_v0  ;;  %v4069_v62 = vor.u32 %v369_v34, %v4029_v33 }
  0x50   : > { %v1103_v2 = vshll.u32 %v4038_v43, 16  ;;  %v1076_v52 = vrot.slane %v1074_v57, 1  ;;  %v3367_v54 = vld [vmem:[#allocation2 + $0x18] sm:$0xff]   ;;  %644 = vst [vmem:[#allocation2 + $0x68] sm:$0x1] %v3886_v50  ;;  %v400_v58 = vshrl.u32 %v188_v63, 16 }
  0x51   : > { %v4071_v11 = vpack.c.b16 %v994_v45, %v994_v45  ;;  %v735_v48 = vld [vmem:[#allocation2 + $0x20] sm:$0x1]  ;;  %v1050_v3 = vshll.u32 %v3367_v54, 16  ;;  %654 = vst [vmem:[#allocation2 + $0x78] sm:$0xf] %v653_v15  ;;  %v1048_v50 = vshrl.u32 %v3367_v54, 16 }
  0x52   : > { %v1105_v4 = vrot.slane %v1103_v2, 1  ;;  %v992_v5 = vunpack.c.l.b16 %v735_v48  ;;  %655 = vst.msk [vmem:[#allocation2 + $0x7c] sm:$0xf] %vm204_vm0, %v3974_v12  ;;  %v1077_v40 = vor.u32 %v1076_v52, %v1072_v60  ;;  %v632_v12 = vsel %vm3773_vm8, %v4069_v62, %v4063_v42  ;;  %v645_v54 = vld [vmem:[#allocation2 + $0x6c] sm:$0xf] }
  0x53   : > { %v1079_v18 = vshll.u32 %v4071_v11, 16  ;;  %v1052_v19 = vrot.slane %v1050_v3, 1  ;;  %v3372_v20 = vld [vmem:[#allocation2 + $0x90] sm:$0xff]   ;;  %658 = vst [vmem:[#allocation2 + $0x80] sm:$0x1] %v3939_v29  ;;  %v4100_v34 = vrot.slane %v400_v58, 7 }
  0x54   : > { %v1106_v15 = vsel %vm1022_vm2, %v1101_v1, %v1105_v4  ;;  %v4086_v22 = vpack.c.b16 %v992_v5, %v992_v5  ;;  %v745_v25 = vld [vmem:[#allocation2 + $0x98] sm:$0x1]  ;;  %v1170_v26 = vshll.u32 %v3372_v20, 16  ;;  %682 = vst [vmem:[#allocation2 + $0xa8] sm:$0xf] %v681_v8  ;;  %v1168_v33 = vshrl.u32 %v3372_v20, 16 }
  0x55   : > { %1227 = vrot.lane.b32.xlu0 %v1106_v15, %s3570_s15  ;;  %v1081_v29 = vrot.slane %v1079_v18, 1  ;;  %v1002_v0 = vunpack.c.l.b16 %v745_v25  ;;  %683 = vst.msk [vmem:[#allocation2 + $0xac] sm:$0xf] %vm204_vm0, %v3988_v47  ;;  %v1053_v23 = vor.u32 %v1052_v19, %v1048_v50  ;;  %v403_v8 = vshll.u32 %v188_v63, 16  ;;  %v189_v1 = vld [vmem:[%s3662_s18 + $0x44] sm:$0xf] }
  0x56   : > { %v1055_v35 = vshll.u32 %v4086_v22, 16  ;;  %v1172_v27 = vrot.slane %v1170_v26, 1  ;;  %v3370_v30 = vld [vmem:[#allocation2 + $0x60] sm:$0xff]   ;;  %686 = vst [vmem:[#allocation2 + $0xb0] sm:$0x1] %v3996_v13  ;;  %v380_v47 = vsel %vm3753_vm7, %v372_v41, %v379_v59  ;;  %v636_v63 = vsel %vm3740_vm6, %v381_v6, %v635_v53 }
  0x57   : > { %v1082_v38 = vsel %vm1022_vm2, %v1077_v40, %v1081_v29  ;;  %v4105_v39 = vpack.c.b16 %v1002_v0, %v1002_v0  ;;  %v741_v51 = vld [vmem:[#allocation2 + $0x68] sm:$0x1]  ;;  %v1122_v57 = vshll.u32 %v3370_v30, 16  ;;  %605 = vst [vmem:[#allocation2 + $0x24] sm:$0xf] %v604_v46  ;;  %v1120_v60 = vshrl.u32 %v3370_v30, 16 }
  0x58   : > { %1223 = vrot.lane.b32.xlu2 %v1082_v38, %s3570_s15  ;;  %v1057_v45 = vrot.slane %v1055_v35, 1  ;;  %v998_v13 = vunpack.c.l.b16 %v741_v51  ;;  %606 = vst.msk [vmem:[#allocation2 + $0x28] sm:$0xf] %vm204_vm0, %v4013_v9  ;;  %v1173_v2 = vor.u32 %v1172_v27, %v1168_v33  ;;  %v405_v52 = vor.u32 %v403_v8, %v4100_v34  ;;  %v4136_v4 = vld [vmem:[%s3662_s18 + $0x50] sm:$0xf] }
  0x59   : > { %v1175_v31 = vshll.u32 %v4105_v39, 16  ;;  %v1124_v37 = vrot.slane %v1122_v57, 1  ;;  %v4121_v46 = vld [vmem:[#allocation2 + $0x78] sm:$0xff]   ;;  %609 = vst [vmem:[#allocation2 + $0x2c] sm:$0x1] %v4017_v17  ;;  %v406_v59 = vrot.slane %v4100_v34, 4 }
  0x5a   : > { %v1058_v48 = vsel %vm1022_vm2, %v1053_v23, %v1057_v45  ;;  %v4126_v3 = vpack.c.b16 %v998_v13, %v998_v13  ;;  %v743_v9 = vld [vmem:[#allocation2 + $0x80] sm:$0x1]  ;;  %v1146_v41 = vshll.u32 %v4121_v46, 16  ;;  %589 = vst [vmem:[#allocation2 + $0xc] sm:$0xf] %v588_v10  ;;  %v1144_v50 = vshrl.u32 %v4121_v46, 16 }
  0x5b   : > { %1219 = vrot.lane.b32.xlu1 %v1058_v48, %s3570_s15  ;;  %v1177_v17 = vrot.slane %v1175_v31, 1  ;;  %v1000_v5 = vunpack.c.l.b16 %v743_v9  ;;  %590 = vst.msk [vmem:[#allocation2 + $0x10] sm:$0xf] %vm204_vm0, %v4023_v24  ;;  %v408_v6 = vshrl.u32 %v189_v1, 16  ;;  %v1125_v40 = vor.u32 %v1124_v37, %v1120_v60  ;;  %v649_v38 = vld [vmem:[#allocation2 + $0x74] sm:$0x1] }
  0x5c   : > { %v1127_v18 = vshll.u32 %v4126_v3, 16  ;;  %v1148_v19 = vrot.slane %v1146_v41, 1  ;;  %v3373_v16 = vld [vmem:[#allocation2 + $0xa8] sm:$0xff]   ;;  %595 = vst [vmem:[#allocation2 + $0x14] sm:$0x1] %v4047_v55  ;;  %v411_v21 = vshll.u32 %v189_v1, 16  ;;  %v646_v26 = vsel %vm3773_vm8, %v405_v52, %v645_v54 }
  0x5d   : > { %v1178_v10 = vsel %vm1022_vm2, %v1173_v2, %v1177_v17  ;;  %v4145_v20 = vpack.c.b16 %v1000_v5, %v1000_v5  ;;  %v747_v53 = vld [vmem:[#allocation2 + $0xb0] sm:$0x1]  ;;  %v1192_v58 = vshrl.u32 %v3373_v16, 16  ;;  %v1194_v15 = vshll.u32 %v3373_v16, 16  ;;  %619 = vst [vmem:[#allocation2 + $0x3c] sm:$0xf] %v618_v61 }
  0x5e   : > { %1239 = vrot.lane.b32.xlu0 %v1178_v10, %s3570_s15  ;;  %v1129_v24 = vrot.slane %v1127_v18, 1  ;;  %v1004_v25 = vunpack.c.l.b16 %v747_v53  ;;  %620 = vst.msk [vmem:[#allocation2 + $0x40] sm:$0xf] %vm204_vm0, %v4051_v28  ;;  %v410_v55 = vrot.slane %v408_v6, 7  ;;  %v4157_v29 = vor.u32 %v1148_v19, %v1144_v50 }
  0x5f   : > { %v1151_v0 = vshll.u32 %v4145_v20, 16  ;;  %v1196_v33 = vrot.slane %v1194_v15, 1  ;;  %v4160_v23 = vld [vmem:[#allocation2 + $0x24] sm:$0xff]   ;;  %623 = vst [vmem:[#allocation2 + $0x44] sm:$0x1] %v4061_v36  ;;  %v434_v32 = vshrl.u32 %v4136_v4, 16 }
  0x60   : > { %v4162_v14 = vld [vmem:[#allocation2 + $0x24] sm:$0xf0]  ;;  %v1130_v61 = vsel %vm1022_vm2, %v1125_v40, %v1129_v24  ;;  %v4167_v28 = vpack.c.b16 %v1004_v25, %v1004_v25  ;;  %v736_v35 = vld [vmem:[#allocation2 + $0x2c] sm:$0x1]  ;;  %633 = vst [vmem:[#allocation2 + $0x54] sm:$0xf] %v632_v12  ;;  %v413_v36 = vor.u32 %v411_v21, %v410_v55 }
  0x61   : > { %1231 = vrot.lane.b32.xlu2 %v1130_v61, %s3570_s15  ;;  %v1153_v27 = vrot.slane %v1151_v0, 1  ;;  %v1197_v30 = vor.u32 %v1196_v33, %v1192_v58  ;;  %v993_v8 = vunpack.c.l.b16 %v736_v35  ;;  %634 = vst.msk [vmem:[#allocation2 + $0x58] sm:$0xf] %vm204_vm0, %v380_v47  ;;  %v415_v13 = vrot.slane %v410_v55, 4 }
  0x62   : > { %v1199_v51 = vshll.u32 %v4167_v28, 16  ;;  %v4177_v57 = vld [vmem:[#allocation2 + $0xc] sm:$0xff]   ;;  %637 = vst [vmem:[#allocation2 + $0x5c] sm:$0x1] %v636_v63  ;;  %v4181_v60 = vrot.slane %v434_v32, 7  ;;  %v1060_v1 = vshrl.u32 %v4160_v23, 16  ;;  %v414_v54 = vsel %vm3753_vm7, %v406_v59, %v413_v36 }
  0x63   : > { %v4179_v45 = vld [vmem:[#allocation2 + $0xc] sm:$0xf0]  ;;  %v1154_v42 = vsel %vm1022_vm2, %v4157_v29, %v1153_v27  ;;  %v4185_v62 = vpack.c.b16 %v993_v8, %v993_v8  ;;  %v734_v12 = vld [vmem:[#allocation2 + $0x14] sm:$0x1]  ;;  %647 = vst [vmem:[#allocation2 + $0x6c] sm:$0xf] %v646_v26  ;;  %v650_v48 = vsel %vm3740_vm6, %v415_v13, %v649_v38 }
  0x64   : > { %1235 = vrot.lane.b32.xlu1 %v1154_v42, %s3570_s15  ;;  %v1201_v47 = vrot.slane %v1199_v51, 1  ;;  %v1062_v2 = vshll.u32 %v4160_v23, 16  ;;  %v991_v31 = vunpack.c.l.b16 %v734_v12  ;;  %648 = vst.msk [vmem:[#allocation2 + $0x70] sm:$0xf] %vm204_vm0, %v414_v54  ;;  %v1036_v6 = vshrl.u32 %v4177_v57, 16 }
  0x65   : > { %v1067_v63 = vshll.u32 %v4185_v62, 16  ;;  %v4191_v37 = vld [vmem:[#allocation2 + $0x3c] sm:$0xff]   ;;  %v1038_v40 = vshll.u32 %v4177_v57, 16  ;;  %651 = vst [vmem:[#allocation2 + $0x74] sm:$0x1] %v650_v48  ;;  %v437_v21 = vshll.u32 %v4136_v4, 16 }
  0x66   : > { %v4193_v52 = vld [vmem:[#allocation2 + $0x3c] sm:$0xf0]  ;;  %v1202_v9 = vsel %vm1022_vm2, %v1197_v30, %v1201_v47  ;;  %v1064_v41 = vrot.slane %v1062_v2, 1  ;;  %v4202_v17 = vpack.c.b16 %v991_v31, %v991_v31  ;;  %v738_v5 = vld [vmem:[#allocation2 + $0x44] sm:$0x1]  ;;  %v1084_v26 = vshrl.u32 %v4191_v37, 16 }
  0x67   : > { %v1069_v50 = vrot.slane %v1067_v63, 1  ;;  %v995_v18 = vunpack.c.l.b16 %v738_v5  ;;  %v1040_v10 = vrot.slane %v1038_v40, 1  ;;  %v1086_v0 = vshll.u32 %v4191_v37, 16  ;;  %v193_v32 = vld [vmem:[%s3662_s18 + $0x54] sm:$0xf] }
  0x68   : > { %v1065_v34 = vor.u32 %v1064_v41, %v1060_v1  ;;  %v1043_v59 = vshll.u32 %v4202_v17, 16  ;;  %v4208_v19 = vld [vmem:[#allocation2 + $0x54] sm:$0xff]   ;;  %v439_v61 = vor.u32 %v437_v21, %v4181_v60  ;;  %v440_v35 = vrot.slane %v4181_v60, 4  ;;  %v659_v13 = vld [vmem:[#allocation2 + $0x84] sm:$0xf] }
  0x69   : > { %v4210_v16 = vld [vmem:[#allocation2 + $0x54] sm:$0xf0]  ;;  %1243 = vrot.lane.b32.xlu2 %v1202_v9, %s3570_s15  ;;  %v740_v53 = vld [vmem:[#allocation2 + $0x5c] sm:$0x1]  ;;  %v4215_v24 = vpack.c.b16 %v995_v18, %v995_v18  ;;  %v1041_v55 = vor.u32 %v1040_v10, %v1036_v6  ;;  %v1088_v30 = vrot.slane %v1086_v0, 1  ;;  %v1108_v8 = vshrl.u32 %v4208_v19, 16 }
  0x6a   : > { %v1070_v58 = vsel %vm1022_vm2, %v1065_v34, %v1069_v50  ;;  %v1045_v15 = vrot.slane %v1043_v59, 1  ;;  %v997_v25 = vunpack.c.l.b16 %v740_v53  ;;  %v1110_v36 = vshll.u32 %v4208_v19, 16  ;;  %v196_v63 = vld [vmem:[%s3662_s18 + $0x60] sm:$0xf]  ;;  %v663_v41 = vld [vmem:[#allocation2 + $0x8c] sm:$0x1] }
  0x6b   : > { %v1091_v33 = vshll.u32 %v4215_v24, 16  ;;  %v4229_v38 = vld [vmem:[#allocation2 + $0x6c] sm:$0xff]   ;;  %v1089_v47 = vor.u32 %v1088_v30, %v1084_v26  ;;  %v442_v31 = vshrl.u32 %v193_v32, 16  ;;  %v445_v48 = vshll.u32 %v193_v32, 16  ;;  %v197_v34 = vld [vmem:[%s3662_s18 + $0x64] sm:$0xf] }
  0x6c   : > { %1221 = vrot.lane.b32.xlu1 %v1070_v58, %s3570_s15  ;;  %v4221_v4 = vpack.c.b16 %v997_v25, %v997_v25  ;;  %v1046_v27 = vsel %vm1022_vm2, %v1041_v55, %v1045_v15  ;;  %v4231_v51 = vld [vmem:[#allocation2 + $0x6c] sm:$0xf0]  ;;  %v742_v60 = vld [vmem:[#allocation2 + $0x74] sm:$0x1]  ;;  %v1112_v1 = vrot.slane %v1110_v36, 1  ;;  %v660_v9 = vsel %vm3773_vm8, %v439_v61, %v659_v13 }
  0x6d   : > { %1217 = vrot.lane.b32.xlu0 %v1046_v27, %s3570_s15  ;;  %v1093_v42 = vrot.slane %v1091_v33, 1  ;;  %v999_v2 = vunpack.c.l.b16 %v742_v60  ;;  %v444_v40 = vrot.slane %v442_v31, 7  ;;  %661 = vst [vmem:[#allocation2 + $0x84] sm:$0xf] %v660_v9  ;;  %v1132_v59 = vshrl.u32 %v4229_v38, 16 }
  0x6e   : > { %v1115_v12 = vshll.u32 %v4221_v4, 16  ;;  %v1113_v50 = vor.u32 %v1112_v1, %v1108_v8  ;;  %v1134_v18 = vshll.u32 %v4229_v38, 16  ;;  %v468_v21 = vshrl.u32 %v196_v63, 16  ;;  %v200_v53 = vld [vmem:[%s3662_s18 + $0x70] sm:$0xf] }
  0x6f   : > { %v1094_v5 = vsel %vm1022_vm2, %v1089_v47, %v1093_v42  ;;  %v4239_v6 = vpack.c.b16 %v999_v2, %v999_v2  ;;  %v471_v10 = vshll.u32 %v196_v63, 16  ;;  %v447_v25 = vor.u32 %v445_v48, %v444_v40  ;;  %v201_v61 = vld [vmem:[%s3662_s18 + $0x74] sm:$0xf]  ;;  %v673_v36 = vld [vmem:[#allocation2 + $0x9c] sm:$0xf] }
  0x70   : > { %v1117_v54 = vrot.slane %v1115_v12, 1  ;;  %v449_v55 = vrot.slane %v444_v40, 4  ;;  %v1136_v26 = vrot.slane %v1134_v18, 1  ;;  %v470_v0 = vrot.slane %v468_v21, 7  ;;  %v677_v1 = vld [vmem:[#allocation2 + $0xa4] sm:$0x1] }
  0x71   : > { %1225 = vrot.lane.b32.xlu2 %v1094_v5, %s3570_s15  ;;  %v1139_v15 = vshll.u32 %v4239_v6, 16  ;;  %v476_v33 = vshrl.u32 %v197_v34, 16  ;;  %v479_v32 = vshll.u32 %v197_v34, 16  ;;  %v448_v30 = vsel %vm3753_vm7, %v440_v35, %v447_v25  ;;  %v687_v5 = vld [vmem:[#allocation2 + $0xb4] sm:$0xf] }
  0x72   : > { %v1118_v58 = vsel %vm1022_vm2, %v1113_v50, %v1117_v54  ;;  %v664_v8 = vsel %vm3740_vm6, %v449_v55, %v663_v41  ;;  %v502_v13 = vshrl.u32 %v200_v53, 16  ;;  %v1137_v42 = vor.u32 %v1136_v26, %v1132_v59  ;;  %662 = vst.msk [vmem:[#allocation2 + $0x88] sm:$0xf] %vm204_vm0, %v448_v30  ;;  %v691_v21 = vld [vmem:[#allocation2 + $0xbc] sm:$0x1] }
  0x73   : > { %v1141_v27 = vrot.slane %v1139_v15, 1  ;;  %v473_v12 = vor.u32 %v471_v10, %v470_v0  ;;  %v474_v60 = vrot.slane %v470_v0, 4  ;;  %v478_v47 = vrot.slane %v476_v33, 7  ;;  %665 = vst [vmem:[#allocation2 + $0x8c] sm:$0x1] %v664_v8 }
  0x74   : > { %1229 = vrot.lane.b32.xlu1 %v1118_v58, %s3570_s15  ;;  %v504_v2 = vrot.slane %v502_v13, 7  ;;  %v505_v31 = vshll.u32 %v200_v53, 16  ;;  %v510_v63 = vshrl.u32 %v201_v61, 16  ;;  %v513_v54 = vshll.u32 %v201_v61, 16  ;;  %v3496_v33 = vld [vmem:[#allocation2 + $0xc] sm:$0xe] }
  0x75   : > { %v1142_v48 = vsel %vm1022_vm2, %v1137_v42, %v1141_v27  ;;  %v481_v35 = vor.u32 %v479_v32, %v478_v47  ;;  %v483_v9 = vrot.slane %v478_v47, 4  ;;  %v674_v41 = vsel %vm3773_vm8, %v473_v12, %v673_v36 }
  0x76   : > { %1233 = vrot.lane.b32.xlu0 %v1142_v48, %s3570_s15  ;;  %675 = vst [vmem:[#allocation2 + $0x9c] sm:$0xf] %v674_v41  ;;  %v507_v50 = vor.u32 %v505_v31, %v504_v2  ;;  %v508_v40 = vrot.slane %v504_v2, 4  ;;  %v512_v34 = vrot.slane %v510_v63, 7  ;;  %v3497_v31 = vor.u32 %v3496_v33, %v4179_v45 }
  0x77   : > { %v482_v59 = vsel %vm3753_vm7, %v474_v60, %v481_v35  ;;  %v678_v18 = vsel %vm3740_vm6, %v483_v9, %v677_v1  ;;  %v1300_v45 = vrot.slane %v4202_v17, 1 }
  0x78   : > { %676 = vst.msk [vmem:[#allocation2 + $0xa0] sm:$0xf] %vm204_vm0, %v482_v59  ;;  %v515_v10 = vor.u32 %v513_v54, %v512_v34  ;;  %v517_v53 = vrot.slane %v512_v34, 4  ;;  %v688_v58 = vsel %vm3773_vm8, %v507_v50, %v687_v5  ;;  %v3390_v34 = vld [vmem:[#allocation2] sm:$0xe] }
  0x79   : > { %679 = vst [vmem:[#allocation2 + $0xa4] sm:$0x1] %v678_v18  ;;  %v4266_v15 = vld [vmem:[#allocation2 + $0x84] sm:$0xff]  }
  0x7a   : > { %v4268_v25 = vld [vmem:[#allocation2 + $0x84] sm:$0xf0]  ;;  %v516_v55 = vsel %vm3753_vm7, %v508_v40, %v515_v10  ;;  %689 = vst [vmem:[#allocation2 + $0xb4] sm:$0xf] %v688_v58  ;;  %v692_v26 = vsel %vm3740_vm6, %v517_v53, %v691_v21  ;;  %v744_v0 = vld [vmem:[#allocation2 + $0x8c] sm:$0x1] }
  0x7b   : > { %690 = vst.msk [vmem:[#allocation2 + $0xb8] sm:$0xf] %vm204_vm0, %v516_v55  ;;  %v1001_v32 = vunpack.c.l.b16 %v744_v0  ;;  %v1156_v27 = vshrl.u32 %v4266_v15, 16  ;;  %v1158_v30 = vshll.u32 %v4266_v15, 16  ;;  %v3389_v40 = vld [vmem:[#allocation2] sm:$0xf0] }
  0x7c   : > { %693 = vst [vmem:[#allocation2 + $0xbc] sm:$0x1] %v692_v26  ;;  %v3392_v21 = vld [vmem:[#allocation2 + $0x18] sm:$0xf0]  ;;  %v1299_v55 = vrot.slane %v3497_v31, 1 }
  0x7d   : > { %v4275_v61 = vpack.c.b16 %v1001_v32, %v1001_v32  ;;  %v1160_v12 = vrot.slane %v1158_v30, 1  ;;  %v3393_v26 = vld [vmem:[#allocation2 + $0x18] sm:$0xe]  ;;  %v3391_v32 = vor.u32 %v3390_v34, %v3389_v40  ;;  %v3396_v30 = vld [vmem:[#allocation2 + $0x30] sm:$0xe]  ;;  %v1303_v40 = vrot.slane %v4086_v22, 1 }
  0x7f   : > { %v4279_v8 = vld [vmem:[#allocation2 + $0x9c] sm:$0xff]   ;;  %v1163_v13 = vshll.u32 %v4275_v61, 16  ;;  %v1161_v63 = vor.u32 %v1160_v12, %v1156_v27  ;;  %v3395_v27 = vld [vmem:[#allocation2 + $0x30] sm:$0xf0] }
  0x80   : > { %v4281_v36 = vld [vmem:[#allocation2 + $0x9c] sm:$0xf0]  ;;  %v746_v42 = vld [vmem:[#allocation2 + $0xa4] sm:$0x1]  ;;  %v1180_v35 = vshrl.u32 %v4279_v8, 16  ;;  %v1182_v9 = vshll.u32 %v4279_v8, 16  ;;  %v3397_v31 = vor.u32 %v3396_v30, %v3395_v27 }
  0x81   : > { %v1003_v60 = vunpack.c.l.b16 %v746_v42  ;;  %v1165_v47 = vrot.slane %v1163_v13, 1  ;;  %v3499_v42 = vld [vmem:[#allocation2 + $0x24] sm:$0xe]  ;;  %v1312_v27 = vrot.slane %v4215_v24, 1  ;;  %v4328_v24 = vld [vmem:[#allocation2 + $0x6c] sm:$0xff]  }
  0x82   : > { %v4284_v1 = vld [vmem:[#allocation2 + $0xb4] sm:$0xff]   ;;  %v1184_v59 = vrot.slane %v1182_v9, 1  ;;  %v3502_v9 = vld [vmem:[#allocation2 + $0x3c] sm:$0xe]  ;;  %v1308_v34 = vrot.slane %v3397_v31, 1 }
  0x83   : > { %5325 = vst [vmem:[#allocation3_spill] sm:$0xff] %v4284_v1  ;;  %v4286_v2 = vld [vmem:[#allocation2 + $0xb4] sm:$0xf0]  ;;  %v4289_v54 = vpack.c.b16 %v1003_v60, %v1003_v60  ;;  %v748_v48 = vld [vmem:[#allocation2 + $0xbc] sm:$0x1]  ;;  %v1166_v5 = vsel %vm1022_vm2, %v1161_v63, %v1165_v47  ;;  %v1204_v53 = vshrl.u32 %v4284_v1, 16  ;;  %v3394_v60 = vor.u32 %v3393_v26, %v3392_v21 }
  0x84   : > { %v1005_v41 = vunpack.c.l.b16 %v748_v48  ;;  %1237 = vrot.lane.b32.xlu2 %v1166_v5, %s3570_s15  ;;  %v1206_v58 = vshll.u32 %v4284_v1, 16  ;;  %v1185_v0 = vor.u32 %v1184_v59, %v1180_v35  ;;  %v1301_v63 = vsel %vm1295_vm9, %v1299_v55, %v1300_v45  ;;  %v811_v49 = vld [vmem:[#allocation2 + $0xbc] sm:$0x1] }
  0x85   : > { %v1187_v50 = vshll.u32 %v4289_v54, 16  ;;  %v1296_v48 = vrot.slane %v3391_v32, 1  ;;  %v1297_v35 = vrot.slane %v3631_v7, 1  ;;  %v1309_v59 = vrot.slane %v4071_v11, 1  ;;  %v3398_v7 = vld [vmem:[#allocation2 + $0x48] sm:$0xf0] }
  0x86   : > { %v4296_v18 = vpack.c.b16 %v1005_v41, %v1005_v41  ;;  %v1208_v13 = vrot.slane %v1206_v58, 1  ;;  %v3505_v41 = vld [vmem:[#allocation2 + $0x54] sm:$0xe]  ;;  %v3500_v21 = vor.u32 %v3499_v42, %v4162_v14  ;;  %v3503_v55 = vor.u32 %v3502_v9, %v4193_v52  ;;  %v3401_v14 = vld [vmem:[#allocation2 + $0x60] sm:$0xf0] }
  0x87   : > { %v1189_v10 = vrot.slane %v1187_v50, 1  ;;  %v1302_v50 = vrot.slane %v3394_v60, 1  ;;  %v1298_v45 = vsel %vm1295_vm9, %v1296_v48, %v1297_v35  ;;  %v1310_v58 = vsel %vm1295_vm9, %v1308_v34, %v1309_v59  ;;  %v3404_v42 = vld [vmem:[#allocation2 + $0x78] sm:$0xf0]  ;;  %v3508_v60 = vld [vmem:[#allocation2 + $0x6c] sm:$0xe] }
  0x88   : > { %v1211_v33 = vshll.u32 %v4296_v18, 16  ;;  %v1209_v47 = vor.u32 %v1208_v13, %v1204_v53  ;;  %v3506_v26 = vor.u32 %v3505_v41, %v4210_v16  ;;  %v1305_v22 = vrot.slane %v3500_v21, 1  ;;  %v3405_v16 = vld [vmem:[#allocation2 + $0x78] sm:$0xe]  ;;  %v4330_v48 = vld [vmem:[#allocation2 + $0x6c] sm:$0xf0] }
  0x89   : > { %v1190_v12 = vsel %vm1022_vm2, %v1185_v0, %v1189_v10  ;;  %v3399_v10 = vld [vmem:[#allocation2 + $0x48] sm:$0xe]  ;;  %v1304_v53 = vsel %vm1295_vm9, %v1302_v50, %v1303_v40  ;;  %v1306_v0 = vrot.slane %v4185_v62, 1  ;;  %v1311_v32 = vrot.slane %v3503_v55, 1  ;;  %v3511_v35 = vld [vmem:[#allocation2 + $0x84] sm:$0xe] }
  0x8a   : > { %v1213_v17 = vrot.slane %v1211_v33, 1  ;;  %1241 = vrot.lane.b32.xlu1 %v1190_v12, %s3570_s15  ;;  %v3400_v11 = vor.u32 %v3399_v10, %v3398_v7  ;;  %v3402_v33 = vld [vmem:[#allocation2 + $0x60] sm:$0xe]  ;;  %v1317_v30 = vrot.slane %v3506_v26, 1  ;;  %v1318_v13 = vrot.slane %v4221_v4, 1 }
  0x8b   : > { %v1307_v52 = vsel %vm1295_vm9, %v1305_v22, %v1306_v0  ;;  %v1315_v62 = vrot.slane %v4038_v43, 1  ;;  %v3406_v31 = vor.u32 %v3405_v16, %v3404_v42  ;;  %v862_v4 = vld [vmem:[#allocation2 + $0x20] sm:$0x1]  ;;  %v3514_v9 = vld [vmem:[#allocation2 + $0x9c] sm:$0xe]  ;;  %v1321_v50 = vrot.slane %v4126_v3, 1 }
  0x8c   : > { %v1214_v5 = vsel %vm1022_vm2, %v1209_v47, %v1213_v17  ;;  %1346 = vrot.lane.b32.xlu2 %v1301_v63, %s3571_s19  ;;  %v1314_v12 = vrot.slane %v3400_v11, 1  ;;  %v3403_v17 = vor.u32 %v3402_v33, %v3401_v14  ;;  %v1313_v47 = vsel %vm1295_vm9, %v1311_v32, %v1312_v27  ;;  %v3437_v40 = vld [vmem:[#allocation2 + $0x18] sm:$0xf0]  ;;  %v3438_v34 = vld [vmem:[#allocation2 + $0x18] sm:$0xe]  ;;  %v3270_v59 = vld [vmem:[%s5314_s1 + $0x40] sm:$0xff] }
  0x8d   : > { %1245 = vrot.lane.b32.xlu0 %v1214_v5, %s3570_s15  ;;  %v1319_v63 = vsel %vm1295_vm9, %v1317_v30, %v1318_v13  ;;  %v2016_v41 = vunpack.c.l.b16 %v862_v4  ;;  %v3439_v21 = vor.u32 %v3438_v34, %v3437_v40  ;;  %v1326_v7 = vrot.slane %v3406_v31, 1  ;;  %2835 = vmatpush.bf16.msra.mxu1 %v3270_v59  ;;  %v3407_v32 = vld [vmem:[#allocation2 + $0x90] sm:$0xf0]  ;;  %v3408_v27 = vld [vmem:[#allocation2 + $0x90] sm:$0xe] }
  0x8e   : > { %v1316_v5 = vsel %vm1295_vm9, %v1314_v12, %v1315_v62  ;;  %v1320_v43 = vrot.slane %v3403_v17, 1  ;;  %v1327_v10 = vrot.slane %v4145_v20, 1  ;;  %3469 = vmatpush.bf16.msra.mxu3 %v3270_v59  ;;  %v3512_v20 = vor.u32 %v3511_v35, %v4268_v25  ;;  %v3410_v30 = vld [vmem:[#allocation2 + $0xa8] sm:$0xf0]  ;;  %v3411_v13 = vld [vmem:[#allocation2 + $0xa8] sm:$0xe] }
  0x8f   : > { %v2320_v3 = vrot.slane %v3439_v21, 1  ;;  %v3515_v14 = vor.u32 %v3514_v9, %v4281_v36  ;;  %v1324_v33 = vrot.slane %v4239_v6, 1  ;;  %v1330_v25 = vrot.slane %v4275_v61, 1  ;;  %v870_v17 = vld [vmem:[#allocation2 + $0x80] sm:$0x1] }
  0x90   : > { %v1322_v26 = vsel %vm1295_vm9, %v1320_v43, %v1321_v50  ;;  %v1328_v11 = vsel %vm1295_vm9, %v1326_v7, %v1327_v10  ;;  %v1329_v16 = vrot.slane %v3512_v20, 1  ;;  %v1336_v12 = vrot.slane %v4289_v54, 1  ;;  %v3517_v9 = vld [vmem:[#allocation2 + $0x6c] sm:$0xe]  ;;  %v3556_v54 = vld [vmem:[#allocation2 + $0x24] sm:$0xf0] }
  0x91   : > { %v1335_v36 = vrot.slane %v3515_v14, 1  ;;  %v3409_v6 = vor.u32 %v3408_v27, %v3407_v32  ;;  %v2024_v61 = vunpack.c.l.b16 %v870_v17  ;;  %v1333_v43 = vrot.slane %v4105_v39, 1  ;;  %v863_v50 = vld [vmem:[#allocation2 + $0x2c] sm:$0x1]  ;;  %v3557_v40 = vld [vmem:[#allocation2 + $0x24] sm:$0xe] }
  0x92   : > { %1344 = vrot.lane.b32.xlu1 %v1298_v45, %s3571_s19  ;;  %v4339_v45 = vpack.c.b16 %v2016_v41, %v2016_v41  ;;  %v1331_v4 = vsel %vm1295_vm9, %v1329_v16, %v1330_v25  ;;  %v4362_v41 = vld [vmem:[#allocation2 + $0x24] sm:$0xff]   ;;  %v2017_v59 = vunpack.c.l.b16 %v863_v50  ;;  %v1339_v21 = vrot.slane %v4167_v28, 1  ;;  %v765_v39 = vld [vmem:[#allocation2 + $0xc] sm:$0xff]   ;;  %v797_v32 = vld [vmem:[#allocation2 + $0x14] sm:$0x1] }
  0x93   : > { %v1337_v35 = vsel %vm1295_vm9, %v1335_v36, %v1336_v12  ;;  %v3518_v28 = vor.u32 %v3517_v9, %v4330_v48  ;;  %v1504_v48 = vunpack.c.l.b16 %v797_v32  ;;  %v1539_v36 = vshll.u32 %v765_v39, 16  ;;  %v4394_v9 = vld [vmem:[#allocation2 + $0x18] sm:$0xff]  }
  0x94   : > { %1352 = vrot.lane.b32.xlu2 %v1310_v58, %s3571_s19  ;;  %v3509_v58 = vor.u32 %v3508_v60, %v4231_v51  ;;  %v2321_v55 = vrot.slane %v4339_v45, 1  ;;  %v3412_v60 = vor.u32 %v3411_v13, %v3410_v30 }
  0x95   : > { %1348 = vrot.lane.b32.xlu0 %v1304_v53, %s3571_s19  ;;  %v805_v53 = vld [vmem:[#allocation2 + $0x74] sm:$0x1]  ;;  %v1832_v27 = vrot.slane %v3518_v28, 1 }
  0x96   : > { %v1512_v22 = vunpack.c.l.b16 %v805_v53  ;;  %v2322_v0 = vsel %vm1295_vm9, %v2320_v3, %v2321_v55  ;;  %v1323_v51 = vrot.slane %v3509_v58, 1  ;;  %v1338_v34 = vrot.slane %v3412_v60, 1  ;;  %v3440_v60 = vld [vmem:[#allocation2 + $0x30] sm:$0xf0] }
  0x97   : > { %3210 = vmatmul.msk.bf16.vlgmr.msra.gmra.mxu1 %vm2368_vm10, %v2322_v0  ;;  %v4368_v53 = vpack.c.b16 %v2024_v61, %v2024_v61  ;;  %v4370_v58 = vpack.c.b16 %v2017_v59, %v2017_v59  ;;  %v3558_v3 = vor.u32 %v3557_v40, %v3556_v54  ;;  %v806_v61 = vld [vmem:[#allocation2 + $0x80] sm:$0x1]  ;;  %v3378_v59 = vld [vmem:[#allocation2 + $0x78] sm:$0xff]  }
  0x98   : > { %v1528_v42 = vpack.c.b16 %v1512_v22, %v1512_v22  ;;  %v1325_v62 = vsel %vm1295_vm9, %v1323_v51, %v1324_v33  ;;  %v3520_v33 = vld [vmem:[#allocation2 + $0xc] sm:$0xe] }
  0x99   : > { %v2323_v22 = vrot.slane %v3558_v3, 1  ;;  %v2324_v0 = vrot.slane %v4370_v58, 1  ;;  %v2152_v14 = vshll.u32 %v4368_v53, 16 }
  0x9a   : > { %1350 = vrot.lane.b32.xlu1 %v1307_v52, %s3571_s19  ;;  %v1635_v52 = vshll.u32 %v4328_v24, 16  ;;  %v1640_v31 = vshll.u32 %v1528_v42, 16  ;;  %v1833_v30 = vrot.slane %v1528_v42, 1  ;;  %v3441_v42 = vld [vmem:[#allocation2 + $0x30] sm:$0xe] }
  0x9b   : > { %v2325_v51 = vsel %vm1295_vm9, %v2323_v22, %v2324_v0  ;;  %v2154_v13 = vrot.slane %v2152_v14, 1  ;;  %v2056_v14 = vshll.u32 %v4339_v45, 16  ;;  %v3426_v45 = vld [vmem:[#allocation2 + $0x78] sm:$0xe] }
  0x9c   : > { %1358 = vrot.lane.b32.xlu2 %v1319_v63, %s3571_s19  ;;  %v1637_v63 = vrot.slane %v1635_v52, 1  ;;  %v1642_v10 = vrot.slane %v1640_v31, 1  ;;  %v1834_v16 = vsel %vm1295_vm9, %v1832_v27, %v1833_v30  ;;  %v1541_v31 = vrot.slane %v1539_v36, 1  ;;  %v3560_v36 = vld [vmem:[#allocation2 + $0x3c] sm:$0xe] }
  0x9d   : > { %1354 = vrot.lane.b32.xlu0 %v1313_v47, %s3571_s19  ;;  %v1633_v47 = vshrl.u32 %v4328_v24, 16  ;;  %v2155_v25 = vsel %vm1022_vm2, %v4157_v29, %v2154_v13 }
  0x9f   : > { %v1638_v7 = vor.u32 %v1637_v63, %v1633_v47  ;;  %v1537_v63 = vshrl.u32 %v765_v39, 16 }
  0xa1   : > { %v1643_v20 = vsel %vm1022_vm2, %v1638_v7, %v1642_v10  ;;  %v848_v7 = vld [vmem:[#allocation2 + $0x84] sm:$0xff]   ;;  %v1542_v3 = vor.u32 %v1541_v31, %v1537_v63 }
  0xa2   : > { %1356 = vrot.lane.b32.xlu1 %v1316_v5, %s3571_s19  ;;  %v1332_v5 = vrot.slane %v3409_v6, 1  ;;  %v1520_v6 = vpack.c.b16 %v1504_v48, %v1504_v48  ;;  %v4404_v10 = vld [vmem:[#allocation2 + $0x84] sm:$0xf0]  ;;  %v4415_v48 = vld [vmem:[#allocation2 + $0x3c] sm:$0xff]  }
  0xa4   : > { %1364 = vrot.lane.b32.xlu2 %v1328_v11, %s3571_s19  ;;  %v1334_v55 = vsel %vm1295_vm9, %v1332_v5, %v1333_v43  ;;  %v1340_v11 = vsel %vm1295_vm9, %v1338_v34, %v1339_v21  ;;  %v1809_v29 = vrot.slane %v1520_v6, 1  ;;  %v2051_v34 = vshll.u32 %v4394_v9, 16 }
  0xa5   : > { %1360 = vrot.lane.b32.xlu0 %v1322_v26, %s3571_s19  ;;  %v3519_v26 = vld [vmem:[#allocation2 + $0xc] sm:$0xf0]  ;;  %v1513_v21 = vunpack.c.l.b16 %v806_v61 }
  0xa6   : > { %v3521_v12 = vor.u32 %v3520_v33, %v3519_v26  ;;  %v1647_v26 = vshll.u32 %v3378_v59, 16  ;;  %v2053_v22 = vrot.slane %v2051_v34, 1  ;;  %v1645_v33 = vshrl.u32 %v3378_v59, 16 }
  0xa7   : > { %3211 = vmatmul.msk.bf16.gmra.mxu1 %vm2368_vm10, %v2325_v51  ;;  %v1529_v0 = vpack.c.b16 %v1513_v21, %v1513_v21  ;;  %v798_v51 = vld [vmem:[#allocation2 + $0x20] sm:$0x1] }
  0xa8   : > { %v1649_v32 = vrot.slane %v1647_v26, 1  ;;  %v1505_v13 = vunpack.c.l.b16 %v798_v51  ;;  %v3413_v51 = vld [vmem:[#allocation2 + $0x18] sm:$0xf0] }
  0xa9   : > { %v1652_v30 = vshll.u32 %v1529_v0, 16 }
  0xaa   : > { %1362 = vrot.lane.b32.xlu1 %v1325_v62, %s3571_s19  ;;  %v864_v62 = vld [vmem:[#allocation2 + $0x38] sm:$0x1]  ;;  %v1650_v31 = vor.u32 %v1649_v32, %v1645_v33  ;;  %v3414_v32 = vld [vmem:[#allocation2 + $0x18] sm:$0xe] }
  0xab   : > { %v2018_v17 = vunpack.c.l.b16 %v864_v62 }
  0xac   : > { %1370 = vrot.lane.b32.xlu2 %v1337_v35, %s3571_s19  ;;  %v1544_v35 = vshll.u32 %v1520_v6, 16 }
  0xad   : > { %1366 = vrot.lane.b32.xlu0 %v1331_v4, %s3571_s19  ;;  %v4392_v47 = vpack.c.b16 %v2018_v17, %v2018_v17  ;;  %v1808_v4 = vrot.slane %v3521_v12, 1  ;;  %v2058_v12 = vrot.slane %v2056_v14, 1  ;;  %v3425_v17 = vld [vmem:[#allocation2 + $0x78] sm:$0xf0] }
  0xae   : > { %v3427_v61 = vor.u32 %v3426_v45, %v3425_v17  ;;  %v2068_v17 = vshll.u32 %v4370_v58, 16  ;;  %v866_v45 = vld [vmem:[#allocation2 + $0x50] sm:$0x1] }
  0xaf   : > { %v2327_v5 = vrot.slane %v4392_v47, 1  ;;  %v1810_v40 = vsel %vm1295_vm9, %v1808_v4, %v1809_v29  ;;  %v1654_v4 = vrot.slane %v1652_v30, 1  ;;  %v1521_v29 = vpack.c.b16 %v1505_v13, %v1505_v13  ;;  %v4442_v30 = vld [vmem:[#allocation2 + $0x84] sm:$0xff]  }
  0xb0   : > { %v1835_v26 = vrot.slane %v3427_v61, 1 }
  0xb2   : > { %1368 = vrot.lane.b32.xlu1 %v1334_v55, %s3571_s19  ;;  %v4383_v52 = vpop.permute.xlu2 %1223  ;;  %v1546_v55 = vrot.slane %v1544_v35, 1 }
  0xb4   : > { %1744 = vrot.lane.b32.xlu2 %v1643_v20, %s3572_s22  ;;  %v871_v20 = vld [vmem:[#allocation2 + $0x8c] sm:$0x1]  ;;  %v1547_v28 = vsel %vm1022_vm2, %v1542_v3, %v1546_v55  ;;  %v1655_v3 = vsel %vm1022_vm2, %v1650_v31, %v1654_v4  ;;  %v1556_v55 = vshll.u32 %v1521_v29, 16 }
  0xb5   : > { %1372 = vrot.lane.b32.xlu0 %v1340_v11, %s3571_s19  ;;  %v4410_v11 = vpop.permute.xlu0 %1215  ;;  %v2025_v27 = vunpack.c.l.b16 %v871_v20  ;;  %v807_v31 = vld [vmem:[#allocation2 + $0x8c] sm:$0x1] }
  0xb6   : > { %v1558_v33 = vrot.slane %v1556_v55, 1  ;;  %v3443_v4 = vld [vmem:[#allocation2 + $0x48] sm:$0xf0] }
  0xba   : > { %1472 = vrot.lane.b32.xlu1 %v4328_v24, %s3573_s23  ;;  %v3442_v24 = vor.u32 %v3441_v42, %v3440_v60  ;;  %v2159_v60 = vshll.u32 %v848_v7, 16  ;;  %v4422_v42 = vpack.c.b16 %v2025_v27, %v2025_v27  ;;  %v2063_v27 = vshll.u32 %v4362_v41, 16 }
  0xbb   : > { %v4397_v43 = vpop.permute.xlu2 %1231 }
  0xbc   : > { %2256 = vrot.lane.b32.xlu2 %v2155_v25, %s3575_s25  ;;  %v2326_v54 = vrot.slane %v3442_v24, 1  ;;  %v865_v25 = vld [vmem:[#allocation2 + $0x44] sm:$0x1]  ;;  %v2161_v34 = vrot.slane %v2159_v60, 1  ;;  %v3523_v60 = vld [vmem:[#allocation2 + $0x84] sm:$0xe] }
  0xbd   : > { %1872 = vrot.lane.b32.xlu0 %v1834_v16, %s3574_s24  ;;  %v3559_v16 = vld [vmem:[#allocation2 + $0x3c] sm:$0xf0]  ;;  %v2019_v6 = vunpack.c.l.b16 %v865_v25  ;;  %v3415_v25 = vor.u32 %v3414_v32, %v3413_v51  ;;  %v4469_v32 = vld [vmem:[#allocation2 + $0x24] sm:$0xf0] }
  0xbe   : > { %v2328_v50 = vsel %vm1295_vm9, %v2326_v54, %v2327_v5  ;;  %v3561_v63 = vor.u32 %v3560_v36, %v3559_v16 }
  0xbf   : > { %3212 = vmatmul.msk.bf16.gmra.mxu1 %vm2368_vm10, %v2328_v50  ;;  %v4424_v24 = vpack.c.b16 %v2019_v6, %v2019_v6  ;;  %v2065_v6 = vrot.slane %v2063_v27, 1  ;;  %v1811_v61 = vrot.slane %v3415_v25, 1 }
  0xc0   : > { %v2329_v54 = vrot.slane %v3561_v63, 1  ;;  %v2020_v63 = vunpack.c.l.b16 %v866_v45  ;;  %v799_v45 = vld [vmem:[#allocation2 + $0x2c] sm:$0x1] }
  0xc1   : > { %v2330_v5 = vrot.slane %v4424_v24, 1 }
  0xc2   : > { %1984 = vrot.lane.b32.xlu1 %v4121_v46, %s3576_s26  ;;  %v2049_v46 = vshrl.u32 %v4394_v9, 16 }
  0xc3   : > { %v4417_v62 = vpop.permute.xlu2 %1243  ;;  %v2331_v21 = vsel %vm1295_vm9, %v2329_v54, %v2330_v5  ;;  %v4454_v54 = vpack.c.b16 %v2020_v63, %v2020_v63  ;;  %v1812_v5 = vrot.slane %v1521_v29, 1  ;;  %v4479_v63 = vld [vmem:[#allocation2 + $0x90] sm:$0xff]  }
  0xc4   : > { %1856 = vrot.lane.b32.xlu2 %v1810_v40, %s3574_s24  ;;  %v2157_v40 = vshrl.u32 %v848_v7, 16 }
  0xc5   : > { %1456 = vrot.lane.b32.xlu0 %v765_v39, %s3573_s23  ;;  %v2054_v39 = vor.u32 %v2053_v22, %v2049_v46  ;;  %v1836_v46 = vrot.slane %v1529_v0, 1  ;;  %v3522_v0 = vld [vmem:[#allocation2 + $0x84] sm:$0xf0]  ;;  %v2333_v55 = vrot.slane %v4454_v54, 1 }
  0xc6   : > { %v2162_v20 = vor.u32 %v2161_v34, %v2157_v40 }
  0xc7   : > { %v2059_v35 = vsel %vm1022_vm2, %v2054_v39, %v2058_v12  ;;  %v4428_v50 = vpop.permute.xlu0 %1227  ;;  %v1837_v13 = vsel %vm1295_vm9, %v1835_v26, %v1836_v46  ;;  %v2061_v12 = vshrl.u32 %v4362_v41, 16  ;;  %v1659_v26 = vshll.u32 %v4442_v30, 16 }
  0xc9   : > { %v2066_v34 = vor.u32 %v2065_v6, %v2061_v12  ;;  %v1661_v25 = vrot.slane %v1659_v26, 1 }
  0xca   : > { %1728 = vrot.lane.b32.xlu1 %v1547_v28, %s3572_s22 }
  0xcb   : > { %v4439_v14 = vpop.permute.xlu2 %1225 }
  0xcc   : > { %1474 = vrot.lane.b32.xlu2 %v3378_v59, %s3573_s23  ;;  %v2164_v59 = vshll.u32 %v4422_v42, 16 }
  0xcd   : > { %1968 = vrot.lane.b32.xlu0 %v4394_v9, %s3576_s26  ;;  %v4435_v22 = vpop.permute.xlu1 %1219 }
  0xce   : > { %v2166_v28 = vrot.slane %v2164_v59, 1  ;;  %v2070_v59 = vrot.slane %v2068_v17, 1 }
  0xcf   : > { %3213 = vmatmul.msk.bf16.gmra.mxu1 %vm2368_vm10, %v2331_v21  ;;  %v1514_v21 = vunpack.c.l.b16 %v807_v31 }
  0xd0   : > { %v2167_v16 = vsel %vm1022_vm2, %v2162_v20, %v2166_v28  ;;  %v4448_v36 = vpop.permute.xlu0 %1239  ;;  %v1813_v20 = vsel %vm1295_vm9, %v1811_v61, %v1812_v5  ;;  %v2071_v29 = vsel %vm1022_vm2, %v2066_v34, %v2070_v59  ;;  %v3524_v28 = vor.u32 %v3523_v60, %v3522_v0  ;;  %v4487_v61 = vld [vmem:[#allocation2 + $0x58] sm:$0xf]  ;;  %v867_v59 = vld [vmem:[#allocation2 + $0x5c] sm:$0x1] }
  0xd1   : > { %v1530_v51 = vpack.c.b16 %v1514_v21, %v1514_v21  ;;  %v2171_v5 = vshll.u32 %v4479_v63, 16  ;;  %v883_v21 = vld [vmem:[#allocation2 + $0x54] sm:$0xe] }
  0xd2   : > { %2240 = vrot.lane.b32.xlu1 %v2059_v35, %s3575_s25  ;;  %v3444_v35 = vld [vmem:[#allocation2 + $0x48] sm:$0xe]  ;;  %v1838_v0 = vrot.slane %v3524_v28, 1  ;;  %v2293_v26 = vunpack.c.l.b16 %v883_v21  ;;  %v808_v28 = vld [vmem:[#allocation2 + $0x98] sm:$0x1]  ;;  %v4521_v21 = vld [vmem:[#allocation2 + $0x9c] sm:$0xff]  }
  0xd3   : > { %v1664_v6 = vshll.u32 %v1530_v51, 16 }
  0xd4   : > { %1986 = vrot.lane.b32.xlu2 %v848_v7, %s3576_s26  ;;  %v1559_v7 = vsel %vm1022_vm2, %v2054_v39, %v1558_v33  ;;  %v3445_v39 = vor.u32 %v3444_v35, %v3443_v4  ;;  %v4467_v33 = vld [vmem:[#allocation2 + $0x24] sm:$0xff]   ;;  %v1506_v35 = vunpack.c.l.b16 %v799_v45 }
  0xd5   : > { %1746 = vrot.lane.b32.xlu0 %v1655_v3, %s3572_s22 }
  0xd6   : > { %v4456_v40 = vpop.permute.xlu1 %1235  ;;  %v2332_v3 = vrot.slane %v3445_v39, 1  ;;  %v1666_v39 = vrot.slane %v1664_v6, 1  ;;  %v4512_v6 = vld [vmem:[#allocation2 + $0x30] sm:$0xff]  }
  0xd8   : > { %v2334_v46 = vsel %vm1295_vm9, %v2332_v3, %v2333_v55  ;;  %v5317_v3 = vunpack.c.l.b16 %v4487_v61  ;;  %v2021_v55 = vunpack.c.l.b16 %v867_v59 }
  0xda   : > { %1874 = vrot.lane.b32.xlu1 %v1837_v13, %s3574_s24  ;;  %v872_v13 = vld [vmem:[#allocation2 + $0x98] sm:$0x1] }
  0xdb   : > { %v2026_v17 = vunpack.c.l.b16 %v872_v13 }
  0xdc   : > { %1730 = vrot.lane.b32.xlu2 %v1559_v7, %s3572_s22  ;;  %v1839_v7 = vrot.slane %v1530_v51, 1  ;;  %v4501_v51 = vpack.c.b16 %v2021_v55, %v2021_v55  ;;  %v4523_v55 = vld [vmem:[#allocation2 + $0x9c] sm:$0xf0] }
  0xdd   : > { %2258 = vrot.lane.b32.xlu0 %v2167_v16, %s3575_s25  ;;  %v1657_v16 = vshrl.u32 %v4442_v30, 16  ;;  %v4490_v34 = vpack.c.b16 %v2026_v17, %v2026_v17  ;;  %v1515_v17 = vunpack.c.l.b16 %v808_v28 }
  0xde   : > { %v4458_v58 = vpop.permute.xlu2 %1237  ;;  %v4477_v60 = vpop.permute.xlu1 %1221  ;;  %v1840_v4 = vsel %vm1295_vm9, %v1838_v0, %v1839_v7  ;;  %v3526_v0 = vld [vmem:[#allocation2 + $0x24] sm:$0xe] }
  0xdf   : > { %3214 = vmatmul.msk.bf16.gmra.mxu1 %vm2368_vm10, %v2334_v46  ;;  %v1218_v27 = vpop.permute.xlu0 %1217  ;;  %v3487_v46 = vld [vmem:[#allocation2 + $0x30] sm:$0xff]  }
  0xe2   : > { %1458 = vrot.lane.b32.xlu1 %v4394_v9, %s3573_s23  ;;  %v2372_v9 = vsel %vm2368_vm10, %v4177_v57, %v1218_v27  ;;  %v1662_v57 = vor.u32 %v1661_v25, %v1657_v16  ;;  %v2309_v27 = vpack.c.b16 %v5317_v3, %v2293_v26  ;;  %v2075_v26 = vshll.u32 %v4512_v6, 16 }
  0xe4   : > { %2242 = vrot.lane.b32.xlu2 %v2071_v29, %s3575_s25  ;;  %v4499_v29 = vpack.c.b16 %v1506_v35, %v1506_v35  ;;  %v1667_v13 = vsel %vm1022_vm2, %v1662_v57, %v1666_v39  ;;  %v2335_v7 = vrot.slane %v2309_v27, 1  ;;  %v1561_v57 = vshrl.u32 %v4467_v33, 16 }
  0xe5   : > { %1858 = vrot.lane.b32.xlu0 %v1813_v20, %s3574_s24  ;;  %v1563_v20 = vshll.u32 %v4467_v33, 16 }
  0xe6   : > { %v1347_v12 = vpop.permute.xlu2 %1346  ;;  %v1230_v45 = vpop.permute.xlu1 %1229  ;;  %v1568_v35 = vshll.u32 %v4499_v29, 16 }
  0xe7   : > { %v4482_v31 = vsel %vm2401_vm11, %v2372_v9, %v1347_v12  ;;  %v2169_v9 = vshrl.u32 %v4479_v63, 16  ;;  %v2336_v12 = vrot.slane %v4501_v51, 1  ;;  %v2384_v27 = vsel %vm2368_vm10, %v4208_v19, %v1230_v45 }
  0xe8   : > { %v1570_v28 = vrot.slane %v1568_v35, 1 }
  0xe9   : > { %v2337_v39 = vsel %vm1295_vm9, %v2335_v7, %v2336_v12  ;;  %v2073_v7 = vshrl.u32 %v4512_v6, 16  ;;  %v2080_v12 = vshll.u32 %v4392_v47, 16 }
  0xea   : > { %1970 = vrot.lane.b32.xlu1 %v4362_v41, %s3576_s26  ;;  %v2378_v41 = vsel %vm2368_vm10, %v3487_v46, %v4383_v52  ;;  %v2173_v52 = vrot.slane %v2171_v5, 1  ;;  %v4528_v46 = vpop.permute.xlu0 %1233 }
  0xec   : > { %1876 = vrot.lane.b32.xlu2 %v1840_v4, %s3574_s24  ;;  %v1565_v4 = vrot.slane %v1563_v20, 1  ;;  %v4518_v5 = vor.u32 %v2173_v52, %v2169_v9  ;;  %v3527_v52 = vor.u32 %v3526_v0, %v4469_v32  ;;  %v868_v0 = vld [vmem:[#allocation2 + $0x68] sm:$0x1] }
  0xed   : > { %1476 = vrot.lane.b32.xlu0 %v4442_v30, %s3573_s23  ;;  %v2176_v30 = vshll.u32 %v4490_v34, 16  ;;  %v2022_v35 = vunpack.c.l.b16 %v868_v0 }
  0xee   : > { %v1353_v16 = vpop.permute.xlu2 %1352  ;;  %v1566_v20 = vor.u32 %v1565_v4, %v1561_v57  ;;  %v1814_v57 = vrot.slane %v3527_v52, 1  ;;  %v1815_v4 = vrot.slane %v4499_v29, 1  ;;  %v3268_v29 = vld [vmem:[%s5314_s1 + $0x30] sm:$0xff] }
  0xef   : > { %v4509_v25 = vsel %vm2401_vm11, %v2378_v41, %v1353_v16  ;;  %v2178_v59 = vrot.slane %v2176_v30, 1  ;;  %3215 = vmatmul.msk.bf16.gmra.mxu1 %vm2368_vm10, %v2337_v39  ;;  %v4532_v41 = vpack.c.b16 %v1515_v17, %v1515_v17  ;;  %v873_v16 = vld [vmem:[#allocation2 + $0xa4] sm:$0x1]  ;;  %v3269_v17 = vld [vmem:[%s5314_s1 + $0x38] sm:$0xff]  ;;  %v3428_v52 = vld [vmem:[#allocation2 + $0x90] sm:$0xf0] }
  0xf0   : > { %v1571_v45 = vsel %vm1022_vm2, %v1566_v20, %v1570_v28  ;;  %v2027_v32 = vunpack.c.l.b16 %v873_v16  ;;  %3461 = vmatpush.bf16.msra.mxu2 %v3269_v17  ;;  %2739 = vmatpush.bf16.msra.mxu0 %v3269_v17  ;;  %v2087_v28 = vshll.u32 %v4415_v48, 16  ;;  %v3429_v16 = vld [vmem:[#allocation2 + $0x90] sm:$0xe] }
  0xf1   : > { %v1676_v19 = vshll.u32 %v4532_v41, 16 }
  0xf2   : > { %1748 = vrot.lane.b32.xlu1 %v1667_v13, %s3572_s22  ;;  %v2179_v13 = vsel %vm1022_vm2, %v4518_v5, %v2178_v59  ;;  %v2082_v59 = vrot.slane %v2080_v12, 1  ;;  %v3488_v12 = vld [vmem:[#allocation2 + $0x78] sm:$0xff]  }
  0xf3   : > { %v1678_v20 = vrot.slane %v1676_v19, 1  ;;  %v2390_v17 = vsel %vm2368_vm10, %v3488_v12, %v4456_v40  ;;  %v3267_v40 = vld [vmem:[%s5314_s1 + $0x28] sm:$0xff]  ;;  %v2089_v12 = vrot.slane %v2087_v28, 1 }
  0xf4   : > { %1460 = vrot.lane.b32.xlu2 %v4467_v33, %s3573_s23  ;;  %v2077_v33 = vrot.slane %v2075_v26, 1  ;;  %v3446_v26 = vld [vmem:[#allocation2 + $0x60] sm:$0xf0]  ;;  %3462 = vmatpush.bf16.msra.mxu2 %v3268_v29 }
  0xf5   : > { %1988 = vrot.lane.b32.xlu0 %v4479_v63, %s3576_s26  ;;  %2740 = vmatpush.bf16.msra.mxu0 %v3268_v29  ;;  %v2092_v29 = vshll.u32 %v4424_v24, 16 }
  0xf6   : > { %v1359_v9 = vpop.permute.xlu2 %1358  ;;  %v4551_v47 = vor.u32 %v2077_v33, %v2073_v7  ;;  %v2183_v7 = vshll.u32 %v4521_v21, 16  ;;  %v4563_v33 = vpack.c.b16 %v2027_v32, %v2027_v32 }
  0xf7   : > { %v4540_v30 = vsel %vm2401_vm11, %v2384_v27, %v1359_v9  ;;  %v3447_v27 = vld [vmem:[#allocation2 + $0x60] sm:$0xe]  ;;  %v2094_v28 = vrot.slane %v2092_v29, 1 }
  0xf8   : > { %5326 = vst [vmem:[#allocation4_spill] sm:$0xff] %v4540_v30  ;;  %v3448_v9 = vor.u32 %v3447_v27, %v3446_v26  ;;  %v2083_v26 = vsel %vm1022_vm2, %v4551_v47, %v2082_v59  ;;  %v2085_v27 = vshrl.u32 %v4415_v48, 16  ;;  %v2181_v59 = vshrl.u32 %v4521_v21, 16  ;;  %3463 = vmatpush.bf16.msra.mxu2 %v3267_v40 }
  0xf9   : > { %2741 = vmatpush.bf16.msra.mxu0 %v3267_v40 }
  0xfa   : > { %2260 = vrot.lane.b32.xlu1 %v2179_v13, %s3575_s25  ;;  %v4560_v13 = vpack.c.b16 %v2022_v35, %v2022_v35  ;;  %v2338_v3 = vrot.slane %v3448_v9, 1  ;;  %v2090_v30 = vor.u32 %v2089_v12, %v2085_v27  ;;  %v3416_v12 = vld [vmem:[#allocation2 + $0x30] sm:$0xf0] }
  0xfc   : > { %v1242_v39 = vpop.permute.xlu1 %1241  ;;  %1972 = vrot.lane.b32.xlu2 %v4512_v6, %s3576_s26  ;;  %v2339_v35 = vrot.slane %v4560_v13, 1  ;;  %v4593_v24 = vsel %vm1022_vm2, %v2090_v30, %v2094_v28  ;;  %v869_v28 = vld [vmem:[#allocation2 + $0x74] sm:$0x1] }
  0xfd   : > { %1732 = vrot.lane.b32.xlu0 %v1571_v45, %s3572_s22  ;;  %v1816_v45 = vsel %vm1295_vm9, %v1814_v57, %v1815_v4  ;;  %v1679_v57 = vsel %vm1022_vm2, %v4518_v5, %v1678_v20  ;;  %v3430_v4 = vor.u32 %v3429_v16, %v3428_v52  ;;  %v800_v5 = vld [vmem:[#allocation2 + $0x38] sm:$0x1]  ;;  %v1842_v52 = vrot.slane %v4532_v41, 1 }
  0xfe   : > { %v1365_v0 = vpop.permute.xlu2 %1364  ;;  %v2340_v9 = vsel %vm1295_vm9, %v2338_v3, %v2339_v35  ;;  %v3266_v3 = vld [vmem:[%s5314_s1 + $0x20] sm:$0xff]  ;;  %v1507_v30 = vunpack.c.l.b16 %v800_v5  ;;  %v3563_v5 = vld [vmem:[#allocation2 + $0x6c] sm:$0xe] }
  0xff   : > { %v4567_v19 = vpop.permute.xlu0 %1245  ;;  %v4574_v32 = vsel %vm2401_vm11, %v2390_v17, %v1365_v0  ;;  %v2185_v17 = vrot.slane %v2183_v7, 1  ;;  %v2188_v0 = vshll.u32 %v4563_v33, 16  ;;  %3216 = vmatmul.msk.bf16.gmra.mxu1 %vm2368_vm10, %v2340_v9  ;;  %v1841_v20 = vrot.slane %v3430_v4, 1  ;;  %3464 = vmatpush.bf16.msra.mxu2 %v3266_v3  ;;  %v3265_v4 = vld [vmem:[%s5314_s1 + $0x18] sm:$0xff] }
 0x100   : > { %5327 = vst [vmem:[#allocation5_spill] sm:$0xff] %v4567_v19  ;;  %2742 = vmatpush.bf16.msra.mxu0 %v3266_v3  ;;  %v2023_v3 = vunpack.c.l.b16 %v869_v28  ;;  %v4652_v28 = vld [vmem:[#allocation2 + $0x3c] sm:$0xff]  }
 0x101   : > { %v2186_v16 = vor.u32 %v2185_v17, %v2181_v59  ;;  %v2190_v7 = vrot.slane %v2188_v0, 1  ;;  %v4620_v17 = vld [vmem:[#allocation2 + $0x6c] sm:$0xff]   ;;  %v3532_v19 = vld [vmem:[#allocation2 + $0x3c] sm:$0xe] }
 0x102   : > { %1860 = vrot.lane.b32.xlu1 %v1816_v45, %s3574_s24  ;;  %v3489_v45 = vld [vmem:[#allocation2 + $0x18] sm:$0xff]   ;;  %v3562_v0 = vld [vmem:[#allocation2 + $0x6c] sm:$0xf0] }
 0x103   : > { %v2374_v35 = vsel %vm2368_vm10, %v3489_v45, %v4435_v22  ;;  %v4612_v22 = vld [vmem:[#allocation2 + $0x9c] sm:$0xff]   ;;  %v2191_v29 = vsel %vm1022_vm2, %v2186_v16, %v2190_v7  ;;  %v1523_v45 = vpack.c.b16 %v1507_v30, %v1507_v30  ;;  %3465 = vmatpush.bf16.msra.mxu2 %v3265_v4  ;;  %v809_v7 = vld [vmem:[#allocation2 + $0xa4] sm:$0x1] }
 0x104   : > { %v4588_v1 = vpop.permute.xlu1 %1344  ;;  %1750 = vrot.lane.b32.xlu2 %v1679_v57, %s3572_s22  ;;  %v3417_v57 = vld [vmem:[#allocation2 + $0x30] sm:$0xe]  ;;  %2743 = vmatpush.bf16.msra.mxu0 %v3265_v4 }
 0x105   : > { %2244 = vrot.lane.b32.xlu0 %v2083_v26, %s3575_s25  ;;  %v2396_v26 = vsel %vm2368_vm10, %v4279_v8, %v1242_v39  ;;  %v4614_v8 = vld [vmem:[#allocation2 + $0x9c] sm:$0xf0]  ;;  %v1843_v39 = vsel %vm1295_vm9, %v1841_v20, %v1842_v52  ;;  %v3418_v59 = vor.u32 %v3417_v57, %v3416_v12  ;;  %v3264_v20 = vld [vmem:[%s5314_s1 + $0x10] sm:$0xff]  ;;  %v1818_v16 = vrot.slane %v1523_v45, 1 }
 0x106   : > { %v1371_v27 = vpop.permute.xlu2 %1370  ;;  %v1580_v12 = vshll.u32 %v1523_v45, 16  ;;  %v3490_v45 = vld [vmem:[#allocation2 + $0x48] sm:$0xff]  }
 0x107   : > { %v1349_v40 = vpop.permute.xlu0 %1348  ;;  %v4607_v41 = vsel %vm2401_vm11, %v2396_v26, %v1371_v27  ;;  %v1817_v52 = vrot.slane %v3418_v59, 1  ;;  %v3564_v27 = vor.u32 %v3563_v5, %v3562_v0  ;;  %3466 = vmatpush.bf16.msra.mxu2 %v3264_v20  ;;  %v1516_v59 = vunpack.c.l.b16 %v809_v7  ;;  %v4654_v5 = vld [vmem:[#allocation2 + $0x3c] sm:$0xf0] }
 0x108   : > { %v4604_v9 = vsel %vm2401_vm11, %v2374_v35, %v1349_v40  ;;  %v2376_v35 = vsel %vm2368_vm10, %v4160_v23, %v4477_v60  ;;  %v4633_v40 = vpack.c.b16 %v2023_v3, %v2023_v3  ;;  %v2380_v23 = vsel %vm2368_vm10, %v4191_v37, %v4439_v14  ;;  %2744 = vmatpush.bf16.msra.mxu0 %v3264_v20 }
 0x109   : > { %v2341_v4 = vrot.slane %v3564_v27, 1  ;;  %v1819_v37 = vsel %vm1295_vm9, %v1817_v52, %v1818_v16  ;;  %v1582_v0 = vrot.slane %v1580_v12, 1  ;;  %v2382_v3 = vsel %vm2368_vm10, %v3490_v45, %v4428_v50  ;;  %v3262_v52 = vld [vmem:[%s5314_s1] sm:$0xff] }
 0x10a   : > { %1478 = vrot.lane.b32.xlu1 %v4479_v63, %s3573_s23  ;;  %v4665_v20 = vpack.c.b16 %v1516_v59, %v1516_v59  ;;  %v801_v27 = vld [vmem:[#allocation2 + $0x44] sm:$0x1] }
 0x10b   : > { %v1583_v50 = vsel %vm1022_vm2, %v4551_v47, %v1582_v0  ;;  %v1508_v59 = vunpack.c.l.b16 %v801_v27  ;;  %v3449_v47 = vld [vmem:[#allocation2 + $0x78] sm:$0xf0] }
 0x10c   : > { %v1351_v26 = vpop.permute.xlu1 %1350  ;;  %2262 = vrot.lane.b32.xlu2 %v2191_v29, %s3575_s25  ;;  %v3263_v29 = vld [vmem:[%s5314_s1 + $0x8] sm:$0xff] }
 0x10d   : > { %1878 = vrot.lane.b32.xlu0 %v1843_v39, %s3574_s24  ;;  %v4627_v63 = vsel %vm2401_vm11, %v2376_v35, %v1351_v26  ;;  %v2342_v39 = vrot.slane %v4633_v40, 1  ;;  %3467 = vmatpush.bf16.msra.mxu2 %v3263_v29  ;;  %v1683_v26 = vshll.u32 %v4612_v22, 16 }
 0x10e   : > { %v4638_v30 = vpop.permute.xlu2 %1744  ;;  %2745 = vmatpush.bf16.msra.mxu0 %v3263_v29 }
 0x10f   : > { %v1355_v60 = vpop.permute.xlu0 %1354  ;;  %v2343_v14 = vsel %vm1295_vm9, %v2341_v4, %v2342_v39  ;;  %v1685_v12 = vrot.slane %v1683_v26, 1  ;;  %v1688_v4 = vshll.u32 %v4665_v20, 16  ;;  %v4679_v39 = vld [vmem:[#allocation2 + $0xa8] sm:$0xff]  }
 0x110   : > { %v4641_v57 = vsel %vm2401_vm11, %v2380_v23, %v1355_v60  ;;  %3217 = vmatmul.msk.bf16.gmra.mxu1 %vm2368_vm10, %v2343_v14  ;;  %v3529_v23 = vld [vmem:[#allocation2 + $0x9c] sm:$0xe]  ;;  %v1681_v60 = vshrl.u32 %v4612_v22, 16  ;;  %v3450_v14 = vld [vmem:[#allocation2 + $0x78] sm:$0xe] }
 0x111   : > { %5328 = vst [vmem:[#allocation6_spill] sm:$0xff] %v4641_v57  ;;  %3468 = vmatpush.bf16.msra.mxu2 %v3262_v52  ;;  %v1690_v45 = vrot.slane %v1688_v4, 1 }
 0x112   : > { %1990 = vrot.lane.b32.xlu1 %v4521_v21, %s3576_s26  ;;  %2746 = vmatpush.bf16.msra.mxu0 %v3262_v52  ;;  %v1686_v0 = vor.u32 %v1685_v12, %v1681_v60  ;;  %v1587_v52 = vshll.u32 %v4652_v28, 16  ;;  %v2345_v12 = vrot.slane %v4368_v53, 1  ;;  %v1585_v53 = vshrl.u32 %v4652_v28, 16 }
 0x114   : > { %v1357_v35 = vpop.permute.xlu1 %1356  ;;  %1862 = vrot.lane.b32.xlu2 %v1819_v37, %s3574_s24 }
 0x115   : > { %1462 = vrot.lane.b32.xlu0 %v4512_v6, %s3573_s23  ;;  %v4661_v21 = vsel %vm2401_vm11, %v2382_v3, %v1357_v35  ;;  %v874_v6 = vld [vmem:[#allocation2 + $0xb0] sm:$0x1]  ;;  %v2195_v3 = vshll.u32 %v4679_v39, 16  ;;  %v3451_v35 = vor.u32 %v3450_v14, %v3449_v47  ;;  %v2193_v47 = vshrl.u32 %v4679_v39, 16 }
 0x116   : > { %5329 = vst [vmem:[#allocation7_spill] sm:$0xff] %v4661_v21  ;;  %v4674_v7 = vpop.permute.xlu2 %2256  ;;  %v2028_v29 = vunpack.c.l.b16 %v874_v6  ;;  %v2392_v6 = vsel %vm2368_vm10, %v4266_v15, %v4458_v58 }
 0x117   : > { %v4670_v16 = vpop.permute.xlu0 %1360  ;;  %v2344_v60 = vrot.slane %v3451_v35, 1  ;;  %v2197_v14 = vrot.slane %v2195_v3, 1 }
 0x118   : > { %v4688_v26 = vpack.c.b16 %v2028_v29, %v2028_v29  ;;  %v4703_v29 = vpop.f32.mrf.mxu1 }
 0x119   : > { %5330 = vst [vmem:[#allocation8_spill] sm:$0xff] %v4703_v29  ;;  %v2346_v15 = vsel %vm1295_vm9, %v2344_v60, %v2345_v12 }
 0x11a   : > { %1734 = vrot.lane.b32.xlu1 %v1583_v50, %s3572_s22  ;;  %v4691_v50 = vpack.c.b16 %v1508_v59, %v1508_v59  ;;  %v1691_v59 = vsel %vm1022_vm2, %v1686_v0, %v1690_v45  ;;  %v2200_v58 = vshll.u32 %v4688_v26, 16  ;;  %v4714_v0 = vld [vmem:[#allocation2 + $0x48] sm:$0xff]   ;;  %v3491_v45 = vld [vmem:[#allocation2 + $0x90] sm:$0xff]  }
 0x11b   : > { %v2394_v3 = vsel %vm2368_vm10, %v3491_v45, %v4448_v36  ;;  %v2099_v12 = vshll.u32 %v4714_v0, 16 }
 0x11c   : > { %v4681_v37 = vpop.permute.xlu1 %1362  ;;  %1480 = vrot.lane.b32.xlu2 %v4612_v22, %s3573_s23  ;;  %v3530_v22 = vor.u32 %v3529_v23, %v4614_v8  ;;  %v1589_v8 = vrot.slane %v1587_v52, 1  ;;  %v1592_v23 = vshll.u32 %v4691_v50, 16  ;;  %v4723_v52 = vor.u32 %v2197_v14, %v2193_v47 }
 0x11d   : > { %1974 = vrot.lane.b32.xlu0 %v4415_v48, %s3576_s26  ;;  %v3533_v14 = vor.u32 %v3532_v19, %v4654_v5 }
 0x11e   : > { %v4696_v48 = vpop.permute.xlu2 %1856  ;;  %v1844_v35 = vrot.slane %v3530_v22, 1  ;;  %v1590_v22 = vor.u32 %v1589_v8, %v1585_v53  ;;  %v1594_v60 = vrot.slane %v1592_v23, 1  ;;  %v2104_v53 = vshll.u32 %v4454_v54, 16 }
 0x11f   : > { %v1367_v27 = vpop.permute.xlu0 %1366  ;;  %v2097_v23 = vshrl.u32 %v4714_v0, 16  ;;  %v1821_v54 = vrot.slane %v4691_v50, 1  ;;  %v202_v50 = vld [vmem:[%s3662_s18 + $0x78] sm:$0xf] }
 0x120   : > { %v4701_v4 = vsel %vm2401_vm11, %v2392_v6, %v1367_v27  ;;  %v1845_v6 = vrot.slane %v4665_v20, 1  ;;  %3218 = vmatmul.msk.bf16.gmra.mxu1 %vm2368_vm10, %v2346_v15  ;;  %v2202_v20 = vrot.slane %v2200_v58, 1  ;;  %v3492_v15 = vld [vmem:[#allocation2 + $0xa8] sm:$0xff]   ;;  %v4737_v58 = vpop.f32.mrf.mxu1  ;;  %v1595_v8 = vsel %vm1022_vm2, %v1590_v22, %v1594_v60 }
 0x121   : > { %v2398_v36 = vsel %vm2368_vm10, %v3492_v15, %v4417_v62  ;;  %5332 = vst [vmem:[#allocation10_spill] sm:$0xff] %v4737_v58  ;;  %v4749_v15 = vld [vmem:[%s3662_s18 + $0x7c] sm:$0xf]  ;;  %v2106_v22 = vrot.slane %v2104_v53, 1 }
 0x122   : > { %2246 = vrot.lane.b32.xlu1 %v4593_v24, %s3575_s25  ;;  %v2203_v62 = vsel %vm1022_vm2, %v4723_v52, %v2202_v20 }
 0x124   : > { %v1369_v27 = vpop.permute.xlu1 %1368  ;;  %1992 = vrot.lane.b32.xlu2 %v4679_v39, %s3576_s26 }
 0x125   : > { %1752 = vrot.lane.b32.xlu0 %v1691_v59, %s3572_s22  ;;  %v4721_v24 = vsel %vm2401_vm11, %v2394_v3, %v1369_v27  ;;  %v1846_v59 = vsel %vm1295_vm9, %v1844_v35, %v1845_v6  ;;  %v2101_v35 = vrot.slane %v2099_v12, 1  ;;  %v810_v6 = vld [vmem:[#allocation2 + $0xb0] sm:$0x1]  ;;  %v3493_v3 = vld [vmem:[#allocation2 + $0x60] sm:$0xff]   ;;  %v1820_v27 = vrot.slane %v3533_v14, 1 }
 0x126   : > { %v4731_v21 = vpop.permute.xlu2 %1474  ;;  %v2386_v19 = vsel %vm2368_vm10, %v3493_v3, %v4397_v43  ;;  %v1517_v60 = vunpack.c.l.b16 %v810_v6  ;;  %v3535_v12 = vld [vmem:[#allocation2 + $0x84] sm:$0xe] }
 0x127   : > { %v1373_v45 = vpop.permute.xlu0 %1372  ;;  %v2419_v20 = vsel %vm2401_vm11, %v2386_v19, %v4670_v16  ;;  %v4763_v16 = vld [vmem:[#allocation2 + $0xb4] sm:$0xf0]  ;;  %v1822_v53 = vsel %vm1295_vm9, %v1820_v27, %v1821_v54  ;;  %v875_v27 = vld [vmem:[#allocation2 + $0xbc] sm:$0x1] }
 0x128   : > { %v4734_v47 = vsel %vm2401_vm11, %v2398_v36, %v1373_v45  ;;  %v4756_v36 = vor.u32 %v2101_v35, %v2097_v23  ;;  %v3431_v45 = vld [vmem:[#allocation2 + $0xa8] sm:$0xf0]  ;;  %v4767_v6 = vpop.f32.mrf.mxu1  ;;  %v3536_v23 = vor.u32 %v3535_v12, %v4404_v10  ;;  %v1533_v19 = vpack.c.b16 %v1517_v60, %v1517_v60  ;;  %v694_v60 = vld [vmem:[#allocation2 + $0xc0] sm:$0xf] }
 0x129   : > { %5331 = vst [vmem:[#allocation9_spill] sm:$0xff] %v4734_v47  ;;  %v4761_v47 = vld [vmem:[#allocation2 + $0xb4] sm:$0xff]  }
 0x12a   : > { %1880 = vrot.lane.b32.xlu1 %v1846_v59, %s3574_s24  ;;  %v3432_v59 = vld [vmem:[#allocation2 + $0xa8] sm:$0xe]  ;;  %5333 = vst [vmem:[#allocation11_spill] sm:$0xff] %v4767_v6  ;;  %v2107_v58 = vsel %vm1022_vm2, %v4756_v36, %v2106_v22  ;;  %v2347_v29 = vrot.slane %v3536_v23, 1  ;;  %v522_v6 = vshll.u32 %v202_v50, 16  ;;  %v530_v23 = vshll.u32 %v4749_v15, 16 }
 0x12c   : > { %v1473_v5 = vpop.permute.xlu1 %1472  ;;  %1736 = vrot.lane.b32.xlu2 %v1595_v8, %s3572_s22  ;;  %v527_v8 = vshrl.u32 %v4749_v15, 16 }
 0x12d   : > { %2264 = vrot.lane.b32.xlu0 %v2203_v62, %s3575_s25  ;;  %v2452_v43 = vsel %vm2434_vm12, %v2419_v20, %v1473_v5  ;;  %v519_v62 = vshrl.u32 %v202_v50, 16  ;;  %v3433_v5 = vor.u32 %v3432_v59, %v3431_v45  ;;  %v2348_v20 = vrot.slane %v4422_v42, 1 }
 0x12e   : > { %v4759_v3 = vpop.permute.xlu2 %1986  ;;  %v2485_v35 = vsel %vm2467_vm13, %v2452_v43, %v4638_v30  ;;  %v529_v57 = vrot.slane %v527_v8, 7  ;;  %v1848_v59 = vrot.slane %v1533_v19, 1  ;;  %v2029_v50 = vunpack.c.l.b16 %v875_v27  ;;  %v802_v8 = vld [vmem:[#allocation2 + $0x50] sm:$0x1] }
 0x12f   : > { %v1873_v14 = vpop.permute.xlu0 %1872  ;;  %v521_v54 = vrot.slane %v519_v62, 7  ;;  %v2349_v30 = vsel %vm1295_vm9, %v2347_v29, %v2348_v20  ;;  %v1847_v22 = vrot.slane %v3433_v5, 1  ;;  %v3494_v20 = vld [vmem:[#allocation2] sm:$0xff]   ;;  %v1509_v56 = vunpack.c.l.b16 %v802_v8 }
 0x130   : > { %v2518_v10 = vsel %vm2500_vm14, %v2485_v35, %v1873_v14  ;;  %3219 = vmatmul.msk.bf16.vlgmr.msra.gmra.mxu3 %vm2368_vm10, %v2349_v30  ;;  %v698_v14 = vld [vmem:[#allocation2 + $0xc8] sm:$0x1]  ;;  %v4790_v35 = vpop.f32.mrf.mxu1  ;;  %v2370_v27 = vsel %vm2368_vm10, %v3494_v20, %v4410_v11  ;;  %v4806_v44 = vpack.c.b16 %v2029_v50, %v2029_v50  ;;  %v2205_v50 = vshrl.u32 %v4761_v47, 16 }
 0x131   : > { %v524_v43 = vor.u32 %v522_v6, %v521_v54  ;;  %v1849_v15 = vsel %vm1295_vm9, %v1847_v22, %v1848_v59  ;;  %v2403_v11 = vsel %vm2401_vm11, %v2370_v27, %v4588_v1  ;;  %v3419_v27 = vld [vmem:[#allocation2 + $0x48] sm:$0xf0] }
 0x132   : > { %1464 = vrot.lane.b32.xlu1 %v4652_v28, %s3573_s23  ;;  %v1700_v28 = vshll.u32 %v1533_v19, 16  ;;  %v532_v19 = vor.u32 %v530_v23, %v529_v57 }
 0x133   : > { %v695_v6 = vsel %vm3773_vm8, %v524_v43, %v694_v60  ;;  %v4819_v43 = vpack.c.b16 %v1509_v56, %v1509_v56 }
 0x134   : > { %v1985_v12 = vpop.permute.xlu1 %1984  ;;  %2248 = vrot.lane.b32.xlu2 %v2107_v58, %s3575_s25  ;;  %v534_v58 = vrot.slane %v529_v57, 4  ;;  %696 = vst [vmem:[#allocation2 + $0xc0] sm:$0xf] %v695_v6  ;;  %v2207_v57 = vshll.u32 %v4761_v47, 16 }
 0x135   : > { %1864 = vrot.lane.b32.xlu0 %v1822_v53, %s3574_s24  ;;  %v2551_v42 = vsel %vm2533_vm15, %v2518_v10, %v1985_v12  ;;  %v525_v53 = vrot.slane %v521_v54, 4  ;;  %v4801_v54 = vld [vmem:[#allocation2 + $0xb4] sm:$0xff]   ;;  %v1702_v12 = vrot.slane %v1700_v28, 1 }
 0x136   : > { %v2592_v45 = vsel %vm2566_vm1, %v2551_v42, %v4674_v7  ;;  %v4785_v29 = vpop.permute.xlu2 %1730  ;;  %v4792_v7 = vld [vmem:[#allocation2 + $0x54] sm:$0xff]   ;;  %v699_v5 = vsel %vm3740_vm6, %v534_v58, %v698_v14  ;;  %v2209_v14 = vrot.slane %v2207_v57, 1  ;;  %v1518_v58 = vunpack.c.l.b16 %v811_v49 }
 0x137   : > { %v1457_v62 = vpop.permute.xlu0 %1456  ;;  %2787 = vmatmul.bf16.vlgmr.msra.gmra.mxu2 %v2592_v45  ;;  %v4803_v10 = vld [vmem:[#allocation2 + $0xb4] sm:$0xf0]  ;;  %700 = vst [vmem:[#allocation2 + $0xc8] sm:$0x1] %v699_v5  ;;  %v533_v30 = vsel %vm3753_vm7, %v525_v53, %v532_v19  ;;  %v1930_v42 = vunpack.c.l.b16 %v4792_v7  ;;  %v1703_v1 = vsel %vm1022_vm2, %v4723_v52, %v1702_v12  ;;  %v1604_v52 = vshll.u32 %v4819_v43, 16 }
 0x138   : > { %697 = vst.msk [vmem:[#allocation2 + $0xc4] sm:$0xf] %vm204_vm0, %v533_v30  ;;  %v2436_v22 = vsel %vm2434_vm12, %v2403_v11, %v1457_v62  ;;  %v2212_v62 = vshll.u32 %v4806_v44, 16  ;;  %v2210_v6 = vor.u32 %v2209_v14, %v2205_v50  ;;  %v4842_v12 = vpack.c.b16 %v1518_v58, %v1518_v58 }
 0x139   : > { %v1606_v57 = vrot.slane %v1604_v52, 1  ;;  %v2116_v49 = vshll.u32 %v4501_v51, 16  ;;  %v1824_v58 = vrot.slane %v4819_v43, 1 }
 0x13a   : > { %1976 = vrot.lane.b32.xlu1 %v4714_v0, %s3576_s26  ;;  %v2214_v19 = vrot.slane %v2212_v62, 1  ;;  %v1712_v50 = vshll.u32 %v4842_v12, 16 }
 0x13b   : > { %v1607_v62 = vsel %vm1022_vm2, %v4756_v36, %v1606_v57 }
 0x13c   : > { %v1729_v60 = vpop.permute.xlu1 %1728  ;;  %1882 = vrot.lane.b32.xlu2 %v1849_v15, %s3574_s24  ;;  %v4829_v53 = vpop.f32.mrf.mxu1  ;;  %v3420_v15 = vld [vmem:[#allocation2 + $0x48] sm:$0xe]  ;;  %v2215_v11 = vsel %vm1022_vm2, %v2210_v6, %v2214_v19 }
 0x13d   : > { %1482 = vrot.lane.b32.xlu0 %v4679_v39, %s3573_s23  ;;  %v2469_v28 = vsel %vm2467_vm13, %v2436_v22, %v1729_v60  ;;  %v5334_v39 = vunpack.c.l.b16 %v4487_v61 }
 0x13e   : > { %v4823_v59 = vpop.permute.xlu2 %2242  ;;  %v2502_v23 = vsel %vm2500_vm14, %v2469_v28, %v4696_v48  ;;  %v1707_v48 = vshll.u32 %v4801_v54, 16  ;;  %v876_v22 = vld [vmem:[#allocation2 + $0xc8] sm:$0x1] }
 0x13f   : > { %v1969_v45 = vpop.permute.xlu0 %1968  ;;  %v1957_v8 = vpack.c.b16 %v5334_v39, %v1930_v42  ;;  %v3421_v42 = vor.u32 %v3420_v15, %v3419_v27  ;;  %v3538_v39 = vld [vmem:[#allocation2 + $0xb4] sm:$0xe]  ;;  %v4863_v52 = vld [vmem:[#allocation2 + $0xc0] sm:$0xff]   ;;  %v1714_v27 = vrot.slane %v1712_v50, 1 }
 0x140   : > { %v2535_v5 = vsel %vm2533_vm15, %v2502_v23, %v1969_v45  ;;  %v1705_v45 = vshrl.u32 %v4801_v54, 16  ;;  %v2030_v23 = vunpack.c.l.b16 %v876_v22  ;;  %v3452_v15 = vld [vmem:[#allocation2 + $0x90] sm:$0xf0] }
 0x141   : > { %v2111_v56 = vshll.u32 %v1957_v8, 16  ;;  %v2109_v28 = vshrl.u32 %v1957_v8, 16 }
 0x142   : > { %1754 = vrot.lane.b32.xlu1 %v1703_v1, %s3572_s22  ;;  %v1709_v1 = vrot.slane %v1707_v48, 1 }
 0x144   : > { %v2241_v20 = vpop.permute.xlu1 %2240  ;;  %1466 = vrot.lane.b32.xlu2 %v4714_v0, %s3573_s23  ;;  %v2388_v0 = vsel %vm2368_vm10, %v4229_v38, %v4528_v46  ;;  %v4858_v51 = vpop.f32.mrf.mxu1  ;;  %v1823_v46 = vrot.slane %v3421_v42, 1 }
 0x145   : > { %1994 = vrot.lane.b32.xlu0 %v4761_v47, %s3576_s26  ;;  %v2568_v61 = vsel %vm2566_vm1, %v2535_v5, %v2241_v20  ;;  %v2113_v47 = vrot.slane %v2111_v56, 1  ;;  %v2421_v14 = vsel %vm2401_vm11, %v2388_v0, %v4681_v37  ;;  %v2118_v5 = vrot.slane %v2116_v49, 1 }
 0x146   : > { %2747 = vmatmul.bf16.vlgmr.msra.gmra.mxu0 %v2568_v61  ;;  %v4845_v60 = vpop.permute.xlu2 %1876  ;;  %v2454_v38 = vsel %vm2434_vm12, %v2421_v14, %v4731_v21  ;;  %v1710_v20 = vor.u32 %v1709_v1, %v1705_v45  ;;  %v3453_v21 = vld [vmem:[#allocation2 + $0x90] sm:$0xe]  ;;  %v2219_v56 = vshll.u32 %v4863_v52, 16  ;;  %v4872_v61 = vpack.c.b16 %v2030_v23, %v2030_v23 }
 0x147   : > { %v1747_v30 = vpop.permute.xlu0 %1746  ;;  %v2114_v19 = vor.u32 %v2113_v47, %v2109_v28  ;;  %v3454_v48 = vor.u32 %v3453_v21, %v3452_v15  ;;  %v3539_v47 = vor.u32 %v3538_v39, %v4803_v10  ;;  %v2217_v0 = vshrl.u32 %v4863_v52, 16 }
 0x148   : > { %v2487_v6 = vsel %vm2467_vm13, %v2454_v38, %v1747_v30  ;;  %v1825_v30 = vsel %vm1295_vm9, %v1823_v46, %v1824_v58  ;;  %v1715_v49 = vsel %vm1022_vm2, %v1710_v20, %v1714_v27  ;;  %v2221_v45 = vrot.slane %v2219_v56, 1  ;;  %v803_v46 = vld [vmem:[#allocation2 + $0x5c] sm:$0x1]  ;;  %v3541_v56 = vld [vmem:[#allocation2 + $0xb4] sm:$0xe] }
 0x149   : > { %v2350_v22 = vrot.slane %v3454_v48, 1  ;;  %v2119_v28 = vsel %vm1022_vm2, %v2114_v19, %v2118_v5  ;;  %v2224_v1 = vshll.u32 %v4872_v61, 16  ;;  %v1421_v14 = vunpack.c.h.b16 %v4792_v7 }
 0x14a   : > { %2266 = vrot.lane.b32.xlu1 %v2215_v11, %s3575_s25  ;;  %v1851_v39 = vrot.slane %v4842_v12, 1  ;;  %v4895_v7 = vor.u32 %v2221_v45, %v2217_v0  ;;  %v1510_v20 = vunpack.c.l.b16 %v803_v46 }
 0x14c   : > { %v1875_v37 = vpop.permute.xlu1 %1874  ;;  %1978 = vrot.lane.b32.xlu2 %v1957_v8, %s3576_s26  ;;  %v777_v8 = vld [vmem:[#allocation2 + $0x54] sm:$0xf]  ;;  %v4887_v10 = vpop.f32.mrf.mxu1 }
 0x14d   : > { %1738 = vrot.lane.b32.xlu0 %v1607_v62, %s3572_s22  ;;  %v2520_v36 = vsel %vm2500_vm14, %v2487_v6, %v1875_v37  ;;  %v1420_v50 = vunpack.c.l.b16 %v777_v8  ;;  %v819_v62 = vld [vmem:[#allocation2 + $0x54] sm:$0xe]  ;;  %v2226_v6 = vrot.slane %v2224_v1, 1  ;;  %v4912_v8 = vld [vmem:[#allocation2 + $0x60] sm:$0xff]   ;;  %v3542_v1 = vor.u32 %v3541_v56, %v4286_v2 }
 0x14e   : > { %v2553_v43 = vsel %vm2533_vm15, %v2520_v36, %v4759_v3  ;;  %v4875_v11 = vpop.permute.xlu2 %1460  ;;  %v2351_v3 = vrot.slane %v4490_v34, 1  ;;  %v1850_v34 = vrot.slane %v3539_v47, 1  ;;  %v1782_v37 = vunpack.c.l.b16 %v819_v62 }
 0x14f   : > { %v2259_v57 = vpop.permute.xlu0 %2258  ;;  %v1446_v36 = vpack.c.b16 %v1421_v14, %v1420_v50  ;;  %v2123_v45 = vshll.u32 %v4912_v8, 16  ;;  %v1341_v2 = vrot.slane %v3542_v1, 1 }
 0x150   : > { %v2595_v42 = vsel %vm2566_vm1, %v2553_v43, %v2259_v57  ;;  %v2352_v23 = vsel %vm1295_vm9, %v2350_v22, %v2351_v3  ;;  %v1852_v12 = vsel %vm1295_vm9, %v1850_v34, %v1851_v39  ;;  %v1798_v15 = vpack.c.b16 %v1421_v14, %v1782_v37 }
 0x151   : > { %2792 = vmatmul.bf16.gmra.mxu2 %v2595_v42  ;;  %3220 = vmatmul.msk.bf16.gmra.mxu3 %vm2368_vm10, %v2352_v23  ;;  %v1611_v21 = vshll.u32 %v1446_v36, 16  ;;  %v1526_v43 = vpack.c.b16 %v1510_v20, %v1510_v20  ;;  %v1609_v3 = vshrl.u32 %v1446_v36, 16  ;;  %v812_v23 = vld [vmem:[#allocation2 + $0xc8] sm:$0x1]  ;;  %v2121_v34 = vshrl.u32 %v4912_v8, 16 }
 0x152   : > { %1866 = vrot.lane.b32.xlu1 %v1825_v30, %s3574_s24  ;;  %v2125_v39 = vrot.slane %v2123_v45, 1  ;;  %v1342_v37 = vrot.slane %v4296_v18, 1 }
 0x153   : > { %v1827_v42 = vrot.slane %v1526_v43, 1  ;;  %v1616_v0 = vshll.u32 %v1526_v43, 16 }
 0x154   : > { %v1459_v38 = vpop.permute.xlu1 %1458  ;;  %1756 = vrot.lane.b32.xlu2 %v1715_v49, %s3572_s22  ;;  %v4914_v22 = vpop.f32.mrf.mxu1  ;;  %v1613_v49 = vrot.slane %v1611_v21, 1  ;;  %v4935_v21 = vld [vmem:[#allocation2 + $0xcc] sm:$0xf0] }
 0x155   : > { %2250 = vrot.lane.b32.xlu0 %v2119_v28, %s3575_s25  ;;  %v2438_v58 = vsel %vm2434_vm12, %v4482_v31, %v1459_v38  ;;  %v2227_v31 = vsel %vm1022_vm2, %v4895_v7, %v2226_v6  ;;  %v1618_v14 = vrot.slane %v1616_v0, 1  ;;  %v3544_v38 = vld [vmem:[#allocation2 + $0x9c] sm:$0xe]  ;;  %v2128_v6 = vshll.u32 %v4560_v13, 16  ;;  %v804_v0 = vld [vmem:[#allocation2 + $0x68] sm:$0x1] }
 0x156   : > { %v4897_v5 = vpop.permute.xlu2 %1972  ;;  %v2471_v27 = vsel %vm2467_vm13, %v2438_v58, %v4785_v29  ;;  %v1614_v50 = vor.u32 %v1613_v49, %v1609_v3  ;;  %v2354_v13 = vrot.slane %v4563_v33, 1  ;;  %v877_v3 = vld [vmem:[#allocation2 + $0xd4] sm:$0x1] }
 0x157   : > { %v1859_v19 = vpop.permute.xlu0 %1858 }
 0x158   : > { %v2504_v48 = vsel %vm2500_vm14, %v2471_v27, %v1859_v19  ;;  %v1619_v20 = vsel %vm1022_vm2, %v1614_v50, %v1618_v14  ;;  %v2031_v50 = vunpack.c.l.b16 %v877_v3 }
 0x15a   : > { %1484 = vrot.lane.b32.xlu1 %v4801_v54, %s3573_s23  ;;  %v1826_v54 = vrot.slane %v1798_v15, 1  ;;  %v860_v15 = vld [vmem:[#allocation2 + $0xcc] sm:$0xff]  }
 0x15c   : > { %v1971_v57 = vpop.permute.xlu1 %1970  ;;  %2268 = vrot.lane.b32.xlu2 %v2227_v31, %s3575_s25  ;;  %v3545_v31 = vor.u32 %v3544_v38, %v4523_v55  ;;  %v4937_v43 = vpop.f32.mrf.mxu1 }
 0x15d   : > { %1884 = vrot.lane.b32.xlu0 %v1852_v12, %s3574_s24  ;;  %v2537_v30 = vsel %vm2533_vm15, %v2504_v48, %v1971_v57  ;;  %v3434_v12 = vld [vmem:[#allocation2 + $0xc0] sm:$0xf0]  ;;  %v4943_v48 = vor.u32 %v2125_v39, %v2121_v34  ;;  %v2130_v57 = vrot.slane %v2128_v6, 1  ;;  %v2231_v39 = vshll.u32 %v860_v15, 16 }
 0x15e   : > { %v2571_v29 = vsel %vm2566_vm1, %v2537_v30, %v4823_v59  ;;  %v4916_v47 = vpop.permute.xlu2 %1750  ;;  %v1828_v59 = vsel %vm1295_vm9, %v1826_v54, %v1827_v42  ;;  %v2353_v56 = vrot.slane %v3545_v31, 1  ;;  %v1343_v30 = vsel %vm1295_vm9, %v1341_v2, %v1342_v37 }
 0x15f   : > { %v1477_v28 = vpop.permute.xlu0 %1476  ;;  %2752 = vmatmul.bf16.gmra.mxu0 %v2571_v29 }
 0x160   : > { %v2456_v46 = vsel %vm2434_vm12, %v4574_v32, %v1477_v28  ;;  %v1519_v32 = vunpack.c.l.b16 %v812_v23  ;;  %v2355_v54 = vsel %vm1295_vm9, %v2353_v56, %v2354_v13 }
 0x161   : > { %3221 = vmatmul.msk.bf16.gmra.mxu3 %vm2368_vm10, %v2355_v54  ;;  %v2135_v54 = vshll.u32 %v4620_v17, 16 }
 0x162   : > { %1996 = vrot.lane.b32.xlu1 %v4863_v52, %s3576_s26  ;;  %v1535_v55 = vpack.c.b16 %v1519_v32, %v1519_v32 }
 0x164   : > { %v1749_v62 = vpop.permute.xlu1 %1748  ;;  %1868 = vrot.lane.b32.xlu2 %v1828_v59, %s3574_s24  ;;  %v1854_v49 = vrot.slane %v1535_v55, 1  ;;  %v2131_v59 = vsel %vm1022_vm2, %v4943_v48, %v2130_v57  ;;  %v1724_v1 = vshll.u32 %v1535_v55, 16  ;;  %v4959_v38 = vpop.f32.mrf.mxu1 }
 0x165   : > { %1468 = vrot.lane.b32.xlu0 %v1446_v36, %s3573_s23  ;;  %v2489_v58 = vsel %vm2467_vm13, %v2456_v46, %v1749_v62  ;;  %v3435_v36 = vld [vmem:[#allocation2 + $0xc0] sm:$0xe]  ;;  %v1511_v62 = vunpack.c.l.b16 %v804_v0  ;;  %v2440_v46 = vsel %vm2434_vm12, %v4604_v9, %v4875_v11  ;;  %v2229_v11 = vshrl.u32 %v860_v15, 16 }
 0x166   : > { %v4932_v27 = vpop.permute.xlu2 %2262  ;;  %v2522_v18 = vsel %vm2500_vm14, %v2489_v58, %v4845_v60  ;;  %v3436_v29 = vor.u32 %v3435_v36, %v3434_v12  ;;  %v1726_v34 = vrot.slane %v1724_v1, 1  ;;  %v4964_v58 = vpack.c.b16 %v2031_v50, %v2031_v50 }
 0x167   : > { %v1989_v19 = vpop.permute.xlu0 %1988  ;;  %v2233_v12 = vrot.slane %v2231_v39, 1 }
 0x168   : > { %v2555_v42 = vsel %vm2533_vm15, %v2522_v18, %v1989_v19  ;;  %v1853_v60 = vrot.slane %v3436_v29, 1  ;;  %v1527_v19 = vpack.c.b16 %v1511_v62, %v1511_v62  ;;  %v1727_v9 = vsel %vm1022_vm2, %v4895_v7, %v1726_v34 }
 0x169   : > { %v2236_v36 = vshll.u32 %v4964_v58, 16  ;;  %v2234_v18 = vor.u32 %v2233_v12, %v2229_v11 }
 0x16a   : > { %1740 = vrot.lane.b32.xlu1 %v1619_v20, %s3572_s22  ;;  %v1855_v23 = vsel %vm1295_vm9, %v1853_v60, %v1854_v49  ;;  %v3456_v60 = vld [vmem:[#allocation2 + $0xa8] sm:$0xe]  ;;  %v1830_v62 = vrot.slane %v1527_v19, 1 }
 0x16b   : > { %v2238_v56 = vrot.slane %v2236_v36, 1 }
 0x16c   : > { %v2261_v28 = vpop.permute.xlu1 %2260  ;;  %1374 = vrot.lane.b32.xlu2 %v1343_v30, %s3571_s19  ;;  %v3422_v30 = vld [vmem:[#allocation2 + $0x60] sm:$0xf0]  ;;  %v4978_v29 = vpop.f32.mrf.mxu1 }
 0x16d   : > { %1980 = vrot.lane.b32.xlu0 %v4912_v8, %s3576_s26  ;;  %v2598_v33 = vsel %vm2566_vm1, %v2555_v42, %v2261_v28  ;;  %v2239_v28 = vsel %vm1022_vm2, %v2234_v18, %v2238_v56 }
 0x16e   : > { %2797 = vmatmul.bf16.gmra.mxu2 %v2598_v33  ;;  %v4955_v14 = vpop.permute.xlu2 %1862  ;;  %v3455_v33 = vld [vmem:[#allocation2 + $0xa8] sm:$0xf0] }
 0x16f   : > { %v1733_v45 = vpop.permute.xlu0 %1732  ;;  %v3457_v49 = vor.u32 %v3456_v60, %v3455_v33  ;;  %v2360_v33 = vrot.slane %v4806_v44, 1 }
 0x170   : > { %v2473_v6 = vsel %vm2467_vm13, %v2440_v46, %v1733_v45  ;;  %v2137_v45 = vrot.slane %v2135_v54, 1 }
 0x171   : > { %v2356_v1 = vrot.slane %v3457_v49, 1 }
 0x172   : > { %2252 = vrot.lane.b32.xlu1 %v2131_v59, %s3575_s25  ;;  %v2140_v59 = vshll.u32 %v4633_v40, 16 }
 0x174   : > { %v1861_v2 = vpop.permute.xlu1 %1860  ;;  %1886 = vrot.lane.b32.xlu2 %v1855_v23, %s3574_s24  ;;  %v2142_v40 = vrot.slane %v2140_v59, 1 }
 0x175   : > { %1486 = vrot.lane.b32.xlu0 %v4863_v52, %s3573_s23  ;;  %v2506_v37 = vsel %vm2500_vm14, %v2473_v6, %v1861_v2  ;;  %v1628_v52 = vshll.u32 %v1527_v19, 16  ;;  %v5002_v6 = vpop.f32.mrf.mxu1 }
 0x176   : > { %v2539_v20 = vsel %vm2533_vm15, %v2506_v37, %v4897_v5  ;;  %v1481_v13 = vpop.permute.xlu2 %1480  ;;  %v3423_v5 = vld [vmem:[#allocation2 + $0x60] sm:$0xe] }
 0x177   : > { %v2245_v32 = vpop.permute.xlu0 %2244  ;;  %v1630_v7 = vrot.slane %v1628_v52, 1  ;;  %v3424_v3 = vor.u32 %v3423_v5, %v3422_v30  ;;  %v3547_v30 = vld [vmem:[#allocation2 + $0xb4] sm:$0xe] }
 0x178   : > { %v2574_v31 = vsel %vm2566_vm1, %v2539_v20, %v2245_v32  ;;  %v3548_v54 = vor.u32 %v3547_v30, %v4763_v16 }
 0x179   : > { %2757 = vmatmul.bf16.gmra.mxu0 %v2574_v31  ;;  %v1829_v50 = vrot.slane %v3424_v3, 1 }
 0x17a   : > { %1758 = vrot.lane.b32.xlu1 %v1727_v9, %s3572_s22  ;;  %v2359_v3 = vrot.slane %v3548_v54, 1 }
 0x17b   : > { %v1831_v37 = vsel %vm1295_vm9, %v1829_v50, %v1830_v62 }
 0x17c   : > { %v1479_v57 = vpop.permute.xlu1 %1478  ;;  %1470 = vrot.lane.b32.xlu2 %v4912_v8, %s3573_s23  ;;  %v2357_v8 = vrot.slane %v4688_v26, 1  ;;  %v2361_v60 = vsel %vm1295_vm9, %v2359_v3, %v2360_v33  ;;  %s5057_s23 = scalar_lea.vmem %s5316_s3, %s3261_s20 }
 0x17d   : > { %1998 = vrot.lane.b32.xlu0 %v860_v15, %s3576_s26  ;;  %v2458_v55 = vsel %vm2434_vm12, %v4701_v4, %v1479_v57  ;;  %v1631_v15 = vsel %vm1022_vm2, %v4943_v48, %v1630_v7  ;;  %v2133_v4 = vshrl.u32 %v4620_v17, 16  ;;  %v5013_v12 = vpop.f32.mrf.mxu1  ;;  %v2460_v57 = vsel %vm2434_vm12, %v4721_v24, %v1481_v13 }
 0x17e   : > { %v2491_v0 = vsel %vm2467_vm13, %v2458_v55, %v4916_v47  ;;  %v2358_v47 = vsel %vm1295_vm9, %v2356_v1, %v2357_v8  ;;  %v1993_v26 = vpop.permute.xlu2 %1992 }
 0x17f   : > { %v1879_v42 = vpop.permute.xlu0 %1878  ;;  %3222 = vmatmul.msk.bf16.gmra.mxu3 %vm2368_vm10, %v2358_v47  ;;  %v2138_v39 = vor.u32 %v2137_v45, %v2133_v4  ;;  %v3459_v47 = vld [vmem:[#allocation2 + $0xc0] sm:$0xe] }
 0x180   : > { %v2524_v23 = vsel %vm2500_vm14, %v2491_v0, %v1879_v42 }
 0x181   : > { %v2143_v19 = vsel %vm1022_vm2, %v2138_v39, %v2142_v40 }
 0x182   : > { %2270 = vrot.lane.b32.xlu1 %v2239_v28, %s3575_s25 }
 0x184   : > { %v1991_v46 = vpop.permute.xlu1 %1990  ;;  %1982 = vrot.lane.b32.xlu2 %v4620_v17, %s3576_s26 }
 0x185   : > { %1742 = vrot.lane.b32.xlu0 %v1631_v15, %s3572_s22  ;;  %v2557_v48 = vsel %vm2533_vm15, %v2524_v23, %v1991_v46  ;;  %v3458_v46 = vld [vmem:[#allocation2 + $0xc0] sm:$0xf0] }
 0x186   : > { %v2601_v34 = vsel %vm2566_vm1, %v2557_v48, %v4932_v27  ;;  %v1737_v9 = vpop.permute.xlu2 %1736  ;;  %v3460_v39 = vor.u32 %v3459_v47, %v3458_v46 }
 0x187   : > { %v1463_v2 = vpop.permute.xlu0 %1462  ;;  %2802 = vmatmul.bf16.gmra.mxu2 %v2601_v34  ;;  %v5047_v34 = vld [vmem:[%s5315_s2] ss:$0 sm:$0xff] }
 0x188   : > { %v2442_v32 = vsel %vm2434_vm12, %v4627_v63, %v1463_v2  ;;  %v5019_v63 = vpop.f32.mrf.mxu1 }
 0x18a   : > { %1870 = vrot.lane.b32.xlu1 %v1831_v37, %s3574_s24  ;;  %v2362_v37 = vrot.slane %v3460_v39, 1 }
 0x18c   : > { %v1735_v20 = vpop.permute.xlu1 %1734 }
 0x18d   : > { %2254 = vrot.lane.b32.xlu0 %v2143_v19, %s3575_s25  ;;  %v2475_v27 = vsel %vm2467_vm13, %v2442_v32, %v1735_v20  ;;  %v2363_v19 = vrot.slane %v4872_v61, 1 }
 0x18e   : > { %v2508_v17 = vsel %vm2500_vm14, %v2475_v27, %v4955_v14  ;;  %v2249_v56 = vpop.permute.xlu2 %2248 }
 0x18f   : > { %v1975_v11 = vpop.permute.xlu0 %1974  ;;  %3223 = vmatmul.msk.bf16.gmra.mxu3 %vm2368_vm10, %v2361_v60  ;;  %v2364_v32 = vsel %vm1295_vm9, %v2362_v37, %v2363_v19 }
 0x190   : > { %v2541_v36 = vsel %vm2533_vm15, %v2508_v17, %v1975_v11  ;;  %v5031_v49 = vpop.f32.mrf.mxu1 }
 0x194   : > { %v2247_v31 = vpop.permute.xlu1 %2246 }
 0x195   : > { %v2577_v52 = vsel %vm2566_vm1, %v2541_v36, %v2247_v31 }
 0x196   : > { %2762 = vmatmul.bf16.gmra.mxu0 %v2577_v52  ;;  %v1883_v24 = vpop.permute.xlu2 %1882 }
 0x197   : > { %v1753_v18 = vpop.permute.xlu0 %1752 }
 0x198   : > { %v2493_v5 = vsel %vm2467_vm13, %v2460_v57, %v1753_v18  ;;  %v5039_v1 = vpop.f32.mrf.mxu1  ;;  %v5335_v18 = vld [vmem:[#allocation6_spill] sm:$0xff] }
 0x19c   : > { %v1881_v7 = vpop.permute.xlu1 %1880 }
 0x19d   : > { %v2526_v55 = vsel %vm2500_vm14, %v2493_v5, %v1881_v7 }
 0x19e   : > { %v2559_v14 = vsel %vm2533_vm15, %v2526_v55, %v1993_v26  ;;  %v1467_v45 = vpop.permute.xlu2 %1466 }
 0x19f   : > { %v2265_v42 = vpop.permute.xlu0 %2264  ;;  %3224 = vmatmul.msk.bf16.gmra.mxu3 %vm2368_vm10, %v2364_v32 }
 0x1a0   : > { %v2604_v28 = vsel %vm2566_vm1, %v2559_v14, %v2265_v42  ;;  %v2877_v40 = vpop.f32.mrf.mxu1  ;;  %v5336_v42 = vld [vmem:[#allocation8_spill] sm:$0xff] }
 0x1a1   : > { %2807 = vmatmul.bf16.gmra.mxu2 %v2604_v28 }
 0x1a4   : > { %v1465_v13 = vpop.permute.xlu1 %1464 }
 0x1a5   : > { %v2444_v0 = vsel %vm2434_vm12, %v4509_v25, %v1465_v13 }
 0x1a6   : > { %v2477_v16 = vsel %vm2467_vm13, %v2444_v0, %v1737_v9  ;;  %v1979_v48 = vpop.permute.xlu2 %1978 }
 0x1a7   : > { %v1865_v15 = vpop.permute.xlu0 %1864 }
 0x1a8   : > { %v2510_v8 = vsel %vm2500_vm14, %v2477_v16, %v1865_v15  ;;  %v2879_v52 = vpop.f32.mrf.mxu1  ;;  %v5337_v16 = vld [vmem:[#allocation10_spill] sm:$0xff] }
 0x1ac   : > { %v1977_v4 = vpop.permute.xlu1 %1976 }
 0x1ad   : > { %v2543_v44 = vsel %vm2533_vm15, %v2510_v8, %v1977_v4  ;;  %v5338_v4 = vld [vmem:[#allocation9_spill] sm:$0xff] }
 0x1ae   : > { %v2580_v59 = vsel %vm2566_vm1, %v2543_v44, %v2249_v56  ;;  %v1757_v36 = vpop.permute.xlu2 %1756  ;;  %v2446_v56 = vsel %vm2434_vm12, %v5335_v18, %v1467_v45 }
 0x1af   : > { %v1483_v50 = vpop.permute.xlu0 %1482  ;;  %2767 = vmatmul.bf16.gmra.mxu0 %v2580_v59 }
 0x1b0   : > { %v2462_v25 = vsel %vm2434_vm12, %v4607_v41, %v1483_v50 }
 0x1b3   : > { %v2882_v50 = vpop.f32.mrf.mxu3 }
 0x1b4   : > { %v1755_v62 = vpop.permute.xlu1 %1754 }
 0x1b5   : > { %v2495_v23 = vsel %vm2467_vm13, %v2462_v25, %v1755_v62  ;;  %v3550_v62 = vld [vmem:[#allocation2 + $0xcc] sm:$0xe] }
 0x1b6   : > { %v2528_v2 = vsel %vm2500_vm14, %v2495_v23, %v1883_v24  ;;  %v2269_v24 = vpop.permute.xlu2 %2268 }
 0x1b7   : > { %v1995_v26 = vpop.permute.xlu0 %1994 }
 0x1b8   : > { %v2561_v27 = vsel %vm2533_vm15, %v2528_v2, %v1995_v26 }
 0x1ba   : > { %v2788_v41 = vpop.f32.mrf.mxu2 }
 0x1bb   : > { %v2789_v20 = vadd.f32 %v5047_v34, %v2788_v41  ;;  %v2366_v41 = vrot.slane %v4964_v58, 1  ;;  %v2884_v32 = vpop.f32.mrf.mxu3 }
 0x1bc   : > { %v2267_v9 = vpop.permute.xlu1 %2266 }
 0x1bd   : > { %v2878_v11 = vadd.f32 %v2877_v40, %v2789_v20  ;;  %v2607_v17 = vsel %vm2566_vm1, %v2561_v27, %v2267_v9  ;;  %v3551_v40 = vor.u32 %v3550_v62, %v4935_v21  ;;  %v5339_v21 = vld [vmem:[#allocation7_spill] sm:$0xff] }
 0x1be   : > { %2812 = vmatmul.bf16.gmra.mxu2 %v2607_v17  ;;  %v1869_v47 = vpop.permute.xlu2 %1868 }
 0x1bf   : > { %2933 = vst.msk [vmem:[%s5057_s23 + $0x100] sm:$0xff] %vm2368_vm10, %v2878_v11  ;;  %v1739_v61 = vpop.permute.xlu0 %1738  ;;  %v2365_v19 = vrot.slane %v3551_v40, 1 }
 0x1c0   : > { %v2479_v5 = vsel %vm2467_vm13, %v2446_v56, %v1739_v61  ;;  %v5340_v56 = vld [vmem:[#allocation11_spill] sm:$0xff] }
 0x1c1   : > { %v2367_v20 = vsel %vm1295_vm9, %v2365_v19, %v2366_v41 }
 0x1c2   : > { %v2790_v31 = vpop.f32.mrf.mxu2  ;;  %3225 = vmatmul.msk.bf16.gmra.mxu3 %vm2368_vm10, %v2367_v20 }
 0x1c3   : > { %v2791_v57 = vadd.f32 %v5047_v34, %v2790_v31  ;;  %v2748_v30 = vpop.f32.mrf.mxu0 }
 0x1c4   : > { %v2749_v7 = vadd.f32 %v5047_v34, %v2748_v30  ;;  %v1867_v55 = vpop.permute.xlu1 %1866 }
 0x1c5   : > { %v5069_v14 = vadd.f32 %v2879_v52, %v2791_v57  ;;  %v2512_v54 = vsel %vm2500_vm14, %v2479_v5, %v1867_v55 }
 0x1c6   : > { %v2838_v28 = vadd.f32 %v5336_v42, %v2749_v7  ;;  %v2545_v3 = vsel %vm2533_vm15, %v2512_v54, %v1979_v48  ;;  %v1375_v31 = vpop.permute.xlu2 %1374 }
 0x1c7   : > { %2934 = vst.msk [vmem:[%s5057_s23 + $0x108] sm:$0xff] %vm2368_vm10, %v5069_v14  ;;  %v2251_v33 = vpop.permute.xlu0 %2250 }
 0x1c8   : > { %2917 = vst.msk [vmem:[%s5057_s23] sm:$0xff] %vm2368_vm10, %v2838_v28  ;;  %2981 = vrot.lane.b32.xlu1 %v2838_v28, %s3575_s25  ;;  %v2583_v60 = vsel %vm2566_vm1, %v2545_v3, %v2251_v33 }
 0x1c9   : > { %2772 = vmatmul.bf16.gmra.mxu0 %v2583_v60  ;;  %v5341_v60 = vld [vmem:[#allocation5_spill] sm:$0xff] }
 0x1cb   : > { %v2750_v13 = vpop.f32.mrf.mxu0 }
 0x1cc   : > { %v2751_v0 = vadd.f32 %v5047_v34, %v2750_v13  ;;  %v1485_v15 = vpop.permute.xlu1 %1484 }
 0x1cd   : > { %v2464_v45 = vsel %vm2434_vm12, %v5338_v4, %v1485_v15 }
 0x1ce   : > { %v2840_v8 = vadd.f32 %v5337_v16, %v2751_v0  ;;  %v2497_v59 = vsel %vm2467_vm13, %v2464_v45, %v1757_v36  ;;  %v1887_v33 = vpop.permute.xlu2 %1886 }
 0x1cf   : > { %v1885_v44 = vpop.permute.xlu0 %1884 }
 0x1d0   : > { %2918 = vst.msk [vmem:[%s5057_s23 + $0x8] sm:$0xff] %vm2368_vm10, %v2840_v8  ;;  %2983 = vrot.lane.b32.xlu2 %v2840_v8, %s3575_s25  ;;  %v2530_v25 = vsel %vm2500_vm14, %v2497_v59, %v1885_v44 }
 0x1d4   : > { %v2793_v23 = vpop.f32.mrf.mxu2  ;;  %v1997_v46 = vpop.permute.xlu1 %1996 }
 0x1d5   : > { %v2794_v48 = vadd.f32 %v5047_v34, %v2793_v23  ;;  %v2563_v26 = vsel %vm2533_vm15, %v2530_v25, %v1997_v46  ;;  %v2887_v4 = vpop.f32.mrf.mxu3 }
 0x1d6   : > { %v2610_v39 = vsel %vm2566_vm1, %v2563_v26, %v2269_v24  ;;  %v5342_v24 = vld [vmem:[#allocation3_spill] sm:$0xff]  ;;  %v1471_v59 = vpop.permute.xlu2 %1470 }
 0x1d7   : > { %v1469_v2 = vpop.permute.xlu0 %1468  ;;  %v2883_v37 = vadd.f32 %v2882_v50, %v2794_v48  ;;  %2817 = vmatmul.bf16.gmra.mxu2 %v2610_v39  ;;  %v2400_v13 = vsel %vm2368_vm10, %v5342_v24, %v5341_v60 }
 0x1d8   : > { %3013 = vrot.lane.b32.xlu2 %v2878_v11, %s3575_s25  ;;  %v2448_v17 = vsel %vm2434_vm12, %v5339_v21, %v1469_v2  ;;  %v2433_v0 = vsel %vm2401_vm11, %v2400_v13, %v1375_v31 }
 0x1d9   : > { %2935 = vst.msk [vmem:[%s5057_s23 + $0x120] sm:$0xff] %vm2368_vm10, %v2883_v37 }
 0x1dc   : > { %v2795_v27 = vpop.f32.mrf.mxu2  ;;  %v1741_v9 = vpop.permute.xlu1 %1740 }
 0x1dd   : > { %v2796_v61 = vadd.f32 %v5047_v34, %v2795_v27  ;;  %v2753_v11 = vpop.f32.mrf.mxu0  ;;  %v2481_v36 = vsel %vm2467_vm13, %v2448_v17, %v1741_v9  ;;  %v2889_v40 = vpop.f32.mrf.mxu3 }
 0x1de   : > { %v2754_v58 = vadd.f32 %v5047_v34, %v2753_v11  ;;  %v2514_v30 = vsel %vm2500_vm14, %v2481_v36, %v1869_v47  ;;  %v1983_v41 = vpop.permute.xlu2 %1982 }
 0x1df   : > { %v1981_v52 = vpop.permute.xlu0 %1980  ;;  %v2885_v18 = vadd.f32 %v2884_v32, %v2796_v61 }
 0x1e0   : > { %v2843_v57 = vadd.f32 %v5340_v56, %v2754_v58  ;;  %v2547_v5 = vsel %vm2533_vm15, %v2514_v30, %v1981_v52 }
 0x1e1   : > { %2936 = vst.msk [vmem:[%s5057_s23 + $0x128] sm:$0xff] %vm2368_vm10, %v2885_v18 }
 0x1e2   : > { %2919 = vst.msk [vmem:[%s5057_s23 + $0x20] sm:$0xff] %vm2368_vm10, %v2843_v57  ;;  %2985 = vrot.lane.b32.xlu0 %v2843_v57, %s3575_s25 }
 0x1e4   : > { %v2253_v7 = vpop.permute.xlu1 %2252 }
 0x1e5   : > { %v2755_v55 = vpop.f32.mrf.mxu0  ;;  %v2586_v54 = vsel %vm2566_vm1, %v2547_v5, %v2253_v7  ;;  %v2892_v58 = vpop.f32.mrf.mxu3 }
 0x1e6   : > { %v2756_v42 = vadd.f32 %v5047_v34, %v2755_v55  ;;  %2777 = vmatmul.bf16.gmra.mxu0 %v2586_v54 }
 0x1e7   : > { %v1487_v28 = vpop.permute.xlu0 %1486 }
 0x1e8   : > { %v2845_v3 = vadd.f32 %v4790_v35, %v2756_v42  ;;  %v2466_v16 = vsel %vm2434_vm12, %v2433_v0, %v1487_v28 }
 0x1ea   : > { %2920 = vst.msk [vmem:[%s5057_s23 + $0x28] sm:$0xff] %vm2368_vm10, %v2845_v3  ;;  %2987 = vrot.lane.b32.xlu1 %v2845_v3, %s3575_s25  ;;  %3015 = vrot.lane.b32.xlu0 %v5069_v14, %s3575_s25 }
 0x1ec   : > { %v1759_v15 = vpop.permute.xlu1 %1758 }
 0x1ed   : > { %v2499_v35 = vsel %vm2467_vm13, %v2466_v16, %v1759_v15  ;;  %v2894_v57 = vpop.f32.mrf.mxu3 }
 0x1ee   : > { %v2532_v45 = vsel %vm2500_vm14, %v2499_v35, %v1887_v33 }
 0x1ef   : > { %v1999_v8 = vpop.permute.xlu0 %1998 }
 0x1f0   : > { %v2565_v50 = vsel %vm2533_vm15, %v2532_v45, %v1999_v8 }
 0x1f1   : > { %v2798_v44 = vpop.f32.mrf.mxu2 }
 0x1f2   : > { %3017 = vrot.lane.b32.xlu1 %v2883_v37, %s3575_s25  ;;  %v2799_v14 = vadd.f32 %v5047_v34, %v2798_v44  ;;  %v5343_v37 = vld [vmem:[#allocation4_spill] sm:$0xff] }
 0x1f3   : > { %v2450_v19 = vsel %vm2434_vm12, %v5343_v37, %v1471_v59 }
 0x1f4   : > { %v2888_v62 = vadd.f32 %v2887_v4, %v2799_v14  ;;  %v2271_v25 = vpop.permute.xlu1 %2270 }
 0x1f5   : > { %v2613_v23 = vsel %vm2566_vm1, %v2565_v50, %v2271_v25 }
 0x1f6   : > { %2937 = vst.msk [vmem:[%s5057_s23 + $0x140] sm:$0xff] %vm2368_vm10, %v2888_v62  ;;  %v2758_v46 = vpop.f32.mrf.mxu0  ;;  %2822 = vmatmul.bf16.gmra.mxu2 %v2613_v23 }
 0x1f7   : > { %v1743_v47 = vpop.permute.xlu0 %1742  ;;  %v2759_v48 = vadd.f32 %v5047_v34, %v2758_v46 }
 0x1f8   : > { %v2483_v20 = vsel %vm2467_vm13, %v2450_v19, %v1743_v47 }
 0x1f9   : > { %v2848_v26 = vadd.f32 %v4829_v53, %v2759_v48  ;;  %v2800_v39 = vpop.f32.mrf.mxu2 }
 0x1fa   : > { %v2801_v2 = vadd.f32 %v5047_v34, %v2800_v39 }
 0x1fb   : > { %2921 = vst.msk [vmem:[%s5057_s23 + $0x40] sm:$0xff] %vm2368_vm10, %v2848_v26  ;;  %2989 = vrot.lane.b32.xlu2 %v2848_v26, %s3575_s25 }
 0x1fc   : > { %v2890_v32 = vadd.f32 %v2889_v40, %v2801_v2  ;;  %v1871_v27 = vpop.permute.xlu1 %1870 }
 0x1fd   : > { %v2516_v9 = vsel %vm2500_vm14, %v2483_v20, %v1871_v27 }
 0x1fe   : > { %2938 = vst.msk [vmem:[%s5057_s23 + $0x148] sm:$0xff] %vm2368_vm10, %v2890_v32  ;;  %v2549_v53 = vsel %vm2533_vm15, %v2516_v9, %v1983_v41  ;;  %v2760_v21 = vpop.f32.mrf.mxu0  ;;  %3023 = vrot.lane.b32.xlu1 %v2890_v32, %s3575_s25 }
 0x1ff   : > { %v2761_v17 = vadd.f32 %v5047_v34, %v2760_v21  ;;  %v2255_v61 = vpop.permute.xlu0 %2254 }
 0x200   : > { %v2589_v11 = vsel %vm2566_vm1, %v2549_v53, %v2255_v61 }
 0x201   : > { %v2850_v36 = vadd.f32 %v4858_v51, %v2761_v17  ;;  %2782 = vmatmul.bf16.gmra.mxu0 %v2589_v11 }
 0x203   : > { %2922 = vst.msk [vmem:[%s5057_s23 + $0x48] sm:$0xff] %vm2368_vm10, %v2850_v36  ;;  %2991 = vrot.lane.b32.xlu0 %v2850_v36, %s3575_s25  ;;  %3019 = vrot.lane.b32.xlu2 %v2885_v18, %s3575_s25 }
 0x20a   : > { %v2803_v31 = vpop.f32.mrf.mxu2 }
 0x20b   : > { %3021 = vrot.lane.b32.xlu0 %v2888_v62, %s3575_s25  ;;  %v2804_v52 = vadd.f32 %v5047_v34, %v2803_v31 }
 0x20d   : > { %v2893_v56 = vadd.f32 %v2892_v58, %v2804_v52 }
 0x20f   : > { %2939 = vst.msk [vmem:[%s5057_s23 + $0x160] sm:$0xff] %vm2368_vm10, %v2893_v56  ;;  %3025 = vrot.lane.b32.xlu2 %v2893_v56, %s3575_s25 }
 0x212   : > { %v2805_v51 = vpop.f32.mrf.mxu2 }
 0x213   : > { %v2806_v30 = vadd.f32 %v5047_v34, %v2805_v51  ;;  %v2763_v5 = vpop.f32.mrf.mxu0 }
 0x214   : > { %v2764_v18 = vadd.f32 %v5047_v34, %v2763_v5 }
 0x215   : > { %v2895_v7 = vadd.f32 %v2894_v57, %v2806_v30 }
 0x216   : > { %v2853_v55 = vadd.f32 %v4887_v10, %v2764_v18  ;;  %v2897_v10 = vpop.f32.mrf.mxu3 }
 0x217   : > { %2940 = vst.msk [vmem:[%s5057_s23 + $0x168] sm:$0xff] %vm2368_vm10, %v2895_v7  ;;  %3027 = vrot.lane.b32.xlu0 %v2895_v7, %s3575_s25 }
 0x218   : > { %2923 = vst.msk [vmem:[%s5057_s23 + $0x60] sm:$0xff] %vm2368_vm10, %v2853_v55  ;;  %2993 = vrot.lane.b32.xlu1 %v2853_v55, %s3575_s25 }
 0x21b   : > { %v2765_v54 = vpop.f32.mrf.mxu0 }
 0x21c   : > { %v2766_v42 = vadd.f32 %v5047_v34, %v2765_v54 }
 0x21e   : > { %v2855_v28 = vadd.f32 %v4914_v22, %v2766_v42  ;;  %v2899_v22 = vpop.f32.mrf.mxu3 }
 0x220   : > { %2924 = vst.msk [vmem:[%s5057_s23 + $0x68] sm:$0xff] %vm2368_vm10, %v2855_v28  ;;  %2995 = vrot.lane.b32.xlu2 %v2855_v28, %s3575_s25 }
 0x224   : > { %v2808_v3 = vpop.f32.mrf.mxu2 }
 0x225   : > { %v2809_v33 = vadd.f32 %v5047_v34, %v2808_v3 }
 0x226   : > { %v2902_v59 = vpop.f32.mrf.mxu3 }
 0x227   : > { %v2898_v60 = vadd.f32 %v2897_v10, %v2809_v33 }
 0x229   : > { %2941 = vst.msk [vmem:[%s5057_s23 + $0x180] sm:$0xff] %vm2368_vm10, %v2898_v60  ;;  %3029 = vrot.lane.b32.xlu1 %v2898_v60, %s3575_s25 }
 0x22a   : > { %v2984_v24 = vpop.permute.xlu2 %2983 }
 0x22b   : > { %3227 = vst.msk [vmem:[%s5057_s23 + $0x18] sm:$0xff] %vm2368_vm10, %v2984_v24 }
 0x22c   : > { %v2810_v13 = vpop.f32.mrf.mxu2  ;;  %v2768_v0 = vpop.f32.mrf.mxu0 }
 0x22d   : > { %v2811_v15 = vadd.f32 %v5047_v34, %v2810_v13  ;;  %v2769_v16 = vadd.f32 %v5047_v34, %v2768_v0 }
 0x22e   : > { %v2904_v48 = vpop.f32.mrf.mxu3 }
 0x22f   : > { %v2858_v35 = vadd.f32 %v4937_v43, %v2769_v16  ;;  %v2900_v8 = vadd.f32 %v2899_v22, %v2811_v15 }
 0x231   : > { %2925 = vst.msk [vmem:[%s5057_s23 + $0x80] sm:$0xff] %vm2368_vm10, %v2858_v35  ;;  %3031 = vrot.lane.b32.xlu2 %v2900_v8, %s3575_s25  ;;  %2997 = vrot.lane.b32.xlu0 %v2858_v35, %s3575_s25 }
 0x232   : > { %2942 = vst.msk [vmem:[%s5057_s23 + $0x188] sm:$0xff] %vm2368_vm10, %v2900_v8  ;;  %v3014_v4 = vpop.permute.xlu2 %3013 }
 0x233   : > { %3242 = vst.msk [vmem:[%s5057_s23 + $0x110] sm:$0xff] %vm2368_vm10, %v3014_v4 }
 0x234   : > { %v2770_v45 = vpop.f32.mrf.mxu0 }
 0x235   : > { %v2771_v44 = vadd.f32 %v5047_v34, %v2770_v45 }
 0x236   : > { %v2907_v41 = vpop.f32.mrf.mxu3 }
 0x237   : > { %v2860_v14 = vadd.f32 %v4959_v38, %v2771_v44 }
 0x239   : > { %2926 = vst.msk [vmem:[%s5057_s23 + $0x88] sm:$0xff] %vm2368_vm10, %v2860_v14  ;;  %2999 = vrot.lane.b32.xlu1 %v2860_v14, %s3575_s25 }
 0x23a   : > { %v2982_v43 = vpop.permute.xlu1 %2981 }
 0x23b   : > { %3226 = vst.msk [vmem:[%s5057_s23 + $0x10] sm:$0xff] %vm2368_vm10, %v2982_v43 }
 0x23e   : > { %v2909_v17 = vpop.f32.mrf.mxu3 }
 0x241   : > { %v2813_v50 = vpop.f32.mrf.mxu2 }
 0x242   : > { %v2814_v62 = vadd.f32 %v5047_v34, %v2813_v50 }
 0x244   : > { %v2903_v25 = vadd.f32 %v2902_v59, %v2814_v62 }
 0x246   : > { %2943 = vst.msk [vmem:[%s5057_s23 + $0x1a0] sm:$0xff] %vm2368_vm10, %v2903_v25  ;;  %v2773_v23 = vpop.f32.mrf.mxu0  ;;  %3033 = vrot.lane.b32.xlu0 %v2903_v25, %s3575_s25  ;;  %v2912_v18 = vpop.f32.mrf.mxu3 }
 0x247   : > { %v2774_v38 = vadd.f32 %v5047_v34, %v2773_v23 }
 0x249   : > { %v2863_v46 = vadd.f32 %v4978_v29, %v2774_v38  ;;  %v2815_v47 = vpop.f32.mrf.mxu2 }
 0x24a   : > { %v2816_v26 = vadd.f32 %v5047_v34, %v2815_v47 }
 0x24b   : > { %2927 = vst.msk [vmem:[%s5057_s23 + $0xa0] sm:$0xff] %vm2368_vm10, %v2863_v46  ;;  %3001 = vrot.lane.b32.xlu2 %v2863_v46, %s3575_s25 }
 0x24c   : > { %v2905_v39 = vadd.f32 %v2904_v48, %v2816_v26 }
 0x24e   : > { %2944 = vst.msk [vmem:[%s5057_s23 + $0x1a8] sm:$0xff] %vm2368_vm10, %v2905_v39  ;;  %v2775_v40 = vpop.f32.mrf.mxu0  ;;  %3035 = vrot.lane.b32.xlu1 %v2905_v39, %s3575_s25  ;;  %v2914_v60 = vpop.f32.mrf.mxu3 }
 0x24f   : > { %v2776_v2 = vadd.f32 %v5047_v34, %v2775_v40 }
 0x251   : > { %v2865_v29 = vadd.f32 %v5002_v6, %v2776_v2 }
 0x253   : > { %2928 = vst.msk [vmem:[%s5057_s23 + $0xa8] sm:$0xff] %vm2368_vm10, %v2865_v29  ;;  %3003 = vrot.lane.b32.xlu0 %v2865_v29, %s3575_s25 }
 0x254   : > { %v2986_v37 = vpop.permute.xlu0 %2985 }
 0x255   : > { %3228 = vst.msk [vmem:[%s5057_s23 + $0x30] sm:$0xff] %vm2368_vm10, %v2986_v37  ;;  %v2990_v19 = vpop.permute.xlu2 %2989 }
 0x256   : > { %3230 = vst.msk [vmem:[%s5057_s23 + $0x50] sm:$0xff] %vm2368_vm10, %v2990_v19 }
 0x25a   : > { %v2818_v20 = vpop.f32.mrf.mxu2 }
 0x25b   : > { %v2819_v32 = vadd.f32 %v5047_v34, %v2818_v20 }
 0x25c   : > { %v2988_v27 = vpop.permute.xlu1 %2987  ;;  %v3016_v9 = vpop.permute.xlu0 %3015 }
 0x25d   : > { %3229 = vst.msk [vmem:[%s5057_s23 + $0x38] sm:$0xff] %vm2368_vm10, %v2988_v27  ;;  %v2908_v6 = vadd.f32 %v2907_v41, %v2819_v32  ;;  %v3020_v53 = vpop.permute.xlu2 %3019 }
 0x25e   : > { %3243 = vst.msk [vmem:[%s5057_s23 + $0x118] sm:$0xff] %vm2368_vm10, %v3016_v9 }
 0x25f   : > { %2945 = vst.msk [vmem:[%s5057_s23 + $0x1c0] sm:$0xff] %vm2368_vm10, %v2908_v6  ;;  %3037 = vrot.lane.b32.xlu2 %v2908_v6, %s3575_s25 }
 0x260   : > { %3245 = vst.msk [vmem:[%s5057_s23 + $0x138] sm:$0xff] %vm2368_vm10, %v3020_v53 }
 0x262   : > { %v2820_v21 = vpop.f32.mrf.mxu2 }
 0x263   : > { %v2821_v61 = vadd.f32 %v5047_v34, %v2820_v21  ;;  %v2778_v11 = vpop.f32.mrf.mxu0 }
 0x264   : > { %v3018_v36 = vpop.permute.xlu1 %3017  ;;  %v2779_v58 = vadd.f32 %v5047_v34, %v2778_v11 }
 0x265   : > { %3244 = vst.msk [vmem:[%s5057_s23 + $0x130] sm:$0xff] %vm2368_vm10, %v3018_v36  ;;  %v2910_v31 = vadd.f32 %v2909_v17, %v2821_v61 }
 0x266   : > { %v2868_v52 = vadd.f32 %v5013_v12, %v2779_v58 }
 0x267   : > { %2946 = vst.msk [vmem:[%s5057_s23 + $0x1c8] sm:$0xff] %vm2368_vm10, %v2910_v31 }
 0x268   : > { %2929 = vst.msk [vmem:[%s5057_s23 + $0xc0] sm:$0xff] %vm2368_vm10, %v2868_v52  ;;  %3005 = vrot.lane.b32.xlu1 %v2868_v52, %s3575_s25 }
 0x269   : > { %v3026_v56 = vpop.permute.xlu2 %3025 }
 0x26a   : > { %3248 = vst.msk [vmem:[%s5057_s23 + $0x170] sm:$0xff] %vm2368_vm10, %v3026_v56 }
 0x26b   : > { %v2780_v51 = vpop.f32.mrf.mxu0 }
 0x26c   : > { %v2781_v57 = vadd.f32 %v5047_v34, %v2780_v51 }
 0x26e   : > { %v2870_v30 = vadd.f32 %v5019_v63, %v2781_v57 }
 0x270   : > { %2930 = vst.msk [vmem:[%s5057_s23 + $0xc8] sm:$0xff] %vm2368_vm10, %v2870_v30  ;;  %v3024_v12 = vpop.permute.xlu1 %3023  ;;  %3007 = vrot.lane.b32.xlu2 %v2870_v30, %s3575_s25 }
 0x271   : > { %3247 = vst.msk [vmem:[%s5057_s23 + $0x158] sm:$0xff] %vm2368_vm10, %v3024_v12 }
 0x275   : > { %v2992_v5 = vpop.permute.xlu0 %2991 }
 0x276   : > { %3231 = vst.msk [vmem:[%s5057_s23 + $0x58] sm:$0xff] %vm2368_vm10, %v2992_v5 }
 0x279   : > { %v2823_v7 = vpop.f32.mrf.mxu2 }
 0x27a   : > { %v2824_v55 = vadd.f32 %v5047_v34, %v2823_v7  ;;  %v2996_v54 = vpop.permute.xlu2 %2995 }
 0x27b   : > { %3233 = vst.msk [vmem:[%s5057_s23 + $0x78] sm:$0xff] %vm2368_vm10, %v2996_v54 }
 0x27c   : > { %v2913_v63 = vadd.f32 %v2912_v18, %v2824_v55 }
 0x27d   : > { %v3022_v42 = vpop.permute.xlu0 %3021 }
 0x27e   : > { %2947 = vst.msk [vmem:[%s5057_s23 + $0x1e0] sm:$0xff] %vm2368_vm10, %v2913_v63  ;;  %v2783_v28 = vpop.f32.mrf.mxu0 }
 0x27f   : > { %3246 = vst.msk [vmem:[%s5057_s23 + $0x150] sm:$0xff] %vm2368_vm10, %v3022_v42  ;;  %v2784_v10 = vadd.f32 %v5047_v34, %v2783_v28 }
 0x281   : > { %v2873_v3 = vadd.f32 %v5031_v49, %v2784_v10  ;;  %v2825_v33 = vpop.f32.mrf.mxu2 }
 0x282   : > { %v2826_v24 = vadd.f32 %v5047_v34, %v2825_v33 }
 0x283   : > { %2931 = vst.msk [vmem:[%s5057_s23 + $0xe0] sm:$0xff] %vm2368_vm10, %v2873_v3  ;;  %3009 = vrot.lane.b32.xlu0 %v2873_v3, %s3575_s25 }
 0x284   : > { %v2915_v22 = vadd.f32 %v2914_v60, %v2826_v24 }
 0x286   : > { %2948 = vst.msk [vmem:[%s5057_s23 + $0x1e8] sm:$0xff] %vm2368_vm10, %v2915_v22  ;;  %v2785_v13 = vpop.f32.mrf.mxu0  ;;  %3043 = vrot.lane.b32.xlu2 %v2915_v22, %s3575_s25 }
 0x287   : > { %v2786_v49 = vadd.f32 %v5047_v34, %v2785_v13 }
 0x289   : > { %v2875_v0 = vadd.f32 %v5039_v1, %v2786_v49  ;;  %v3028_v15 = vpop.permute.xlu0 %3027 }
 0x28a   : > { %3249 = vst.msk [vmem:[%s5057_s23 + $0x178] sm:$0xff] %vm2368_vm10, %v3028_v15  ;;  %v2994_v16 = vpop.permute.xlu1 %2993 }
 0x28b   : > { %2932 = vst.msk [vmem:[%s5057_s23 + $0xe8] sm:$0xff] %vm2368_vm10, %v2875_v0  ;;  %v3032_v35 = vpop.permute.xlu2 %3031  ;;  %3011 = vrot.lane.b32.xlu1 %v2875_v0, %s3575_s25  ;;  %3039 = vrot.lane.b32.xlu0 %v2910_v31, %s3575_s25 }
 0x28c   : > { %3232 = vst.msk [vmem:[%s5057_s23 + $0x70] sm:$0xff] %vm2368_vm10, %v2994_v16 }
 0x28d   : > { %3251 = vst.msk [vmem:[%s5057_s23 + $0x198] sm:$0xff] %vm2368_vm10, %v3032_v35 }
 0x293   : > { %3041 = vrot.lane.b32.xlu1 %v2913_v63, %s3575_s25 }
 0x29b   : > { %v3030_v1 = vpop.permute.xlu1 %3029 }
 0x29c   : > { %3250 = vst.msk [vmem:[%s5057_s23 + $0x190] sm:$0xff] %vm2368_vm10, %v3030_v1 }
 0x2a3   : > { %v2998_v34 = vpop.permute.xlu0 %2997 }
 0x2a4   : > { %3234 = vst.msk [vmem:[%s5057_s23 + $0x90] sm:$0xff] %vm2368_vm10, %v2998_v34 }
 0x2a5   : > { %v3002_v8 = vpop.permute.xlu2 %3001 }
 0x2a6   : > { %3236 = vst.msk [vmem:[%s5057_s23 + $0xb0] sm:$0xff] %vm2368_vm10, %v3002_v8 }
 0x2ab   : > { %v3000_v4 = vpop.permute.xlu1 %2999 }
 0x2ac   : > { %3235 = vst.msk [vmem:[%s5057_s23 + $0x98] sm:$0xff] %vm2368_vm10, %v3000_v4 }
 0x2b8   : > { %v3034_v45 = vpop.permute.xlu0 %3033 }
 0x2b9   : > { %3252 = vst.msk [vmem:[%s5057_s23 + $0x1b0] sm:$0xff] %vm2368_vm10, %v3034_v45  ;;  %v3038_v44 = vpop.permute.xlu2 %3037 }
 0x2ba   : > { %3254 = vst.msk [vmem:[%s5057_s23 + $0x1d0] sm:$0xff] %vm2368_vm10, %v3038_v44 }
 0x2c0   : > { %v3036_v14 = vpop.permute.xlu1 %3035 }
 0x2c1   : > { %3253 = vst.msk [vmem:[%s5057_s23 + $0x1b8] sm:$0xff] %vm2368_vm10, %v3036_v14 }
 0x2c5   : > { %v3004_v43 = vpop.permute.xlu0 %3003 }
 0x2c6   : > { %3237 = vst.msk [vmem:[%s5057_s23 + $0xb8] sm:$0xff] %vm2368_vm10, %v3004_v43 }
 0x2ca   : > { %v3008_v59 = vpop.permute.xlu2 %3007 }
 0x2cb   : > { %3239 = vst.msk [vmem:[%s5057_s23 + $0xd8] sm:$0xff] %vm2368_vm10, %v3008_v59 }
 0x2da   : > { %v3006_v50 = vpop.permute.xlu1 %3005 }
 0x2db   : > { %3238 = vst.msk [vmem:[%s5057_s23 + $0xd0] sm:$0xff] %vm2368_vm10, %v3006_v50 }
 0x2e0   : > { %v3044_v62 = vpop.permute.xlu2 %3043 }
 0x2e1   : > { %3257 = vst.msk [vmem:[%s5057_s23 + $0x1f8] sm:$0xff] %vm2368_vm10, %v3044_v62 }
 0x2f5   : > { %v3010_v25 = vpop.permute.xlu0 %3009 }
 0x2f6   : > { %3240 = vst.msk [vmem:[%s5057_s23 + $0xf0] sm:$0xff] %vm2368_vm10, %v3010_v25 }
 0x2fd   : > { %v3012_v23 = vpop.permute.xlu1 %3011  ;;  %v3040_v38 = vpop.permute.xlu0 %3039 }
 0x2fe   : > { %3241 = vst.msk [vmem:[%s5057_s23 + $0xf8] sm:$0xff] %vm2368_vm10, %v3012_v23 }
 0x2ff   : > { %3255 = vst.msk [vmem:[%s5057_s23 + $0x1d8] sm:$0xff] %vm2368_vm10, %v3040_v38 }
 0x305   : > { %v3042_v46 = vpop.permute.xlu1 %3041 }
 0x306   : > { %3256 = vst.msk [vmem:[%s5057_s23 + $0x1f0] sm:$0xff] %vm2368_vm10, %v3042_v46 }
 0x307 PF: > { %s13_s12 = sadd.s32 1, %s3567_s12  }
 0x308   : > { %p10_p4 = scmp.ge.s32.totalorder %s13_s12, 4  }
 0x30a   :  { %12 = sbr.rel (!%p10_p4) target bundleno = 1 (0x1), region = 65 }

</bundles_post_ra>
